<compile_context>
chip_gen: v6e
topology: v6e:2x2x1
jax: 0.10.0
libtpu: 0.0.40
codegen_flags: <defaults>
</compile_context>

<pallas_src>
import jax
import jax.numpy as jnp
from jax.experimental import pallas as pl
from jax.experimental.pallas import tpu as pltpu


# ---------------------------------------------------------------- constants
_S = 16        # row stride of the flattened, zero-padded pool1 plane (16x16 grid)
_ROWS1 = 272   # rows of that plane per pool-window group (17*16)
_ROWS2 = 232   # conv2 rows computed (covers every valid o = h*16 + w, plus slack)
_ROWSM = 208   # pool2-candidate rows (covers o = 32*hh + 2*ww + {0,1,16,17})


# ------------------------------------------------------------------- kernel
def _net_kernel(p1_ref, w1_ref, w2_ref, b2_ref, wfc1_ref, bfc1_ref,
                wfc2_ref, bfc2_ref, o_ref):
    f32 = jnp.float32

    # ---- conv1 (3x3, pad=1, 1->32) fused with the 2x2 max-pool -------------
    # p1_ref[0]: (1088, 10) im2col taps (+ bias indicator); rows a*272 + p hold
    # window position a of every 2x2 pool window on a zero-padded 16x16 grid
    # (row p = py*16 + px).  One tall matmul covers all four positions.
    c_all = jnp.dot(p1_ref[0], w1_ref[...], preferred_element_type=f32)  # (1088,32)
    pooled = jnp.maximum(
        jnp.maximum(c_all[0 * _ROWS1:1 * _ROWS1, :],
                    c_all[1 * _ROWS1:2 * _ROWS1, :]),
        jnp.maximum(c_all[2 * _ROWS1:3 * _ROWS1, :],
                    c_all[3 * _ROWS1:4 * _ROWS1, :]))                    # (272, 32)
    # interior rows (py, px in 1..14) hold pool1[py-1, px-1, :]; all other rows
    # are exactly zero (zero patches, including the bias-indicator column).

    # ---- conv2 (3x3, pad=1, 32->64): 9 shifted full-plane matmuls ----------
    # Grouped into 3 partial sums (one per dy) to shorten the add chain.
    parts = []
    for dy in range(3):
        sh0 = dy * _S
        p = jnp.dot(pooled[sh0:sh0 + _ROWS2, :], w2_ref[3 * dy],
                    preferred_element_type=f32)
        for dx in range(1, 3):
            sh = sh0 + dx
            p = p + jnp.dot(pooled[sh:sh + _ROWS2, :], w2_ref[3 * dy + dx],
                            preferred_element_type=f32)
        parts.append(p)
    conv2 = (parts[0] + parts[1]) + (parts[2] + b2_ref[...])  # (232,64); row o=h*16+w

    # ---- 2x2 max-pool of conv2: elementwise max of 4 shifted slices --------
    m2 = jnp.maximum(
        jnp.maximum(conv2[0:_ROWSM, :], conv2[1:_ROWSM + 1, :]),
        jnp.maximum(conv2[_S:_S + _ROWSM, :], conv2[_S + 1:_S + 1 + _ROWSM, :]))
    # pool2[hh, ww, :] == m2[32*hh + 2*ww, :]

    # TODO(synk): Dropout2d(0.2) implemented as identity (eval semantics);
    # PyTorch training-mode RNG channel mask is not reproduced here.

    # ---- Linear(3136 -> 100): 49 independent (1,64)x(64,100) MXU dots.
    # fc1 weight is pre-permuted to (49, 64, 100) NHWC order, so no runtime
    # NCHW flatten/transpose is needed.  Accumulate per output row (7 partials)
    # then tree-add to keep the dependency chain shallow.
    row_parts = []
    for hh in range(7):
        base = 32 * hh
        ph = jnp.dot(m2[base:base + 1, :], wfc1_ref[7 * hh],
                     preferred_element_type=f32)
        for ww in range(1, 7):
            o = base + 2 * ww
            ph = ph + jnp.dot(m2[o:o + 1, :], wfc1_ref[7 * hh + ww],
                              preferred_element_type=f32)
        row_parts.append(ph)
    h1 = bfc1_ref[...].astype(f32)
    h1 = h1 + ((row_parts[0] + row_parts[1]) + (row_parts[2] + row_parts[3])
               + ((row_parts[4] + row_parts[5]) + row_parts[6]))          # (1, 100)

    # ---- Linear(100 -> 10) --------------------------------------------------
    out = jnp.dot(h1, wfc2_ref[...], preferred_element_type=f32) + bfc2_ref[...]
    o_ref[0] = out.astype(o_ref.dtype)                                    # (1, 10)


# ----------------------------------------------------------------- wrappers
def _conv1_pool_patches(x_nchw):
    """Per-sample conv1 im2col patches for all four 2x2 pool-window positions.

    Returns (N, 1088, 10) float32:
      rows a*272 + p:  window position a = ay*2 + ax,
                       row p = py*16 + px over a zero-padded 16x16 pool1 grid
                       (+ slack rows that stay exactly zero)
      cols:            the 9 conv taps (t = dy*3 + dx) + a bias-indicator column.
    Built from the tiny (N, 1, 28, 28) input; fuses into the jitted forward.
    """
    n = x_nchw.shape[0]
    xpad = jnp.pad(x_nchw[:, 0].astype(jnp.float32),
                   ((0, 0), (1, 1), (1, 1)))                         # (N, 30, 30)
    groups = []
    for ay in range(2):
        for ax in range(2):
            taps = []
            for dy in range(3):
                for dx in range(3):
                    r0, c0 = ay + dy, ax + dx
                    # value at pool pos (hh, ww) = xpad[2hh+ay+dy, 2ww+ax+dx]
                    taps.append(xpad[:, r0:r0 + 27:2, c0:c0 + 27:2])  # (N,14,14)
            taps.append(jnp.ones_like(taps[0]))                       # bias col
            g = jnp.stack(taps, axis=-1)                              # (N,14,14,10)
            g = jnp.pad(g, ((0, 0), (1, 2), (1, 1), (0, 0)))          # (N,17,16,10)
            groups.append(g.reshape(n, _ROWS1, 10))
    return jnp.concatenate(groups, axis=1)                            # (N,1088,10)


def init_params(key):
    ks = jax.random.split(key, 8)
    return {
        # conv weights in HWIO (PyTorch OIHW converts via transpose(2, 3, 1, 0))
        "conv1_w": jax.random.normal(ks[0], (3, 3, 1, 32), jnp.float32) * 0.1,
        "conv1_b": jax.random.normal(ks[1], (32,), jnp.float32) * 0.1,
        "conv2_w": jax.random.normal(ks[2], (3, 3, 32, 64), jnp.float32) * 0.05,
        "conv2_b": jax.random.normal(ks[3], (64,), jnp.float32) * 0.1,
        # fc weights as (in, out); fc1 rows follow PyTorch's NCHW flatten order
        "fc1_w": jax.random.normal(ks[4], (3136, 100), jnp.float32) * 0.02,
        "fc1_b": jax.random.normal(ks[5], (100,), jnp.float32) * 0.1,
        "fc2_w": jax.random.normal(ks[6], (100, 10), jnp.float32) * 0.1,
        "fc2_b": jax.random.normal(ks[7], (10,), jnp.float32) * 0.1,
    }


def prepare_params(p):
    """One-time re-layout of the PyTorch-style parameters for the fused kernel."""
    w1aug = jnp.concatenate(
        [p["conv1_w"].reshape(9, 32), p["conv1_b"].reshape(1, 32)], axis=0)  # (10,32)
    w2r = p["conv2_w"].reshape(9, 32, 64)
    b2 = p["conv2_b"].reshape(1, 64)
    # permute fc1 rows from NCHW flatten order (c*49 + hh*7 + ww) -> (hh*7+ww, c)
    wfc1 = p["fc1_w"].reshape(64, 7, 7, 100).transpose(1, 2, 0, 3).reshape(49, 64, 100)
    bfc1 = p["fc1_b"].reshape(1, 100)
    wfc2 = p["fc2_w"]
    bfc2 = p["fc2_b"].reshape(1, 10)
    return (w1aug, w2r, b2, wfc1, bfc1, wfc2, bfc2)


@jax.jit
def net_forward(kparams, x_nchw):
    w1aug, w2r, b2, wfc1, bfc1, wfc2, bfc2 = kparams
    n = x_nchw.shape[0]
    p1 = _conv1_pool_patches(x_nchw)                                   # (N,1088,10)

    out = pl.pallas_call(
        _net_kernel,
        out_shape=jax.ShapeDtypeStruct((n, 1, 10), jnp.float32),
        grid=(n,),
        in_specs=[
            pl.BlockSpec((1, 4 * _ROWS1, 10), lambda i: (i, 0, 0)),    # patches
            pl.BlockSpec((10, 32), lambda i: (0, 0)),                  # conv1 w+b
            pl.BlockSpec((9, 32, 64), lambda i: (0, 0, 0)),            # conv2 w
            pl.BlockSpec((1, 64), lambda i: (0, 0)),                   # conv2 b
            pl.BlockSpec((49, 64, 100), lambda i: (0, 0, 0)),          # fc1 w (NHWC)
            pl.BlockSpec((1, 100), lambda i: (0, 0)),                  # fc1 b
            pl.BlockSpec((100, 10), lambda i: (0, 0)),                 # fc2 w
            pl.BlockSpec((1, 10), lambda i: (0, 0)),                   # fc2 b
        ],
        out_specs=pl.BlockSpec((1, 1, 10), lambda i: (i, 0, 0)),
        compiler_params=pltpu.CompilerParams(dimension_semantics=("parallel",)),
    )(p1, w1aug, w2r, b2, wfc1, bfc1, wfc2, bfc2)
    return out.reshape(n, 10)


# ----------------------------------------------------- pure-JAX reference
def net_reference(p, x_nchw):
    dn = ("NCHW", "HWIO", "NCHW")
    y = jax.lax.conv_general_dilated(x_nchw.astype(jnp.float32), p["conv1_w"],
                                     (1, 1), "SAME", dimension_numbers=dn)
    y = y + p["conv1_b"][None, :, None, None]
    y = jax.lax.reduce_window(y, -jnp.inf, jax.lax.max,
                              (1, 1, 2, 2), (1, 1, 2, 2), "VALID")
    y = jax.lax.conv_general_dilated(y, p["conv2_w"], (1, 1), "SAME",
                                     dimension_numbers=dn)
    y = y + p["conv2_b"][None, :, None, None]
    y = jax.lax.reduce_window(y, -jnp.inf, jax.lax.max,
                              (1, 1, 2, 2), (1, 1, 2, 2), "VALID")
    y = y.reshape(x_nchw.shape[0], -1)            # NCHW flatten -> 3136
    y = y @ p["fc1_w"] + p["fc1_b"]
    return y @ p["fc2_w"] + p["fc2_b"]


if __name__ == "__main__":
    key = jax.random.PRNGKey(0)
    pkey, xkey = jax.random.split(key)
    params = init_params(pkey)
    kparams = prepare_params(params)           # one-time weight re-layout

    # batch=2, channels=1, spatial=28x28 (required by Linear(3136, 100))
    x = jax.random.normal(xkey, (2, 1, 28, 28), jnp.float32)

    out = net_forward(kparams, x)
    out = jax.block_until_ready(out)

    assert out.shape == (2, 10), out.shape
    assert out.dtype == jnp.float32
    assert bool(jnp.all(jnp.isfinite(out)))

    ref = net_reference(params, x)
    max_err = float(jnp.max(jnp.abs(out - ref)))
    assert bool(jnp.allclose(out, ref, rtol=5e-2, atol=5e-2)), max_err

    print("KERNEL_OK")
</pallas_src>

<mosaic_0001>
module attributes {stable_mosaic.version = 11 : i64} {
  func.func @_net_kernel(%arg0: i32, %arg1: memref<1x1088x10xf32, #tpu.memory_space<vmem>>, %arg2: memref<10x32xf32, #tpu.memory_space<vmem>>, %arg3: memref<9x32x64xf32, #tpu.memory_space<vmem>>, %arg4: memref<1x64xf32, #tpu.memory_space<vmem>>, %arg5: memref<49x64x100xf32, #tpu.memory_space<vmem>>, %arg6: memref<1x100xf32, #tpu.memory_space<vmem>>, %arg7: memref<100x10xf32, #tpu.memory_space<vmem>>, %arg8: memref<1x10xf32, #tpu.memory_space<vmem>>, %arg9: memref<1x1x10xf32, #tpu.memory_space<vmem>>) attributes {dimension_semantics = [#tpu.dimension_semantics<parallel>], iteration_bounds = array<i64: 2>, scalar_prefetch = 0 : i64, scratch_operands = 0 : i64, tpu.core_type = #tpu.core_type<tc>, window_params = [{transform_indices = @transform_0, window_bounds = array<i64: 1, 1088, 10>}, {pipeline_mode = #tpu.pipeline_mode<synchronous>, transform_indices = @transform_1, window_bounds = array<i64: 10, 32>}, {pipeline_mode = #tpu.pipeline_mode<synchronous>, transform_indices = @transform_2, window_bounds = array<i64: 9, 32, 64>}, {pipeline_mode = #tpu.pipeline_mode<synchronous>, transform_indices = @transform_3, window_bounds = array<i64: 1, 64>}, {pipeline_mode = #tpu.pipeline_mode<synchronous>, transform_indices = @transform_4, window_bounds = array<i64: 49, 64, 100>}, {pipeline_mode = #tpu.pipeline_mode<synchronous>, transform_indices = @transform_5, window_bounds = array<i64: 1, 100>}, {pipeline_mode = #tpu.pipeline_mode<synchronous>, transform_indices = @transform_6, window_bounds = array<i64: 100, 10>}, {pipeline_mode = #tpu.pipeline_mode<synchronous>, transform_indices = @transform_7, window_bounds = array<i64: 1, 10>}, {transform_indices = @transform_8, window_bounds = array<i64: 1, 1, 10>}]} {
    %c0 = arith.constant 0 : index
    %c0_0 = arith.constant 0 : index
    %c0_1 = arith.constant 0 : index
    %0 = vector.load %arg1[%c0, %c0_0, %c0_1] : memref<1x1088x10xf32, #tpu.memory_space<vmem>>, vector<1x1088x10xf32>
    %1 = vector.shape_cast %0 : vector<1x1088x10xf32> to vector<1088x10xf32>
    %c0_2 = arith.constant 0 : index
    %c0_3 = arith.constant 0 : index
    %2 = vector.load %arg2[%c0_2, %c0_3] : memref<10x32xf32, #tpu.memory_space<vmem>>, vector<10x32xf32>
    %cst = arith.constant dense<0.000000e+00> : vector<1088x32xf32>
    %3 = tpu.matmul %1, %2, %cst {dimension_numbers = #tpu.dot_dimension_numbers<[1], [0], [0], [1], [0, 0, 1, 1], [], []>} : vector<1088x10xf32>, vector<10x32xf32>, vector<1088x32xf32> -> vector<1088x32xf32>
    %4 = vector.extract_strided_slice %3 {offsets = [0, 0], sizes = [272, 32], strides = [1, 1]} : vector<1088x32xf32> to vector<272x32xf32>
    %5 = vector.extract_strided_slice %3 {offsets = [272, 0], sizes = [272, 32], strides = [1, 1]} : vector<1088x32xf32> to vector<272x32xf32>
    %6 = arith.maximumf %4, %5 : vector<272x32xf32>
    %7 = vector.extract_strided_slice %3 {offsets = [544, 0], sizes = [272, 32], strides = [1, 1]} : vector<1088x32xf32> to vector<272x32xf32>
    %8 = vector.extract_strided_slice %3 {offsets = [816, 0], sizes = [272, 32], strides = [1, 1]} : vector<1088x32xf32> to vector<272x32xf32>
    %9 = arith.maximumf %7, %8 : vector<272x32xf32>
    %10 = arith.maximumf %6, %9 : vector<272x32xf32>
    %11 = vector.extract_strided_slice %10 {offsets = [0, 0], sizes = [232, 32], strides = [1, 1]} : vector<272x32xf32> to vector<232x32xf32>
    %c0_4 = arith.constant 0 : index
    %c0_5 = arith.constant 0 : index
    %c0_6 = arith.constant 0 : index
    %12 = vector.load %arg3[%c0_4, %c0_5, %c0_6] : memref<9x32x64xf32, #tpu.memory_space<vmem>>, vector<1x32x64xf32>
    %13 = vector.shape_cast %12 : vector<1x32x64xf32> to vector<32x64xf32>
    %cst_7 = arith.constant dense<0.000000e+00> : vector<232x64xf32>
    %14 = tpu.matmul %11, %13, %cst_7 {dimension_numbers = #tpu.dot_dimension_numbers<[1], [0], [0], [1], [0, 0, 1, 1], [], []>} : vector<232x32xf32>, vector<32x64xf32>, vector<232x64xf32> -> vector<232x64xf32>
    %15 = vector.extract_strided_slice %10 {offsets = [1, 0], sizes = [232, 32], strides = [1, 1]} : vector<272x32xf32> to vector<232x32xf32>
    %c1 = arith.constant 1 : index
    %c0_8 = arith.constant 0 : index
    %c0_9 = arith.constant 0 : index
    %16 = vector.load %arg3[%c1, %c0_8, %c0_9] : memref<9x32x64xf32, #tpu.memory_space<vmem>>, vector<1x32x64xf32>
    %17 = vector.shape_cast %16 : vector<1x32x64xf32> to vector<32x64xf32>
    %cst_10 = arith.constant dense<0.000000e+00> : vector<232x64xf32>
    %18 = tpu.matmul %15, %17, %cst_10 {dimension_numbers = #tpu.dot_dimension_numbers<[1], [0], [0], [1], [0, 0, 1, 1], [], []>} : vector<232x32xf32>, vector<32x64xf32>, vector<232x64xf32> -> vector<232x64xf32>
    %19 = arith.addf %14, %18 : vector<232x64xf32>
    %20 = vector.extract_strided_slice %10 {offsets = [2, 0], sizes = [232, 32], strides = [1, 1]} : vector<272x32xf32> to vector<232x32xf32>
    %c2 = arith.constant 2 : index
    %c0_11 = arith.constant 0 : index
    %c0_12 = arith.constant 0 : index
    %21 = vector.load %arg3[%c2, %c0_11, %c0_12] : memref<9x32x64xf32, #tpu.memory_space<vmem>>, vector<1x32x64xf32>
    %22 = vector.shape_cast %21 : vector<1x32x64xf32> to vector<32x64xf32>
    %cst_13 = arith.constant dense<0.000000e+00> : vector<232x64xf32>
    %23 = tpu.matmul %20, %22, %cst_13 {dimension_numbers = #tpu.dot_dimension_numbers<[1], [0], [0], [1], [0, 0, 1, 1], [], []>} : vector<232x32xf32>, vector<32x64xf32>, vector<232x64xf32> -> vector<232x64xf32>
    %24 = arith.addf %19, %23 : vector<232x64xf32>
    %25 = vector.extract_strided_slice %10 {offsets = [16, 0], sizes = [232, 32], strides = [1, 1]} : vector<272x32xf32> to vector<232x32xf32>
    %c3 = arith.constant 3 : index
    %c0_14 = arith.constant 0 : index
    %c0_15 = arith.constant 0 : index
    %26 = vector.load %arg3[%c3, %c0_14, %c0_15] : memref<9x32x64xf32, #tpu.memory_space<vmem>>, vector<1x32x64xf32>
    %27 = vector.shape_cast %26 : vector<1x32x64xf32> to vector<32x64xf32>
    %cst_16 = arith.constant dense<0.000000e+00> : vector<232x64xf32>
    %28 = tpu.matmul %25, %27, %cst_16 {dimension_numbers = #tpu.dot_dimension_numbers<[1], [0], [0], [1], [0, 0, 1, 1], [], []>} : vector<232x32xf32>, vector<32x64xf32>, vector<232x64xf32> -> vector<232x64xf32>
    %29 = vector.extract_strided_slice %10 {offsets = [17, 0], sizes = [232, 32], strides = [1, 1]} : vector<272x32xf32> to vector<232x32xf32>
    %c4 = arith.constant 4 : index
    %c0_17 = arith.constant 0 : index
    %c0_18 = arith.constant 0 : index
    %30 = vector.load %arg3[%c4, %c0_17, %c0_18] : memref<9x32x64xf32, #tpu.memory_space<vmem>>, vector<1x32x64xf32>
    %31 = vector.shape_cast %30 : vector<1x32x64xf32> to vector<32x64xf32>
    %cst_19 = arith.constant dense<0.000000e+00> : vector<232x64xf32>
    %32 = tpu.matmul %29, %31, %cst_19 {dimension_numbers = #tpu.dot_dimension_numbers<[1], [0], [0], [1], [0, 0, 1, 1], [], []>} : vector<232x32xf32>, vector<32x64xf32>, vector<232x64xf32> -> vector<232x64xf32>
    %33 = arith.addf %28, %32 : vector<232x64xf32>
    %34 = vector.extract_strided_slice %10 {offsets = [18, 0], sizes = [232, 32], strides = [1, 1]} : vector<272x32xf32> to vector<232x32xf32>
    %c5 = arith.constant 5 : index
    %c0_20 = arith.constant 0 : index
    %c0_21 = arith.constant 0 : index
    %35 = vector.load %arg3[%c5, %c0_20, %c0_21] : memref<9x32x64xf32, #tpu.memory_space<vmem>>, vector<1x32x64xf32>
    %36 = vector.shape_cast %35 : vector<1x32x64xf32> to vector<32x64xf32>
    %cst_22 = arith.constant dense<0.000000e+00> : vector<232x64xf32>
    %37 = tpu.matmul %34, %36, %cst_22 {dimension_numbers = #tpu.dot_dimension_numbers<[1], [0], [0], [1], [0, 0, 1, 1], [], []>} : vector<232x32xf32>, vector<32x64xf32>, vector<232x64xf32> -> vector<232x64xf32>
    %38 = arith.addf %33, %37 : vector<232x64xf32>
    %39 = vector.extract_strided_slice %10 {offsets = [32, 0], sizes = [232, 32], strides = [1, 1]} : vector<272x32xf32> to vector<232x32xf32>
    %c6 = arith.constant 6 : index
    %c0_23 = arith.constant 0 : index
    %c0_24 = arith.constant 0 : index
    %40 = vector.load %arg3[%c6, %c0_23, %c0_24] : memref<9x32x64xf32, #tpu.memory_space<vmem>>, vector<1x32x64xf32>
    %41 = vector.shape_cast %40 : vector<1x32x64xf32> to vector<32x64xf32>
    %cst_25 = arith.constant dense<0.000000e+00> : vector<232x64xf32>
    %42 = tpu.matmul %39, %41, %cst_25 {dimension_numbers = #tpu.dot_dimension_numbers<[1], [0], [0], [1], [0, 0, 1, 1], [], []>} : vector<232x32xf32>, vector<32x64xf32>, vector<232x64xf32> -> vector<232x64xf32>
    %43 = vector.extract_strided_slice %10 {offsets = [33, 0], sizes = [232, 32], strides = [1, 1]} : vector<272x32xf32> to vector<232x32xf32>
    %c7 = arith.constant 7 : index
    %c0_26 = arith.constant 0 : index
    %c0_27 = arith.constant 0 : index
    %44 = vector.load %arg3[%c7, %c0_26, %c0_27] : memref<9x32x64xf32, #tpu.memory_space<vmem>>, vector<1x32x64xf32>
    %45 = vector.shape_cast %44 : vector<1x32x64xf32> to vector<32x64xf32>
    %cst_28 = arith.constant dense<0.000000e+00> : vector<232x64xf32>
    %46 = tpu.matmul %43, %45, %cst_28 {dimension_numbers = #tpu.dot_dimension_numbers<[1], [0], [0], [1], [0, 0, 1, 1], [], []>} : vector<232x32xf32>, vector<32x64xf32>, vector<232x64xf32> -> vector<232x64xf32>
    %47 = arith.addf %42, %46 : vector<232x64xf32>
    %48 = vector.extract_strided_slice %10 {offsets = [34, 0], sizes = [232, 32], strides = [1, 1]} : vector<272x32xf32> to vector<232x32xf32>
    %c8 = arith.constant 8 : index
    %c0_29 = arith.constant 0 : index
    %c0_30 = arith.constant 0 : index
    %49 = vector.load %arg3[%c8, %c0_29, %c0_30] : memref<9x32x64xf32, #tpu.memory_space<vmem>>, vector<1x32x64xf32>
    %50 = vector.shape_cast %49 : vector<1x32x64xf32> to vector<32x64xf32>
    %cst_31 = arith.constant dense<0.000000e+00> : vector<232x64xf32>
    %51 = tpu.matmul %48, %50, %cst_31 {dimension_numbers = #tpu.dot_dimension_numbers<[1], [0], [0], [1], [0, 0, 1, 1], [], []>} : vector<232x32xf32>, vector<32x64xf32>, vector<232x64xf32> -> vector<232x64xf32>
    %52 = arith.addf %47, %51 : vector<232x64xf32>
    %53 = arith.addf %24, %38 : vector<232x64xf32>
    %c0_32 = arith.constant 0 : index
    %c0_33 = arith.constant 0 : index
    %54 = vector.load %arg4[%c0_32, %c0_33] : memref<1x64xf32, #tpu.memory_space<vmem>>, vector<1x64xf32>
    %55 = vector.broadcast %54 : vector<1x64xf32> to vector<232x64xf32>
    %56 = arith.addf %52, %55 : vector<232x64xf32>
    %57 = arith.addf %53, %56 : vector<232x64xf32>
    %58 = vector.extract_strided_slice %57 {offsets = [0, 0], sizes = [208, 64], strides = [1, 1]} : vector<232x64xf32> to vector<208x64xf32>
    %59 = vector.extract_strided_slice %57 {offsets = [1, 0], sizes = [208, 64], strides = [1, 1]} : vector<232x64xf32> to vector<208x64xf32>
    %60 = arith.maximumf %58, %59 : vector<208x64xf32>
    %61 = vector.extract_strided_slice %57 {offsets = [16, 0], sizes = [208, 64], strides = [1, 1]} : vector<232x64xf32> to vector<208x64xf32>
    %62 = vector.extract_strided_slice %57 {offsets = [17, 0], sizes = [208, 64], strides = [1, 1]} : vector<232x64xf32> to vector<208x64xf32>
    %63 = arith.maximumf %61, %62 : vector<208x64xf32>
    %64 = arith.maximumf %60, %63 : vector<208x64xf32>
    %65 = vector.extract_strided_slice %64 {offsets = [0, 0], sizes = [1, 64], strides = [1, 1]} : vector<208x64xf32> to vector<1x64xf32>
    %c0_34 = arith.constant 0 : index
    %c0_35 = arith.constant 0 : index
    %c0_36 = arith.constant 0 : index
    %66 = vector.load %arg5[%c0_34, %c0_35, %c0_36] : memref<49x64x100xf32, #tpu.memory_space<vmem>>, vector<1x64x100xf32>
    %67 = vector.shape_cast %66 : vector<1x64x100xf32> to vector<64x100xf32>
    %cst_37 = arith.constant dense<0.000000e+00> : vector<1x100xf32>
    %68 = tpu.matmul %65, %67, %cst_37 {dimension_numbers = #tpu.dot_dimension_numbers<[1], [0], [0], [1], [0, 0, 1, 1], [], []>} : vector<1x64xf32>, vector<64x100xf32>, vector<1x100xf32> -> vector<1x100xf32>
    %69 = vector.extract_strided_slice %64 {offsets = [2, 0], sizes = [1, 64], strides = [1, 1]} : vector<208x64xf32> to vector<1x64xf32>
    %c1_38 = arith.constant 1 : index
    %c0_39 = arith.constant 0 : index
    %c0_40 = arith.constant 0 : index
    %70 = vector.load %arg5[%c1_38, %c0_39, %c0_40] : memref<49x64x100xf32, #tpu.memory_space<vmem>>, vector<1x64x100xf32>
    %71 = vector.shape_cast %70 : vector<1x64x100xf32> to vector<64x100xf32>
    %cst_41 = arith.constant dense<0.000000e+00> : vector<1x100xf32>
    %72 = tpu.matmul %69, %71, %cst_41 {dimension_numbers = #tpu.dot_dimension_numbers<[1], [0], [0], [1], [0, 0, 1, 1], [], []>} : vector<1x64xf32>, vector<64x100xf32>, vector<1x100xf32> -> vector<1x100xf32>
    %73 = arith.addf %68, %72 : vector<1x100xf32>
    %74 = vector.extract_strided_slice %64 {offsets = [4, 0], sizes = [1, 64], strides = [1, 1]} : vector<208x64xf32> to vector<1x64xf32>
    %c2_42 = arith.constant 2 : index
    %c0_43 = arith.constant 0 : index
    %c0_44 = arith.constant 0 : index
    %75 = vector.load %arg5[%c2_42, %c0_43, %c0_44] : memref<49x64x100xf32, #tpu.memory_space<vmem>>, vector<1x64x100xf32>
    %76 = vector.shape_cast %75 : vector<1x64x100xf32> to vector<64x100xf32>
    %cst_45 = arith.constant dense<0.000000e+00> : vector<1x100xf32>
    %77 = tpu.matmul %74, %76, %cst_45 {dimension_numbers = #tpu.dot_dimension_numbers<[1], [0], [0], [1], [0, 0, 1, 1], [], []>} : vector<1x64xf32>, vector<64x100xf32>, vector<1x100xf32> -> vector<1x100xf32>
    %78 = arith.addf %73, %77 : vector<1x100xf32>
    %79 = vector.extract_strided_slice %64 {offsets = [6, 0], sizes = [1, 64], strides = [1, 1]} : vector<208x64xf32> to vector<1x64xf32>
    %c3_46 = arith.constant 3 : index
    %c0_47 = arith.constant 0 : index
    %c0_48 = arith.constant 0 : index
    %80 = vector.load %arg5[%c3_46, %c0_47, %c0_48] : memref<49x64x100xf32, #tpu.memory_space<vmem>>, vector<1x64x100xf32>
    %81 = vector.shape_cast %80 : vector<1x64x100xf32> to vector<64x100xf32>
    %cst_49 = arith.constant dense<0.000000e+00> : vector<1x100xf32>
    %82 = tpu.matmul %79, %81, %cst_49 {dimension_numbers = #tpu.dot_dimension_numbers<[1], [0], [0], [1], [0, 0, 1, 1], [], []>} : vector<1x64xf32>, vector<64x100xf32>, vector<1x100xf32> -> vector<1x100xf32>
    %83 = arith.addf %78, %82 : vector<1x100xf32>
    %84 = vector.extract_strided_slice %64 {offsets = [8, 0], sizes = [1, 64], strides = [1, 1]} : vector<208x64xf32> to vector<1x64xf32>
    %c4_50 = arith.constant 4 : index
    %c0_51 = arith.constant 0 : index
    %c0_52 = arith.constant 0 : index
    %85 = vector.load %arg5[%c4_50, %c0_51, %c0_52] : memref<49x64x100xf32, #tpu.memory_space<vmem>>, vector<1x64x100xf32>
    %86 = vector.shape_cast %85 : vector<1x64x100xf32> to vector<64x100xf32>
    %cst_53 = arith.constant dense<0.000000e+00> : vector<1x100xf32>
    %87 = tpu.matmul %84, %86, %cst_53 {dimension_numbers = #tpu.dot_dimension_numbers<[1], [0], [0], [1], [0, 0, 1, 1], [], []>} : vector<1x64xf32>, vector<64x100xf32>, vector<1x100xf32> -> vector<1x100xf32>
    %88 = arith.addf %83, %87 : vector<1x100xf32>
    %89 = vector.extract_strided_slice %64 {offsets = [10, 0], sizes = [1, 64], strides = [1, 1]} : vector<208x64xf32> to vector<1x64xf32>
    %c5_54 = arith.constant 5 : index
    %c0_55 = arith.constant 0 : index
    %c0_56 = arith.constant 0 : index
    %90 = vector.load %arg5[%c5_54, %c0_55, %c0_56] : memref<49x64x100xf32, #tpu.memory_space<vmem>>, vector<1x64x100xf32>
    %91 = vector.shape_cast %90 : vector<1x64x100xf32> to vector<64x100xf32>
    %cst_57 = arith.constant dense<0.000000e+00> : vector<1x100xf32>
    %92 = tpu.matmul %89, %91, %cst_57 {dimension_numbers = #tpu.dot_dimension_numbers<[1], [0], [0], [1], [0, 0, 1, 1], [], []>} : vector<1x64xf32>, vector<64x100xf32>, vector<1x100xf32> -> vector<1x100xf32>
    %93 = arith.addf %88, %92 : vector<1x100xf32>
    %94 = vector.extract_strided_slice %64 {offsets = [12, 0], sizes = [1, 64], strides = [1, 1]} : vector<208x64xf32> to vector<1x64xf32>
    %c6_58 = arith.constant 6 : index
    %c0_59 = arith.constant 0 : index
    %c0_60 = arith.constant 0 : index
    %95 = vector.load %arg5[%c6_58, %c0_59, %c0_60] : memref<49x64x100xf32, #tpu.memory_space<vmem>>, vector<1x64x100xf32>
    %96 = vector.shape_cast %95 : vector<1x64x100xf32> to vector<64x100xf32>
    %cst_61 = arith.constant dense<0.000000e+00> : vector<1x100xf32>
    %97 = tpu.matmul %94, %96, %cst_61 {dimension_numbers = #tpu.dot_dimension_numbers<[1], [0], [0], [1], [0, 0, 1, 1], [], []>} : vector<1x64xf32>, vector<64x100xf32>, vector<1x100xf32> -> vector<1x100xf32>
    %98 = arith.addf %93, %97 : vector<1x100xf32>
    %99 = vector.extract_strided_slice %64 {offsets = [32, 0], sizes = [1, 64], strides = [1, 1]} : vector<208x64xf32> to vector<1x64xf32>
    %c7_62 = arith.constant 7 : index
    %c0_63 = arith.constant 0 : index
    %c0_64 = arith.constant 0 : index
    %100 = vector.load %arg5[%c7_62, %c0_63, %c0_64] : memref<49x64x100xf32, #tpu.memory_space<vmem>>, vector<1x64x100xf32>
    %101 = vector.shape_cast %100 : vector<1x64x100xf32> to vector<64x100xf32>
    %cst_65 = arith.constant dense<0.000000e+00> : vector<1x100xf32>
    %102 = tpu.matmul %99, %101, %cst_65 {dimension_numbers = #tpu.dot_dimension_numbers<[1], [0], [0], [1], [0, 0, 1, 1], [], []>} : vector<1x64xf32>, vector<64x100xf32>, vector<1x100xf32> -> vector<1x100xf32>
    %103 = vector.extract_strided_slice %64 {offsets = [34, 0], sizes = [1, 64], strides = [1, 1]} : vector<208x64xf32> to vector<1x64xf32>
    %c8_66 = arith.constant 8 : index
    %c0_67 = arith.constant 0 : index
    %c0_68 = arith.constant 0 : index
    %104 = vector.load %arg5[%c8_66, %c0_67, %c0_68] : memref<49x64x100xf32, #tpu.memory_space<vmem>>, vector<1x64x100xf32>
    %105 = vector.shape_cast %104 : vector<1x64x100xf32> to vector<64x100xf32>
    %cst_69 = arith.constant dense<0.000000e+00> : vector<1x100xf32>
    %106 = tpu.matmul %103, %105, %cst_69 {dimension_numbers = #tpu.dot_dimension_numbers<[1], [0], [0], [1], [0, 0, 1, 1], [], []>} : vector<1x64xf32>, vector<64x100xf32>, vector<1x100xf32> -> vector<1x100xf32>
    %107 = arith.addf %102, %106 : vector<1x100xf32>
    %108 = vector.extract_strided_slice %64 {offsets = [36, 0], sizes = [1, 64], strides = [1, 1]} : vector<208x64xf32> to vector<1x64xf32>
    %c9 = arith.constant 9 : index
    %c0_70 = arith.constant 0 : index
    %c0_71 = arith.constant 0 : index
    %109 = vector.load %arg5[%c9, %c0_70, %c0_71] : memref<49x64x100xf32, #tpu.memory_space<vmem>>, vector<1x64x100xf32>
    %110 = vector.shape_cast %109 : vector<1x64x100xf32> to vector<64x100xf32>
    %cst_72 = arith.constant dense<0.000000e+00> : vector<1x100xf32>
    %111 = tpu.matmul %108, %110, %cst_72 {dimension_numbers = #tpu.dot_dimension_numbers<[1], [0], [0], [1], [0, 0, 1, 1], [], []>} : vector<1x64xf32>, vector<64x100xf32>, vector<1x100xf32> -> vector<1x100xf32>
    %112 = arith.addf %107, %111 : vector<1x100xf32>
    %113 = vector.extract_strided_slice %64 {offsets = [38, 0], sizes = [1, 64], strides = [1, 1]} : vector<208x64xf32> to vector<1x64xf32>
    %c10 = arith.constant 10 : index
    %c0_73 = arith.constant 0 : index
    %c0_74 = arith.constant 0 : index
    %114 = vector.load %arg5[%c10, %c0_73, %c0_74] : memref<49x64x100xf32, #tpu.memory_space<vmem>>, vector<1x64x100xf32>
    %115 = vector.shape_cast %114 : vector<1x64x100xf32> to vector<64x100xf32>
    %cst_75 = arith.constant dense<0.000000e+00> : vector<1x100xf32>
    %116 = tpu.matmul %113, %115, %cst_75 {dimension_numbers = #tpu.dot_dimension_numbers<[1], [0], [0], [1], [0, 0, 1, 1], [], []>} : vector<1x64xf32>, vector<64x100xf32>, vector<1x100xf32> -> vector<1x100xf32>
    %117 = arith.addf %112, %116 : vector<1x100xf32>
    %118 = vector.extract_strided_slice %64 {offsets = [40, 0], sizes = [1, 64], strides = [1, 1]} : vector<208x64xf32> to vector<1x64xf32>
    %c11 = arith.constant 11 : index
    %c0_76 = arith.constant 0 : index
    %c0_77 = arith.constant 0 : index
    %119 = vector.load %arg5[%c11, %c0_76, %c0_77] : memref<49x64x100xf32, #tpu.memory_space<vmem>>, vector<1x64x100xf32>
    %120 = vector.shape_cast %119 : vector<1x64x100xf32> to vector<64x100xf32>
    %cst_78 = arith.constant dense<0.000000e+00> : vector<1x100xf32>
    %121 = tpu.matmul %118, %120, %cst_78 {dimension_numbers = #tpu.dot_dimension_numbers<[1], [0], [0], [1], [0, 0, 1, 1], [], []>} : vector<1x64xf32>, vector<64x100xf32>, vector<1x100xf32> -> vector<1x100xf32>
    %122 = arith.addf %117, %121 : vector<1x100xf32>
    %123 = vector.extract_strided_slice %64 {offsets = [42, 0], sizes = [1, 64], strides = [1, 1]} : vector<208x64xf32> to vector<1x64xf32>
    %c12 = arith.constant 12 : index
    %c0_79 = arith.constant 0 : index
    %c0_80 = arith.constant 0 : index
    %124 = vector.load %arg5[%c12, %c0_79, %c0_80] : memref<49x64x100xf32, #tpu.memory_space<vmem>>, vector<1x64x100xf32>
    %125 = vector.shape_cast %124 : vector<1x64x100xf32> to vector<64x100xf32>
    %cst_81 = arith.constant dense<0.000000e+00> : vector<1x100xf32>
    %126 = tpu.matmul %123, %125, %cst_81 {dimension_numbers = #tpu.dot_dimension_numbers<[1], [0], [0], [1], [0, 0, 1, 1], [], []>} : vector<1x64xf32>, vector<64x100xf32>, vector<1x100xf32> -> vector<1x100xf32>
    %127 = arith.addf %122, %126 : vector<1x100xf32>
    %128 = vector.extract_strided_slice %64 {offsets = [44, 0], sizes = [1, 64], strides = [1, 1]} : vector<208x64xf32> to vector<1x64xf32>
    %c13 = arith.constant 13 : index
    %c0_82 = arith.constant 0 : index
    %c0_83 = arith.constant 0 : index
    %129 = vector.load %arg5[%c13, %c0_82, %c0_83] : memref<49x64x100xf32, #tpu.memory_space<vmem>>, vector<1x64x100xf32>
    %130 = vector.shape_cast %129 : vector<1x64x100xf32> to vector<64x100xf32>
    %cst_84 = arith.constant dense<0.000000e+00> : vector<1x100xf32>
    %131 = tpu.matmul %128, %130, %cst_84 {dimension_numbers = #tpu.dot_dimension_numbers<[1], [0], [0], [1], [0, 0, 1, 1], [], []>} : vector<1x64xf32>, vector<64x100xf32>, vector<1x100xf32> -> vector<1x100xf32>
    %132 = arith.addf %127, %131 : vector<1x100xf32>
    %133 = vector.extract_strided_slice %64 {offsets = [64, 0], sizes = [1, 64], strides = [1, 1]} : vector<208x64xf32> to vector<1x64xf32>
    %c14 = arith.constant 14 : index
    %c0_85 = arith.constant 0 : index
    %c0_86 = arith.constant 0 : index
    %134 = vector.load %arg5[%c14, %c0_85, %c0_86] : memref<49x64x100xf32, #tpu.memory_space<vmem>>, vector<1x64x100xf32>
    %135 = vector.shape_cast %134 : vector<1x64x100xf32> to vector<64x100xf32>
    %cst_87 = arith.constant dense<0.000000e+00> : vector<1x100xf32>
    %136 = tpu.matmul %133, %135, %cst_87 {dimension_numbers = #tpu.dot_dimension_numbers<[1], [0], [0], [1], [0, 0, 1, 1], [], []>} : vector<1x64xf32>, vector<64x100xf32>, vector<1x100xf32> -> vector<1x100xf32>
    %137 = vector.extract_strided_slice %64 {offsets = [66, 0], sizes = [1, 64], strides = [1, 1]} : vector<208x64xf32> to vector<1x64xf32>
    %c15 = arith.constant 15 : index
    %c0_88 = arith.constant 0 : index
    %c0_89 = arith.constant 0 : index
    %138 = vector.load %arg5[%c15, %c0_88, %c0_89] : memref<49x64x100xf32, #tpu.memory_space<vmem>>, vector<1x64x100xf32>
    %139 = vector.shape_cast %138 : vector<1x64x100xf32> to vector<64x100xf32>
    %cst_90 = arith.constant dense<0.000000e+00> : vector<1x100xf32>
    %140 = tpu.matmul %137, %139, %cst_90 {dimension_numbers = #tpu.dot_dimension_numbers<[1], [0], [0], [1], [0, 0, 1, 1], [], []>} : vector<1x64xf32>, vector<64x100xf32>, vector<1x100xf32> -> vector<1x100xf32>
    %141 = arith.addf %136, %140 : vector<1x100xf32>
    %142 = vector.extract_strided_slice %64 {offsets = [68, 0], sizes = [1, 64], strides = [1, 1]} : vector<208x64xf32> to vector<1x64xf32>
    %c16 = arith.constant 16 : index
    %c0_91 = arith.constant 0 : index
    %c0_92 = arith.constant 0 : index
    %143 = vector.load %arg5[%c16, %c0_91, %c0_92] : memref<49x64x100xf32, #tpu.memory_space<vmem>>, vector<1x64x100xf32>
    %144 = vector.shape_cast %143 : vector<1x64x100xf32> to vector<64x100xf32>
    %cst_93 = arith.constant dense<0.000000e+00> : vector<1x100xf32>
    %145 = tpu.matmul %142, %144, %cst_93 {dimension_numbers = #tpu.dot_dimension_numbers<[1], [0], [0], [1], [0, 0, 1, 1], [], []>} : vector<1x64xf32>, vector<64x100xf32>, vector<1x100xf32> -> vector<1x100xf32>
    %146 = arith.addf %141, %145 : vector<1x100xf32>
    %147 = vector.extract_strided_slice %64 {offsets = [70, 0], sizes = [1, 64], strides = [1, 1]} : vector<208x64xf32> to vector<1x64xf32>
    %c17 = arith.constant 17 : index
    %c0_94 = arith.constant 0 : index
    %c0_95 = arith.constant 0 : index
    %148 = vector.load %arg5[%c17, %c0_94, %c0_95] : memref<49x64x100xf32, #tpu.memory_space<vmem>>, vector<1x64x100xf32>
    %149 = vector.shape_cast %148 : vector<1x64x100xf32> to vector<64x100xf32>
    %cst_96 = arith.constant dense<0.000000e+00> : vector<1x100xf32>
    %150 = tpu.matmul %147, %149, %cst_96 {dimension_numbers = #tpu.dot_dimension_numbers<[1], [0], [0], [1], [0, 0, 1, 1], [], []>} : vector<1x64xf32>, vector<64x100xf32>, vector<1x100xf32> -> vector<1x100xf32>
    %151 = arith.addf %146, %150 : vector<1x100xf32>
    %152 = vector.extract_strided_slice %64 {offsets = [72, 0], sizes = [1, 64], strides = [1, 1]} : vector<208x64xf32> to vector<1x64xf32>
    %c18 = arith.constant 18 : index
    %c0_97 = arith.constant 0 : index
    %c0_98 = arith.constant 0 : index
    %153 = vector.load %arg5[%c18, %c0_97, %c0_98] : memref<49x64x100xf32, #tpu.memory_space<vmem>>, vector<1x64x100xf32>
    %154 = vector.shape_cast %153 : vector<1x64x100xf32> to vector<64x100xf32>
    %cst_99 = arith.constant dense<0.000000e+00> : vector<1x100xf32>
    %155 = tpu.matmul %152, %154, %cst_99 {dimension_numbers = #tpu.dot_dimension_numbers<[1], [0], [0], [1], [0, 0, 1, 1], [], []>} : vector<1x64xf32>, vector<64x100xf32>, vector<1x100xf32> -> vector<1x100xf32>
    %156 = arith.addf %151, %155 : vector<1x100xf32>
    %157 = vector.extract_strided_slice %64 {offsets = [74, 0], sizes = [1, 64], strides = [1, 1]} : vector<208x64xf32> to vector<1x64xf32>
    %c19 = arith.constant 19 : index
    %c0_100 = arith.constant 0 : index
    %c0_101 = arith.constant 0 : index
    %158 = vector.load %arg5[%c19, %c0_100, %c0_101] : memref<49x64x100xf32, #tpu.memory_space<vmem>>, vector<1x64x100xf32>
    %159 = vector.shape_cast %158 : vector<1x64x100xf32> to vector<64x100xf32>
    %cst_102 = arith.constant dense<0.000000e+00> : vector<1x100xf32>
    %160 = tpu.matmul %157, %159, %cst_102 {dimension_numbers = #tpu.dot_dimension_numbers<[1], [0], [0], [1], [0, 0, 1, 1], [], []>} : vector<1x64xf32>, vector<64x100xf32>, vector<1x100xf32> -> vector<1x100xf32>
    %161 = arith.addf %156, %160 : vector<1x100xf32>
    %162 = vector.extract_strided_slice %64 {offsets = [76, 0], sizes = [1, 64], strides = [1, 1]} : vector<208x64xf32> to vector<1x64xf32>
    %c20 = arith.constant 20 : index
    %c0_103 = arith.constant 0 : index
    %c0_104 = arith.constant 0 : index
    %163 = vector.load %arg5[%c20, %c0_103, %c0_104] : memref<49x64x100xf32, #tpu.memory_space<vmem>>, vector<1x64x100xf32>
    %164 = vector.shape_cast %163 : vector<1x64x100xf32> to vector<64x100xf32>
    %cst_105 = arith.constant dense<0.000000e+00> : vector<1x100xf32>
    %165 = tpu.matmul %162, %164, %cst_105 {dimension_numbers = #tpu.dot_dimension_numbers<[1], [0], [0], [1], [0, 0, 1, 1], [], []>} : vector<1x64xf32>, vector<64x100xf32>, vector<1x100xf32> -> vector<1x100xf32>
    %166 = arith.addf %161, %165 : vector<1x100xf32>
    %167 = vector.extract_strided_slice %64 {offsets = [96, 0], sizes = [1, 64], strides = [1, 1]} : vector<208x64xf32> to vector<1x64xf32>
    %c21 = arith.constant 21 : index
    %c0_106 = arith.constant 0 : index
    %c0_107 = arith.constant 0 : index
    %168 = vector.load %arg5[%c21, %c0_106, %c0_107] : memref<49x64x100xf32, #tpu.memory_space<vmem>>, vector<1x64x100xf32>
    %169 = vector.shape_cast %168 : vector<1x64x100xf32> to vector<64x100xf32>
    %cst_108 = arith.constant dense<0.000000e+00> : vector<1x100xf32>
    %170 = tpu.matmul %167, %169, %cst_108 {dimension_numbers = #tpu.dot_dimension_numbers<[1], [0], [0], [1], [0, 0, 1, 1], [], []>} : vector<1x64xf32>, vector<64x100xf32>, vector<1x100xf32> -> vector<1x100xf32>
    %171 = vector.extract_strided_slice %64 {offsets = [98, 0], sizes = [1, 64], strides = [1, 1]} : vector<208x64xf32> to vector<1x64xf32>
    %c22 = arith.constant 22 : index
    %c0_109 = arith.constant 0 : index
    %c0_110 = arith.constant 0 : index
    %172 = vector.load %arg5[%c22, %c0_109, %c0_110] : memref<49x64x100xf32, #tpu.memory_space<vmem>>, vector<1x64x100xf32>
    %173 = vector.shape_cast %172 : vector<1x64x100xf32> to vector<64x100xf32>
    %cst_111 = arith.constant dense<0.000000e+00> : vector<1x100xf32>
    %174 = tpu.matmul %171, %173, %cst_111 {dimension_numbers = #tpu.dot_dimension_numbers<[1], [0], [0], [1], [0, 0, 1, 1], [], []>} : vector<1x64xf32>, vector<64x100xf32>, vector<1x100xf32> -> vector<1x100xf32>
    %175 = arith.addf %170, %174 : vector<1x100xf32>
    %176 = vector.extract_strided_slice %64 {offsets = [100, 0], sizes = [1, 64], strides = [1, 1]} : vector<208x64xf32> to vector<1x64xf32>
    %c23 = arith.constant 23 : index
    %c0_112 = arith.constant 0 : index
    %c0_113 = arith.constant 0 : index
    %177 = vector.load %arg5[%c23, %c0_112, %c0_113] : memref<49x64x100xf32, #tpu.memory_space<vmem>>, vector<1x64x100xf32>
    %178 = vector.shape_cast %177 : vector<1x64x100xf32> to vector<64x100xf32>
    %cst_114 = arith.constant dense<0.000000e+00> : vector<1x100xf32>
    %179 = tpu.matmul %176, %178, %cst_114 {dimension_numbers = #tpu.dot_dimension_numbers<[1], [0], [0], [1], [0, 0, 1, 1], [], []>} : vector<1x64xf32>, vector<64x100xf32>, vector<1x100xf32> -> vector<1x100xf32>
    %180 = arith.addf %175, %179 : vector<1x100xf32>
    %181 = vector.extract_strided_slice %64 {offsets = [102, 0], sizes = [1, 64], strides = [1, 1]} : vector<208x64xf32> to vector<1x64xf32>
    %c24 = arith.constant 24 : index
    %c0_115 = arith.constant 0 : index
    %c0_116 = arith.constant 0 : index
    %182 = vector.load %arg5[%c24, %c0_115, %c0_116] : memref<49x64x100xf32, #tpu.memory_space<vmem>>, vector<1x64x100xf32>
    %183 = vector.shape_cast %182 : vector<1x64x100xf32> to vector<64x100xf32>
    %cst_117 = arith.constant dense<0.000000e+00> : vector<1x100xf32>
    %184 = tpu.matmul %181, %183, %cst_117 {dimension_numbers = #tpu.dot_dimension_numbers<[1], [0], [0], [1], [0, 0, 1, 1], [], []>} : vector<1x64xf32>, vector<64x100xf32>, vector<1x100xf32> -> vector<1x100xf32>
    %185 = arith.addf %180, %184 : vector<1x100xf32>
    %186 = vector.extract_strided_slice %64 {offsets = [104, 0], sizes = [1, 64], strides = [1, 1]} : vector<208x64xf32> to vector<1x64xf32>
    %c25 = arith.constant 25 : index
    %c0_118 = arith.constant 0 : index
    %c0_119 = arith.constant 0 : index
    %187 = vector.load %arg5[%c25, %c0_118, %c0_119] : memref<49x64x100xf32, #tpu.memory_space<vmem>>, vector<1x64x100xf32>
    %188 = vector.shape_cast %187 : vector<1x64x100xf32> to vector<64x100xf32>
    %cst_120 = arith.constant dense<0.000000e+00> : vector<1x100xf32>
    %189 = tpu.matmul %186, %188, %cst_120 {dimension_numbers = #tpu.dot_dimension_numbers<[1], [0], [0], [1], [0, 0, 1, 1], [], []>} : vector<1x64xf32>, vector<64x100xf32>, vector<1x100xf32> -> vector<1x100xf32>
    %190 = arith.addf %185, %189 : vector<1x100xf32>
    %191 = vector.extract_strided_slice %64 {offsets = [106, 0], sizes = [1, 64], strides = [1, 1]} : vector<208x64xf32> to vector<1x64xf32>
    %c26 = arith.constant 26 : index
    %c0_121 = arith.constant 0 : index
    %c0_122 = arith.constant 0 : index
    %192 = vector.load %arg5[%c26, %c0_121, %c0_122] : memref<49x64x100xf32, #tpu.memory_space<vmem>>, vector<1x64x100xf32>
    %193 = vector.shape_cast %192 : vector<1x64x100xf32> to vector<64x100xf32>
    %cst_123 = arith.constant dense<0.000000e+00> : vector<1x100xf32>
    %194 = tpu.matmul %191, %193, %cst_123 {dimension_numbers = #tpu.dot_dimension_numbers<[1], [0], [0], [1], [0, 0, 1, 1], [], []>} : vector<1x64xf32>, vector<64x100xf32>, vector<1x100xf32> -> vector<1x100xf32>
    %195 = arith.addf %190, %194 : vector<1x100xf32>
    %196 = vector.extract_strided_slice %64 {offsets = [108, 0], sizes = [1, 64], strides = [1, 1]} : vector<208x64xf32> to vector<1x64xf32>
    %c27 = arith.constant 27 : index
    %c0_124 = arith.constant 0 : index
    %c0_125 = arith.constant 0 : index
    %197 = vector.load %arg5[%c27, %c0_124, %c0_125] : memref<49x64x100xf32, #tpu.memory_space<vmem>>, vector<1x64x100xf32>
    %198 = vector.shape_cast %197 : vector<1x64x100xf32> to vector<64x100xf32>
    %cst_126 = arith.constant dense<0.000000e+00> : vector<1x100xf32>
    %199 = tpu.matmul %196, %198, %cst_126 {dimension_numbers = #tpu.dot_dimension_numbers<[1], [0], [0], [1], [0, 0, 1, 1], [], []>} : vector<1x64xf32>, vector<64x100xf32>, vector<1x100xf32> -> vector<1x100xf32>
    %200 = arith.addf %195, %199 : vector<1x100xf32>
    %201 = vector.extract_strided_slice %64 {offsets = [128, 0], sizes = [1, 64], strides = [1, 1]} : vector<208x64xf32> to vector<1x64xf32>
    %c28 = arith.constant 28 : index
    %c0_127 = arith.constant 0 : index
    %c0_128 = arith.constant 0 : index
    %202 = vector.load %arg5[%c28, %c0_127, %c0_128] : memref<49x64x100xf32, #tpu.memory_space<vmem>>, vector<1x64x100xf32>
    %203 = vector.shape_cast %202 : vector<1x64x100xf32> to vector<64x100xf32>
    %cst_129 = arith.constant dense<0.000000e+00> : vector<1x100xf32>
    %204 = tpu.matmul %201, %203, %cst_129 {dimension_numbers = #tpu.dot_dimension_numbers<[1], [0], [0], [1], [0, 0, 1, 1], [], []>} : vector<1x64xf32>, vector<64x100xf32>, vector<1x100xf32> -> vector<1x100xf32>
    %205 = vector.extract_strided_slice %64 {offsets = [130, 0], sizes = [1, 64], strides = [1, 1]} : vector<208x64xf32> to vector<1x64xf32>
    %c29 = arith.constant 29 : index
    %c0_130 = arith.constant 0 : index
    %c0_131 = arith.constant 0 : index
    %206 = vector.load %arg5[%c29, %c0_130, %c0_131] : memref<49x64x100xf32, #tpu.memory_space<vmem>>, vector<1x64x100xf32>
    %207 = vector.shape_cast %206 : vector<1x64x100xf32> to vector<64x100xf32>
    %cst_132 = arith.constant dense<0.000000e+00> : vector<1x100xf32>
    %208 = tpu.matmul %205, %207, %cst_132 {dimension_numbers = #tpu.dot_dimension_numbers<[1], [0], [0], [1], [0, 0, 1, 1], [], []>} : vector<1x64xf32>, vector<64x100xf32>, vector<1x100xf32> -> vector<1x100xf32>
    %209 = arith.addf %204, %208 : vector<1x100xf32>
    %210 = vector.extract_strided_slice %64 {offsets = [132, 0], sizes = [1, 64], strides = [1, 1]} : vector<208x64xf32> to vector<1x64xf32>
    %c30 = arith.constant 30 : index
    %c0_133 = arith.constant 0 : index
    %c0_134 = arith.constant 0 : index
    %211 = vector.load %arg5[%c30, %c0_133, %c0_134] : memref<49x64x100xf32, #tpu.memory_space<vmem>>, vector<1x64x100xf32>
    %212 = vector.shape_cast %211 : vector<1x64x100xf32> to vector<64x100xf32>
    %cst_135 = arith.constant dense<0.000000e+00> : vector<1x100xf32>
    %213 = tpu.matmul %210, %212, %cst_135 {dimension_numbers = #tpu.dot_dimension_numbers<[1], [0], [0], [1], [0, 0, 1, 1], [], []>} : vector<1x64xf32>, vector<64x100xf32>, vector<1x100xf32> -> vector<1x100xf32>
    %214 = arith.addf %209, %213 : vector<1x100xf32>
    %215 = vector.extract_strided_slice %64 {offsets = [134, 0], sizes = [1, 64], strides = [1, 1]} : vector<208x64xf32> to vector<1x64xf32>
    %c31 = arith.constant 31 : index
    %c0_136 = arith.constant 0 : index
    %c0_137 = arith.constant 0 : index
    %216 = vector.load %arg5[%c31, %c0_136, %c0_137] : memref<49x64x100xf32, #tpu.memory_space<vmem>>, vector<1x64x100xf32>
    %217 = vector.shape_cast %216 : vector<1x64x100xf32> to vector<64x100xf32>
    %cst_138 = arith.constant dense<0.000000e+00> : vector<1x100xf32>
    %218 = tpu.matmul %215, %217, %cst_138 {dimension_numbers = #tpu.dot_dimension_numbers<[1], [0], [0], [1], [0, 0, 1, 1], [], []>} : vector<1x64xf32>, vector<64x100xf32>, vector<1x100xf32> -> vector<1x100xf32>
    %219 = arith.addf %214, %218 : vector<1x100xf32>
    %220 = vector.extract_strided_slice %64 {offsets = [136, 0], sizes = [1, 64], strides = [1, 1]} : vector<208x64xf32> to vector<1x64xf32>
    %c32 = arith.constant 32 : index
    %c0_139 = arith.constant 0 : index
    %c0_140 = arith.constant 0 : index
    %221 = vector.load %arg5[%c32, %c0_139, %c0_140] : memref<49x64x100xf32, #tpu.memory_space<vmem>>, vector<1x64x100xf32>
    %222 = vector.shape_cast %221 : vector<1x64x100xf32> to vector<64x100xf32>
    %cst_141 = arith.constant dense<0.000000e+00> : vector<1x100xf32>
    %223 = tpu.matmul %220, %222, %cst_141 {dimension_numbers = #tpu.dot_dimension_numbers<[1], [0], [0], [1], [0, 0, 1, 1], [], []>} : vector<1x64xf32>, vector<64x100xf32>, vector<1x100xf32> -> vector<1x100xf32>
    %224 = arith.addf %219, %223 : vector<1x100xf32>
    %225 = vector.extract_strided_slice %64 {offsets = [138, 0], sizes = [1, 64], strides = [1, 1]} : vector<208x64xf32> to vector<1x64xf32>
    %c33 = arith.constant 33 : index
    %c0_142 = arith.constant 0 : index
    %c0_143 = arith.constant 0 : index
    %226 = vector.load %arg5[%c33, %c0_142, %c0_143] : memref<49x64x100xf32, #tpu.memory_space<vmem>>, vector<1x64x100xf32>
    %227 = vector.shape_cast %226 : vector<1x64x100xf32> to vector<64x100xf32>
    %cst_144 = arith.constant dense<0.000000e+00> : vector<1x100xf32>
    %228 = tpu.matmul %225, %227, %cst_144 {dimension_numbers = #tpu.dot_dimension_numbers<[1], [0], [0], [1], [0, 0, 1, 1], [], []>} : vector<1x64xf32>, vector<64x100xf32>, vector<1x100xf32> -> vector<1x100xf32>
    %229 = arith.addf %224, %228 : vector<1x100xf32>
    %230 = vector.extract_strided_slice %64 {offsets = [140, 0], sizes = [1, 64], strides = [1, 1]} : vector<208x64xf32> to vector<1x64xf32>
    %c34 = arith.constant 34 : index
    %c0_145 = arith.constant 0 : index
    %c0_146 = arith.constant 0 : index
    %231 = vector.load %arg5[%c34, %c0_145, %c0_146] : memref<49x64x100xf32, #tpu.memory_space<vmem>>, vector<1x64x100xf32>
    %232 = vector.shape_cast %231 : vector<1x64x100xf32> to vector<64x100xf32>
    %cst_147 = arith.constant dense<0.000000e+00> : vector<1x100xf32>
    %233 = tpu.matmul %230, %232, %cst_147 {dimension_numbers = #tpu.dot_dimension_numbers<[1], [0], [0], [1], [0, 0, 1, 1], [], []>} : vector<1x64xf32>, vector<64x100xf32>, vector<1x100xf32> -> vector<1x100xf32>
    %234 = arith.addf %229, %233 : vector<1x100xf32>
    %235 = vector.extract_strided_slice %64 {offsets = [160, 0], sizes = [1, 64], strides = [1, 1]} : vector<208x64xf32> to vector<1x64xf32>
    %c35 = arith.constant 35 : index
    %c0_148 = arith.constant 0 : index
    %c0_149 = arith.constant 0 : index
    %236 = vector.load %arg5[%c35, %c0_148, %c0_149] : memref<49x64x100xf32, #tpu.memory_space<vmem>>, vector<1x64x100xf32>
    %237 = vector.shape_cast %236 : vector<1x64x100xf32> to vector<64x100xf32>
    %cst_150 = arith.constant dense<0.000000e+00> : vector<1x100xf32>
    %238 = tpu.matmul %235, %237, %cst_150 {dimension_numbers = #tpu.dot_dimension_numbers<[1], [0], [0], [1], [0, 0, 1, 1], [], []>} : vector<1x64xf32>, vector<64x100xf32>, vector<1x100xf32> -> vector<1x100xf32>
    %239 = vector.extract_strided_slice %64 {offsets = [162, 0], sizes = [1, 64], strides = [1, 1]} : vector<208x64xf32> to vector<1x64xf32>
    %c36 = arith.constant 36 : index
    %c0_151 = arith.constant 0 : index
    %c0_152 = arith.constant 0 : index
    %240 = vector.load %arg5[%c36, %c0_151, %c0_152] : memref<49x64x100xf32, #tpu.memory_space<vmem>>, vector<1x64x100xf32>
    %241 = vector.shape_cast %240 : vector<1x64x100xf32> to vector<64x100xf32>
    %cst_153 = arith.constant dense<0.000000e+00> : vector<1x100xf32>
    %242 = tpu.matmul %239, %241, %cst_153 {dimension_numbers = #tpu.dot_dimension_numbers<[1], [0], [0], [1], [0, 0, 1, 1], [], []>} : vector<1x64xf32>, vector<64x100xf32>, vector<1x100xf32> -> vector<1x100xf32>
    %243 = arith.addf %238, %242 : vector<1x100xf32>
    %244 = vector.extract_strided_slice %64 {offsets = [164, 0], sizes = [1, 64], strides = [1, 1]} : vector<208x64xf32> to vector<1x64xf32>
    %c37 = arith.constant 37 : index
    %c0_154 = arith.constant 0 : index
    %c0_155 = arith.constant 0 : index
    %245 = vector.load %arg5[%c37, %c0_154, %c0_155] : memref<49x64x100xf32, #tpu.memory_space<vmem>>, vector<1x64x100xf32>
    %246 = vector.shape_cast %245 : vector<1x64x100xf32> to vector<64x100xf32>
    %cst_156 = arith.constant dense<0.000000e+00> : vector<1x100xf32>
    %247 = tpu.matmul %244, %246, %cst_156 {dimension_numbers = #tpu.dot_dimension_numbers<[1], [0], [0], [1], [0, 0, 1, 1], [], []>} : vector<1x64xf32>, vector<64x100xf32>, vector<1x100xf32> -> vector<1x100xf32>
    %248 = arith.addf %243, %247 : vector<1x100xf32>
    %249 = vector.extract_strided_slice %64 {offsets = [166, 0], sizes = [1, 64], strides = [1, 1]} : vector<208x64xf32> to vector<1x64xf32>
    %c38 = arith.constant 38 : index
    %c0_157 = arith.constant 0 : index
    %c0_158 = arith.constant 0 : index
    %250 = vector.load %arg5[%c38, %c0_157, %c0_158] : memref<49x64x100xf32, #tpu.memory_space<vmem>>, vector<1x64x100xf32>
    %251 = vector.shape_cast %250 : vector<1x64x100xf32> to vector<64x100xf32>
    %cst_159 = arith.constant dense<0.000000e+00> : vector<1x100xf32>
    %252 = tpu.matmul %249, %251, %cst_159 {dimension_numbers = #tpu.dot_dimension_numbers<[1], [0], [0], [1], [0, 0, 1, 1], [], []>} : vector<1x64xf32>, vector<64x100xf32>, vector<1x100xf32> -> vector<1x100xf32>
    %253 = arith.addf %248, %252 : vector<1x100xf32>
    %254 = vector.extract_strided_slice %64 {offsets = [168, 0], sizes = [1, 64], strides = [1, 1]} : vector<208x64xf32> to vector<1x64xf32>
    %c39 = arith.constant 39 : index
    %c0_160 = arith.constant 0 : index
    %c0_161 = arith.constant 0 : index
    %255 = vector.load %arg5[%c39, %c0_160, %c0_161] : memref<49x64x100xf32, #tpu.memory_space<vmem>>, vector<1x64x100xf32>
    %256 = vector.shape_cast %255 : vector<1x64x100xf32> to vector<64x100xf32>
    %cst_162 = arith.constant dense<0.000000e+00> : vector<1x100xf32>
    %257 = tpu.matmul %254, %256, %cst_162 {dimension_numbers = #tpu.dot_dimension_numbers<[1], [0], [0], [1], [0, 0, 1, 1], [], []>} : vector<1x64xf32>, vector<64x100xf32>, vector<1x100xf32> -> vector<1x100xf32>
    %258 = arith.addf %253, %257 : vector<1x100xf32>
    %259 = vector.extract_strided_slice %64 {offsets = [170, 0], sizes = [1, 64], strides = [1, 1]} : vector<208x64xf32> to vector<1x64xf32>
    %c40 = arith.constant 40 : index
    %c0_163 = arith.constant 0 : index
    %c0_164 = arith.constant 0 : index
    %260 = vector.load %arg5[%c40, %c0_163, %c0_164] : memref<49x64x100xf32, #tpu.memory_space<vmem>>, vector<1x64x100xf32>
    %261 = vector.shape_cast %260 : vector<1x64x100xf32> to vector<64x100xf32>
    %cst_165 = arith.constant dense<0.000000e+00> : vector<1x100xf32>
    %262 = tpu.matmul %259, %261, %cst_165 {dimension_numbers = #tpu.dot_dimension_numbers<[1], [0], [0], [1], [0, 0, 1, 1], [], []>} : vector<1x64xf32>, vector<64x100xf32>, vector<1x100xf32> -> vector<1x100xf32>
    %263 = arith.addf %258, %262 : vector<1x100xf32>
    %264 = vector.extract_strided_slice %64 {offsets = [172, 0], sizes = [1, 64], strides = [1, 1]} : vector<208x64xf32> to vector<1x64xf32>
    %c41 = arith.constant 41 : index
    %c0_166 = arith.constant 0 : index
    %c0_167 = arith.constant 0 : index
    %265 = vector.load %arg5[%c41, %c0_166, %c0_167] : memref<49x64x100xf32, #tpu.memory_space<vmem>>, vector<1x64x100xf32>
    %266 = vector.shape_cast %265 : vector<1x64x100xf32> to vector<64x100xf32>
    %cst_168 = arith.constant dense<0.000000e+00> : vector<1x100xf32>
    %267 = tpu.matmul %264, %266, %cst_168 {dimension_numbers = #tpu.dot_dimension_numbers<[1], [0], [0], [1], [0, 0, 1, 1], [], []>} : vector<1x64xf32>, vector<64x100xf32>, vector<1x100xf32> -> vector<1x100xf32>
    %268 = arith.addf %263, %267 : vector<1x100xf32>
    %269 = vector.extract_strided_slice %64 {offsets = [192, 0], sizes = [1, 64], strides = [1, 1]} : vector<208x64xf32> to vector<1x64xf32>
    %c42 = arith.constant 42 : index
    %c0_169 = arith.constant 0 : index
    %c0_170 = arith.constant 0 : index
    %270 = vector.load %arg5[%c42, %c0_169, %c0_170] : memref<49x64x100xf32, #tpu.memory_space<vmem>>, vector<1x64x100xf32>
    %271 = vector.shape_cast %270 : vector<1x64x100xf32> to vector<64x100xf32>
    %cst_171 = arith.constant dense<0.000000e+00> : vector<1x100xf32>
    %272 = tpu.matmul %269, %271, %cst_171 {dimension_numbers = #tpu.dot_dimension_numbers<[1], [0], [0], [1], [0, 0, 1, 1], [], []>} : vector<1x64xf32>, vector<64x100xf32>, vector<1x100xf32> -> vector<1x100xf32>
    %273 = vector.extract_strided_slice %64 {offsets = [194, 0], sizes = [1, 64], strides = [1, 1]} : vector<208x64xf32> to vector<1x64xf32>
    %c43 = arith.constant 43 : index
    %c0_172 = arith.constant 0 : index
    %c0_173 = arith.constant 0 : index
    %274 = vector.load %arg5[%c43, %c0_172, %c0_173] : memref<49x64x100xf32, #tpu.memory_space<vmem>>, vector<1x64x100xf32>
    %275 = vector.shape_cast %274 : vector<1x64x100xf32> to vector<64x100xf32>
    %cst_174 = arith.constant dense<0.000000e+00> : vector<1x100xf32>
    %276 = tpu.matmul %273, %275, %cst_174 {dimension_numbers = #tpu.dot_dimension_numbers<[1], [0], [0], [1], [0, 0, 1, 1], [], []>} : vector<1x64xf32>, vector<64x100xf32>, vector<1x100xf32> -> vector<1x100xf32>
    %277 = arith.addf %272, %276 : vector<1x100xf32>
    %278 = vector.extract_strided_slice %64 {offsets = [196, 0], sizes = [1, 64], strides = [1, 1]} : vector<208x64xf32> to vector<1x64xf32>
    %c44 = arith.constant 44 : index
    %c0_175 = arith.constant 0 : index
    %c0_176 = arith.constant 0 : index
    %279 = vector.load %arg5[%c44, %c0_175, %c0_176] : memref<49x64x100xf32, #tpu.memory_space<vmem>>, vector<1x64x100xf32>
    %280 = vector.shape_cast %279 : vector<1x64x100xf32> to vector<64x100xf32>
    %cst_177 = arith.constant dense<0.000000e+00> : vector<1x100xf32>
    %281 = tpu.matmul %278, %280, %cst_177 {dimension_numbers = #tpu.dot_dimension_numbers<[1], [0], [0], [1], [0, 0, 1, 1], [], []>} : vector<1x64xf32>, vector<64x100xf32>, vector<1x100xf32> -> vector<1x100xf32>
    %282 = arith.addf %277, %281 : vector<1x100xf32>
    %283 = vector.extract_strided_slice %64 {offsets = [198, 0], sizes = [1, 64], strides = [1, 1]} : vector<208x64xf32> to vector<1x64xf32>
    %c45 = arith.constant 45 : index
    %c0_178 = arith.constant 0 : index
    %c0_179 = arith.constant 0 : index
    %284 = vector.load %arg5[%c45, %c0_178, %c0_179] : memref<49x64x100xf32, #tpu.memory_space<vmem>>, vector<1x64x100xf32>
    %285 = vector.shape_cast %284 : vector<1x64x100xf32> to vector<64x100xf32>
    %cst_180 = arith.constant dense<0.000000e+00> : vector<1x100xf32>
    %286 = tpu.matmul %283, %285, %cst_180 {dimension_numbers = #tpu.dot_dimension_numbers<[1], [0], [0], [1], [0, 0, 1, 1], [], []>} : vector<1x64xf32>, vector<64x100xf32>, vector<1x100xf32> -> vector<1x100xf32>
    %287 = arith.addf %282, %286 : vector<1x100xf32>
    %288 = vector.extract_strided_slice %64 {offsets = [200, 0], sizes = [1, 64], strides = [1, 1]} : vector<208x64xf32> to vector<1x64xf32>
    %c46 = arith.constant 46 : index
    %c0_181 = arith.constant 0 : index
    %c0_182 = arith.constant 0 : index
    %289 = vector.load %arg5[%c46, %c0_181, %c0_182] : memref<49x64x100xf32, #tpu.memory_space<vmem>>, vector<1x64x100xf32>
    %290 = vector.shape_cast %289 : vector<1x64x100xf32> to vector<64x100xf32>
    %cst_183 = arith.constant dense<0.000000e+00> : vector<1x100xf32>
    %291 = tpu.matmul %288, %290, %cst_183 {dimension_numbers = #tpu.dot_dimension_numbers<[1], [0], [0], [1], [0, 0, 1, 1], [], []>} : vector<1x64xf32>, vector<64x100xf32>, vector<1x100xf32> -> vector<1x100xf32>
    %292 = arith.addf %287, %291 : vector<1x100xf32>
    %293 = vector.extract_strided_slice %64 {offsets = [202, 0], sizes = [1, 64], strides = [1, 1]} : vector<208x64xf32> to vector<1x64xf32>
    %c47 = arith.constant 47 : index
    %c0_184 = arith.constant 0 : index
    %c0_185 = arith.constant 0 : index
    %294 = vector.load %arg5[%c47, %c0_184, %c0_185] : memref<49x64x100xf32, #tpu.memory_space<vmem>>, vector<1x64x100xf32>
    %295 = vector.shape_cast %294 : vector<1x64x100xf32> to vector<64x100xf32>
    %cst_186 = arith.constant dense<0.000000e+00> : vector<1x100xf32>
    %296 = tpu.matmul %293, %295, %cst_186 {dimension_numbers = #tpu.dot_dimension_numbers<[1], [0], [0], [1], [0, 0, 1, 1], [], []>} : vector<1x64xf32>, vector<64x100xf32>, vector<1x100xf32> -> vector<1x100xf32>
    %297 = arith.addf %292, %296 : vector<1x100xf32>
    %298 = vector.extract_strided_slice %64 {offsets = [204, 0], sizes = [1, 64], strides = [1, 1]} : vector<208x64xf32> to vector<1x64xf32>
    %c48 = arith.constant 48 : index
    %c0_187 = arith.constant 0 : index
    %c0_188 = arith.constant 0 : index
    %299 = vector.load %arg5[%c48, %c0_187, %c0_188] : memref<49x64x100xf32, #tpu.memory_space<vmem>>, vector<1x64x100xf32>
    %300 = vector.shape_cast %299 : vector<1x64x100xf32> to vector<64x100xf32>
    %cst_189 = arith.constant dense<0.000000e+00> : vector<1x100xf32>
    %301 = tpu.matmul %298, %300, %cst_189 {dimension_numbers = #tpu.dot_dimension_numbers<[1], [0], [0], [1], [0, 0, 1, 1], [], []>} : vector<1x64xf32>, vector<64x100xf32>, vector<1x100xf32> -> vector<1x100xf32>
    %302 = arith.addf %297, %301 : vector<1x100xf32>
    %c0_190 = arith.constant 0 : index
    %c0_191 = arith.constant 0 : index
    %303 = vector.load %arg6[%c0_190, %c0_191] : memref<1x100xf32, #tpu.memory_space<vmem>>, vector<1x100xf32>
    %304 = arith.addf %98, %132 : vector<1x100xf32>
    %305 = arith.addf %166, %200 : vector<1x100xf32>
    %306 = arith.addf %304, %305 : vector<1x100xf32>
    %307 = arith.addf %234, %268 : vector<1x100xf32>
    %308 = arith.addf %307, %302 : vector<1x100xf32>
    %309 = arith.addf %306, %308 : vector<1x100xf32>
    %310 = arith.addf %303, %309 : vector<1x100xf32>
    %c0_192 = arith.constant 0 : index
    %c0_193 = arith.constant 0 : index
    %311 = vector.load %arg7[%c0_192, %c0_193] : memref<100x10xf32, #tpu.memory_space<vmem>>, vector<100x10xf32>
    %cst_194 = arith.constant dense<0.000000e+00> : vector<1x10xf32>
    %312 = tpu.matmul %310, %311, %cst_194 {dimension_numbers = #tpu.dot_dimension_numbers<[1], [0], [0], [1], [0, 0, 1, 1], [], []>} : vector<1x100xf32>, vector<100x10xf32>, vector<1x10xf32> -> vector<1x10xf32>
    %c0_195 = arith.constant 0 : index
    %c0_196 = arith.constant 0 : index
    %313 = vector.load %arg8[%c0_195, %c0_196] : memref<1x10xf32, #tpu.memory_space<vmem>>, vector<1x10xf32>
    %314 = arith.addf %312, %313 : vector<1x10xf32>
    %c0_197 = arith.constant 0 : index
    %c0_198 = arith.constant 0 : index
    %c0_199 = arith.constant 0 : index
    %315 = vector.load %arg9[%c0_197, %c0_198, %c0_199] : memref<1x1x10xf32, #tpu.memory_space<vmem>>, vector<1x1x10xf32>
    %316 = vector.shape_cast %315 : vector<1x1x10xf32> to vector<1x10xf32>
    %317 = vector.shape_cast %314 : vector<1x10xf32> to vector<1x1x10xf32>
    tpu.vector_store %arg9[%c0_197, %c0_198, %c0_199], %317 {strides = array<i32>} : memref<1x1x10xf32, #tpu.memory_space<vmem>>, vector<1x1x10xf32>,
    return
  }
  func.func @transform_0(%arg0: i32) -> (i32, i32, i32) {
    %c0_i32 = arith.constant 0 : i32
    %c0_i32_0 = arith.constant 0 : i32
    %c0_i32_1 = arith.constant 0 : i32
    return %arg0, %c0_i32, %c0_i32_0 : i32, i32, i32
  }
  func.func @transform_1(%arg0: i32) -> (i32, i32) {
    %c0_i32 = arith.constant 0 : i32
    %c0_i32_0 = arith.constant 0 : i32
    %c0_i32_1 = arith.constant 0 : i32
    return %c0_i32, %c0_i32_0 : i32, i32
  }
  func.func @transform_2(%arg0: i32) -> (i32, i32, i32) {
    %c0_i32 = arith.constant 0 : i32
    %c0_i32_0 = arith.constant 0 : i32
    %c0_i32_1 = arith.constant 0 : i32
    %c0_i32_2 = arith.constant 0 : i32
    return %c0_i32, %c0_i32_0, %c0_i32_1 : i32, i32, i32
  }
  func.func @transform_3(%arg0: i32) -> (i32, i32) {
    %c0_i32 = arith.constant 0 : i32
    %c0_i32_0 = arith.constant 0 : i32
    %c0_i32_1 = arith.constant 0 : i32
    return %c0_i32, %c0_i32_0 : i32, i32
  }
  func.func @transform_4(%arg0: i32) -> (i32, i32, i32) {
    %c0_i32 = arith.constant 0 : i32
    %c0_i32_0 = arith.constant 0 : i32
    %c0_i32_1 = arith.constant 0 : i32
    %c0_i32_2 = arith.constant 0 : i32
    return %c0_i32, %c0_i32_0, %c0_i32_1 : i32, i32, i32
  }
  func.func @transform_5(%arg0: i32) -> (i32, i32) {
    %c0_i32 = arith.constant 0 : i32
    %c0_i32_0 = arith.constant 0 : i32
    %c0_i32_1 = arith.constant 0 : i32
    return %c0_i32, %c0_i32_0 : i32, i32
  }
  func.func @transform_6(%arg0: i32) -> (i32, i32) {
    %c0_i32 = arith.constant 0 : i32
    %c0_i32_0 = arith.constant 0 : i32
    %c0_i32_1 = arith.constant 0 : i32
    return %c0_i32, %c0_i32_0 : i32, i32
  }
  func.func @transform_7(%arg0: i32) -> (i32, i32) {
    %c0_i32 = arith.constant 0 : i32
    %c0_i32_0 = arith.constant 0 : i32
    %c0_i32_1 = arith.constant 0 : i32
    return %c0_i32, %c0_i32_0 : i32, i32
  }
  func.func @transform_8(%arg0: i32) -> (i32, i32, i32) {
    %c0_i32 = arith.constant 0 : i32
    %c0_i32_0 = arith.constant 0 : i32
    %c0_i32_1 = arith.constant 0 : i32
    return %arg0, %c0_i32, %c0_i32_0 : i32, i32, i32
  }
}

</mosaic_0001>

<bundles_post_ra>
// kernel: net_forward.1
= control target key start
LH: loop header
LB: loop body
LE: loop exit
PB: predicated region body
PF: predicated region fallthrough
CT: control target
= control target key end

     0   :  { %13 = vsyncpa [#allocation3], 0  ;;  %s17407_s0 = inlined_call_operand.vmem [shape: f32[2,1088,10], index: 0, kind: input, shape index: {}]   ;;  %s17408_s1 = inlined_call_operand.vmem [shape: f32[10,32], index: 1, kind: input, shape index: {}]   ;;  %s17409_s2 = inlined_call_operand.vmem [shape: f32[9,32,64], index: 2, kind: input, shape index: {}]   ;;  %s17410_s3 = inlined_call_operand.vmem [shape: f32[1,64], index: 3, kind: input, shape index: {}]   ;;  %s17411_s4 = inlined_call_operand.vmem [shape: f32[49,64,100], index: 4, kind: input, shape index: {}]   ;;  %s17412_s5 = inlined_call_operand.vmem [shape: f32[1,100], index: 5, kind: input, shape index: {}]   ;;  %s17413_s6 = inlined_call_operand.vmem [shape: f32[100,10], index: 6, kind: input, shape index: {}]   ;;  %s17414_s7 = inlined_call_operand.vmem [shape: f32[1,10], index: 7, kind: input, shape index: {}]   ;;  %s17415_s8 = inlined_call_operand.hbm [shape: f32[2,1,10], index: 8, kind: output, shape index: {}]  }
   0x1   :  { %15 = vsyncpa [#allocation3 + $0x1], 0  ;;  %s12508_s27 = smov 0   ;;  %s12510_s28 = smov 0  }
   0x2   :  { %s12512_s29 = smov 0   ;;  %s12514_s30 = smov 0  }
   0x3 LB: > { %s12529_s9 = sadd.s32 4294967295, %s12458_s30   ;;  %s8564_s10 = sadd.s32 4294967294, %s12458_s30   ;;  %s12458_s30 = sphi %s12514_s30, %s17947_s30   ;;  %s12454_s29 = sphi %s12512_s29, %s17946_s29   ;;  %s12450_s28 = sphi %s12510_s28, %s17945_s28   ;;  %s12446_s27 = sphi %s12508_s27, %s17944_s27  }
   0x4   : > { %s12533_s11 = sadd.s32 1, %s12458_s30   ;;  %s201_s12 = sadd.s32 1, %s12454_s29 }
   0x5   : > { %s198_s13 = ssub.s32 %s12458_s30, %s12533_s11  ;;  %p211_p0 = scmp.ne.s32.totalorder %s12454_s29, %s12450_s28 }
   0x6   : > { %p199_p1 = scmp.eq.s32.totalorder %s198_s13, 0  ;;  %p212_p2 = scmp.eq.s32.totalorder %s12529_s9, 1 }
   0x7   : > { %p217_p3 = scmp.ne.s32.totalorder %s12450_s28, %s12446_s27  ;;  %p218_p4 = scmp.eq.s32.totalorder %s8564_s10, 1 }
   0x8   : > { %s12544_s14 = scalar_select %p199_p1, %s12454_s29, %s201_s12  }
   0x9   : > { %p12546_p5 = por %p212_p2, %p211_p0  ;;  %p12550_p6 = por %p218_p4, %p217_p3 }
   0xa   : > { %p8567_p7 = scmp.ge.s32.totalorder %s12458_s30, 1  ;;  %p265_p8 = scmp.lt.s32.totalorder %s12458_s30, 3 }
   0xc   : > { %p266_p9 = pnand %p8567_p7, %p265_p8 }
   0xe   : > { %269 = sbr.rel (%p266_p9) target bundleno = 2103 (0x837), region = 52 }
  0x13   : > { %v440_v0 = vld [vmem:[%s17408_s1 + $0x8] sm:$0x3]  ;;  %vm850_vm0 = vcmask 1041408   ;;  %v439_v1 = vld [vmem:[%s17408_s1] sm:$0xff]  ;;  %p298_p10 = scmp.lt.s32.totalorder %s12529_s9, 1  ;;  %vm441_vm1 = vcmask 80896  }
  0x14   : > { %10328 = vmatprep.subr.msk.mxu0 %vm850_vm0, %v440_v0  ;;  %12351 = vmatprep.subr.msk.mxu1 %vm850_vm0, %v440_v0  ;;  %vm12461_vm2 = vmmov 0   ;;  %vm2342_vm3 = vcmask 1045504   ;;  %vm1800_vm4 = vcmask 261120   ;;  %vm1740_vm5 = vcmask 1046528   ;;  %s296_s17 = sand.u32 1, %s12450_s28   ;;  %s9435_s20 = sshll.u32 %s12529_s9, 4 }
  0x15   : > { %10329 = vmatpush3.msk.msra.mxu0 %vm850_vm0, %v440_v0  ;;  %s299_s21 = scalar_select %p298_p10, %s12529_s9, 1  ;;  %12353 = vmatpush3.msk.msra.mxu1 %vm850_vm0, %v440_v0  ;;  %vm4360_vm6 = vcmask 523264   ;;  %vm8420_vm7 = vcmask 1043456   ;;  %vm8416_vm8 = vcmask 818176   ;;  %vm8494_vm9 = vcmask 73728  }
  0x16   : > { %10330 = vmatprep.subr.mxu0 %v439_v1  ;;  %12352 = vmatprep.subr.mxu1 %v439_v1  ;;  %s8497_s26 = scalar_lea.sflag [#allocation3], %s296_s17  ;;  %s12462_s9 = smov [#allocation2]  }
  0x17   : > { %10331 = vmatpush3.msra.mxu0 %v439_v1  ;;  %s12355_s22 = smul.u32 1088, %s299_s21  ;;  %12354 = vmatpush3.msra.mxu1 %v439_v1  ;;  %s297_s21 = scalar_lea.vmem [#allocation2], %s296_s17 }
  0x18   : > { %s12402_s12 = sshll.u32 %s12462_s9, 4  ;;  %s12403_s12 = int_to_ptr.vmem [resolvable:$false] %s12402_s12 }
  0x19   : > { %s12567_s25 = scalar_lea.vmem %s17407_s0, %s12355_s22  ;;  %s8509_s22 = sshll.u32 %s297_s21, 4  ;;  %s8510_s22 = int_to_ptr.vmem [resolvable:$true] %s8509_s22 }
  0x1a   : > { %v303_v2 = vld [vmem:[%s12567_s25] sm:$0xff]  ;;  %v304_v3 = vld [vmem:[%s12567_s25 + $0x8] sm:$0xff]  ;;  %v305_v4 = vld [vmem:[%s12567_s25 + $0x10] sm:$0xff]  ;;  %s12398_s10 = scalar_lea.vmem %s8510_s22, 16  ;;  %s12404_s13 = scalar_lea.vmem %s12403_s12, 32 }
  0x1b   : > { %10332 = vmatprep.mubr.msk.f32.mxu0 %vm441_vm1, %v303_v2  ;;  %v306_v5 = vld [vmem:[%s12567_s25 + $0x18] sm:$0xff]  ;;  %v307_v6 = vld [vmem:[%s12567_s25 + $0x20] sm:$0xff]  ;;  %v308_v7 = vld [vmem:[%s12567_s25 + $0x28] sm:$0xff]  ;;  %p12399_p11 = scmp.ne.s32.totalorder %s8510_s22, %s12398_s10  ;;  %p12405_p0 = scmp.lt.s32.totalorder %s8510_s22, %s12403_s12 }
  0x1c   : > { %10333 = vmatmul.mubr.msk.f32.vlgmr.msra.gmra.mxu0 %vm441_vm1, %v304_v3  ;;  %v309_v8 = vld [vmem:[%s12567_s25 + $0x30] sm:$0xff]  ;;  %v310_v9 = vld [vmem:[%s12567_s25 + $0x38] sm:$0xff]  ;;  %v311_v10 = vld [vmem:[%s12567_s25 + $0x40] sm:$0xff]  ;;  %p12406_p1 = scmp.lt.s32.totalorder %s12404_s13, %s12398_s10 }
  0x1d   : > { %10335 = vmatprep.mubr.msk.f32.mxu0 %vm441_vm1, %v305_v4  ;;  %v312_v11 = vld [vmem:[%s12567_s25 + $0x48] sm:$0xff]  ;;  %v313_v12 = vld [vmem:[%s12567_s25 + $0x50] sm:$0xff]  ;;  %v314_v13 = vld [vmem:[%s12567_s25 + $0x58] sm:$0xff]  ;;  %p12400_p12 = pnand %p12399_p11, %p12546_p5 }
  0x1e   : > { %v315_v14 = vld [vmem:[%s12567_s25 + $0x60] sm:$0xff]  ;;  %v316_v15 = vld [vmem:[%s12567_s25 + $0x68] sm:$0xff]  ;;  %v317_v16 = vld [vmem:[%s12567_s25 + $0x70] sm:$0xff]  ;;  %p12407_p2 = por %p12406_p1, %p12405_p0 }
  0x1f   : > { %v318_v17 = vld [vmem:[%s12567_s25 + $0x78] sm:$0xff]  ;;  %v319_v18 = vld [vmem:[%s12567_s25 + $0x80] sm:$0xff]  ;;  %v320_v19 = vld [vmem:[%s12567_s25 + $0x88] sm:$0xff]  ;;  %p12401_p13 = pneg %p12400_p12 }
  0x20   : > { %10336 = vmatmul.mubr.msk.f32.gmra.mxu0 %vm441_vm1, %v306_v5  ;;  %v321_v20 = vld [vmem:[%s12567_s25 + $0x90] sm:$0xff]  ;;  %v322_v21 = vld [vmem:[%s12567_s25 + $0x98] sm:$0xff]  ;;  %v323_v22 = vld [vmem:[%s12567_s25 + $0xa0] sm:$0xff] }
  0x21   : > { %10338 = vmatprep.mubr.msk.f32.mxu0 %vm441_vm1, %v307_v6  ;;  %v324_v23 = vld [vmem:[%s12567_s25 + $0xa8] sm:$0xff]  ;;  %v325_v24 = vld [vmem:[%s12567_s25 + $0xb0] sm:$0xff]  ;;  %v326_v25 = vld [vmem:[%s12567_s25 + $0xb8] sm:$0xff]  ;;  %p12408_p3 = pnand %p12407_p2, %p12401_p13 }
  0x22   : > { %v327_v26 = vld [vmem:[%s12567_s25 + $0xc0] sm:$0xff]  ;;  %v328_v27 = vld [vmem:[%s12567_s25 + $0xc8] sm:$0xff]  ;;  %v329_v28 = vld [vmem:[%s12567_s25 + $0xd0] sm:$0xff] }
  0x23   : > { %v330_v29 = vld [vmem:[%s12567_s25 + $0xd8] sm:$0xff]  ;;  %v331_v30 = vld [vmem:[%s12567_s25 + $0xe0] sm:$0xff]  ;;  %v332_v31 = vld [vmem:[%s12567_s25 + $0xe8] sm:$0xff] }
  0x24   : > { %10339 = vmatmul.mubr.msk.f32.gmra.mxu0 %vm441_vm1, %v308_v7  ;;  %v333_v32 = vld [vmem:[%s12567_s25 + $0xf0] sm:$0xff]  ;;  %v334_v33 = vld [vmem:[%s12567_s25 + $0xf8] sm:$0xff]  ;;  %v335_v34 = vld [vmem:[%s12567_s25 + $0x100] sm:$0xff] }
  0x25   : > { %10341 = vmatprep.mubr.msk.f32.mxu0 %vm441_vm1, %v309_v8  ;;  %v336_v35 = vld [vmem:[%s12567_s25 + $0x108] sm:$0xff]  ;;  %v433_v36 = vld [vmem:[%s12567_s25 + $0x410] sm:$0xff]  ;;  %v434_v38 = vld [vmem:[%s12567_s25 + $0x418] sm:$0xff] }
  0x26   : > { %v337_v37 = vld [vmem:[%s12567_s25 + $0x110] sm:$0xff]  ;;  %10527 = vmatprep.mubr.msk.f32.mxu1 %vm441_vm1, %v433_v36  ;;  %v338_v39 = vld [vmem:[%s12567_s25 + $0x118] sm:$0xff]  ;;  %v339_v40 = vld [vmem:[%s12567_s25 + $0x120] sm:$0xff] }
  0x27   : > { %10528 = vmatmul.mubr.msk.f32.vlgmr.msra.gmra.mxu1 %vm441_vm1, %v434_v38  ;;  %v435_v41 = vld [vmem:[%s12567_s25 + $0x420] sm:$0xff]  ;;  %v436_v42 = vld [vmem:[%s12567_s25 + $0x428] sm:$0xff]  ;;  %v341_v44 = vld [vmem:[%s12567_s25 + $0x130] sm:$0xff] }
  0x28   : > { %10342 = vmatmul.mubr.msk.f32.gmra.mxu0 %vm441_vm1, %v310_v9  ;;  %10530 = vmatprep.mubr.msk.f32.mxu1 %vm441_vm1, %v435_v41  ;;  %v340_v43 = vld [vmem:[%s12567_s25 + $0x128] sm:$0xff]  ;;  %v437_v45 = vld [vmem:[%s12567_s25 + $0x430] sm:$0xff]  ;;  %v438_v46 = vld [vmem:[%s12567_s25 + $0x438] sm:$0xff] }
  0x29   : > { %10344 = vmatprep.mubr.msk.f32.mxu0 %vm441_vm1, %v311_v10  ;;  %v342_v47 = vld [vmem:[%s12567_s25 + $0x138] sm:$0xff]  ;;  %v343_v48 = vld [vmem:[%s12567_s25 + $0x140] sm:$0xff]  ;;  %v344_v49 = vld [vmem:[%s12567_s25 + $0x148] sm:$0xff] }
  0x2a   : > { %v345_v50 = vld [vmem:[%s12567_s25 + $0x150] sm:$0xff]  ;;  %v346_v51 = vld [vmem:[%s12567_s25 + $0x158] sm:$0xff]  ;;  %v347_v52 = vld [vmem:[%s12567_s25 + $0x160] sm:$0xff] }
  0x2b   : > { %10531 = vmatmul.mubr.msk.f32.gmra.mxu1 %vm441_vm1, %v436_v42  ;;  %v348_v53 = vld [vmem:[%s12567_s25 + $0x168] sm:$0xff]  ;;  %v349_v54 = vld [vmem:[%s12567_s25 + $0x170] sm:$0xff]  ;;  %v350_v55 = vld [vmem:[%s12567_s25 + $0x178] sm:$0xff] }
  0x2c   : > { %10345 = vmatmul.mubr.msk.f32.gmra.mxu0 %vm441_vm1, %v312_v11  ;;  %10533 = vmatprep.mubr.msk.f32.mxu1 %vm441_vm1, %v437_v45  ;;  %v351_v56 = vld [vmem:[%s12567_s25 + $0x180] sm:$0xff]  ;;  %v352_v57 = vld [vmem:[%s12567_s25 + $0x188] sm:$0xff]  ;;  %v353_v58 = vld [vmem:[%s12567_s25 + $0x190] sm:$0xff] }
  0x2d   : > { %10347 = vmatprep.mubr.msk.f32.mxu0 %vm441_vm1, %v313_v12  ;;  %v354_v59 = vld [vmem:[%s12567_s25 + $0x198] sm:$0xff]  ;;  %v355_v60 = vld [vmem:[%s12567_s25 + $0x1a0] sm:$0xff]  ;;  %v356_v61 = vld [vmem:[%s12567_s25 + $0x1a8] sm:$0xff] }
  0x2e   : > { %v357_v62 = vld [vmem:[%s12567_s25 + $0x1b0] sm:$0xff]  ;;  %v358_v63 = vld [vmem:[%s12567_s25 + $0x1b8] sm:$0xff]  ;;  %v359_v0 = vld [vmem:[%s12567_s25 + $0x1c0] sm:$0xff] }
  0x2f   : > { %10534 = vmatmul.mubr.msk.f32.gmra.mxu1 %vm441_vm1, %v438_v46  ;;  %v360_v1 = vld [vmem:[%s12567_s25 + $0x1c8] sm:$0xff]  ;;  %v361_v2 = vld [vmem:[%s12567_s25 + $0x1d0] sm:$0xff]  ;;  %v362_v3 = vld [vmem:[%s12567_s25 + $0x1d8] sm:$0xff] }
  0x30   : > { %10348 = vmatmul.mubr.msk.f32.gmra.mxu0 %vm441_vm1, %v314_v13  ;;  %v363_v4 = vld [vmem:[%s12567_s25 + $0x1e0] sm:$0xff]  ;;  %v364_v5 = vld [vmem:[%s12567_s25 + $0x1e8] sm:$0xff]  ;;  %v365_v6 = vld [vmem:[%s12567_s25 + $0x1f0] sm:$0xff] }
  0x31   : > { %10350 = vmatprep.mubr.msk.f32.mxu0 %vm441_vm1, %v315_v14  ;;  %v366_v7 = vld [vmem:[%s12567_s25 + $0x1f8] sm:$0xff]  ;;  %v367_v8 = vld [vmem:[%s12567_s25 + $0x200] sm:$0xff]  ;;  %v368_v9 = vld [vmem:[%s12567_s25 + $0x208] sm:$0xff] }
  0x32   : > { %v369_v10 = vld [vmem:[%s12567_s25 + $0x210] sm:$0xff]  ;;  %v370_v11 = vld [vmem:[%s12567_s25 + $0x218] sm:$0xff]  ;;  %v371_v12 = vld [vmem:[%s12567_s25 + $0x220] sm:$0xff] }
  0x33   : > { %v372_v13 = vld [vmem:[%s12567_s25 + $0x228] sm:$0xff]  ;;  %v373_v14 = vld [vmem:[%s12567_s25 + $0x230] sm:$0xff]  ;;  %v395_v36 = vld [vmem:[%s12567_s25 + $0x2e0] sm:$0xff] }
  0x34   : > { %10351 = vmatmul.mubr.msk.f32.gmra.mxu0 %vm441_vm1, %v316_v15  ;;  %v374_v15 = vld [vmem:[%s12567_s25 + $0x238] sm:$0xff]  ;;  %v397_v38 = vld [vmem:[%s12567_s25 + $0x2f0] sm:$0xff]  ;;  %v400_v41 = vld [vmem:[%s12567_s25 + $0x308] sm:$0xff] }
  0x35   : > { %10353 = vmatprep.mubr.msk.f32.mxu0 %vm441_vm1, %v317_v16  ;;  %v375_v16 = vld [vmem:[%s12567_s25 + $0x240] sm:$0xff]  ;;  %v401_v42 = vld [vmem:[%s12567_s25 + $0x310] sm:$0xff] }
  0x36   : > { %v403_v46 = vld [vmem:[%s12567_s25 + $0x320] sm:$0xff] }
  0x38   : > { %10354 = vmatmul.mubr.msk.f32.gmra.mxu0 %vm441_vm1, %v318_v17  ;;  %v376_v17 = vld [vmem:[%s12567_s25 + $0x248] sm:$0xff] }
  0x39   : > { %10356 = vmatprep.mubr.msk.f32.mxu0 %vm441_vm1, %v319_v18  ;;  %v377_v18 = vld [vmem:[%s12567_s25 + $0x250] sm:$0xff] }
  0x3c   : > { %10357 = vmatmul.mubr.msk.f32.gmra.mxu0 %vm441_vm1, %v320_v19  ;;  %v378_v19 = vld [vmem:[%s12567_s25 + $0x258] sm:$0xff] }
  0x3d   : > { %10359 = vmatprep.mubr.msk.f32.mxu0 %vm441_vm1, %v321_v20  ;;  %v379_v20 = vld [vmem:[%s12567_s25 + $0x260] sm:$0xff] }
  0x40   : > { %10360 = vmatmul.mubr.msk.f32.gmra.mxu0 %vm441_vm1, %v322_v21  ;;  %v380_v21 = vld [vmem:[%s12567_s25 + $0x268] sm:$0xff] }
  0x41   : > { %10362 = vmatprep.mubr.msk.f32.mxu0 %vm441_vm1, %v323_v22  ;;  %v381_v22 = vld [vmem:[%s12567_s25 + $0x270] sm:$0xff] }
  0x44   : > { %10363 = vmatmul.mubr.msk.f32.gmra.mxu0 %vm441_vm1, %v324_v23  ;;  %v382_v23 = vld [vmem:[%s12567_s25 + $0x278] sm:$0xff] }
  0x45   : > { %10365 = vmatprep.mubr.msk.f32.mxu0 %vm441_vm1, %v325_v24  ;;  %v383_v24 = vld [vmem:[%s12567_s25 + $0x280] sm:$0xff] }
  0x48   : > { %10366 = vmatmul.mubr.msk.f32.gmra.mxu0 %vm441_vm1, %v326_v25  ;;  %v384_v25 = vld [vmem:[%s12567_s25 + $0x288] sm:$0xff] }
  0x49   : > { %10368 = vmatprep.mubr.msk.f32.mxu0 %vm441_vm1, %v327_v26  ;;  %v385_v26 = vld [vmem:[%s12567_s25 + $0x290] sm:$0xff] }
  0x4c   : > { %10369 = vmatmul.mubr.msk.f32.gmra.mxu0 %vm441_vm1, %v328_v27  ;;  %v386_v27 = vld [vmem:[%s12567_s25 + $0x298] sm:$0xff] }
  0x4d   : > { %10371 = vmatprep.mubr.msk.f32.mxu0 %vm441_vm1, %v329_v28  ;;  %v387_v28 = vld [vmem:[%s12567_s25 + $0x2a0] sm:$0xff] }
  0x50   : > { %10372 = vmatmul.mubr.msk.f32.gmra.mxu0 %vm441_vm1, %v330_v29  ;;  %v388_v29 = vld [vmem:[%s12567_s25 + $0x2a8] sm:$0xff] }
  0x51   : > { %10374 = vmatprep.mubr.msk.f32.mxu0 %vm441_vm1, %v331_v30  ;;  %v389_v30 = vld [vmem:[%s12567_s25 + $0x2b0] sm:$0xff] }
  0x54   : > { %10375 = vmatmul.mubr.msk.f32.gmra.mxu0 %vm441_vm1, %v332_v31  ;;  %v390_v31 = vld [vmem:[%s12567_s25 + $0x2b8] sm:$0xff] }
  0x55   : > { %10377 = vmatprep.mubr.msk.f32.mxu0 %vm441_vm1, %v333_v32  ;;  %v391_v32 = vld [vmem:[%s12567_s25 + $0x2c0] sm:$0xff] }
  0x58   : > { %10378 = vmatmul.mubr.msk.f32.gmra.mxu0 %vm441_vm1, %v334_v33  ;;  %v392_v33 = vld [vmem:[%s12567_s25 + $0x2c8] sm:$0xff] }
  0x59   : > { %10380 = vmatprep.mubr.msk.f32.mxu0 %vm441_vm1, %v335_v34  ;;  %v393_v34 = vld [vmem:[%s12567_s25 + $0x2d0] sm:$0xff] }
  0x5c   : > { %10381 = vmatmul.mubr.msk.f32.gmra.mxu0 %vm441_vm1, %v336_v35  ;;  %v394_v35 = vld [vmem:[%s12567_s25 + $0x2d8] sm:$0xff] }
  0x5d   : > { %10383 = vmatprep.mubr.msk.f32.mxu0 %vm441_vm1, %v337_v37  ;;  %v396_v37 = vld [vmem:[%s12567_s25 + $0x2e8] sm:$0xff] }
  0x60   : > { %10384 = vmatmul.mubr.msk.f32.gmra.mxu0 %vm441_vm1, %v338_v39  ;;  %v398_v39 = vld [vmem:[%s12567_s25 + $0x2f8] sm:$0xff] }
  0x61   : > { %10386 = vmatprep.mubr.msk.f32.mxu0 %vm441_vm1, %v339_v40  ;;  %v399_v40 = vld [vmem:[%s12567_s25 + $0x300] sm:$0xff] }
  0x64   : > { %10387 = vmatmul.mubr.msk.f32.gmra.mxu0 %vm441_vm1, %v340_v43 }
  0x65   : > { %10389 = vmatprep.mubr.msk.f32.mxu0 %vm441_vm1, %v341_v44  ;;  %v402_v44 = vld [vmem:[%s12567_s25 + $0x318] sm:$0xff] }
  0x68   : > { %10390 = vmatmul.mubr.msk.f32.gmra.mxu0 %vm441_vm1, %v342_v47 }
  0x69   : > { %10392 = vmatprep.mubr.msk.f32.mxu0 %vm441_vm1, %v343_v48  ;;  %v404_v48 = vld [vmem:[%s12567_s25 + $0x328] sm:$0xff] }
  0x6c   : > { %10393 = vmatmul.mubr.msk.f32.gmra.mxu0 %vm441_vm1, %v344_v49 }
  0x6d   : > { %10395 = vmatprep.mubr.msk.f32.mxu0 %vm441_vm1, %v345_v50  ;;  %v405_v50 = vld [vmem:[%s12567_s25 + $0x330] sm:$0xff] }
  0x70   : > { %10396 = vmatmul.mubr.msk.f32.gmra.mxu0 %vm441_vm1, %v346_v51 }
  0x71   : > { %10398 = vmatprep.mubr.msk.f32.mxu0 %vm441_vm1, %v347_v52  ;;  %v406_v52 = vld [vmem:[%s12567_s25 + $0x338] sm:$0xff] }
  0x74   : > { %10399 = vmatmul.mubr.msk.f32.gmra.mxu0 %vm441_vm1, %v348_v53 }
  0x75   : > { %10401 = vmatprep.mubr.msk.f32.mxu0 %vm441_vm1, %v349_v54  ;;  %v407_v54 = vld [vmem:[%s12567_s25 + $0x340] sm:$0xff] }
  0x78   : > { %10402 = vmatmul.mubr.msk.f32.gmra.mxu0 %vm441_vm1, %v350_v55 }
  0x79   : > { %10404 = vmatprep.mubr.msk.f32.mxu0 %vm441_vm1, %v351_v56  ;;  %v408_v56 = vld [vmem:[%s12567_s25 + $0x348] sm:$0xff] }
  0x7c   : > { %10405 = vmatmul.mubr.msk.f32.gmra.mxu0 %vm441_vm1, %v352_v57 }
  0x7d   : > { %10407 = vmatprep.mubr.msk.f32.mxu0 %vm441_vm1, %v353_v58  ;;  %v409_v58 = vld [vmem:[%s12567_s25 + $0x350] sm:$0xff] }
  0x80   : > { %10408 = vmatmul.mubr.msk.f32.gmra.mxu0 %vm441_vm1, %v354_v59 }
  0x81   : > { %10410 = vmatprep.mubr.msk.f32.mxu0 %vm441_vm1, %v355_v60  ;;  %v410_v60 = vld [vmem:[%s12567_s25 + $0x358] sm:$0xff] }
  0x84   : > { %10411 = vmatmul.mubr.msk.f32.gmra.mxu0 %vm441_vm1, %v356_v61 }
  0x85   : > { %10413 = vmatprep.mubr.msk.f32.mxu0 %vm441_vm1, %v357_v62  ;;  %v411_v62 = vld [vmem:[%s12567_s25 + $0x360] sm:$0xff] }
  0x88   : > { %10414 = vmatmul.mubr.msk.f32.gmra.mxu0 %vm441_vm1, %v358_v63 }
  0x89   : > { %10416 = vmatprep.mubr.msk.f32.mxu0 %vm441_vm1, %v359_v0  ;;  %v412_v0 = vld [vmem:[%s12567_s25 + $0x368] sm:$0xff] }
  0x8c   : > { %10417 = vmatmul.mubr.msk.f32.gmra.mxu0 %vm441_vm1, %v360_v1 }
  0x8d   : > { %10419 = vmatprep.mubr.msk.f32.mxu0 %vm441_vm1, %v361_v2  ;;  %v413_v2 = vld [vmem:[%s12567_s25 + $0x370] sm:$0xff] }
  0x90   : > { %10420 = vmatmul.mubr.msk.f32.gmra.mxu0 %vm441_vm1, %v362_v3 }
  0x91   : > { %10422 = vmatprep.mubr.msk.f32.mxu0 %vm441_vm1, %v363_v4  ;;  %v414_v4 = vld [vmem:[%s12567_s25 + $0x378] sm:$0xff] }
  0x94   : > { %10423 = vmatmul.mubr.msk.f32.gmra.mxu0 %vm441_vm1, %v364_v5 }
  0x95   : > { %10425 = vmatprep.mubr.msk.f32.mxu0 %vm441_vm1, %v365_v6  ;;  %v415_v6 = vld [vmem:[%s12567_s25 + $0x380] sm:$0xff] }
  0x98   : > { %10426 = vmatmul.mubr.msk.f32.gmra.mxu0 %vm441_vm1, %v366_v7 }
  0x99   : > { %10428 = vmatprep.mubr.msk.f32.mxu0 %vm441_vm1, %v367_v8  ;;  %v416_v8 = vld [vmem:[%s12567_s25 + $0x388] sm:$0xff] }
  0x9c   : > { %10429 = vmatmul.mubr.msk.f32.gmra.mxu0 %vm441_vm1, %v368_v9 }
  0x9d   : > { %10431 = vmatprep.mubr.msk.f32.mxu0 %vm441_vm1, %v369_v10  ;;  %v417_v10 = vld [vmem:[%s12567_s25 + $0x390] sm:$0xff] }
  0xa0   : > { %10432 = vmatmul.mubr.msk.f32.gmra.mxu0 %vm441_vm1, %v370_v11 }
  0xa1   : > { %10434 = vmatprep.mubr.msk.f32.mxu0 %vm441_vm1, %v371_v12  ;;  %v418_v12 = vld [vmem:[%s12567_s25 + $0x398] sm:$0xff] }
  0xa4   : > { %10435 = vmatmul.mubr.msk.f32.gmra.mxu0 %vm441_vm1, %v372_v13 }
  0xa5   : > { %10437 = vmatprep.mubr.msk.f32.mxu0 %vm441_vm1, %v373_v14  ;;  %v419_v14 = vld [vmem:[%s12567_s25 + $0x3a0] sm:$0xff] }
  0xa8   : > { %10438 = vmatmul.mubr.msk.f32.gmra.mxu0 %vm441_vm1, %v374_v15 }
  0xa9   : > { %10440 = vmatprep.mubr.msk.f32.mxu0 %vm441_vm1, %v375_v16  ;;  %v420_v16 = vld [vmem:[%s12567_s25 + $0x3a8] sm:$0xff] }
  0xac   : > { %10441 = vmatmul.mubr.msk.f32.gmra.mxu0 %vm441_vm1, %v376_v17 }
  0xad   : > { %10443 = vmatprep.mubr.msk.f32.mxu0 %vm441_vm1, %v377_v18  ;;  %v421_v18 = vld [vmem:[%s12567_s25 + $0x3b0] sm:$0xff] }
  0xb0   : > { %10444 = vmatmul.mubr.msk.f32.gmra.mxu0 %vm441_vm1, %v378_v19 }
  0xb1   : > { %10446 = vmatprep.mubr.msk.f32.mxu0 %vm441_vm1, %v379_v20  ;;  %v422_v20 = vld [vmem:[%s12567_s25 + $0x3b8] sm:$0xff] }
  0xb4   : > { %10447 = vmatmul.mubr.msk.f32.gmra.mxu0 %vm441_vm1, %v380_v21 }
  0xb5   : > { %10449 = vmatprep.mubr.msk.f32.mxu0 %vm441_vm1, %v381_v22  ;;  %v423_v22 = vld [vmem:[%s12567_s25 + $0x3c0] sm:$0xff] }
  0xb8   : > { %10450 = vmatmul.mubr.msk.f32.gmra.mxu0 %vm441_vm1, %v382_v23 }
  0xb9   : > { %10452 = vmatprep.mubr.msk.f32.mxu0 %vm441_vm1, %v383_v24  ;;  %v424_v24 = vld [vmem:[%s12567_s25 + $0x3c8] sm:$0xff] }
  0xbc   : > { %10453 = vmatmul.mubr.msk.f32.gmra.mxu0 %vm441_vm1, %v384_v25 }
  0xbd   : > { %10455 = vmatprep.mubr.msk.f32.mxu0 %vm441_vm1, %v385_v26  ;;  %v425_v26 = vld [vmem:[%s12567_s25 + $0x3d0] sm:$0xff] }
  0xc0   : > { %10456 = vmatmul.mubr.msk.f32.gmra.mxu0 %vm441_vm1, %v386_v27 }
  0xc1   : > { %10458 = vmatprep.mubr.msk.f32.mxu0 %vm441_vm1, %v387_v28  ;;  %v426_v28 = vld [vmem:[%s12567_s25 + $0x3d8] sm:$0xff] }
  0xc4   : > { %10459 = vmatmul.mubr.msk.f32.gmra.mxu0 %vm441_vm1, %v388_v29 }
  0xc5   : > { %10461 = vmatprep.mubr.msk.f32.mxu0 %vm441_vm1, %v389_v30  ;;  %v427_v30 = vld [vmem:[%s12567_s25 + $0x3e0] sm:$0xff] }
  0xc8   : > { %10462 = vmatmul.mubr.msk.f32.gmra.mxu0 %vm441_vm1, %v390_v31 }
  0xc9   : > { %10464 = vmatprep.mubr.msk.f32.mxu0 %vm441_vm1, %v391_v32  ;;  %v428_v32 = vld [vmem:[%s12567_s25 + $0x3e8] sm:$0xff] }
  0xcc   : > { %10465 = vmatmul.mubr.msk.f32.gmra.mxu0 %vm441_vm1, %v392_v33 }
  0xcd   : > { %10467 = vmatprep.mubr.msk.f32.mxu0 %vm441_vm1, %v393_v34  ;;  %v429_v34 = vld [vmem:[%s12567_s25 + $0x3f0] sm:$0xff] }
  0xd0   : > { %10468 = vmatmul.mubr.msk.f32.gmra.mxu0 %vm441_vm1, %v394_v35 }
  0xd1   : > { %10470 = vmatprep.mubr.msk.f32.mxu0 %vm441_vm1, %v395_v36  ;;  %v430_v36 = vld [vmem:[%s12567_s25 + $0x3f8] sm:$0xff] }
  0xd4   : > { %10471 = vmatmul.mubr.msk.f32.gmra.mxu0 %vm441_vm1, %v396_v37 }
  0xd5   : > { %10473 = vmatprep.mubr.msk.f32.mxu0 %vm441_vm1, %v397_v38  ;;  %v431_v38 = vld [vmem:[%s12567_s25 + $0x400] sm:$0xff] }
  0xd8   : > { %10474 = vmatmul.mubr.msk.f32.gmra.mxu0 %vm441_vm1, %v398_v39 }
  0xd9   : > { %10476 = vmatprep.mubr.msk.f32.mxu0 %vm441_vm1, %v399_v40  ;;  %v432_v40 = vld [vmem:[%s12567_s25 + $0x408] sm:$0xff]  ;;  %s17372_s25 = scalar_lea.hbm %s17415_s8, %s9435_s20 }
  0xdc   : > { %v12777_v43 = vpop.f32.mrf.mxu0  ;;  %10477 = vmatmul.mubr.msk.f32.gmra.mxu0 %vm441_vm1, %v400_v41 }
  0xdd   : > { %10479 = vmatprep.mubr.msk.f32.mxu0 %vm441_vm1, %v401_v42 }
  0xde   : > { %v12782_v45 = vpop.f32.mrf.mxu0 }
  0xe0   : > { %v12785_v47 = vpop.f32.mrf.mxu0  ;;  %10480 = vmatmul.mubr.msk.f32.gmra.mxu0 %vm441_vm1, %v402_v44 }
  0xe1   : > { %10482 = vmatprep.mubr.msk.f32.mxu0 %vm441_vm1, %v403_v46 }
  0xe2   : > { %v12790_v49 = vpop.f32.mrf.mxu0 }
  0xe4   : > { %v12793_v51 = vpop.f32.mrf.mxu0  ;;  %10483 = vmatmul.mubr.msk.f32.gmra.mxu0 %vm441_vm1, %v404_v48 }
  0xe5   : > { %10485 = vmatprep.mubr.msk.f32.mxu0 %vm441_vm1, %v405_v50 }
  0xe6   : > { %v12798_v53 = vpop.f32.mrf.mxu0 }
  0xe8   : > { %v12801_v55 = vpop.f32.mrf.mxu0  ;;  %10486 = vmatmul.mubr.msk.f32.gmra.mxu0 %vm441_vm1, %v406_v52 }
  0xe9   : > { %10488 = vmatprep.mubr.msk.f32.mxu0 %vm441_vm1, %v407_v54 }
  0xea   : > { %v12806_v57 = vpop.f32.mrf.mxu0 }
  0xec   : > { %v12809_v59 = vpop.f32.mrf.mxu0  ;;  %10489 = vmatmul.mubr.msk.f32.gmra.mxu0 %vm441_vm1, %v408_v56 }
  0xed   : > { %10491 = vmatprep.mubr.msk.f32.mxu0 %vm441_vm1, %v409_v58  ;;  %v17416_v58 = vmov 0.0  }
  0xee   : > { %v12814_v61 = vpop.f32.mrf.mxu0  ;;  %10536 = vmatprep.subr.mxu1 %v17416_v58  ;;  %10821 = vmatprep.subr.mxu0 %v17416_v58 }
  0xef   : > { %10544 = vmatprep.mubr.msk.f32.mxu1 %vm12461_vm2, %v17416_v58 }
  0xf0   : > { %v12817_v63 = vpop.f32.mrf.mxu0  ;;  %10492 = vmatmul.mubr.msk.f32.gmra.mxu0 %vm441_vm1, %v410_v60  ;;  %v8709_v60 = vld [vmem:[%s17409_s2 + $0x38] sm:$0xff] }
  0xf1   : > { %10494 = vmatprep.mubr.msk.f32.mxu0 %vm441_vm1, %v411_v62  ;;  %10537 = vmatpush3.msra.mxu1 %v8709_v60 }
  0xf2   : > { %v12822_v1 = vpop.f32.mrf.mxu0  ;;  %10538 = vmatprep.subr.mxu1 %v17416_v58 }
  0xf4   : > { %v12825_v3 = vpop.f32.mrf.mxu0  ;;  %10495 = vmatmul.mubr.msk.f32.gmra.mxu0 %vm441_vm1, %v412_v0  ;;  %v8708_v0 = vld [vmem:[%s17409_s2 + $0x30] sm:$0xff] }
  0xf5   : > { %17489 = vst [vmem:[#allocation5_spill] sm:$0xff] %v12825_v3  ;;  %10497 = vmatprep.mubr.msk.f32.mxu0 %vm441_vm1, %v413_v2  ;;  %10539 = vmatpush3.msra.mxu1 %v8708_v0 }
  0xf6   : > { %v12830_v5 = vpop.f32.mrf.mxu0  ;;  %10540 = vmatprep.subr.mxu1 %v17416_v58 }
  0xf8   : > { %v12833_v7 = vpop.f32.mrf.mxu0  ;;  %10498 = vmatmul.mubr.msk.f32.gmra.mxu0 %vm441_vm1, %v414_v4  ;;  %v8707_v4 = vld [vmem:[%s17409_s2 + $0x28] sm:$0xff] }
  0xf9   : > { %17490 = vst [vmem:[#allocation6_spill] sm:$0xff] %v12833_v7  ;;  %10500 = vmatprep.mubr.msk.f32.mxu0 %vm441_vm1, %v415_v6  ;;  %v8808_v6 = vld [vmem:[%s17409_s2 + $0x98] sm:$0xff]  ;;  %10541 = vmatpush3.msra.mxu1 %v8707_v4 }
  0xfa   : > { %v12838_v9 = vpop.f32.mrf.mxu0  ;;  %10822 = vmatpush3.msra.mxu0 %v8808_v6  ;;  %10542 = vmatprep.subr.mxu1 %v17416_v58 }
  0xfb   : > { %17491 = vst [vmem:[#allocation7_spill] sm:$0xff] %v12838_v9  ;;  %10823 = vmatprep.subr.mxu0 %v17416_v58 }
  0xfc   : > { %v12841_v11 = vpop.f32.mrf.mxu0  ;;  %10501 = vmatmul.mubr.msk.f32.gmra.mxu0 %vm441_vm1, %v416_v8 }
  0xfd   : > { %17492 = vst [vmem:[#allocation8_spill] sm:$0xff] %v12841_v11  ;;  %10503 = vmatprep.mubr.msk.f32.mxu0 %vm441_vm1, %v417_v10  ;;  %v8706_v10 = vld [vmem:[%s17409_s2 + $0x20] sm:$0xff] }
  0xfe   : > { %v12846_v13 = vpop.f32.mrf.mxu0  ;;  %10543 = vmatpush3.msra.mxu1 %v8706_v10 }
  0xff   : > { %17493 = vst [vmem:[#allocation9_spill] sm:$0xff] %v12846_v13  ;;  %10631 = vmatprep.subr.mxu1 %v17416_v58 }
 0x100   : > { %v12849_v15 = vpop.f32.mrf.mxu0  ;;  %10504 = vmatmul.mubr.msk.f32.gmra.mxu0 %vm441_vm1, %v418_v12  ;;  %v8807_v12 = vld [vmem:[%s17409_s2 + $0x90] sm:$0xff] }
 0x101   : > { %17494 = vst [vmem:[#allocation10_spill] sm:$0xff] %v12849_v15  ;;  %10506 = vmatprep.mubr.msk.f32.mxu0 %vm441_vm1, %v419_v14  ;;  %10824 = vmatpush3.msra.mxu0 %v8807_v12 }
 0x102   : > { %v12854_v17 = vpop.f32.mrf.mxu0  ;;  %10825 = vmatprep.subr.mxu0 %v17416_v58 }
 0x103   : > { %17495 = vst [vmem:[#allocation11_spill] sm:$0xff] %v12854_v17 }
 0x104   : > { %v12857_v19 = vpop.f32.mrf.mxu0  ;;  %10507 = vmatmul.mubr.msk.f32.gmra.mxu0 %vm441_vm1, %v420_v16  ;;  %v8806_v16 = vld [vmem:[%s17409_s2 + $0x88] sm:$0xff] }
 0x105   : > { %17496 = vst [vmem:[#allocation12_spill] sm:$0xff] %v12857_v19  ;;  %10509 = vmatprep.mubr.msk.f32.mxu0 %vm441_vm1, %v421_v18  ;;  %10826 = vmatpush3.msra.mxu0 %v8806_v16 }
 0x106   : > { %v12862_v21 = vpop.f32.mrf.mxu0  ;;  %10827 = vmatprep.subr.mxu0 %v17416_v58 }
 0x107   : > { %17497 = vst [vmem:[#allocation13_spill] sm:$0xff] %v12862_v21 }
 0x108   : > { %v12865_v23 = vpop.f32.mrf.mxu0  ;;  %10510 = vmatmul.mubr.msk.f32.gmra.mxu0 %vm441_vm1, %v422_v20  ;;  %v8805_v20 = vld [vmem:[%s17409_s2 + $0x80] sm:$0xff] }
 0x109   : > { %17498 = vst [vmem:[#allocation14_spill] sm:$0xff] %v12865_v23  ;;  %10512 = vmatprep.mubr.msk.f32.mxu0 %vm441_vm1, %v423_v22  ;;  %10828 = vmatpush3.msra.mxu0 %v8805_v20 }
 0x10a   : > { %v12870_v25 = vpop.f32.mrf.mxu0  ;;  %11011 = vmatprep.subr.mxu0 %v17416_v58 }
 0x10b   : > { %17499 = vst [vmem:[#allocation15_spill] sm:$0xff] %v12870_v25 }
 0x10c   : > { %v12873_v27 = vpop.f32.mrf.mxu0  ;;  %10513 = vmatmul.mubr.msk.f32.gmra.mxu0 %vm441_vm1, %v424_v24 }
 0x10d   : > { %17500 = vst [vmem:[#allocation16_spill] sm:$0xff] %v12873_v27  ;;  %10515 = vmatprep.mubr.msk.f32.mxu0 %vm441_vm1, %v425_v26 }
 0x10e   : > { %v12878_v29 = vpop.f32.mrf.mxu0 }
 0x10f   : > { %17501 = vst [vmem:[#allocation17_spill] sm:$0xff] %v12878_v29 }
 0x110   : > { %v12881_v31 = vpop.f32.mrf.mxu0  ;;  %10516 = vmatmul.mubr.msk.f32.gmra.mxu0 %vm441_vm1, %v426_v28 }
 0x111   : > { %17502 = vst [vmem:[#allocation18_spill] sm:$0xff] %v12881_v31  ;;  %10518 = vmatprep.mubr.msk.f32.mxu0 %vm441_vm1, %v427_v30 }
 0x112   : > { %v12886_v33 = vpop.f32.mrf.mxu0 }
 0x113   : > { %17503 = vst [vmem:[#allocation19_spill] sm:$0xff] %v12886_v33 }
 0x114   : > { %v12889_v35 = vpop.f32.mrf.mxu0  ;;  %10519 = vmatmul.mubr.msk.f32.gmra.mxu0 %vm441_vm1, %v428_v32 }
 0x115   : > { %10521 = vmatprep.mubr.msk.f32.mxu0 %vm441_vm1, %v429_v34 }
 0x116   : > { %v12894_v37 = vpop.f32.mrf.mxu0 }
 0x117   : > { %17504 = vst [vmem:[#allocation20_spill] sm:$0xff] %v12894_v37 }
 0x118   : > { %v12897_v39 = vpop.f32.mrf.mxu0  ;;  %10522 = vmatmul.mubr.msk.f32.gmra.mxu0 %vm441_vm1, %v430_v36 }
 0x119   : > { %10524 = vmatprep.mubr.msk.f32.mxu0 %vm441_vm1, %v431_v38 }
 0x11a   : > { %v12902_v41 = vpop.f32.mrf.mxu0 }
 0x11b   : > { %17505 = vst [vmem:[#allocation21_spill] sm:$0xff] %v12902_v41 }
 0x11c   : > { %v12904_v42 = vpop.f32.mrf.mxu0  ;;  %10525 = vmatmul.mubr.msk.f32.gmra.mxu0 %vm441_vm1, %v432_v40 }
 0x11d   : > { %10829 = vmatprep.mubr.msk.f32.mxu0 %vm12461_vm2, %v17416_v58 }
 0x11e   : > { %v12907_v44 = vpop.f32.mrf.mxu0 }
 0x120   : > { %v12909_v46 = vpop.f32.mrf.mxu0 }
 0x122   : > { %v12911_v48 = vpop.f32.mrf.mxu0 }
 0x124   : > { %v12913_v50 = vpop.f32.mrf.mxu0 }
 0x126   : > { %v12915_v52 = vpop.f32.mrf.mxu0 }
 0x128   : > { %v12917_v54 = vpop.f32.mrf.mxu0 }
 0x12a   : > { %v12919_v56 = vpop.f32.mrf.mxu0 }
 0x12c   : > { %v12926_v62 = vpop.f32.mrf.mxu0 }
 0x12e   : > { %v12932_v2 = vpop.f32.mrf.mxu0 }
 0x130   : > { %v12941_v8 = vpop.f32.mrf.mxu0 }
 0x132   : > { %v12953_v14 = vpop.f32.mrf.mxu0 }
 0x134   : > { %v12962_v18 = vpop.f32.mrf.mxu0 }
 0x136   : > { %v12968_v22 = vpop.f32.mrf.mxu0 }
 0x138   : > { %v12971_v24 = vpop.f32.mrf.mxu0 }
 0x139   : > { %17506 = vst [vmem:[#allocation22_spill] sm:$0xff] %v12971_v24 }
 0x13a   : > { %v12973_v26 = vpop.f32.mrf.mxu0 }
 0x13c   : > { %v12975_v28 = vpop.f32.mrf.mxu0 }
 0x13d   : > { %17507 = vst [vmem:[#allocation23_spill] sm:$0xff] %v12975_v28 }
 0x13e   : > { %v12977_v30 = vpop.f32.mrf.mxu0 }
 0x13f   : > { %17508 = vst [vmem:[#allocation24_spill] sm:$0xff] %v12977_v30 }
 0x140   : > { %v12979_v32 = vpop.f32.mrf.mxu0 }
 0x141   : > { %17509 = vst [vmem:[#allocation25_spill] sm:$0xff] %v12979_v32 }
 0x142   : > { %v12981_v34 = vpop.f32.mrf.mxu0 }
 0x143   : > { %17510 = vst [vmem:[#allocation26_spill] sm:$0xff] %v12981_v34  ;;  %v10529_v34 = vpop.f32.mrf.mxu1 }
 0x144   : > { %v12983_v36 = vpop.f32.mrf.mxu0 }
 0x145   : > { %17511 = vst [vmem:[#allocation27_spill] sm:$0xff] %v12983_v36 }
 0x146   : > { %v12985_v38 = vpop.f32.mrf.mxu0 }
 0x147   : > { %17512 = vst [vmem:[#allocation28_spill] sm:$0xff] %v12985_v38 }
 0x148   : > { %v12987_v40 = vpop.f32.mrf.mxu0 }
 0x149   : > { %17513 = vst [vmem:[#allocation29_spill] sm:$0xff] %v12987_v40 }
 0x14a   : > { %v12989_v60 = vpop.f32.mrf.mxu0 }
 0x14b   : > { %17514 = vst [vmem:[#allocation30_spill] sm:$0xff] %v12989_v60 }
 0x14c   : > { %v12991_v0 = vpop.f32.mrf.mxu0 }
 0x14d   : > { %17515 = vst [vmem:[#allocation31_spill] sm:$0xff] %v12991_v0 }
 0x14e   : > { %v12993_v4 = vpop.f32.mrf.mxu0 }
 0x14f   : > { %17516 = vst [vmem:[#allocation32_spill] sm:$0xff] %v12993_v4 }
 0x150   : > { %v12995_v6 = vpop.f32.mrf.mxu0 }
 0x151   : > { %17517 = vst [vmem:[#allocation33_spill] sm:$0xff] %v12995_v6 }
 0x152   : > { %v12997_v10 = vpop.f32.mrf.mxu0 }
 0x153   : > { %17518 = vst [vmem:[#allocation34_spill] sm:$0xff] %v12997_v10 }
 0x154   : > { %v12999_v12 = vpop.f32.mrf.mxu0 }
 0x155   : > { %17519 = vst [vmem:[#allocation35_spill] sm:$0xff] %v12999_v12 }
 0x156   : > { %v13001_v16 = vpop.f32.mrf.mxu0 }
 0x157   : > { %17520 = vst [vmem:[#allocation36_spill] sm:$0xff] %v13001_v16 }
 0x158   : > { %v10427_v20 = vpop.f32.mrf.mxu0 }
 0x15a   : > { %v13003_v58 = vpop.f32.mrf.mxu0 }
 0x15b   : > { %17521 = vst [vmem:[#allocation37_spill] sm:$0xff] %v13003_v58 }
 0x15c   : > { %v10430_v41 = vpop.f32.mrf.mxu0 }
 0x15e   : > { %v13005_v37 = vpop.f32.mrf.mxu0 }
 0x15f   : > { %17522 = vst [vmem:[#allocation38_spill] sm:$0xff] %v13005_v37 }
 0x160   : > { %v10433_v31 = vpop.f32.mrf.mxu0 }
 0x162   : > { %v1250_v33 = vpop.f32.mrf.mxu0 }
 0x164   : > { %v10436_v27 = vpop.f32.mrf.mxu0 }
 0x166   : > { %v13007_v29 = vpop.f32.mrf.mxu0 }
 0x168   : > { %v13009_v23 = vpop.f32.mrf.mxu0 }
 0x16a   : > { %v13011_v6 = vpop.f32.mrf.mxu0 }
 0x16c   : > { %v13013_v10 = vpop.f32.mrf.mxu0 }
 0x16e   : > { %v13015_v12 = vpop.f32.mrf.mxu0 }
 0x170   : > { %v13017_v16 = vpop.f32.mrf.mxu0 }
 0x172   : > { %v13019_v0 = vpop.f32.mrf.mxu0 }
 0x174   : > { %v13021_v58 = vpop.f32.mrf.mxu0 }
 0x176   : > { %v13023_v37 = vpop.f32.mrf.mxu0 }
 0x178   : > { %v13025_v25 = vpop.f32.mrf.mxu0 }
 0x17a   : > { %v13027_v4 = vpop.f32.mrf.mxu0 }
 0x17c   : > { %v13029_v19 = vpop.f32.mrf.mxu0 }
 0x17d   : > { %17523 = vst [vmem:[#allocation39_spill] sm:$0xff] %v13029_v19 }
 0x17e   : > { %v13031_v40 = vpop.f32.mrf.mxu0 }
 0x180   : > { %v13033_v21 = vpop.f32.mrf.mxu0 }
 0x181   : > { %17524 = vst [vmem:[#allocation40_spill] sm:$0xff] %v13033_v21  ;;  %v13055_v21 = vpop.f32.mrf.mxu1 }
 0x182   : > { %v13035_v60 = vpop.f32.mrf.mxu0  ;;  %17535 = vst [vmem:[#allocation51_spill] sm:$0xff] %v13055_v21  ;;  %v1630_v21 = vmax.f32 %v12897_v39, %v10430_v41 }
 0x183   : > { %17525 = vst [vmem:[#allocation41_spill] sm:$0xff] %v13035_v60 }
 0x184   : > { %v13037_v15 = vpop.f32.mrf.mxu0 }
 0x185   : > { %17526 = vst [vmem:[#allocation42_spill] sm:$0xff] %v13037_v15 }
 0x186   : > { %v13039_v36 = vpop.f32.mrf.mxu0 }
 0x187   : > { %17527 = vst [vmem:[#allocation43_spill] sm:$0xff] %v13039_v36 }
 0x188   : > { %v13041_v17 = vpop.f32.mrf.mxu0 }
 0x189   : > { %17528 = vst [vmem:[#allocation44_spill] sm:$0xff] %v13041_v17  ;;  %v10532_v17 = vpop.f32.mrf.mxu1 }
 0x18a   : > { %v13043_v38 = vpop.f32.mrf.mxu0 }
 0x18b   : > { %17529 = vst [vmem:[#allocation45_spill] sm:$0xff] %v13043_v38 }
 0x18c   : > { %v13045_v11 = vpop.f32.mrf.mxu0 }
 0x18d   : > { %17530 = vst [vmem:[#allocation46_spill] sm:$0xff] %v13045_v11  ;;  %v13063_v11 = vpop.f32.mrf.mxu1 }
 0x18e   : > { %v13047_v32 = vpop.f32.mrf.mxu0  ;;  %17539 = vst [vmem:[#allocation55_spill] sm:$0xff] %v13063_v11  ;;  %v1632_v11 = vmax.f32 %v12904_v42, %v10433_v31 }
 0x18f   : > { %17531 = vst [vmem:[#allocation47_spill] sm:$0xff] %v13047_v32  ;;  %v1628_v32 = vmax.f32 %v12889_v35, %v10427_v20  ;;  %v10535_v60 = vpop.f32.mrf.mxu1 }
 0x190   : > { %v13049_v13 = vpop.f32.mrf.mxu0 }
 0x191   : > { %17532 = vst [vmem:[#allocation48_spill] sm:$0xff] %v13049_v13  ;;  %v1590_v24 = vpop.f32.mrf.mxu1 }
 0x192   : > { %v13051_v7 = vpop.f32.mrf.mxu0 }
 0x193   : > { %17533 = vst [vmem:[#allocation49_spill] sm:$0xff] %v13051_v7 }
 0x194   : > { %v13053_v28 = vpop.f32.mrf.mxu0 }
 0x195   : > { %17534 = vst [vmem:[#allocation50_spill] sm:$0xff] %v13053_v28 }
 0x196   : > { %v13057_v15 = vpop.f32.mrf.mxu0 }
 0x197   : > { %17536 = vst [vmem:[#allocation52_spill] sm:$0xff] %v13057_v15 }
 0x198   : > { %v13059_v36 = vpop.f32.mrf.mxu0 }
 0x199   : > { %17537 = vst [vmem:[#allocation53_spill] sm:$0xff] %v13059_v36 }
 0x19a   : > { %v13061_v9 = vpop.f32.mrf.mxu0 }
 0x19b   : > { %17538 = vst [vmem:[#allocation54_spill] sm:$0xff] %v13061_v9 }
 0x19c   : > { %v10478_v38 = vpop.f32.mrf.mxu0 }
 0x19d   : > { %v1662_v13 = vmax.f32 %v10478_v38, %v10529_v34  ;;  %v1631_v34 = vmax.f32 %v12907_v44, %v1250_v33 }
 0x19e   : > { %v13066_v30 = vpop.f32.mrf.mxu0 }
 0x19f   : > { %v13068_v7 = vmax.f32 %v1628_v32, %v1662_v13 }
 0x1a0   : > { %v10481_v28 = vpop.f32.mrf.mxu0 }
 0x1a1   : > { %v1664_v15 = vmax.f32 %v10481_v28, %v10532_v17  ;;  %v1600_v17 = vmax.f32 %v12777_v43, %v12909_v46  ;;  %v1601_v46 = vmax.f32 %v12790_v49, %v12915_v52  ;;  %v1603_v49 = vmax.f32 %v12798_v53, %v12919_v56 }
 0x1a2   : > { %v13071_v3 = vpop.f32.mrf.mxu0 }
 0x1a3   : > { %v13073_v36 = vmax.f32 %v1630_v21, %v1664_v15  ;;  %v1599_v21 = vmax.f32 %v12782_v45, %v12911_v48 }
 0x1a4   : > { %v10484_v9 = vpop.f32.mrf.mxu0 }
 0x1a5   : > { %17540 = vst [vmem:[#allocation56_spill] sm:$0xff] %v13073_v36  ;;  %v1666_v19 = vmax.f32 %v10484_v9, %v10535_v60  ;;  %v17419_v33 = vrot.slane %v13073_v36, 2  ;;  %v1704_v60 = vld [vmem:[%s17409_s2 + $0x18] sm:$0xff] }
 0x1a6   : > { %v1420_v35 = vpop.f32.mrf.mxu0 }
 0x1a7   : > { %v13077_v38 = vmax.f32 %v1632_v11, %v1666_v19  ;;  %v1665_v13 = vmax.f32 %v1420_v35, %v1590_v24 }
 0x1a8   : > { %v10487_v32 = vpop.f32.mrf.mxu0 }
 0x1a9   : > { %17541 = vst [vmem:[#allocation57_spill] sm:$0xff] %v13077_v38  ;;  %v13079_v20 = vmax.f32 %v1631_v34, %v1665_v13  ;;  %v1634_v39 = vmax.f32 %v10436_v27, %v10487_v32  ;;  %v3846_v11 = vrot.slane %v13077_v38, 2  ;;  %v1602_v27 = vmax.f32 %v12785_v47, %v12913_v50  ;;  %v17608_v38 = vld [vmem:[#allocation19_spill] sm:$0xff] }
 0x1aa   : > { %v1430_v15 = vpop.f32.mrf.mxu0 }
 0x1ab   : > { %17542 = vst [vmem:[#allocation58_spill] sm:$0xff] %v13079_v20  ;;  %v3844_v31 = vrot.slane %v13079_v20, 2  ;;  %v1633_v9 = vmax.f32 %v13007_v29, %v1430_v15  ;;  %v13089_v19 = vmax.f32 %v1600_v17, %v1634_v39  ;;  %v1703_v17 = vld [vmem:[%s17409_s2 + $0x10] sm:$0xff]  ;;  %v17547_v15 = vmov 0.0  }
 0x1ac   : > { %v10490_v41 = vpop.f32.mrf.mxu0 }
 0x1ad   : > { %v13093_v42 = vmax.f32 %v1599_v21, %v1633_v9  ;;  %v1636_v43 = vmax.f32 %v13009_v23, %v10490_v41  ;;  %v13099_v29 = vsel %vm2342_vm3, %v17419_v33, %v3844_v31  ;;  %v13102_v44 = vsel %vm2342_vm3, %v3844_v31, %v3846_v11  ;;  %v1702_v11 = vld [vmem:[%s17409_s2 + $0x8] sm:$0xff] }
 0x1ae   : > { %v1440_v45 = vpop.f32.mrf.mxu0  ;;  %17543 = vst [vmem:[#allocation59_spill] sm:$0xff] %v13099_v29  ;;  %17544 = vst [vmem:[#allocation60_spill] sm:$0xff] %v13102_v44  ;;  %v1742_v23 = vrot.slane %v13089_v19, 1  ;;  %v17418_v53 = vrot.slane %v13089_v19, 2  ;;  %v17599_v33 = vld [vmem:[#allocation34_spill] sm:$0xff] }
 0x1af   : > { %v1741_v48 = vrot.slane %v13093_v42, 1  ;;  %v13107_v47 = vmax.f32 %v1602_v27, %v1636_v43  ;;  %v1635_v50 = vmax.f32 %v13011_v6, %v1440_v45 }
 0x1b0   : > { %v10493_v24 = vpop.f32.mrf.mxu0 }
 0x1b1   : > { %17545 = vst [vmem:[#allocation61_spill] sm:$0xff] %v13107_v47  ;;  %v13111_v28 = vmax.f32 %v1601_v46, %v1635_v50  ;;  %v1746_v52 = vrot.slane %v13107_v47, 1  ;;  %v1743_v34 = vsel %vm1740_vm5, %v1741_v48, %v1742_v23  ;;  %v1638_v13 = vmax.f32 %v13013_v10, %v10493_v24  ;;  %v8870_v48 = vld [vmem:[%s17409_s2 + $0xb8] sm:$0xff] }
 0x1b2   : > { %v1450_v35 = vpop.f32.mrf.mxu0  ;;  %10545 = vmatmul.mubr.msk.f32.vlgmr.msra.gmra.mxu1 %vm1800_vm4, %v1743_v34  ;;  %v1604_v10 = vmax.f32 %v12793_v51, %v12917_v54  ;;  %v1605_v54 = vmax.f32 %v12806_v57, %v12932_v2  ;;  %v1701_v2 = vld [vmem:[%s17409_s2] sm:$0xff]  ;;  %v1606_v24 = vmax.f32 %v12801_v55, %v12926_v62  ;;  %v1607_v55 = vmax.f32 %v12814_v61, %v12953_v14  ;;  %v8868_v61 = vld [vmem:[%s17409_s2 + $0xa8] sm:$0xff] }
 0x1b3   : > { %17546 = vst [vmem:[#allocation62_spill] sm:$0xff] %v13111_v28  ;;  %v17420_v6 = vrot.slane %v13111_v28, 2  ;;  %v1637_v32 = vmax.f32 %v13015_v12, %v1450_v35  ;;  %v1744_v39 = vrot.slane %v13111_v28, 1  ;;  %10632 = vmatpush3.msra.mxu1 %v1704_v60  ;;  %10547 = vmatprep.mubr.msk.f32.mxu1 %vm12461_vm2, %v17547_v15  ;;  %v8869_v35 = vld [vmem:[%s17409_s2 + $0xb0] sm:$0xff] }
 0x1b4   : > { %v10496_v56 = vpop.f32.mrf.mxu0  ;;  %10633 = vmatprep.subr.mxu1 %v17547_v15  ;;  %v13151_v41 = vmax.f32 %v1604_v10, %v1638_v13  ;;  %v8867_v10 = vld [vmem:[%s17409_s2 + $0xa0] sm:$0xff] }
 0x1b5   : > { %v13133_v21 = vmax.f32 %v1603_v49, %v1637_v32  ;;  %v1745_v12 = vsel %vm1740_vm5, %v1742_v23, %v1744_v39  ;;  %v1747_v31 = vsel %vm1740_vm5, %v1744_v39, %v1746_v52  ;;  %10634 = vmatpush3.msra.mxu1 %v1703_v17  ;;  %v13147_v51 = vsel %vm2342_vm3, %v17418_v53, %v17420_v6  ;;  %v17600_v6 = vld [vmem:[#allocation17_spill] sm:$0xff] }
 0x1b6   : > { %v1460_v9 = vpop.f32.mrf.mxu0  ;;  %10830 = vmatmul.mubr.msk.f32.vlgmr.msra.gmra.mxu0 %vm1800_vm4, %v1747_v31  ;;  %10548 = vmatmul.mubr.msk.f32.gmra.mxu1 %vm1800_vm4, %v1745_v12  ;;  %v1640_v50 = vmax.f32 %v13017_v16, %v10496_v56  ;;  %v1750_v23 = vrot.slane %v13151_v41, 1  ;;  %v1608_v39 = vmax.f32 %v12809_v59, %v12941_v8  ;;  %v1609_v59 = vmax.f32 %v12822_v1, %v12968_v22 }
 0x1b7   : > { %v1639_v27 = vmax.f32 %v13019_v0, %v1460_v9  ;;  %10832 = vmatprep.mubr.msk.f32.mxu0 %vm12461_vm2, %v17547_v15  ;;  %v1748_v43 = vrot.slane %v13133_v21, 1  ;;  %10550 = vmatprep.mubr.msk.f32.mxu1 %vm12461_vm2, %v17547_v15  ;;  %v1623_v44 = vmax.f32 %v17600_v6, %v17599_v33  ;;  %v17602_v33 = vld [vmem:[#allocation50_spill] sm:$0xff] }
 0x1b8   : > { %v10499_v45 = vpop.f32.mrf.mxu0  ;;  %10635 = vmatprep.subr.mxu1 %v17547_v15  ;;  %11012 = vmatpush3.msra.mxu0 %v8870_v48  ;;  %v17556_v48 = vld [vmem:[#allocation5_spill] sm:$0xff] }
 0x1b9   : > { %v13161_v46 = vmax.f32 %v1605_v54, %v1639_v27  ;;  %v1749_v57 = vsel %vm1740_vm5, %v1746_v52, %v1748_v43  ;;  %10636 = vmatpush3.msra.mxu1 %v1702_v11  ;;  %v13183_v49 = vsel %vm1740_vm5, %v1748_v43, %v1750_v23  ;;  %11013 = vmatprep.subr.mxu0 %v17547_v15 }
 0x1ba   : > { %v1470_v0 = vpop.f32.mrf.mxu0  ;;  %10833 = vmatmul.mubr.msk.f32.gmra.mxu0 %vm1800_vm4, %v1749_v57  ;;  %10637 = vmatprep.subr.mxu1 %v17547_v15  ;;  %17548 = vst [vmem:[#allocation63_spill] sm:$0xff] %v13183_v49  ;;  %v1642_v13 = vmax.f32 %v13021_v58, %v10499_v45  ;;  %v1610_v11 = vmax.f32 %v12817_v63, %v12962_v18 }
 0x1bb   : > { %10551 = vmatmul.mubr.msk.f32.gmra.mxu1 %vm1800_vm4, %v1747_v31  ;;  %10835 = vmatprep.mubr.msk.f32.mxu0 %vm12461_vm2, %v17547_v15  ;;  %v1641_v60 = vmax.f32 %v13023_v37, %v1470_v0  ;;  %v1752_v16 = vrot.slane %v13161_v46, 1  ;;  %v13194_v37 = vmax.f32 %v1606_v24, %v1640_v50  ;;  %v1611_v45 = vmax.f32 %v12830_v5, %v12973_v26  ;;  %v17554_v5 = vld [vmem:[#allocation39_spill] sm:$0xff]  ;;  %v17555_v0 = vld [vmem:[#allocation22_spill] sm:$0xff] }
 0x1bc   : > { %10553 = vmatprep.mubr.msk.f32.mxu1 %vm12461_vm2, %v17547_v15  ;;  %10638 = vmatpush3.msra.mxu1 %v1701_v2  ;;  %v10502_v52 = vpop.f32.mrf.mxu0  ;;  %v13236_v8 = vmax.f32 %v1608_v39, %v1642_v13  ;;  %v1612_v50 = vmax.f32 %v17556_v48, %v17555_v0  ;;  %v17570_v48 = vld [vmem:[#allocation42_spill] sm:$0xff] }
 0x1bd   : > { %10726 = vmatprep.subr.mxu1 %v17547_v15  ;;  %v13202_v62 = vmax.f32 %v1607_v55, %v1641_v60  ;;  %v13205_v34 = vsel %vm1740_vm5, %v1750_v23, %v1752_v16  ;;  %11014 = vmatpush3.msra.mxu0 %v8869_v35  ;;  %v1754_v32 = vrot.slane %v13194_v37, 1  ;;  %v1644_v22 = vmax.f32 %v13025_v25, %v10502_v52  ;;  %v17557_v23 = vld [vmem:[#allocation41_spill] sm:$0xff]  ;;  %v17559_v35 = vld [vmem:[#allocation24_spill] sm:$0xff]  ;;  %v17560_v55 = vld [vmem:[#allocation7_spill] sm:$0xff] }
 0x1be   : > { %10836 = vmatmul.mubr.msk.f32.gmra.mxu0 %vm1800_vm4, %v13183_v49  ;;  %17549 = vst [vmem:[#allocation64_spill] sm:$0xff] %v13205_v34  ;;  %v1480_v14 = vpop.f32.mrf.mxu0  ;;  %11015 = vmatprep.subr.mxu0 %v17547_v15  ;;  %v1758_v9 = vrot.slane %v13236_v8, 1 }
 0x1bf   : > { %10554 = vmatmul.mubr.msk.f32.gmra.mxu1 %vm1800_vm4, %v1749_v57  ;;  %10838 = vmatprep.mubr.msk.f32.mxu0 %vm12461_vm2, %v17547_v15  ;;  %v1643_v17 = vmax.f32 %v13027_v4, %v1480_v14  ;;  %v13225_v56 = vsel %vm1740_vm5, %v1752_v16, %v1754_v32  ;;  %v1756_v58 = vrot.slane %v13202_v62, 1  ;;  %v13271_v57 = vmax.f32 %v1610_v11, %v1644_v22  ;;  %v17565_v22 = vld [vmem:[#allocation43_spill] sm:$0xff] }
 0x1c0   : > { %10556 = vmatprep.mubr.msk.f32.mxu1 %vm12461_vm2, %v17547_v15  ;;  %11016 = vmatpush3.msra.mxu0 %v8868_v61  ;;  %17550 = vst [vmem:[#allocation65_spill] sm:$0xff] %v13225_v56  ;;  %v10505_v12 = vpop.f32.mrf.mxu0  ;;  %v1613_v61 = vmax.f32 %v17560_v55, %v17559_v35  ;;  %v17573_v55 = vld [vmem:[#allocation45_spill] sm:$0xff] }
 0x1c1   : > { %11017 = vmatprep.subr.mxu0 %v17547_v15  ;;  %v13244_v4 = vmax.f32 %v1609_v59, %v1643_v17  ;;  %v13247_v31 = vsel %vm1740_vm5, %v1754_v32, %v1756_v58  ;;  %v13264_v27 = vsel %vm1740_vm5, %v1756_v58, %v1758_v9  ;;  %v1646_v26 = vmax.f32 %v17554_v5, %v10505_v12  ;;  %v17562_v17 = vld [vmem:[#allocation40_spill] sm:$0xff]  ;;  %v17563_v12 = vld [vmem:[#allocation23_spill] sm:$0xff]  ;;  %v17564_v59 = vld [vmem:[#allocation6_spill] sm:$0xff] }
 0x1c2   : > { %10839 = vmatmul.mubr.msk.f32.gmra.mxu0 %vm1800_vm4, %v13205_v34  ;;  %17551 = vst [vmem:[#allocation66_spill] sm:$0xff] %v13247_v31  ;;  %v1490_v1 = vpop.f32.mrf.mxu0  ;;  %17552 = vst [vmem:[#allocation67_spill] sm:$0xff] %v13264_v27  ;;  %v1762_v2 = vrot.slane %v13271_v57, 1 }
 0x1c3   : > { %10557 = vmatmul.mubr.msk.f32.gmra.mxu1 %vm1800_vm4, %v13183_v49  ;;  %10841 = vmatprep.mubr.msk.f32.mxu0 %vm12461_vm2, %v17547_v15  ;;  %v1645_v54 = vmax.f32 %v13031_v40, %v1490_v1  ;;  %v1760_v25 = vrot.slane %v13244_v4, 1  ;;  %v13305_v14 = vmax.f32 %v1612_v50, %v1646_v26  ;;  %v1614_v1 = vmax.f32 %v17564_v59, %v17563_v12 }
 0x1c4   : > { %10559 = vmatprep.mubr.msk.f32.mxu1 %vm12461_vm2, %v17547_v15  ;;  %11018 = vmatpush3.msra.mxu0 %v8867_v10  ;;  %v10508_v43 = vpop.f32.mrf.mxu0 }
 0x1c5   : > { %11201 = vmatprep.subr.mxu0 %v17547_v15  ;;  %v13279_v63 = vmax.f32 %v1611_v45, %v1645_v54  ;;  %v13282_v18 = vsel %vm1740_vm5, %v1758_v9, %v1760_v25  ;;  %v13298_v60 = vsel %vm1740_vm5, %v1760_v25, %v1762_v2  ;;  %v1648_v58 = vmax.f32 %v17562_v17, %v10508_v43  ;;  %v17567_v43 = vld [vmem:[#allocation26_spill] sm:$0xff]  ;;  %v17568_v45 = vld [vmem:[#allocation9_spill] sm:$0xff] }
 0x1c6   : > { %10842 = vmatmul.mubr.msk.f32.gmra.mxu0 %vm1800_vm4, %v13225_v56  ;;  %17553 = vst [vmem:[#allocation68_spill] sm:$0xff] %v13282_v18  ;;  %v1500_v40 = vpop.f32.mrf.mxu0  ;;  %17558 = vst [vmem:[#allocation39_spill] sm:$0xff] %v13298_v60  ;;  %v1766_v10 = vrot.slane %v13305_v14, 1 }
 0x1c7   : > { %10560 = vmatmul.mubr.msk.f32.gmra.mxu1 %vm1800_vm4, %v13205_v34  ;;  %10844 = vmatprep.mubr.msk.f32.mxu0 %vm12461_vm2, %v17547_v15  ;;  %v1647_v24 = vmax.f32 %v17557_v23, %v1500_v40  ;;  %v1764_v16 = vrot.slane %v13279_v63, 1  ;;  %v1615_v40 = vmax.f32 %v17568_v45, %v17567_v43  ;;  %v13339_v5 = vmax.f32 %v1614_v1, %v1648_v58  ;;  %v17575_v58 = vld [vmem:[#allocation28_spill] sm:$0xff] }
 0x1c8   : > { %10562 = vmatprep.mubr.msk.f32.mxu1 %vm12461_vm2, %v17547_v15  ;;  %v10511_v52 = vpop.f32.mrf.mxu0 }
 0x1c9   : > { %v13313_v13 = vmax.f32 %v1613_v61, %v1647_v24  ;;  %v13316_v32 = vsel %vm1740_vm5, %v1762_v2, %v1764_v16  ;;  %v13332_v11 = vsel %vm1740_vm5, %v1764_v16, %v1766_v10  ;;  %v1650_v50 = vmax.f32 %v17570_v48, %v10511_v52  ;;  %v17571_v24 = vld [vmem:[#allocation25_spill] sm:$0xff]  ;;  %v17572_v16 = vld [vmem:[#allocation8_spill] sm:$0xff] }
 0x1ca   : > { %10845 = vmatmul.mubr.msk.f32.gmra.mxu0 %vm1800_vm4, %v13247_v31  ;;  %17561 = vst [vmem:[#allocation22_spill] sm:$0xff] %v13316_v32  ;;  %v1510_v39 = vpop.f32.mrf.mxu0  ;;  %17566 = vst [vmem:[#allocation5_spill] sm:$0xff] %v13332_v11  ;;  %v1770_v23 = vrot.slane %v13339_v5, 1  ;;  %v1616_v35 = vmax.f32 %v17572_v16, %v17571_v24 }
 0x1cb   : > { %10563 = vmatmul.mubr.msk.f32.gmra.mxu1 %vm1800_vm4, %v13225_v56  ;;  %10847 = vmatprep.mubr.msk.f32.mxu0 %vm12461_vm2, %v17547_v15  ;;  %v1649_v9 = vmax.f32 %v17565_v22, %v1510_v39  ;;  %v1768_v54 = vrot.slane %v13313_v13, 1 }
 0x1cc   : > { %10565 = vmatprep.mubr.msk.f32.mxu1 %vm12461_vm2, %v17547_v15  ;;  %v10514_v25 = vpop.f32.mrf.mxu0  ;;  %v13373_v59 = vmax.f32 %v1616_v35, %v1650_v50  ;;  %v17581_v50 = vld [vmem:[#allocation47_spill] sm:$0xff]  ;;  %v17583_v35 = vld [vmem:[#allocation30_spill] sm:$0xff] }
 0x1cd   : > { %v13347_v26 = vmax.f32 %v1615_v40, %v1649_v9  ;;  %v13350_v2 = vsel %vm1740_vm5, %v1766_v10, %v1768_v54  ;;  %v13366_v39 = vsel %vm1740_vm5, %v1768_v54, %v1770_v23  ;;  %v17576_v10 = vld [vmem:[#allocation11_spill] sm:$0xff]  ;;  %v17578_v54 = vld [vmem:[#allocation44_spill] sm:$0xff] }
 0x1ce   : > { %10848 = vmatmul.mubr.msk.f32.gmra.mxu0 %vm1800_vm4, %v13264_v27  ;;  %17569 = vst [vmem:[#allocation41_spill] sm:$0xff] %v13350_v2  ;;  %v1520_v0 = vpop.f32.mrf.mxu0  ;;  %17574 = vst [vmem:[#allocation24_spill] sm:$0xff] %v13366_v39  ;;  %v1617_v12 = vmax.f32 %v17576_v10, %v17575_v58  ;;  %v1652_v43 = vmax.f32 %v17578_v54, %v10514_v25  ;;  %v1774_v45 = vrot.slane %v13373_v59, 1  ;;  %v17579_v40 = vld [vmem:[#allocation27_spill] sm:$0xff] }
 0x1cf   : > { %10566 = vmatmul.mubr.msk.f32.gmra.mxu1 %vm1800_vm4, %v13247_v31  ;;  %10850 = vmatprep.mubr.msk.f32.mxu0 %vm12461_vm2, %v17547_v15  ;;  %v1651_v61 = vmax.f32 %v17573_v55, %v1520_v0  ;;  %v1772_v52 = vrot.slane %v13347_v26, 1  ;;  %v17580_v0 = vld [vmem:[#allocation10_spill] sm:$0xff]  ;;  %v17584_v55 = vld [vmem:[#allocation13_spill] sm:$0xff] }
 0x1d0   : > { %10568 = vmatprep.mubr.msk.f32.mxu1 %vm12461_vm2, %v17547_v15  ;;  %v10517_v17 = vpop.f32.mrf.mxu0  ;;  %v1618_v48 = vmax.f32 %v17580_v0, %v17579_v40  ;;  %v17587_v40 = vld [vmem:[#allocation29_spill] sm:$0xff] }
 0x1d1   : > { %v13381_v1 = vmax.f32 %v1617_v12, %v1651_v61  ;;  %v13384_v22 = vsel %vm1740_vm5, %v1770_v23, %v1772_v52  ;;  %v13400_v24 = vsel %vm1740_vm5, %v1772_v52, %v1774_v45  ;;  %v1619_v61 = vmax.f32 %v17584_v55, %v17583_v35  ;;  %v17591_v55 = vld [vmem:[#allocation32_spill] sm:$0xff] }
 0x1d2   : > { %10851 = vmatmul.mubr.msk.f32.gmra.mxu0 %vm1800_vm4, %v13282_v18  ;;  %17577 = vst [vmem:[#allocation7_spill] sm:$0xff] %v13384_v22  ;;  %v1530_v9 = vpop.f32.mrf.mxu0  ;;  %17582 = vst [vmem:[#allocation40_spill] sm:$0xff] %v13400_v24  ;;  %v13407_v58 = vmax.f32 %v1618_v48, %v1652_v43  ;;  %v17589_v48 = vld [vmem:[#allocation49_spill] sm:$0xff] }
 0x1d3   : > { %10569 = vmatmul.mubr.msk.f32.gmra.mxu1 %vm1800_vm4, %v13264_v27  ;;  %10853 = vmatprep.mubr.msk.f32.mxu0 %vm12461_vm2, %v17547_v15  ;;  %v1653_v23 = vmax.f32 %v17581_v50, %v1530_v9  ;;  %v1776_v25 = vrot.slane %v13381_v1, 1  ;;  %v17586_v9 = vld [vmem:[#allocation46_spill] sm:$0xff] }
 0x1d4   : > { %10571 = vmatprep.mubr.msk.f32.mxu1 %vm12461_vm2, %v17547_v15  ;;  %v10520_v16 = vpop.f32.mrf.mxu0  ;;  %v1654_v54 = vmax.f32 %v17586_v9, %v10517_v17  ;;  %v1778_v43 = vrot.slane %v13407_v58, 1 }
 0x1d5   : > { %v13415_v52 = vmax.f32 %v1619_v61, %v1653_v23  ;;  %v13418_v10 = vsel %vm1740_vm5, %v1774_v45, %v1776_v25  ;;  %v17588_v45 = vld [vmem:[#allocation12_spill] sm:$0xff]  ;;  %v17592_v61 = vld [vmem:[#allocation15_spill] sm:$0xff] }
 0x1d6   : > { %10854 = vmatmul.mubr.msk.f32.gmra.mxu0 %vm1800_vm4, %v13298_v60  ;;  %17585 = vst [vmem:[#allocation23_spill] sm:$0xff] %v13418_v10  ;;  %v1540_v12 = vpop.f32.mrf.mxu0  ;;  %v1620_v0 = vmax.f32 %v17588_v45, %v17587_v40  ;;  %v13434_v23 = vsel %vm1740_vm5, %v1776_v25, %v1778_v43  ;;  %v1621_v9 = vmax.f32 %v17592_v61, %v17591_v55  ;;  %v17597_v55 = vld [vmem:[#allocation52_spill] sm:$0xff] }
 0x1d7   : > { %10572 = vmatmul.mubr.msk.f32.gmra.mxu1 %vm1800_vm4, %v13282_v18  ;;  %10856 = vmatprep.mubr.msk.f32.mxu0 %vm12461_vm2, %v17547_v15  ;;  %v1655_v50 = vmax.f32 %v17589_v48, %v1540_v12  ;;  %17590 = vst [vmem:[#allocation6_spill] sm:$0xff] %v13434_v23  ;;  %v1780_v17 = vrot.slane %v13415_v52, 1  ;;  %v17595_v48 = vld [vmem:[#allocation31_spill] sm:$0xff] }
 0x1d8   : > { %10574 = vmatprep.mubr.msk.f32.mxu1 %vm12461_vm2, %v17547_v15  ;;  %v10523_v35 = vpop.f32.mrf.mxu0  ;;  %v13441_v53 = vmax.f32 %v1620_v0, %v1654_v54  ;;  %v17594_v54 = vld [vmem:[#allocation48_spill] sm:$0xff] }
 0x1d9   : > { %v13449_v25 = vmax.f32 %v1621_v9, %v1655_v50  ;;  %v13452_v12 = vsel %vm1740_vm5, %v1778_v43, %v1780_v17  ;;  %v1656_v45 = vmax.f32 %v17594_v54, %v10520_v16  ;;  %v17596_v43 = vld [vmem:[#allocation14_spill] sm:$0xff]  ;;  %v1658_v6 = vmax.f32 %v17602_v33, %v10523_v35  ;;  %v17607_v33 = vld [vmem:[#allocation36_spill] sm:$0xff] }
 0x1da   : > { %10857 = vmatmul.mubr.msk.f32.gmra.mxu0 %vm1800_vm4, %v13316_v32  ;;  %17593 = vst [vmem:[#allocation43_spill] sm:$0xff] %v13452_v12  ;;  %v1550_v40 = vpop.f32.mrf.mxu0  ;;  %v1782_v0 = vrot.slane %v13441_v53, 1  ;;  %v1622_v50 = vmax.f32 %v17596_v43, %v17595_v48 }
 0x1db   : > { %10575 = vmatmul.mubr.msk.f32.gmra.mxu1 %vm1800_vm4, %v13298_v60  ;;  %10859 = vmatprep.mubr.msk.f32.mxu0 %vm12461_vm2, %v17547_v15  ;;  %v1657_v61 = vmax.f32 %v17597_v55, %v1550_v40  ;;  %v1784_v16 = vrot.slane %v13449_v25, 1 }
 0x1dc   : > { %10577 = vmatprep.mubr.msk.f32.mxu1 %vm12461_vm2, %v17547_v15  ;;  %v13468_v9 = vsel %vm1740_vm5, %v1780_v17, %v1782_v0  ;;  %v10526_v54 = vpop.f32.mrf.mxu0  ;;  %v13475_v29 = vmax.f32 %v1622_v50, %v1656_v45  ;;  %v17605_v50 = vld [vmem:[#allocation54_spill] sm:$0xff] }
 0x1dd   : > { %17598 = vst [vmem:[#allocation26_spill] sm:$0xff] %v13468_v9  ;;  %v13483_v17 = vmax.f32 %v1623_v44, %v1657_v61  ;;  %v13486_v40 = vsel %vm1740_vm5, %v1782_v0, %v1784_v16  ;;  %v17603_v44 = vld [vmem:[#allocation33_spill] sm:$0xff]  ;;  %v17604_v0 = vld [vmem:[#allocation16_spill] sm:$0xff] }
 0x1de   : > { %10860 = vmatmul.mubr.msk.f32.gmra.mxu0 %vm1800_vm4, %v13332_v11  ;;  %17601 = vst [vmem:[#allocation9_spill] sm:$0xff] %v13486_v40  ;;  %v1560_v48 = vpop.f32.mrf.mxu0  ;;  %v1786_v45 = vrot.slane %v13475_v29, 1  ;;  %v1624_v43 = vmax.f32 %v17604_v0, %v17603_v44  ;;  %v17612_v0 = vld [vmem:[#allocation18_spill] sm:$0xff]  ;;  %v2388_v56 = vrot.slane %v13475_v29, 2 }
 0x1df   : > { %10578 = vmatmul.mubr.msk.f32.gmra.mxu1 %vm1800_vm4, %v13316_v32  ;;  %10862 = vmatprep.mubr.msk.f32.mxu0 %vm12461_vm2, %v17547_v15  ;;  %v1659_v55 = vmax.f32 %v17605_v50, %v1560_v48  ;;  %v1788_v35 = vrot.slane %v13483_v17, 1 }
 0x1e0   : > { %10580 = vmatprep.mubr.msk.f32.mxu1 %vm12461_vm2, %v17547_v15  ;;  %v13502_v61 = vsel %vm1740_vm5, %v1784_v16, %v1786_v45 }
 0x1e1   : > { %17606 = vst [vmem:[#allocation42_spill] sm:$0xff] %v13502_v61  ;;  %v13520_v48 = vsel %vm1740_vm5, %v1786_v45, %v1788_v35 }
 0x1e2   : > { %10863 = vmatmul.mubr.msk.f32.gmra.mxu0 %vm1800_vm4, %v13350_v2  ;;  %17609 = vst [vmem:[#allocation25_spill] sm:$0xff] %v13520_v48 }
 0x1e3   : > { %10581 = vmatmul.mubr.msk.f32.gmra.mxu1 %vm1800_vm4, %v13332_v11  ;;  %10865 = vmatprep.mubr.msk.f32.mxu0 %vm12461_vm2, %v17547_v15 }
 0x1e4   : > { %10583 = vmatprep.mubr.msk.f32.mxu1 %vm12461_vm2, %v17547_v15 }
 0x1e6   : > { %10866 = vmatmul.mubr.msk.f32.gmra.mxu0 %vm1800_vm4, %v13366_v39 }
 0x1e7   : > { %10584 = vmatmul.mubr.msk.f32.gmra.mxu1 %vm1800_vm4, %v13350_v2  ;;  %10868 = vmatprep.mubr.msk.f32.mxu0 %vm12461_vm2, %v17547_v15 }
 0x1e8   : > { %10586 = vmatprep.mubr.msk.f32.mxu1 %vm12461_vm2, %v17547_v15 }
 0x1ea   : > { %10869 = vmatmul.mubr.msk.f32.gmra.mxu0 %vm1800_vm4, %v13384_v22 }
 0x1eb   : > { %10587 = vmatmul.mubr.msk.f32.gmra.mxu1 %vm1800_vm4, %v13366_v39  ;;  %10871 = vmatprep.mubr.msk.f32.mxu0 %vm12461_vm2, %v17547_v15 }
 0x1ec   : > { %10589 = vmatprep.mubr.msk.f32.mxu1 %vm12461_vm2, %v17547_v15 }
 0x1ee   : > { %10872 = vmatmul.mubr.msk.f32.gmra.mxu0 %vm1800_vm4, %v13400_v24 }
 0x1ef   : > { %10590 = vmatmul.mubr.msk.f32.gmra.mxu1 %vm1800_vm4, %v13384_v22  ;;  %10874 = vmatprep.mubr.msk.f32.mxu0 %vm12461_vm2, %v17547_v15 }
 0x1f0   : > { %10592 = vmatprep.mubr.msk.f32.mxu1 %vm12461_vm2, %v17547_v15 }
 0x1f2   : > { %10875 = vmatmul.mubr.msk.f32.gmra.mxu0 %vm1800_vm4, %v13418_v10 }
 0x1f3   : > { %10593 = vmatmul.mubr.msk.f32.gmra.mxu1 %vm1800_vm4, %v13400_v24  ;;  %10877 = vmatprep.mubr.msk.f32.mxu0 %vm12461_vm2, %v17547_v15 }
 0x1f4   : > { %10595 = vmatprep.mubr.msk.f32.mxu1 %vm12461_vm2, %v17547_v15 }
 0x1f6   : > { %10878 = vmatmul.mubr.msk.f32.gmra.mxu0 %vm1800_vm4, %v13434_v23 }
 0x1f7   : > { %10596 = vmatmul.mubr.msk.f32.gmra.mxu1 %vm1800_vm4, %v13418_v10  ;;  %10880 = vmatprep.mubr.msk.f32.mxu0 %vm12461_vm2, %v17547_v15 }
 0x1f8   : > { %10598 = vmatprep.mubr.msk.f32.mxu1 %vm12461_vm2, %v17547_v15 }
 0x1fa   : > { %10881 = vmatmul.mubr.msk.f32.gmra.mxu0 %vm1800_vm4, %v13452_v12 }
 0x1fb   : > { %10599 = vmatmul.mubr.msk.f32.gmra.mxu1 %vm1800_vm4, %v13434_v23  ;;  %10883 = vmatprep.mubr.msk.f32.mxu0 %vm12461_vm2, %v17547_v15 }
 0x1fc   : > { %10601 = vmatprep.mubr.msk.f32.mxu1 %vm12461_vm2, %v17547_v15 }
 0x1fe   : > { %10884 = vmatmul.mubr.msk.f32.gmra.mxu0 %vm1800_vm4, %v13468_v9 }
 0x1ff   : > { %10602 = vmatmul.mubr.msk.f32.gmra.mxu1 %vm1800_vm4, %v13452_v12  ;;  %10886 = vmatprep.mubr.msk.f32.mxu0 %vm12461_vm2, %v17547_v15  ;;  %v13509_v12 = vmax.f32 %v1624_v43, %v1658_v6 }
 0x200   : > { %10604 = vmatprep.mubr.msk.f32.mxu1 %vm12461_vm2, %v17547_v15 }
 0x201   : > { %v1790_v44 = vrot.slane %v13509_v12, 1 }
 0x202   : > { %10887 = vmatmul.mubr.msk.f32.gmra.mxu0 %vm1800_vm4, %v13486_v40 }
 0x203   : > { %10605 = vmatmul.mubr.msk.f32.gmra.mxu1 %vm1800_vm4, %v13468_v9  ;;  %10889 = vmatprep.mubr.msk.f32.mxu0 %vm12461_vm2, %v17547_v15  ;;  %v1625_v9 = vmax.f32 %v17608_v38, %v17607_v33  ;;  %v17610_v38 = vld [vmem:[#allocation53_spill] sm:$0xff]  ;;  %v13535_v43 = vsel %vm1740_vm5, %v1788_v35, %v1790_v44 }
 0x204   : > { %10607 = vmatprep.mubr.msk.f32.mxu1 %vm12461_vm2, %v17547_v15  ;;  %v1660_v6 = vmax.f32 %v17610_v38, %v10526_v54  ;;  %17613 = vst [vmem:[#allocation8_spill] sm:$0xff] %v13535_v43  ;;  %v17614_v54 = vld [vmem:[#allocation51_spill] sm:$0xff]  ;;  %v17615_v35 = vld [vmem:[#allocation37_spill] sm:$0xff]  ;;  %v17616_v38 = vld [vmem:[#allocation20_spill] sm:$0xff] }
 0x205   : > { %v13517_v16 = vmax.f32 %v1625_v9, %v1659_v55  ;;  %v17611_v9 = vld [vmem:[#allocation35_spill] sm:$0xff]  ;;  %v1661_v55 = vmax.f32 %v13066_v30, %v17614_v54 }
 0x206   : > { %10890 = vmatmul.mubr.msk.f32.gmra.mxu0 %vm1800_vm4, %v13502_v61  ;;  %v1626_v45 = vmax.f32 %v17612_v0, %v17611_v9  ;;  %v1627_v9 = vmax.f32 %v17616_v38, %v17615_v35  ;;  %v17621_v35 = vld [vmem:[#allocation21_spill] sm:$0xff] }
 0x207   : > { %10608 = vmatmul.mubr.msk.f32.gmra.mxu1 %vm1800_vm4, %v13486_v40  ;;  %10892 = vmatprep.mubr.msk.f32.mxu0 %vm12461_vm2, %v17547_v15  ;;  %v1792_v50 = vrot.slane %v13517_v16, 1 }
 0x208   : > { %10610 = vmatprep.mubr.msk.f32.mxu1 %vm12461_vm2, %v17547_v15  ;;  %v13542_v33 = vmax.f32 %v1626_v45, %v1660_v6  ;;  %v13557_v30 = vmax.f32 %v1627_v9, %v1661_v55  ;;  %v17618_v45 = vld [vmem:[#allocation55_spill] sm:$0xff]  ;;  %v17620_v55 = vld [vmem:[#allocation38_spill] sm:$0xff] }
 0x209   : > { %v13553_v0 = vsel %vm1740_vm5, %v1790_v44, %v1792_v50  ;;  %v1663_v44 = vmax.f32 %v13071_v3, %v17618_v45  ;;  %v1629_v38 = vmax.f32 %v17621_v35, %v17620_v55  ;;  %v1798_v45 = vrot.slane %v13068_v7, 1 }
 0x20a   : > { %10893 = vmatmul.mubr.msk.f32.gmra.mxu0 %vm1800_vm4, %v13520_v48  ;;  %17617 = vst [vmem:[#allocation45_spill] sm:$0xff] %v13553_v0  ;;  %v1794_v6 = vrot.slane %v13542_v33, 1  ;;  %v1796_v9 = vrot.slane %v13557_v30, 1  ;;  %v17425_v35 = vrot.slane %v13073_v36, 1 }
 0x20b   : > { %10611 = vmatmul.mubr.msk.f32.gmra.mxu1 %vm1800_vm4, %v13502_v61  ;;  %10895 = vmatprep.mubr.msk.f32.mxu0 %vm12461_vm2, %v17547_v15  ;;  %v13582_v3 = vmax.f32 %v1629_v38, %v1663_v44  ;;  %v8771_v38 = vld [vmem:[%s17409_s2 + $0x58] sm:$0xff] }
 0x20c   : > { %10613 = vmatprep.mubr.msk.f32.mxu1 %vm12461_vm2, %v17547_v15  ;;  %v13569_v54 = vsel %vm1740_vm5, %v1792_v50, %v1794_v6  ;;  %v13585_v50 = vsel %vm1740_vm5, %v1794_v6, %v1796_v9  ;;  %v13597_v44 = vsel %vm1740_vm5, %v1796_v9, %v1798_v45 }
 0x20d   : > { %17619 = vst [vmem:[#allocation28_spill] sm:$0xff] %v13569_v54  ;;  %17622 = vst [vmem:[#allocation11_spill] sm:$0xff] %v13582_v3  ;;  %v2711_v6 = vrot.slane %v13582_v3, 1 }
 0x20e   : > { %10896 = vmatmul.mubr.msk.f32.gmra.mxu0 %vm1800_vm4, %v13535_v43  ;;  %17623 = vst [vmem:[#allocation44_spill] sm:$0xff] %v13585_v50  ;;  %17624 = vst [vmem:[#allocation27_spill] sm:$0xff] %v13597_v44 }
 0x20f   : > { %10614 = vmatmul.mubr.msk.f32.gmra.mxu1 %vm1800_vm4, %v13520_v48  ;;  %10898 = vmatprep.mubr.msk.f32.mxu0 %vm12461_vm2, %v17547_v15  ;;  %v13609_v55 = vsel %vm1740_vm5, %v1798_v45, %v2711_v6  ;;  %v13626_v9 = vsel %vm1740_vm5, %v2711_v6, %v17425_v35  ;;  %v2348_v45 = vrot.slane %v13107_v47, 2  ;;  %v17627_v6 = vrot.slane %v13111_v28, 2 }
 0x210   : > { %10616 = vmatprep.mubr.msk.f32.mxu1 %vm12461_vm2, %v17547_v15  ;;  %17625 = vst [vmem:[#allocation10_spill] sm:$0xff] %v13609_v55  ;;  %17626 = vst [vmem:[#allocation47_spill] sm:$0xff] %v13626_v9 }
 0x211   : > { %v13643_v35 = vsel %vm2342_vm3, %v17627_v6, %v2348_v45  ;;  %v8768_v6 = vld [vmem:[%s17409_s2 + $0x40] sm:$0xff] }
 0x212   : > { %10899 = vmatmul.mubr.msk.f32.gmra.mxu0 %vm1800_vm4, %v13553_v0 }
 0x213   : > { %10617 = vmatmul.mubr.msk.f32.gmra.mxu1 %vm1800_vm4, %v13535_v43  ;;  %10901 = vmatprep.mubr.msk.f32.mxu0 %vm12461_vm2, %v17547_v15 }
 0x214   : > { %10619 = vmatprep.mubr.msk.f32.mxu1 %vm12461_vm2, %v17547_v15 }
 0x216   : > { %10902 = vmatmul.mubr.msk.f32.gmra.mxu0 %vm1800_vm4, %v13569_v54 }
 0x217   : > { %10620 = vmatmul.mubr.msk.f32.gmra.mxu1 %vm1800_vm4, %v13553_v0  ;;  %10904 = vmatprep.mubr.msk.f32.mxu0 %vm12461_vm2, %v17547_v15  ;;  %v8900_v0 = vld [vmem:[%s17409_s2 + $0xc0] sm:$0xff] }
 0x218   : > { %10622 = vmatprep.mubr.msk.f32.mxu1 %vm12461_vm2, %v17547_v15 }
 0x21a   : > { %10905 = vmatmul.mubr.msk.f32.gmra.mxu0 %vm1800_vm4, %v13585_v50 }
 0x21b   : > { %10623 = vmatmul.mubr.msk.f32.gmra.mxu1 %vm1800_vm4, %v13569_v54  ;;  %10907 = vmatprep.mubr.msk.f32.mxu0 %vm12461_vm2, %v17547_v15  ;;  %v2358_v54 = vrot.slane %v13202_v62, 2 }
 0x21c   : > { %10625 = vmatprep.mubr.msk.f32.mxu1 %vm12461_vm2, %v17547_v15 }
 0x21e   : > { %10908 = vmatmul.mubr.msk.f32.gmra.mxu0 %vm1800_vm4, %v13597_v44 }
 0x21f   : > { %10626 = vmatmul.mubr.msk.f32.gmra.mxu1 %vm1800_vm4, %v13585_v50  ;;  %10910 = vmatprep.mubr.msk.f32.mxu0 %vm12461_vm2, %v17547_v15  ;;  %v8902_v50 = vld [vmem:[%s17409_s2 + $0xd0] sm:$0xff] }
 0x220   : > { %10628 = vmatprep.mubr.msk.f32.mxu1 %vm12461_vm2, %v17547_v15 }
 0x222   : > { %10911 = vmatmul.mubr.msk.f32.gmra.mxu0 %vm1800_vm4, %v13609_v55  ;;  %v8770_v55 = vld [vmem:[%s17409_s2 + $0x50] sm:$0xff] }
 0x223   : > { %10629 = vmatmul.mubr.msk.f32.gmra.mxu1 %vm1800_vm4, %v13597_v44  ;;  %10913 = vmatprep.mubr.msk.f32.mxu0 %vm12461_vm2, %v17547_v15  ;;  %v8903_v44 = vld [vmem:[%s17409_s2 + $0xd8] sm:$0xff] }
 0x224   : > { %10639 = vmatprep.mubr.msk.f32.mxu1 %vm12461_vm2, %v17547_v15 }
 0x226   : > { %10914 = vmatmul.mubr.msk.f32.gmra.mxu0 %vm1800_vm4, %v13626_v9  ;;  %v2350_v9 = vrot.slane %v13133_v21, 2 }
 0x227   : > { %10640 = vmatmul.mubr.msk.f32.vlgmr.msra.gmra.mxu1 %vm1800_vm4, %v13093_v42  ;;  %11019 = vmatprep.mubr.msk.f32.mxu0 %vm12461_vm2, %v17547_v15 }
 0x228   : > { %10727 = vmatpush3.msra.mxu1 %v8771_v38  ;;  %10642 = vmatprep.mubr.msk.f32.mxu1 %vm12461_vm2, %v17547_v15  ;;  %v8769_v38 = vld [vmem:[%s17409_s2 + $0x48] sm:$0xff] }
 0x229   : > { %10728 = vmatprep.subr.mxu1 %v17547_v15 }
 0x22a   : > { %11020 = vmatmul.mubr.msk.f32.vlgmr.msra.gmra.mxu0 %vm1800_vm4, %v13643_v35  ;;  %10729 = vmatpush3.msra.mxu1 %v8770_v55  ;;  %v13663_v55 = vsel %vm2342_vm3, %v2348_v45, %v2350_v9  ;;  %v2352_v45 = vrot.slane %v13151_v41, 2 }
 0x22b   : > { %10643 = vmatmul.mubr.msk.f32.gmra.mxu1 %vm1800_vm4, %v13089_v19  ;;  %11022 = vmatprep.mubr.msk.f32.mxu0 %vm12461_vm2, %v17547_v15 }
 0x22c   : > { %10645 = vmatprep.mubr.msk.f32.mxu1 %vm12461_vm2, %v17547_v15  ;;  %10730 = vmatprep.subr.mxu1 %v17547_v15 }
 0x22d   : > { %10731 = vmatpush3.msra.mxu1 %v8769_v38  ;;  %11202 = vmatpush3.msra.mxu0 %v8903_v44  ;;  %v13679_v38 = vsel %vm2342_vm3, %v2350_v9, %v2352_v45  ;;  %v2354_v44 = vrot.slane %v13161_v46, 2 }
 0x22e   : > { %11023 = vmatmul.mubr.msk.f32.gmra.mxu0 %vm1800_vm4, %v13663_v55  ;;  %10732 = vmatprep.subr.mxu1 %v17547_v15  ;;  %17628 = vst [vmem:[#allocation30_spill] sm:$0xff] %v13679_v38 }
 0x22f   : > { %10646 = vmatmul.mubr.msk.f32.gmra.mxu1 %vm1800_vm4, %v13111_v28  ;;  %11025 = vmatprep.mubr.msk.f32.mxu0 %vm12461_vm2, %v17547_v15  ;;  %v13696_v9 = vsel %vm2342_vm3, %v2352_v45, %v2354_v44 }
 0x230   : > { %10648 = vmatprep.mubr.msk.f32.mxu1 %vm12461_vm2, %v17547_v15  ;;  %10733 = vmatpush3.msra.mxu1 %v8768_v6  ;;  %17629 = vst [vmem:[#allocation13_spill] sm:$0xff] %v13696_v9  ;;  %v8901_v6 = vld [vmem:[%s17409_s2 + $0xc8] sm:$0xff] }
 0x231   : > { %11203 = vmatprep.subr.mxu0 %v17547_v15  ;;  %10916 = vmatprep.subr.mxu1 %v17547_v15 }
 0x232   : > { %11026 = vmatmul.mubr.msk.f32.gmra.mxu0 %vm1800_vm4, %v13679_v38 }
 0x233   : > { %10649 = vmatmul.mubr.msk.f32.gmra.mxu1 %vm1800_vm4, %v13107_v47  ;;  %11028 = vmatprep.mubr.msk.f32.mxu0 %vm12461_vm2, %v17547_v15 }
 0x234   : > { %10651 = vmatprep.mubr.msk.f32.mxu1 %vm12461_vm2, %v17547_v15  ;;  %11204 = vmatpush3.msra.mxu0 %v8902_v50  ;;  %v2356_v50 = vrot.slane %v13194_v37, 2 }
 0x235   : > { %11205 = vmatprep.subr.mxu0 %v17547_v15 }
 0x236   : > { %11029 = vmatmul.mubr.msk.f32.gmra.mxu0 %vm1800_vm4, %v13696_v9  ;;  %v13712_v45 = vsel %vm2342_vm3, %v2354_v44, %v2356_v50  ;;  %v13728_v44 = vsel %vm2342_vm3, %v2356_v50, %v2358_v54  ;;  %v2362_v50 = vrot.slane %v13244_v4, 2 }
 0x237   : > { %10652 = vmatmul.mubr.msk.f32.gmra.mxu1 %vm1800_vm4, %v13133_v21  ;;  %11031 = vmatprep.mubr.msk.f32.mxu0 %vm12461_vm2, %v17547_v15  ;;  %17630 = vst [vmem:[#allocation46_spill] sm:$0xff] %v13712_v45  ;;  %17631 = vst [vmem:[#allocation29_spill] sm:$0xff] %v13728_v44 }
 0x238   : > { %10654 = vmatprep.mubr.msk.f32.mxu1 %vm12461_vm2, %v17547_v15  ;;  %11206 = vmatpush3.msra.mxu0 %v8901_v6  ;;  %v2360_v6 = vrot.slane %v13236_v8, 2 }
 0x239   : > { %11207 = vmatprep.subr.mxu0 %v17547_v15 }
 0x23a   : > { %11032 = vmatmul.mubr.msk.f32.gmra.mxu0 %vm1800_vm4, %v13712_v45  ;;  %v13753_v43 = vsel %vm2342_vm3, %v2360_v6, %v2362_v50 }
 0x23b   : > { %10655 = vmatmul.mubr.msk.f32.gmra.mxu1 %vm1800_vm4, %v13151_v41  ;;  %11034 = vmatprep.mubr.msk.f32.mxu0 %vm12461_vm2, %v17547_v15  ;;  %17633 = vst [vmem:[#allocation49_spill] sm:$0xff] %v13753_v43 }
 0x23c   : > { %10657 = vmatprep.mubr.msk.f32.mxu1 %vm12461_vm2, %v17547_v15  ;;  %11208 = vmatpush3.msra.mxu0 %v8900_v0  ;;  %v13741_v0 = vsel %vm2342_vm3, %v2358_v54, %v2360_v6  ;;  %v2364_v54 = vrot.slane %v13271_v57, 2  ;;  %v2366_v6 = vrot.slane %v13279_v63, 2 }
 0x23d   : > { %11391 = vmatprep.subr.mxu0 %v17547_v15  ;;  %17632 = vst [vmem:[#allocation12_spill] sm:$0xff] %v13741_v0 }
 0x23e   : > { %11035 = vmatmul.mubr.msk.f32.gmra.mxu0 %vm1800_vm4, %v13728_v44  ;;  %v13765_v48 = vsel %vm2342_vm3, %v2362_v50, %v2364_v54  ;;  %v13777_v61 = vsel %vm2342_vm3, %v2364_v54, %v2366_v6  ;;  %v2368_v50 = vrot.slane %v13305_v14, 2  ;;  %v2370_v54 = vrot.slane %v13313_v13, 2 }
 0x23f   : > { %10658 = vmatmul.mubr.msk.f32.gmra.mxu1 %vm1800_vm4, %v13161_v46  ;;  %11037 = vmatprep.mubr.msk.f32.mxu0 %vm12461_vm2, %v17547_v15  ;;  %17634 = vst [vmem:[#allocation32_spill] sm:$0xff] %v13765_v48  ;;  %17635 = vst [vmem:[#allocation15_spill] sm:$0xff] %v13777_v61 }
 0x240   : > { %10660 = vmatprep.mubr.msk.f32.mxu1 %vm12461_vm2, %v17547_v15  ;;  %v13789_v40 = vsel %vm2342_vm3, %v2366_v6, %v2368_v50  ;;  %v13801_v23 = vsel %vm2342_vm3, %v2368_v50, %v2370_v54  ;;  %v2372_v6 = vrot.slane %v13339_v5, 2  ;;  %v2374_v50 = vrot.slane %v13347_v26, 2 }
 0x241   : > { %17636 = vst [vmem:[#allocation48_spill] sm:$0xff] %v13789_v40  ;;  %17637 = vst [vmem:[#allocation31_spill] sm:$0xff] %v13801_v23 }
 0x242   : > { %11038 = vmatmul.mubr.msk.f32.gmra.mxu0 %vm1800_vm4, %v13741_v0  ;;  %v13813_v10 = vsel %vm2342_vm3, %v2370_v54, %v2372_v6  ;;  %v13825_v24 = vsel %vm2342_vm3, %v2372_v6, %v2374_v50  ;;  %v2376_v54 = vrot.slane %v13373_v59, 2  ;;  %v2378_v6 = vrot.slane %v13381_v1, 2 }
 0x243   : > { %10661 = vmatmul.mubr.msk.f32.gmra.mxu1 %vm1800_vm4, %v13194_v37  ;;  %11040 = vmatprep.mubr.msk.f32.mxu0 %vm12461_vm2, %v17547_v15  ;;  %17638 = vst [vmem:[#allocation14_spill] sm:$0xff] %v13813_v10  ;;  %17639 = vst [vmem:[#allocation52_spill] sm:$0xff] %v13825_v24 }
 0x244   : > { %10663 = vmatprep.mubr.msk.f32.mxu1 %vm12461_vm2, %v17547_v15  ;;  %v13837_v22 = vsel %vm2342_vm3, %v2374_v50, %v2376_v54  ;;  %v13849_v39 = vsel %vm2342_vm3, %v2376_v54, %v2378_v6  ;;  %v2380_v50 = vrot.slane %v13407_v58, 2  ;;  %v2382_v54 = vrot.slane %v13415_v52, 2 }
 0x245   : > { %17640 = vst [vmem:[#allocation34_spill] sm:$0xff] %v13837_v22  ;;  %17641 = vst [vmem:[#allocation17_spill] sm:$0xff] %v13849_v39 }
 0x246   : > { %11041 = vmatmul.mubr.msk.f32.gmra.mxu0 %vm1800_vm4, %v13753_v43  ;;  %v13861_v2 = vsel %vm2342_vm3, %v2378_v6, %v2380_v50  ;;  %v13873_v11 = vsel %vm2342_vm3, %v2380_v50, %v2382_v54  ;;  %v2384_v6 = vrot.slane %v13441_v53, 2  ;;  %v2386_v50 = vrot.slane %v13449_v25, 2 }
 0x247   : > { %10664 = vmatmul.mubr.msk.f32.gmra.mxu1 %vm1800_vm4, %v13202_v62  ;;  %11043 = vmatprep.mubr.msk.f32.mxu0 %vm12461_vm2, %v17547_v15  ;;  %17642 = vst [vmem:[#allocation50_spill] sm:$0xff] %v13861_v2  ;;  %17643 = vst [vmem:[#allocation33_spill] sm:$0xff] %v13873_v11 }
 0x248   : > { %10666 = vmatprep.mubr.msk.f32.mxu1 %vm12461_vm2, %v17547_v15  ;;  %v13885_v32 = vsel %vm2342_vm3, %v2382_v54, %v2384_v6  ;;  %v13899_v54 = vsel %vm2342_vm3, %v2384_v6, %v2386_v50  ;;  %v13915_v6 = vsel %vm2342_vm3, %v2386_v50, %v2388_v56 }
 0x249   : > { %17644 = vst [vmem:[#allocation16_spill] sm:$0xff] %v13885_v32  ;;  %17646 = vst [vmem:[#allocation36_spill] sm:$0xff] %v13899_v54 }
 0x24a   : > { %11044 = vmatmul.mubr.msk.f32.gmra.mxu0 %vm1800_vm4, %v13765_v48  ;;  %17649 = vst [vmem:[#allocation35_spill] sm:$0xff] %v13915_v6 }
 0x24b   : > { %10667 = vmatmul.mubr.msk.f32.gmra.mxu1 %vm1800_vm4, %v13236_v8  ;;  %11046 = vmatprep.mubr.msk.f32.mxu0 %vm12461_vm2, %v17547_v15 }
 0x24c   : > { %10669 = vmatprep.mubr.msk.f32.mxu1 %vm12461_vm2, %v17547_v15 }
 0x24e   : > { %11047 = vmatmul.mubr.msk.f32.gmra.mxu0 %vm1800_vm4, %v13777_v61 }
 0x24f   : > { %10670 = vmatmul.mubr.msk.f32.gmra.mxu1 %vm1800_vm4, %v13244_v4  ;;  %11049 = vmatprep.mubr.msk.f32.mxu0 %vm12461_vm2, %v17547_v15 }
 0x250   : > { %10672 = vmatprep.mubr.msk.f32.mxu1 %vm12461_vm2, %v17547_v15 }
 0x252   : > { %11050 = vmatmul.mubr.msk.f32.gmra.mxu0 %vm1800_vm4, %v13789_v40 }
 0x253   : > { %10673 = vmatmul.mubr.msk.f32.gmra.mxu1 %vm1800_vm4, %v13271_v57  ;;  %11052 = vmatprep.mubr.msk.f32.mxu0 %vm12461_vm2, %v17547_v15 }
 0x254   : > { %10675 = vmatprep.mubr.msk.f32.mxu1 %vm12461_vm2, %v17547_v15 }
 0x256   : > { %11053 = vmatmul.mubr.msk.f32.gmra.mxu0 %vm1800_vm4, %v13801_v23 }
 0x257   : > { %10676 = vmatmul.mubr.msk.f32.gmra.mxu1 %vm1800_vm4, %v13279_v63  ;;  %11055 = vmatprep.mubr.msk.f32.mxu0 %vm12461_vm2, %v17547_v15 }
 0x258   : > { %10678 = vmatprep.mubr.msk.f32.mxu1 %vm12461_vm2, %v17547_v15 }
 0x25a   : > { %11056 = vmatmul.mubr.msk.f32.gmra.mxu0 %vm1800_vm4, %v13813_v10 }
 0x25b   : > { %10679 = vmatmul.mubr.msk.f32.gmra.mxu1 %vm1800_vm4, %v13305_v14  ;;  %11058 = vmatprep.mubr.msk.f32.mxu0 %vm12461_vm2, %v17547_v15 }
 0x25c   : > { %10681 = vmatprep.mubr.msk.f32.mxu1 %vm12461_vm2, %v17547_v15 }
 0x25e   : > { %11059 = vmatmul.mubr.msk.f32.gmra.mxu0 %vm1800_vm4, %v13825_v24 }
 0x25f   : > { %10682 = vmatmul.mubr.msk.f32.gmra.mxu1 %vm1800_vm4, %v13313_v13  ;;  %11061 = vmatprep.mubr.msk.f32.mxu0 %vm12461_vm2, %v17547_v15 }
 0x260   : > { %10684 = vmatprep.mubr.msk.f32.mxu1 %vm12461_vm2, %v17547_v15 }
 0x262   : > { %11062 = vmatmul.mubr.msk.f32.gmra.mxu0 %vm1800_vm4, %v13837_v22 }
 0x263   : > { %10685 = vmatmul.mubr.msk.f32.gmra.mxu1 %vm1800_vm4, %v13339_v5  ;;  %11064 = vmatprep.mubr.msk.f32.mxu0 %vm12461_vm2, %v17547_v15 }
 0x264   : > { %10687 = vmatprep.mubr.msk.f32.mxu1 %vm12461_vm2, %v17547_v15 }
 0x266   : > { %11065 = vmatmul.mubr.msk.f32.gmra.mxu0 %vm1800_vm4, %v13849_v39 }
 0x267   : > { %10688 = vmatmul.mubr.msk.f32.gmra.mxu1 %vm1800_vm4, %v13347_v26  ;;  %11067 = vmatprep.mubr.msk.f32.mxu0 %vm12461_vm2, %v17547_v15 }
 0x268   : > { %10690 = vmatprep.mubr.msk.f32.mxu1 %vm12461_vm2, %v17547_v15 }
 0x26a   : > { %11068 = vmatmul.mubr.msk.f32.gmra.mxu0 %vm1800_vm4, %v13861_v2 }
 0x26b   : > { %10691 = vmatmul.mubr.msk.f32.gmra.mxu1 %vm1800_vm4, %v13373_v59  ;;  %11070 = vmatprep.mubr.msk.f32.mxu0 %vm12461_vm2, %v17547_v15 }
 0x26c   : > { %10693 = vmatprep.mubr.msk.f32.mxu1 %vm12461_vm2, %v17547_v15 }
 0x26e   : > { %11071 = vmatmul.mubr.msk.f32.gmra.mxu0 %vm1800_vm4, %v13873_v11 }
 0x26f   : > { %10694 = vmatmul.mubr.msk.f32.gmra.mxu1 %vm1800_vm4, %v13381_v1  ;;  %11073 = vmatprep.mubr.msk.f32.mxu0 %vm12461_vm2, %v17547_v15 }
 0x270   : > { %10696 = vmatprep.mubr.msk.f32.mxu1 %vm12461_vm2, %v17547_v15 }
 0x272   : > { %11074 = vmatmul.mubr.msk.f32.gmra.mxu0 %vm1800_vm4, %v13885_v32  ;;  %v13890_v60 = vpop.f32.mrf.mxu1 }
 0x273   : > { %17645 = vst [vmem:[#allocation54_spill] sm:$0xff] %v13890_v60  ;;  %10697 = vmatmul.mubr.msk.f32.gmra.mxu1 %vm1800_vm4, %v13407_v58  ;;  %11076 = vmatprep.mubr.msk.f32.mxu0 %vm12461_vm2, %v17547_v15 }
 0x274   : > { %10699 = vmatprep.mubr.msk.f32.mxu1 %vm12461_vm2, %v17547_v15  ;;  %v10546_v18 = vpop.f32.mrf.mxu1 }
 0x276   : > { %v13901_v27 = vpop.f32.mrf.mxu0  ;;  %11077 = vmatmul.mubr.msk.f32.gmra.mxu0 %vm1800_vm4, %v13899_v54  ;;  %v13905_v31 = vpop.f32.mrf.mxu1 }
 0x277   : > { %17647 = vst [vmem:[#allocation19_spill] sm:$0xff] %v13901_v27  ;;  %17648 = vst [vmem:[#allocation53_spill] sm:$0xff] %v13905_v31  ;;  %10700 = vmatmul.mubr.msk.f32.gmra.mxu1 %vm1800_vm4, %v13415_v52  ;;  %11079 = vmatprep.mubr.msk.f32.mxu0 %vm12461_vm2, %v17547_v15  ;;  %v2390_v27 = vrot.slane %v13483_v17, 2 }
 0x278   : > { %v10831_v34 = vpop.f32.mrf.mxu0  ;;  %10702 = vmatprep.mubr.msk.f32.mxu1 %vm12461_vm2, %v17547_v15  ;;  %v10549_v18 = vpop.f32.mrf.mxu1 }
 0x279   : > { %v13931_v18 = vsel %vm2342_vm3, %v2388_v56, %v2390_v27 }
 0x27a   : > { %v13918_v49 = vpop.f32.mrf.mxu0  ;;  %11080 = vmatmul.mubr.msk.f32.gmra.mxu0 %vm1800_vm4, %v13915_v6  ;;  %17652 = vst [vmem:[#allocation37_spill] sm:$0xff] %v13931_v18 }
 0x27b   : > { %17650 = vst [vmem:[#allocation18_spill] sm:$0xff] %v13918_v49  ;;  %v13922_v31 = vpop.f32.mrf.mxu1  ;;  %10703 = vmatmul.mubr.msk.f32.gmra.mxu1 %vm1800_vm4, %v13441_v53  ;;  %11082 = vmatprep.mubr.msk.f32.mxu0 %vm12461_vm2, %v17547_v15 }
 0x27c   : > { %17651 = vst [vmem:[#allocation51_spill] sm:$0xff] %v13922_v31  ;;  %v10834_v34 = vpop.f32.mrf.mxu0  ;;  %10705 = vmatprep.mubr.msk.f32.mxu1 %vm12461_vm2, %v17547_v15 }
 0x27d   : > { %v10552_v50 = vpop.f32.mrf.mxu1  ;;  %v2392_v34 = vrot.slane %v13509_v12, 2 }
 0x27e   : > { %v13933_v49 = vpop.f32.mrf.mxu0  ;;  %11083 = vmatmul.mubr.msk.f32.gmra.mxu0 %vm1800_vm4, %v13931_v18 }
 0x27f   : > { %17653 = vst [vmem:[#allocation20_spill] sm:$0xff] %v13933_v49  ;;  %v13937_v31 = vpop.f32.mrf.mxu1  ;;  %10706 = vmatmul.mubr.msk.f32.gmra.mxu1 %vm1800_vm4, %v13449_v25  ;;  %11085 = vmatprep.mubr.msk.f32.mxu0 %vm12461_vm2, %v17547_v15  ;;  %v13947_v50 = vsel %vm2342_vm3, %v2390_v27, %v2392_v34  ;;  %v2394_v49 = vrot.slane %v13517_v16, 2 }
 0x280   : > { %17654 = vst [vmem:[#allocation55_spill] sm:$0xff] %v13937_v31  ;;  %v10837_v60 = vpop.f32.mrf.mxu0  ;;  %10708 = vmatprep.mubr.msk.f32.mxu1 %vm12461_vm2, %v17547_v15  ;;  %17655 = vst [vmem:[#allocation38_spill] sm:$0xff] %v13947_v50 }
 0x281   : > { %v10555_v56 = vpop.f32.mrf.mxu1 }
 0x282   : > { %v13950_v47 = vpop.f32.mrf.mxu0  ;;  %11086 = vmatmul.mubr.msk.f32.gmra.mxu0 %vm1800_vm4, %v13947_v50  ;;  %v13963_v56 = vsel %vm2342_vm3, %v2392_v34, %v2394_v49 }
 0x283   : > { %17656 = vst [vmem:[#allocation21_spill] sm:$0xff] %v13950_v47  ;;  %v13954_v31 = vpop.f32.mrf.mxu1  ;;  %10709 = vmatmul.mubr.msk.f32.gmra.mxu1 %vm1800_vm4, %v13475_v29  ;;  %11088 = vmatprep.mubr.msk.f32.mxu0 %vm12461_vm2, %v17547_v15  ;;  %17658 = vst [vmem:[#allocation70_spill] sm:$0xff] %v13963_v56 }
 0x284   : > { %17657 = vst [vmem:[#allocation69_spill] sm:$0xff] %v13954_v31  ;;  %v10840_v60 = vpop.f32.mrf.mxu0  ;;  %10711 = vmatprep.mubr.msk.f32.mxu1 %vm12461_vm2, %v17547_v15 }
 0x285   : > { %v10558_v27 = vpop.f32.mrf.mxu1  ;;  %v2396_v60 = vrot.slane %v13542_v33, 2 }
 0x286   : > { %v13965_v47 = vpop.f32.mrf.mxu0  ;;  %11089 = vmatmul.mubr.msk.f32.gmra.mxu0 %vm1800_vm4, %v13963_v56 }
 0x287   : > { %17659 = vst [vmem:[#allocation71_spill] sm:$0xff] %v13965_v47  ;;  %v13969_v31 = vpop.f32.mrf.mxu1  ;;  %10712 = vmatmul.mubr.msk.f32.gmra.mxu1 %vm1800_vm4, %v13483_v17  ;;  %11091 = vmatprep.mubr.msk.f32.mxu0 %vm12461_vm2, %v17547_v15  ;;  %v13979_v27 = vsel %vm2342_vm3, %v2394_v49, %v2396_v60 }
 0x288   : > { %17660 = vst [vmem:[#allocation72_spill] sm:$0xff] %v13969_v31  ;;  %v10843_v28 = vpop.f32.mrf.mxu0  ;;  %10714 = vmatprep.mubr.msk.f32.mxu1 %vm12461_vm2, %v17547_v15  ;;  %17661 = vst [vmem:[#allocation73_spill] sm:$0xff] %v13979_v27 }
 0x289   : > { %v10561_v34 = vpop.f32.mrf.mxu1  ;;  %v2398_v28 = vrot.slane %v13557_v30, 2 }
 0x28a   : > { %v13981_v47 = vpop.f32.mrf.mxu0  ;;  %11092 = vmatmul.mubr.msk.f32.gmra.mxu0 %vm1800_vm4, %v13979_v27 }
 0x28b   : > { %17662 = vst [vmem:[#allocation74_spill] sm:$0xff] %v13981_v47  ;;  %v13985_v31 = vpop.f32.mrf.mxu1  ;;  %10715 = vmatmul.mubr.msk.f32.gmra.mxu1 %vm1800_vm4, %v13509_v12  ;;  %11094 = vmatprep.mubr.msk.f32.mxu0 %vm12461_vm2, %v17547_v15  ;;  %v13995_v34 = vsel %vm2342_vm3, %v2396_v60, %v2398_v28 }
 0x28c   : > { %17663 = vst [vmem:[#allocation75_spill] sm:$0xff] %v13985_v31  ;;  %v10846_v20 = vpop.f32.mrf.mxu0  ;;  %10717 = vmatprep.mubr.msk.f32.mxu1 %vm12461_vm2, %v17547_v15  ;;  %17664 = vst [vmem:[#allocation76_spill] sm:$0xff] %v13995_v34 }
 0x28d   : > { %v10564_v49 = vpop.f32.mrf.mxu1  ;;  %v2400_v20 = vrot.slane %v13068_v7, 2 }
 0x28e   : > { %v13997_v47 = vpop.f32.mrf.mxu0  ;;  %11095 = vmatmul.mubr.msk.f32.gmra.mxu0 %vm1800_vm4, %v13995_v34 }
 0x28f   : > { %17665 = vst [vmem:[#allocation77_spill] sm:$0xff] %v13997_v47  ;;  %v14001_v31 = vpop.f32.mrf.mxu1  ;;  %10718 = vmatmul.mubr.msk.f32.gmra.mxu1 %vm1800_vm4, %v13517_v16  ;;  %11097 = vmatprep.mubr.msk.f32.mxu0 %vm12461_vm2, %v17547_v15  ;;  %v14011_v49 = vsel %vm2342_vm3, %v2398_v28, %v2400_v20  ;;  %v3148_v47 = vrot.slane %v13582_v3, 2 }
 0x290   : > { %17666 = vst [vmem:[#allocation78_spill] sm:$0xff] %v14001_v31  ;;  %v10849_v27 = vpop.f32.mrf.mxu0  ;;  %10720 = vmatprep.mubr.msk.f32.mxu1 %vm12461_vm2, %v17547_v15  ;;  %17667 = vst [vmem:[#allocation79_spill] sm:$0xff] %v14011_v49 }
 0x291   : > { %v10567_v60 = vpop.f32.mrf.mxu1 }
 0x292   : > { %v14014_v34 = vpop.f32.mrf.mxu0  ;;  %11098 = vmatmul.mubr.msk.f32.gmra.mxu0 %vm1800_vm4, %v14011_v49  ;;  %v14027_v60 = vsel %vm2342_vm3, %v2400_v20, %v3148_v47 }
 0x293   : > { %17668 = vst [vmem:[#allocation80_spill] sm:$0xff] %v14014_v34  ;;  %v14018_v31 = vpop.f32.mrf.mxu1  ;;  %10721 = vmatmul.mubr.msk.f32.gmra.mxu1 %vm1800_vm4, %v13542_v33  ;;  %11100 = vmatprep.mubr.msk.f32.mxu0 %vm12461_vm2, %v17547_v15  ;;  %17670 = vst [vmem:[#allocation82_spill] sm:$0xff] %v14027_v60  ;;  %v2343_v34 = vrot.slane %v13093_v42, 2  ;;  %v8804_v42 = vld [vmem:[%s17409_s2 + $0x78] sm:$0xff] }
 0x294   : > { %17669 = vst [vmem:[#allocation81_spill] sm:$0xff] %v14018_v31  ;;  %v10852_v27 = vpop.f32.mrf.mxu0  ;;  %10723 = vmatprep.mubr.msk.f32.mxu1 %vm12461_vm2, %v17547_v15 }
 0x295   : > { %v10570_v28 = vpop.f32.mrf.mxu1 }
 0x296   : > { %v14030_v3 = vpop.f32.mrf.mxu0  ;;  %11101 = vmatmul.mubr.msk.f32.gmra.mxu0 %vm1800_vm4, %v14027_v60  ;;  %v17673_v28 = vrot.slane %v13073_v36, 2 }
 0x297   : > { %17671 = vst [vmem:[#allocation83_spill] sm:$0xff] %v14030_v3  ;;  %v14034_v31 = vpop.f32.mrf.mxu1  ;;  %10724 = vmatmul.mubr.msk.f32.gmra.mxu1 %vm1800_vm4, %v13557_v30  ;;  %11103 = vmatprep.mubr.msk.f32.mxu0 %vm12461_vm2, %v17547_v15  ;;  %v17675_v3 = vrot.slane %v13089_v19, 2 }
 0x298   : > { %17672 = vst [vmem:[#allocation84_spill] sm:$0xff] %v14034_v31  ;;  %v10855_v27 = vpop.f32.mrf.mxu0  ;;  %10734 = vmatprep.mubr.msk.f32.mxu1 %vm12461_vm2, %v17547_v15  ;;  %v14048_v60 = vsel %vm2342_vm3, %v3148_v47, %v17673_v28  ;;  %v8803_v47 = vld [vmem:[%s17409_s2 + $0x70] sm:$0xff] }
 0x299   : > { %v10573_v20 = vpop.f32.mrf.mxu1  ;;  %17674 = vst [vmem:[#allocation85_spill] sm:$0xff] %v14048_v60  ;;  %v2345_v31 = vsel %vm2342_vm3, %v2343_v34, %v17675_v3 }
 0x29a   : > { %v14053_v49 = vpop.f32.mrf.mxu0  ;;  %11104 = vmatmul.mubr.msk.f32.gmra.mxu0 %vm1800_vm4, %v14048_v60 }
 0x29b   : > { %17676 = vst [vmem:[#allocation86_spill] sm:$0xff] %v14053_v49  ;;  %v14057_v27 = vpop.f32.mrf.mxu1  ;;  %10735 = vmatmul.mubr.msk.f32.vlgmr.msra.gmra.mxu1 %vm1800_vm4, %v2345_v31  ;;  %11209 = vmatprep.mubr.msk.f32.mxu0 %vm12461_vm2, %v17547_v15  ;;  %v8802_v31 = vld [vmem:[%s17409_s2 + $0x68] sm:$0xff] }
 0x29c   : > { %10917 = vmatpush3.msra.mxu1 %v8804_v42  ;;  %v10858_v19 = vpop.f32.mrf.mxu0  ;;  %10737 = vmatprep.mubr.msk.f32.mxu1 %vm12461_vm2, %v17547_v15 }
 0x29d   : > { %v10576_v3 = vpop.f32.mrf.mxu1  ;;  %10918 = vmatprep.subr.mxu1 %v17547_v15 }
 0x29e   : > { %v14068_v34 = vpop.f32.mrf.mxu0  ;;  %11210 = vmatmul.mubr.msk.f32.vlgmr.msra.gmra.mxu0 %vm1800_vm4, %v13133_v21  ;;  %10919 = vmatpush3.msra.mxu1 %v8803_v47  ;;  %v8801_v47 = vld [vmem:[%s17409_s2 + $0x60] sm:$0xff] }
 0x29f   : > { %17677 = vst [vmem:[#allocation87_spill] sm:$0xff] %v14068_v34  ;;  %v14075_v20 = vpop.f32.mrf.mxu1  ;;  %10738 = vmatmul.mubr.msk.f32.gmra.mxu1 %vm1800_vm4, %v13147_v51  ;;  %11212 = vmatprep.mubr.msk.f32.mxu0 %vm12461_vm2, %v17547_v15 }
 0x2a0   : > { %v10861_v42 = vpop.f32.mrf.mxu0  ;;  %10740 = vmatprep.mubr.msk.f32.mxu1 %vm12461_vm2, %v17547_v15  ;;  %10920 = vmatprep.subr.mxu1 %v17547_v15 }
 0x2a1   : > { %v10579_v28 = vpop.f32.mrf.mxu1  ;;  %10921 = vmatpush3.msra.mxu1 %v8802_v31 }
 0x2a2   : > { %v14087_v19 = vpop.f32.mrf.mxu0  ;;  %11213 = vmatmul.mubr.msk.f32.gmra.mxu0 %vm1800_vm4, %v13151_v41  ;;  %10922 = vmatprep.subr.mxu1 %v17547_v15 }
 0x2a3   : > { %17678 = vst [vmem:[#allocation88_spill] sm:$0xff] %v14087_v19  ;;  %v14092_v51 = vpop.f32.mrf.mxu1  ;;  %10741 = vmatmul.mubr.msk.f32.gmra.mxu1 %vm1800_vm4, %v13643_v35  ;;  %11215 = vmatprep.mubr.msk.f32.mxu0 %vm12461_vm2, %v17547_v15 }
 0x2a4   : > { %v10864_v3 = vpop.f32.mrf.mxu0  ;;  %10743 = vmatprep.mubr.msk.f32.mxu1 %vm12461_vm2, %v17547_v15  ;;  %10923 = vmatpush3.msra.mxu1 %v8801_v47 }
 0x2a5   : > { %v10582_v31 = vpop.f32.mrf.mxu1  ;;  %11106 = vmatprep.subr.mxu1 %v17547_v15 }
 0x2a6   : > { %v14101_v42 = vpop.f32.mrf.mxu0  ;;  %11216 = vmatmul.mubr.msk.f32.gmra.mxu0 %vm1800_vm4, %v13161_v46 }
 0x2a7   : > { %17679 = vst [vmem:[#allocation89_spill] sm:$0xff] %v14101_v42  ;;  %v14105_v28 = vpop.f32.mrf.mxu1  ;;  %10744 = vmatmul.mubr.msk.f32.gmra.mxu1 %vm1800_vm4, %v13663_v55  ;;  %11218 = vmatprep.mubr.msk.f32.mxu0 %vm12461_vm2, %v17547_v15 }
 0x2a8   : > { %v10867_v35 = vpop.f32.mrf.mxu0  ;;  %10746 = vmatprep.mubr.msk.f32.mxu1 %vm12461_vm2, %v17547_v15 }
 0x2a9   : > { %v10585_v47 = vpop.f32.mrf.mxu1 }
 0x2aa   : > { %v14113_v3 = vpop.f32.mrf.mxu0  ;;  %11219 = vmatmul.mubr.msk.f32.gmra.mxu0 %vm1800_vm4, %v13194_v37 }
 0x2ab   : > { %17680 = vst [vmem:[#allocation90_spill] sm:$0xff] %v14113_v3  ;;  %v14117_v31 = vpop.f32.mrf.mxu1  ;;  %10747 = vmatmul.mubr.msk.f32.gmra.mxu1 %vm1800_vm4, %v13679_v38  ;;  %11221 = vmatprep.mubr.msk.f32.mxu0 %vm12461_vm2, %v17547_v15 }
 0x2ac   : > { %v10870_v55 = vpop.f32.mrf.mxu0  ;;  %10749 = vmatprep.mubr.msk.f32.mxu1 %vm12461_vm2, %v17547_v15 }
 0x2ad   : > { %v10588_v35 = vpop.f32.mrf.mxu1 }
 0x2ae   : > { %v14125_v60 = vpop.f32.mrf.mxu0  ;;  %11222 = vmatmul.mubr.msk.f32.gmra.mxu0 %vm1800_vm4, %v13202_v62 }
 0x2af   : > { %17681 = vst [vmem:[#allocation91_spill] sm:$0xff] %v14125_v60  ;;  %v14129_v47 = vpop.f32.mrf.mxu1  ;;  %10750 = vmatmul.mubr.msk.f32.gmra.mxu1 %vm1800_vm4, %v13696_v9  ;;  %11224 = vmatprep.mubr.msk.f32.mxu0 %vm12461_vm2, %v17547_v15 }
 0x2b0   : > { %v10873_v3 = vpop.f32.mrf.mxu0  ;;  %10752 = vmatprep.mubr.msk.f32.mxu1 %vm12461_vm2, %v17547_v15 }
 0x2b1   : > { %v10591_v55 = vpop.f32.mrf.mxu1 }
 0x2b2   : > { %v14137_v42 = vpop.f32.mrf.mxu0  ;;  %11225 = vmatmul.mubr.msk.f32.gmra.mxu0 %vm1800_vm4, %v13236_v8 }
 0x2b3   : > { %17682 = vst [vmem:[#allocation92_spill] sm:$0xff] %v14137_v42  ;;  %v14141_v35 = vpop.f32.mrf.mxu1  ;;  %10753 = vmatmul.mubr.msk.f32.gmra.mxu1 %vm1800_vm4, %v13712_v45  ;;  %11227 = vmatprep.mubr.msk.f32.mxu0 %vm12461_vm2, %v17547_v15 }
 0x2b4   : > { %v10876_v60 = vpop.f32.mrf.mxu0  ;;  %10755 = vmatprep.mubr.msk.f32.mxu1 %vm12461_vm2, %v17547_v15 }
 0x2b5   : > { %v10594_v3 = vpop.f32.mrf.mxu1 }
 0x2b6   : > { %v14149_v19 = vpop.f32.mrf.mxu0  ;;  %11228 = vmatmul.mubr.msk.f32.gmra.mxu0 %vm1800_vm4, %v13244_v4 }
 0x2b7   : > { %17683 = vst [vmem:[#allocation93_spill] sm:$0xff] %v14149_v19  ;;  %v14153_v55 = vpop.f32.mrf.mxu1  ;;  %10756 = vmatmul.mubr.msk.f32.gmra.mxu1 %vm1800_vm4, %v13728_v44  ;;  %11230 = vmatprep.mubr.msk.f32.mxu0 %vm12461_vm2, %v17547_v15 }
 0x2b8   : > { %v10879_v42 = vpop.f32.mrf.mxu0  ;;  %10758 = vmatprep.mubr.msk.f32.mxu1 %vm12461_vm2, %v17547_v15 }
 0x2b9   : > { %v10597_v60 = vpop.f32.mrf.mxu1 }
 0x2ba   : > { %v14161_v45 = vpop.f32.mrf.mxu0  ;;  %11231 = vmatmul.mubr.msk.f32.gmra.mxu0 %vm1800_vm4, %v13271_v57 }
 0x2bb   : > { %17684 = vst [vmem:[#allocation94_spill] sm:$0xff] %v14161_v45  ;;  %v14165_v3 = vpop.f32.mrf.mxu1  ;;  %10759 = vmatmul.mubr.msk.f32.gmra.mxu1 %vm1800_vm4, %v13741_v0  ;;  %11233 = vmatprep.mubr.msk.f32.mxu0 %vm12461_vm2, %v17547_v15 }
 0x2bc   : > { %v10882_v19 = vpop.f32.mrf.mxu0  ;;  %10761 = vmatprep.mubr.msk.f32.mxu1 %vm12461_vm2, %v17547_v15 }
 0x2bd   : > { %v10600_v42 = vpop.f32.mrf.mxu1 }
 0x2be   : > { %v14173_v44 = vpop.f32.mrf.mxu0  ;;  %11234 = vmatmul.mubr.msk.f32.gmra.mxu0 %vm1800_vm4, %v13279_v63 }
 0x2bf   : > { %17685 = vst [vmem:[#allocation95_spill] sm:$0xff] %v14173_v44  ;;  %v14177_v60 = vpop.f32.mrf.mxu1  ;;  %10762 = vmatmul.mubr.msk.f32.gmra.mxu1 %vm1800_vm4, %v13753_v43  ;;  %11236 = vmatprep.mubr.msk.f32.mxu0 %vm12461_vm2, %v17547_v15 }
 0x2c0   : > { %v10885_v45 = vpop.f32.mrf.mxu0  ;;  %10764 = vmatprep.mubr.msk.f32.mxu1 %vm12461_vm2, %v17547_v15 }
 0x2c1   : > { %v10603_v19 = vpop.f32.mrf.mxu1 }
 0x2c2   : > { %v14185_v0 = vpop.f32.mrf.mxu0  ;;  %11237 = vmatmul.mubr.msk.f32.gmra.mxu0 %vm1800_vm4, %v13305_v14 }
 0x2c3   : > { %17686 = vst [vmem:[#allocation96_spill] sm:$0xff] %v14185_v0  ;;  %v14189_v42 = vpop.f32.mrf.mxu1  ;;  %10765 = vmatmul.mubr.msk.f32.gmra.mxu1 %vm1800_vm4, %v13765_v48  ;;  %11239 = vmatprep.mubr.msk.f32.mxu0 %vm12461_vm2, %v17547_v15 }
 0x2c4   : > { %v10888_v44 = vpop.f32.mrf.mxu0  ;;  %10767 = vmatprep.mubr.msk.f32.mxu1 %vm12461_vm2, %v17547_v15 }
 0x2c5   : > { %v10606_v45 = vpop.f32.mrf.mxu1 }
 0x2c6   : > { %v14197_v43 = vpop.f32.mrf.mxu0  ;;  %11240 = vmatmul.mubr.msk.f32.gmra.mxu0 %vm1800_vm4, %v13313_v13 }
 0x2c7   : > { %17687 = vst [vmem:[#allocation97_spill] sm:$0xff] %v14197_v43  ;;  %v14201_v19 = vpop.f32.mrf.mxu1  ;;  %10768 = vmatmul.mubr.msk.f32.gmra.mxu1 %vm1800_vm4, %v13777_v61  ;;  %11242 = vmatprep.mubr.msk.f32.mxu0 %vm12461_vm2, %v17547_v15 }
 0x2c8   : > { %v10891_v0 = vpop.f32.mrf.mxu0  ;;  %10770 = vmatprep.mubr.msk.f32.mxu1 %vm12461_vm2, %v17547_v15 }
 0x2c9   : > { %v10609_v44 = vpop.f32.mrf.mxu1 }
 0x2ca   : > { %v14209_v48 = vpop.f32.mrf.mxu0  ;;  %11243 = vmatmul.mubr.msk.f32.gmra.mxu0 %vm1800_vm4, %v13339_v5 }
 0x2cb   : > { %17688 = vst [vmem:[#allocation98_spill] sm:$0xff] %v14209_v48  ;;  %v14213_v45 = vpop.f32.mrf.mxu1  ;;  %10771 = vmatmul.mubr.msk.f32.gmra.mxu1 %vm1800_vm4, %v13789_v40  ;;  %11245 = vmatprep.mubr.msk.f32.mxu0 %vm12461_vm2, %v17547_v15 }
 0x2cc   : > { %v10894_v43 = vpop.f32.mrf.mxu0  ;;  %10773 = vmatprep.mubr.msk.f32.mxu1 %vm12461_vm2, %v17547_v15 }
 0x2cd   : > { %v10612_v0 = vpop.f32.mrf.mxu1 }
 0x2ce   : > { %v14221_v61 = vpop.f32.mrf.mxu0  ;;  %11246 = vmatmul.mubr.msk.f32.gmra.mxu0 %vm1800_vm4, %v13347_v26 }
 0x2cf   : > { %17689 = vst [vmem:[#allocation99_spill] sm:$0xff] %v14221_v61  ;;  %v14225_v44 = vpop.f32.mrf.mxu1  ;;  %10774 = vmatmul.mubr.msk.f32.gmra.mxu1 %vm1800_vm4, %v13801_v23  ;;  %11248 = vmatprep.mubr.msk.f32.mxu0 %vm12461_vm2, %v17547_v15 }
 0x2d0   : > { %v10897_v48 = vpop.f32.mrf.mxu0  ;;  %10776 = vmatprep.mubr.msk.f32.mxu1 %vm12461_vm2, %v17547_v15 }
 0x2d1   : > { %v10615_v43 = vpop.f32.mrf.mxu1 }
 0x2d2   : > { %v14233_v40 = vpop.f32.mrf.mxu0  ;;  %11249 = vmatmul.mubr.msk.f32.gmra.mxu0 %vm1800_vm4, %v13373_v59 }
 0x2d3   : > { %17690 = vst [vmem:[#allocation100_spill] sm:$0xff] %v14233_v40  ;;  %v14237_v0 = vpop.f32.mrf.mxu1  ;;  %10777 = vmatmul.mubr.msk.f32.gmra.mxu1 %vm1800_vm4, %v13813_v10  ;;  %11251 = vmatprep.mubr.msk.f32.mxu0 %vm12461_vm2, %v17547_v15 }
 0x2d4   : > { %v10900_v61 = vpop.f32.mrf.mxu0  ;;  %10779 = vmatprep.mubr.msk.f32.mxu1 %vm12461_vm2, %v17547_v15 }
 0x2d5   : > { %v10618_v48 = vpop.f32.mrf.mxu1 }
 0x2d6   : > { %v14245_v23 = vpop.f32.mrf.mxu0  ;;  %11252 = vmatmul.mubr.msk.f32.gmra.mxu0 %vm1800_vm4, %v13381_v1 }
 0x2d7   : > { %17691 = vst [vmem:[#allocation101_spill] sm:$0xff] %v14245_v23  ;;  %v14249_v43 = vpop.f32.mrf.mxu1  ;;  %10780 = vmatmul.mubr.msk.f32.gmra.mxu1 %vm1800_vm4, %v13825_v24  ;;  %11254 = vmatprep.mubr.msk.f32.mxu0 %vm12461_vm2, %v17547_v15 }
 0x2d8   : > { %v10903_v40 = vpop.f32.mrf.mxu0  ;;  %10782 = vmatprep.mubr.msk.f32.mxu1 %vm12461_vm2, %v17547_v15 }
 0x2d9   : > { %v10621_v61 = vpop.f32.mrf.mxu1 }
 0x2da   : > { %v14257_v10 = vpop.f32.mrf.mxu0  ;;  %11255 = vmatmul.mubr.msk.f32.gmra.mxu0 %vm1800_vm4, %v13407_v58 }
 0x2db   : > { %17692 = vst [vmem:[#allocation102_spill] sm:$0xff] %v14257_v10  ;;  %v14261_v48 = vpop.f32.mrf.mxu1  ;;  %10783 = vmatmul.mubr.msk.f32.gmra.mxu1 %vm1800_vm4, %v13837_v22  ;;  %11257 = vmatprep.mubr.msk.f32.mxu0 %vm12461_vm2, %v17547_v15 }
 0x2dc   : > { %17693 = vst [vmem:[#allocation103_spill] sm:$0xff] %v14261_v48  ;;  %v10906_v23 = vpop.f32.mrf.mxu0  ;;  %10785 = vmatprep.mubr.msk.f32.mxu1 %vm12461_vm2, %v17547_v15 }
 0x2dd   : > { %v10624_v40 = vpop.f32.mrf.mxu1 }
 0x2de   : > { %v14269_v24 = vpop.f32.mrf.mxu0  ;;  %11258 = vmatmul.mubr.msk.f32.gmra.mxu0 %vm1800_vm4, %v13415_v52 }
 0x2df   : > { %17694 = vst [vmem:[#allocation104_spill] sm:$0xff] %v14269_v24  ;;  %v14273_v61 = vpop.f32.mrf.mxu1  ;;  %10786 = vmatmul.mubr.msk.f32.gmra.mxu1 %vm1800_vm4, %v13849_v39  ;;  %11260 = vmatprep.mubr.msk.f32.mxu0 %vm12461_vm2, %v17547_v15 }
 0x2e0   : > { %17695 = vst [vmem:[#allocation105_spill] sm:$0xff] %v14273_v61  ;;  %v10909_v10 = vpop.f32.mrf.mxu0  ;;  %10788 = vmatprep.mubr.msk.f32.mxu1 %vm12461_vm2, %v17547_v15  ;;  %v17716_v61 = vld [vmem:[#allocation61_spill] sm:$0xff] }
 0x2e1   : > { %v10627_v23 = vpop.f32.mrf.mxu1 }
 0x2e2   : > { %v14281_v22 = vpop.f32.mrf.mxu0  ;;  %11261 = vmatmul.mubr.msk.f32.gmra.mxu0 %vm1800_vm4, %v13441_v53 }
 0x2e3   : > { %17696 = vst [vmem:[#allocation106_spill] sm:$0xff] %v14281_v22  ;;  %v14285_v40 = vpop.f32.mrf.mxu1  ;;  %10789 = vmatmul.mubr.msk.f32.gmra.mxu1 %vm1800_vm4, %v13861_v2  ;;  %11263 = vmatprep.mubr.msk.f32.mxu0 %vm12461_vm2, %v17547_v15 }
 0x2e4   : > { %17697 = vst [vmem:[#allocation107_spill] sm:$0xff] %v14285_v40  ;;  %v10912_v24 = vpop.f32.mrf.mxu0  ;;  %10791 = vmatprep.mubr.msk.f32.mxu1 %vm12461_vm2, %v17547_v15 }
 0x2e5   : > { %v10630_v10 = vpop.f32.mrf.mxu1 }
 0x2e6   : > { %v14293_v39 = vpop.f32.mrf.mxu0  ;;  %11264 = vmatmul.mubr.msk.f32.gmra.mxu0 %vm1800_vm4, %v13449_v25 }
 0x2e7   : > { %17698 = vst [vmem:[#allocation108_spill] sm:$0xff] %v14293_v39  ;;  %v14297_v23 = vpop.f32.mrf.mxu1  ;;  %10792 = vmatmul.mubr.msk.f32.gmra.mxu1 %vm1800_vm4, %v13873_v11  ;;  %11266 = vmatprep.mubr.msk.f32.mxu0 %vm12461_vm2, %v17547_v15 }
 0x2e8   : > { %v10915_v22 = vpop.f32.mrf.mxu0  ;;  %10794 = vmatprep.mubr.msk.f32.mxu1 %vm12461_vm2, %v17547_v15 }
 0x2e9   : > { %v10641_v24 = vpop.f32.mrf.mxu1 }
 0x2ea   : > { %v14305_v2 = vpop.f32.mrf.mxu0  ;;  %11267 = vmatmul.mubr.msk.f32.gmra.mxu0 %vm1800_vm4, %v13475_v29 }
 0x2eb   : > { %17699 = vst [vmem:[#allocation109_spill] sm:$0xff] %v14305_v2  ;;  %v14309_v10 = vpop.f32.mrf.mxu1  ;;  %10795 = vmatmul.mubr.msk.f32.gmra.mxu1 %vm1800_vm4, %v13885_v32  ;;  %11269 = vmatprep.mubr.msk.f32.mxu0 %vm12461_vm2, %v17547_v15 }
 0x2ec   : > { %v11021_v39 = vpop.f32.mrf.mxu0  ;;  %10797 = vmatprep.mubr.msk.f32.mxu1 %vm12461_vm2, %v17547_v15 }
 0x2ed   : > { %v10644_v22 = vpop.f32.mrf.mxu1 }
 0x2ee   : > { %v14317_v11 = vpop.f32.mrf.mxu0  ;;  %11270 = vmatmul.mubr.msk.f32.gmra.mxu0 %vm1800_vm4, %v13483_v17 }
 0x2ef   : > { %17700 = vst [vmem:[#allocation110_spill] sm:$0xff] %v14317_v11  ;;  %v14321_v24 = vpop.f32.mrf.mxu1  ;;  %10798 = vmatmul.mubr.msk.f32.gmra.mxu1 %vm1800_vm4, %v13899_v54  ;;  %11272 = vmatprep.mubr.msk.f32.mxu0 %vm12461_vm2, %v17547_v15 }
 0x2f0   : > { %v11024_v32 = vpop.f32.mrf.mxu0  ;;  %10800 = vmatprep.mubr.msk.f32.mxu1 %vm12461_vm2, %v17547_v15 }
 0x2f1   : > { %v10647_v39 = vpop.f32.mrf.mxu1 }
 0x2f2   : > { %v14329_v9 = vpop.f32.mrf.mxu0  ;;  %11273 = vmatmul.mubr.msk.f32.gmra.mxu0 %vm1800_vm4, %v13509_v12 }
 0x2f3   : > { %17701 = vst [vmem:[#allocation111_spill] sm:$0xff] %v14329_v9  ;;  %v14333_v22 = vpop.f32.mrf.mxu1  ;;  %10801 = vmatmul.mubr.msk.f32.gmra.mxu1 %vm1800_vm4, %v13915_v6  ;;  %11275 = vmatprep.mubr.msk.f32.mxu0 %vm12461_vm2, %v17547_v15  ;;  %v17709_v9 = vld [vmem:[#allocation76_spill] sm:$0xff] }
 0x2f4   : > { %v11027_v54 = vpop.f32.mrf.mxu0  ;;  %10803 = vmatprep.mubr.msk.f32.mxu1 %vm12461_vm2, %v17547_v15 }
 0x2f5   : > { %v10650_v32 = vpop.f32.mrf.mxu1 }
 0x2f6   : > { %v14341_v34 = vpop.f32.mrf.mxu0  ;;  %11276 = vmatmul.mubr.msk.f32.gmra.mxu0 %vm1800_vm4, %v13517_v16 }
 0x2f7   : > { %17702 = vst [vmem:[#allocation112_spill] sm:$0xff] %v14341_v34  ;;  %v14345_v39 = vpop.f32.mrf.mxu1  ;;  %10804 = vmatmul.mubr.msk.f32.gmra.mxu1 %vm1800_vm4, %v13931_v18  ;;  %11278 = vmatprep.mubr.msk.f32.mxu0 %vm12461_vm2, %v17547_v15 }
 0x2f8   : > { %v11030_v6 = vpop.f32.mrf.mxu0  ;;  %10806 = vmatprep.mubr.msk.f32.mxu1 %vm12461_vm2, %v17547_v15 }
 0x2f9   : > { %v10653_v54 = vpop.f32.mrf.mxu1 }
 0x2fa   : > { %v14353_v38 = vpop.f32.mrf.mxu0  ;;  %11279 = vmatmul.mubr.msk.f32.gmra.mxu0 %vm1800_vm4, %v13542_v33 }
 0x2fb   : > { %17703 = vst [vmem:[#allocation113_spill] sm:$0xff] %v14353_v38  ;;  %v14357_v32 = vpop.f32.mrf.mxu1  ;;  %10807 = vmatmul.mubr.msk.f32.gmra.mxu1 %vm1800_vm4, %v13947_v50  ;;  %11281 = vmatprep.mubr.msk.f32.mxu0 %vm12461_vm2, %v17547_v15 }
 0x2fc   : > { %v11033_v18 = vpop.f32.mrf.mxu0  ;;  %10809 = vmatprep.mubr.msk.f32.mxu1 %vm12461_vm2, %v17547_v15 }
 0x2fd   : > { %v10656_v6 = vpop.f32.mrf.mxu1 }
 0x2fe   : > { %v14365_v49 = vpop.f32.mrf.mxu0  ;;  %11282 = vmatmul.mubr.msk.f32.gmra.mxu0 %vm1800_vm4, %v13557_v30 }
 0x2ff   : > { %17704 = vst [vmem:[#allocation114_spill] sm:$0xff] %v14365_v49  ;;  %v14369_v54 = vpop.f32.mrf.mxu1  ;;  %10810 = vmatmul.mubr.msk.f32.gmra.mxu1 %vm1800_vm4, %v13963_v56  ;;  %11284 = vmatprep.mubr.msk.f32.mxu0 %vm12461_vm2, %v17547_v15  ;;  %v17706_v49 = vld [vmem:[#allocation73_spill] sm:$0xff] }
 0x300   : > { %v11036_v50 = vpop.f32.mrf.mxu0  ;;  %10812 = vmatprep.mubr.msk.f32.mxu1 %vm12461_vm2, %v17547_v15 }
 0x301   : > { %v10659_v18 = vpop.f32.mrf.mxu1 }
 0x302   : > { %v14377_v38 = vpop.f32.mrf.mxu0  ;;  %11285 = vmatmul.mubr.msk.f32.gmra.mxu0 %vm1800_vm4, %v13068_v7  ;;  %v17708_v18 = vld [vmem:[#allocation11_spill] sm:$0xff] }
 0x303   : > { %17705 = vst [vmem:[#allocation115_spill] sm:$0xff] %v14377_v38  ;;  %v14381_v6 = vpop.f32.mrf.mxu1  ;;  %10813 = vmatmul.mubr.msk.f32.gmra.mxu1 %vm1800_vm4, %v17706_v49  ;;  %11287 = vmatprep.mubr.msk.f32.mxu0 %vm12461_vm2, %v17547_v15 }
 0x304   : > { %v11039_v56 = vpop.f32.mrf.mxu0  ;;  %10815 = vmatprep.mubr.msk.f32.mxu1 %vm12461_vm2, %v17547_v15 }
 0x305   : > { %v10662_v50 = vpop.f32.mrf.mxu1 }
 0x306   : > { %v14389_v34 = vpop.f32.mrf.mxu0  ;;  %11288 = vmatmul.mubr.msk.f32.gmra.mxu0 %vm1800_vm4, %v17708_v18 }
 0x307   : > { %17707 = vst [vmem:[#allocation116_spill] sm:$0xff] %v14389_v34  ;;  %v14393_v38 = vpop.f32.mrf.mxu1  ;;  %10816 = vmatmul.mubr.msk.f32.gmra.mxu1 %vm1800_vm4, %v17709_v9  ;;  %11290 = vmatprep.mubr.msk.f32.mxu0 %vm12461_vm2, %v17547_v15  ;;  %v17711_v34 = vld [vmem:[#allocation79_spill] sm:$0xff] }
 0x308   : > { %v11042_v49 = vpop.f32.mrf.mxu0  ;;  %10818 = vmatprep.mubr.msk.f32.mxu1 %vm12461_vm2, %v17547_v15 }
 0x309   : > { %v10665_v56 = vpop.f32.mrf.mxu1 }
 0x30a   : > { %v14401_v11 = vpop.f32.mrf.mxu0  ;;  %11291 = vmatmul.mubr.msk.f32.gmra.mxu0 %vm1800_vm4, %v13073_v36  ;;  %v8907_v56 = vld [vmem:[%s17409_s2 + $0xf8] sm:$0xff]  ;;  %v17713_v36 = vld [vmem:[#allocation58_spill] sm:$0xff] }
 0x30b   : > { %17710 = vst [vmem:[#allocation11_spill] sm:$0xff] %v14401_v11  ;;  %v14405_v50 = vpop.f32.mrf.mxu1  ;;  %10819 = vmatmul.mubr.msk.f32.gmra.mxu1 %vm1800_vm4, %v17711_v34  ;;  %11293 = vmatprep.mubr.msk.f32.mxu0 %vm12461_vm2, %v17547_v15  ;;  %v17714_v34 = vld [vmem:[#allocation62_spill] sm:$0xff] }
 0x30c   : > { %v11045_v9 = vpop.f32.mrf.mxu0  ;;  %10924 = vmatprep.mubr.msk.f32.mxu1 %vm12461_vm2, %v17547_v15 }
 0x30d   : > { %v10668_v49 = vpop.f32.mrf.mxu1  ;;  %v8906_v9 = vld [vmem:[%s17409_s2 + $0xf0] sm:$0xff] }
 0x30e   : > { %v14416_v11 = vpop.f32.mrf.mxu0  ;;  %11294 = vmatmul.mubr.msk.f32.gmra.mxu0 %vm1800_vm4, %v17713_v36  ;;  %v8905_v36 = vld [vmem:[%s17409_s2 + $0xe8] sm:$0xff] }
 0x30f   : > { %17712 = vst [vmem:[#allocation117_spill] sm:$0xff] %v14416_v11  ;;  %v14420_v2 = vpop.f32.mrf.mxu1  ;;  %10925 = vmatmul.mubr.msk.f32.vlgmr.msra.gmra.mxu1 %vm1800_vm4, %v17714_v34  ;;  %11407 = vmatprep.mubr.msk.f32.mxu0 %vm12461_vm2, %v17547_v15 }
 0x310   : > { %11107 = vmatpush3.msra.mxu1 %v8907_v56  ;;  %v11048_v49 = vpop.f32.mrf.mxu0  ;;  %10927 = vmatprep.mubr.msk.f32.mxu1 %vm12461_vm2, %v17547_v15 }
 0x311   : > { %v10671_v11 = vpop.f32.mrf.mxu1  ;;  %11108 = vmatprep.subr.mxu1 %v17547_v15 }
 0x312   : > { %v14435_v34 = vpop.f32.mrf.mxu0  ;;  %11109 = vmatpush3.msra.mxu1 %v8906_v9  ;;  %v8904_v11 = vld [vmem:[%s17409_s2 + $0xe0] sm:$0xff] }
 0x313   : > { %17715 = vst [vmem:[#allocation62_spill] sm:$0xff] %v14435_v34  ;;  %v14437_v40 = vpop.f32.mrf.mxu1  ;;  %10928 = vmatmul.mubr.msk.f32.gmra.mxu1 %vm1800_vm4, %v17716_v61  ;;  %11110 = vmatprep.subr.mxu1 %v17547_v15 }
 0x314   : > { %v11051_v56 = vpop.f32.mrf.mxu0  ;;  %10930 = vmatprep.mubr.msk.f32.mxu1 %vm12461_vm2, %v17547_v15  ;;  %11111 = vmatpush3.msra.mxu1 %v8905_v36 }
 0x315   : > { %v10674_v49 = vpop.f32.mrf.mxu1  ;;  %11112 = vmatprep.subr.mxu1 %v17547_v15 }
 0x316   : > { %v14448_v9 = vpop.f32.mrf.mxu0  ;;  %11113 = vmatpush3.msra.mxu1 %v8904_v11 }
 0x317   : > { %17717 = vst [vmem:[#allocation61_spill] sm:$0xff] %v14448_v9  ;;  %v14450_v34 = vpop.f32.mrf.mxu1  ;;  %10931 = vmatmul.mubr.msk.f32.gmra.mxu1 %vm1800_vm4, %v13133_v21  ;;  %11296 = vmatprep.subr.mxu1 %v17547_v15 }
 0x318   : > { %v11054_v61 = vpop.f32.mrf.mxu0  ;;  %10933 = vmatprep.mubr.msk.f32.mxu1 %vm12461_vm2, %v17547_v15 }
 0x319   : > { %v10677_v56 = vpop.f32.mrf.mxu1 }
 0x31a   : > { %v14457_v48 = vpop.f32.mrf.mxu0 }
 0x31b   : > { %17718 = vst [vmem:[#allocation118_spill] sm:$0xff] %v14457_v48  ;;  %v14459_v36 = vpop.f32.mrf.mxu1  ;;  %10934 = vmatmul.mubr.msk.f32.gmra.mxu1 %vm1800_vm4, %v13151_v41 }
 0x31c   : > { %v11057_v11 = vpop.f32.mrf.mxu0  ;;  %10936 = vmatprep.mubr.msk.f32.mxu1 %vm12461_vm2, %v17547_v15 }
 0x31d   : > { %v10680_v49 = vpop.f32.mrf.mxu1 }
 0x31e   : > { %v14465_v21 = vpop.f32.mrf.mxu0 }
 0x31f   : > { %17719 = vst [vmem:[#allocation119_spill] sm:$0xff] %v14465_v21  ;;  %v14467_v9 = vpop.f32.mrf.mxu1  ;;  %10937 = vmatmul.mubr.msk.f32.gmra.mxu1 %vm1800_vm4, %v13161_v46 }
 0x320   : > { %v11060_v61 = vpop.f32.mrf.mxu0  ;;  %10939 = vmatprep.mubr.msk.f32.mxu1 %vm12461_vm2, %v17547_v15 }
 0x321   : > { %v10683_v56 = vpop.f32.mrf.mxu1 }
 0x322   : > { %v14473_v48 = vpop.f32.mrf.mxu0 }
 0x323   : > { %17720 = vst [vmem:[#allocation120_spill] sm:$0xff] %v14473_v48  ;;  %v14475_v41 = vpop.f32.mrf.mxu1  ;;  %10940 = vmatmul.mubr.msk.f32.gmra.mxu1 %vm1800_vm4, %v13194_v37 }
 0x324   : > { %v11063_v11 = vpop.f32.mrf.mxu0  ;;  %10942 = vmatprep.mubr.msk.f32.mxu1 %vm12461_vm2, %v17547_v15 }
 0x325   : > { %v10686_v49 = vpop.f32.mrf.mxu1 }
 0x326   : > { %v14481_v21 = vpop.f32.mrf.mxu0 }
 0x327   : > { %17721 = vst [vmem:[#allocation121_spill] sm:$0xff] %v14481_v21  ;;  %v14483_v46 = vpop.f32.mrf.mxu1  ;;  %10943 = vmatmul.mubr.msk.f32.gmra.mxu1 %vm1800_vm4, %v13202_v62 }
 0x328   : > { %v11066_v61 = vpop.f32.mrf.mxu0  ;;  %10945 = vmatprep.mubr.msk.f32.mxu1 %vm12461_vm2, %v17547_v15 }
 0x329   : > { %v10689_v56 = vpop.f32.mrf.mxu1 }
 0x32a   : > { %v14489_v48 = vpop.f32.mrf.mxu0 }
 0x32b   : > { %17722 = vst [vmem:[#allocation122_spill] sm:$0xff] %v14489_v48  ;;  %v14491_v37 = vpop.f32.mrf.mxu1  ;;  %10946 = vmatmul.mubr.msk.f32.gmra.mxu1 %vm1800_vm4, %v13236_v8 }
 0x32c   : > { %v11069_v11 = vpop.f32.mrf.mxu0  ;;  %10948 = vmatprep.mubr.msk.f32.mxu1 %vm12461_vm2, %v17547_v15 }
 0x32d   : > { %v10692_v49 = vpop.f32.mrf.mxu1 }
 0x32e   : > { %v14497_v21 = vpop.f32.mrf.mxu0 }
 0x32f   : > { %17723 = vst [vmem:[#allocation123_spill] sm:$0xff] %v14497_v21  ;;  %v14499_v62 = vpop.f32.mrf.mxu1  ;;  %10949 = vmatmul.mubr.msk.f32.gmra.mxu1 %vm1800_vm4, %v13244_v4 }
 0x330   : > { %v11072_v61 = vpop.f32.mrf.mxu0  ;;  %10951 = vmatprep.mubr.msk.f32.mxu1 %vm12461_vm2, %v17547_v15 }
 0x331   : > { %v10695_v56 = vpop.f32.mrf.mxu1 }
 0x332   : > { %v14505_v48 = vpop.f32.mrf.mxu0 }
 0x333   : > { %17724 = vst [vmem:[#allocation124_spill] sm:$0xff] %v14505_v48  ;;  %v14507_v8 = vpop.f32.mrf.mxu1  ;;  %10952 = vmatmul.mubr.msk.f32.gmra.mxu1 %vm1800_vm4, %v13271_v57 }
 0x334   : > { %v11075_v11 = vpop.f32.mrf.mxu0  ;;  %10954 = vmatprep.mubr.msk.f32.mxu1 %vm12461_vm2, %v17547_v15 }
 0x335   : > { %v10698_v49 = vpop.f32.mrf.mxu1 }
 0x336   : > { %v14513_v21 = vpop.f32.mrf.mxu0 }
 0x337   : > { %17725 = vst [vmem:[#allocation125_spill] sm:$0xff] %v14513_v21  ;;  %v14515_v4 = vpop.f32.mrf.mxu1  ;;  %10955 = vmatmul.mubr.msk.f32.gmra.mxu1 %vm1800_vm4, %v13279_v63 }
 0x338   : > { %v11078_v61 = vpop.f32.mrf.mxu0  ;;  %10957 = vmatprep.mubr.msk.f32.mxu1 %vm12461_vm2, %v17547_v15 }
 0x339   : > { %v10701_v56 = vpop.f32.mrf.mxu1 }
 0x33a   : > { %v14521_v48 = vpop.f32.mrf.mxu0 }
 0x33b   : > { %17726 = vst [vmem:[#allocation126_spill] sm:$0xff] %v14521_v48  ;;  %v14523_v57 = vpop.f32.mrf.mxu1  ;;  %10958 = vmatmul.mubr.msk.f32.gmra.mxu1 %vm1800_vm4, %v13305_v14 }
 0x33c   : > { %v11081_v11 = vpop.f32.mrf.mxu0  ;;  %10960 = vmatprep.mubr.msk.f32.mxu1 %vm12461_vm2, %v17547_v15 }
 0x33d   : > { %v10704_v49 = vpop.f32.mrf.mxu1 }
 0x33e   : > { %v14529_v21 = vpop.f32.mrf.mxu0 }
 0x33f   : > { %17727 = vst [vmem:[#allocation127_spill] sm:$0xff] %v14529_v21  ;;  %v14531_v63 = vpop.f32.mrf.mxu1  ;;  %10961 = vmatmul.mubr.msk.f32.gmra.mxu1 %vm1800_vm4, %v13313_v13 }
 0x340   : > { %v11084_v61 = vpop.f32.mrf.mxu0  ;;  %10963 = vmatprep.mubr.msk.f32.mxu1 %vm12461_vm2, %v17547_v15 }
 0x341   : > { %v10707_v56 = vpop.f32.mrf.mxu1 }
 0x342   : > { %v14537_v48 = vpop.f32.mrf.mxu0 }
 0x343   : > { %17728 = vst [vmem:[#allocation128_spill] sm:$0xff] %v14537_v48  ;;  %v14539_v14 = vpop.f32.mrf.mxu1  ;;  %10964 = vmatmul.mubr.msk.f32.gmra.mxu1 %vm1800_vm4, %v13339_v5 }
 0x344   : > { %v11087_v11 = vpop.f32.mrf.mxu0  ;;  %10966 = vmatprep.mubr.msk.f32.mxu1 %vm12461_vm2, %v17547_v15 }
 0x345   : > { %v10710_v49 = vpop.f32.mrf.mxu1 }
 0x346   : > { %v14545_v21 = vpop.f32.mrf.mxu0 }
 0x347   : > { %17729 = vst [vmem:[#allocation129_spill] sm:$0xff] %v14545_v21  ;;  %v14547_v13 = vpop.f32.mrf.mxu1  ;;  %10967 = vmatmul.mubr.msk.f32.gmra.mxu1 %vm1800_vm4, %v13347_v26 }
 0x348   : > { %v11090_v61 = vpop.f32.mrf.mxu0  ;;  %10969 = vmatprep.mubr.msk.f32.mxu1 %vm12461_vm2, %v17547_v15 }
 0x349   : > { %v10713_v56 = vpop.f32.mrf.mxu1 }
 0x34a   : > { %v14553_v48 = vpop.f32.mrf.mxu0 }
 0x34b   : > { %17730 = vst [vmem:[#allocation130_spill] sm:$0xff] %v14553_v48  ;;  %v14555_v5 = vpop.f32.mrf.mxu1  ;;  %10970 = vmatmul.mubr.msk.f32.gmra.mxu1 %vm1800_vm4, %v13373_v59 }
 0x34c   : > { %v11093_v11 = vpop.f32.mrf.mxu0  ;;  %10972 = vmatprep.mubr.msk.f32.mxu1 %vm12461_vm2, %v17547_v15 }
 0x34d   : > { %v10716_v49 = vpop.f32.mrf.mxu1 }
 0x34e   : > { %v14561_v21 = vpop.f32.mrf.mxu0 }
 0x34f   : > { %17731 = vst [vmem:[#allocation131_spill] sm:$0xff] %v14561_v21  ;;  %v14563_v26 = vpop.f32.mrf.mxu1  ;;  %10973 = vmatmul.mubr.msk.f32.gmra.mxu1 %vm1800_vm4, %v13381_v1 }
 0x350   : > { %17732 = vst [vmem:[#allocation132_spill] sm:$0xff] %v14563_v26  ;;  %v11096_v61 = vpop.f32.mrf.mxu0  ;;  %10975 = vmatprep.mubr.msk.f32.mxu1 %vm12461_vm2, %v17547_v15 }
 0x351   : > { %v10719_v56 = vpop.f32.mrf.mxu1 }
 0x352   : > { %v14569_v48 = vpop.f32.mrf.mxu0 }
 0x353   : > { %17733 = vst [vmem:[#allocation133_spill] sm:$0xff] %v14569_v48  ;;  %v14571_v59 = vpop.f32.mrf.mxu1  ;;  %10976 = vmatmul.mubr.msk.f32.gmra.mxu1 %vm1800_vm4, %v13407_v58  ;;  %v17737_v48 = vld [vmem:[#allocation54_spill] sm:$0xff] }
 0x354   : > { %17734 = vst [vmem:[#allocation134_spill] sm:$0xff] %v14571_v59  ;;  %v11099_v11 = vpop.f32.mrf.mxu0  ;;  %10978 = vmatprep.mubr.msk.f32.mxu1 %vm12461_vm2, %v17547_v15  ;;  %v2194_v58 = vadd.f32 %v14297_v23, %v17737_v48 }
 0x355   : > { %v10722_v49 = vpop.f32.mrf.mxu1 }
 0x356   : > { %v14577_v21 = vpop.f32.mrf.mxu0 }
 0x357   : > { %17735 = vst [vmem:[#allocation135_spill] sm:$0xff] %v14577_v21  ;;  %v14579_v1 = vpop.f32.mrf.mxu1  ;;  %10979 = vmatmul.mubr.msk.f32.gmra.mxu1 %vm1800_vm4, %v13415_v52 }
 0x358   : > { %17736 = vst [vmem:[#allocation136_spill] sm:$0xff] %v14579_v1  ;;  %v11102_v61 = vpop.f32.mrf.mxu0  ;;  %10981 = vmatprep.mubr.msk.f32.mxu1 %vm12461_vm2, %v17547_v15 }
 0x359   : > { %v10725_v56 = vpop.f32.mrf.mxu1  ;;  %v17738_v61 = vld [vmem:[#allocation53_spill] sm:$0xff] }
 0x35a   : > { %v14587_v11 = vpop.f32.mrf.mxu0  ;;  %v2199_v1 = vadd.f32 %v14309_v10, %v17738_v61 }
 0x35b   : > { %v2526_v59 = vpop.f32.mrf.mxu1  ;;  %10982 = vmatmul.mubr.msk.f32.gmra.mxu1 %vm1800_vm4, %v13441_v53 }
 0x35c   : > { %v14591_v49 = vadd.f32 %v2526_v59, %v2194_v58  ;;  %v11105_v21 = vpop.f32.mrf.mxu0  ;;  %10984 = vmatprep.mubr.msk.f32.mxu1 %vm12461_vm2, %v17547_v15 }
 0x35d   : > { %v10736_v52 = vpop.f32.mrf.mxu1  ;;  %v17739_v21 = vld [vmem:[#allocation51_spill] sm:$0xff] }
 0x35e   : > { %v14597_v56 = vpop.f32.mrf.mxu0  ;;  %v2204_v59 = vadd.f32 %v14321_v24, %v17739_v21 }
 0x35f   : > { %v2531_v26 = vpop.f32.mrf.mxu1  ;;  %10985 = vmatmul.mubr.msk.f32.gmra.mxu1 %vm1800_vm4, %v13449_v25 }
 0x360   : > { %v14601_v48 = vadd.f32 %v2531_v26, %v2199_v1  ;;  %v11211_v23 = vpop.f32.mrf.mxu0  ;;  %10987 = vmatprep.mubr.msk.f32.mxu1 %vm12461_vm2, %v17547_v15  ;;  %v17740_v26 = vld [vmem:[#allocation55_spill] sm:$0xff] }
 0x361   : > { %v10739_v53 = vpop.f32.mrf.mxu1  ;;  %v2209_v1 = vadd.f32 %v14333_v22, %v17740_v26 }
 0x362   : > { %v14607_v58 = vpop.f32.mrf.mxu0 }
 0x363   : > { %v2536_v52 = vpop.f32.mrf.mxu1  ;;  %10988 = vmatmul.mubr.msk.f32.gmra.mxu1 %vm1800_vm4, %v13475_v29 }
 0x364   : > { %v14611_v10 = vadd.f32 %v2536_v52, %v2204_v59  ;;  %v11214_v61 = vpop.f32.mrf.mxu0  ;;  %10990 = vmatprep.mubr.msk.f32.mxu1 %vm12461_vm2, %v17547_v15  ;;  %v17741_v59 = vld [vmem:[#allocation69_spill] sm:$0xff] }
 0x365   : > { %v10742_v25 = vpop.f32.mrf.mxu1  ;;  %v2214_v52 = vadd.f32 %v14345_v39, %v17741_v59 }
 0x366   : > { %v14617_v23 = vpop.f32.mrf.mxu0 }
 0x367   : > { %v2541_v53 = vpop.f32.mrf.mxu1  ;;  %10991 = vmatmul.mubr.msk.f32.gmra.mxu1 %vm1800_vm4, %v13483_v17 }
 0x368   : > { %v14621_v24 = vadd.f32 %v2541_v53, %v2209_v1  ;;  %v11217_v21 = vpop.f32.mrf.mxu0  ;;  %10993 = vmatprep.mubr.msk.f32.mxu1 %vm12461_vm2, %v17547_v15  ;;  %v17742_v1 = vld [vmem:[#allocation72_spill] sm:$0xff] }
 0x369   : > { %v10745_v29 = vpop.f32.mrf.mxu1  ;;  %v2219_v53 = vadd.f32 %v14357_v32, %v17742_v1 }
 0x36a   : > { %v14627_v61 = vpop.f32.mrf.mxu0 }
 0x36b   : > { %v2546_v25 = vpop.f32.mrf.mxu1  ;;  %10994 = vmatmul.mubr.msk.f32.gmra.mxu1 %vm1800_vm4, %v13509_v12 }
 0x36c   : > { %v14631_v22 = vadd.f32 %v2546_v25, %v2214_v52  ;;  %v11220_v26 = vpop.f32.mrf.mxu0  ;;  %10996 = vmatprep.mubr.msk.f32.mxu1 %vm12461_vm2, %v17547_v15  ;;  %v17743_v52 = vld [vmem:[#allocation75_spill] sm:$0xff] }
 0x36d   : > { %v10748_v17 = vpop.f32.mrf.mxu1  ;;  %v2224_v25 = vadd.f32 %v14369_v54, %v17743_v52 }
 0x36e   : > { %v14637_v21 = vpop.f32.mrf.mxu0 }
 0x36f   : > { %v2551_v29 = vpop.f32.mrf.mxu1  ;;  %10997 = vmatmul.mubr.msk.f32.gmra.mxu1 %vm1800_vm4, %v13517_v16 }
 0x370   : > { %v14641_v39 = vadd.f32 %v2551_v29, %v2219_v53  ;;  %v11223_v59 = vpop.f32.mrf.mxu0  ;;  %10999 = vmatprep.mubr.msk.f32.mxu1 %vm12461_vm2, %v17547_v15  ;;  %v17744_v53 = vld [vmem:[#allocation78_spill] sm:$0xff] }
 0x371   : > { %v10751_v12 = vpop.f32.mrf.mxu1  ;;  %v2229_v29 = vadd.f32 %v14381_v6, %v17744_v53 }
 0x372   : > { %v14647_v26 = vpop.f32.mrf.mxu0 }
 0x373   : > { %v2556_v17 = vpop.f32.mrf.mxu1  ;;  %11000 = vmatmul.mubr.msk.f32.gmra.mxu1 %vm1800_vm4, %v13542_v33 }
 0x374   : > { %v14651_v32 = vadd.f32 %v2556_v17, %v2224_v25  ;;  %v11226_v1 = vpop.f32.mrf.mxu0  ;;  %11002 = vmatprep.mubr.msk.f32.mxu1 %vm12461_vm2, %v17547_v15  ;;  %v17745_v25 = vld [vmem:[#allocation81_spill] sm:$0xff] }
 0x375   : > { %v10754_v16 = vpop.f32.mrf.mxu1  ;;  %v2234_v17 = vadd.f32 %v14393_v38, %v17745_v25 }
 0x376   : > { %v14657_v59 = vpop.f32.mrf.mxu0 }
 0x377   : > { %v2561_v12 = vpop.f32.mrf.mxu1  ;;  %11003 = vmatmul.mubr.msk.f32.gmra.mxu1 %vm1800_vm4, %v13557_v30 }
 0x378   : > { %v14661_v54 = vadd.f32 %v2561_v12, %v2229_v29  ;;  %v11229_v52 = vpop.f32.mrf.mxu0  ;;  %11005 = vmatprep.mubr.msk.f32.mxu1 %vm12461_vm2, %v17547_v15  ;;  %v17746_v29 = vld [vmem:[#allocation84_spill] sm:$0xff] }
 0x379   : > { %v10757_v33 = vpop.f32.mrf.mxu1  ;;  %v2239_v12 = vadd.f32 %v14405_v50, %v17746_v29  ;;  %v2244_v50 = vadd.f32 %v14420_v2, %v14057_v27  ;;  %v8967_v2 = vld [vmem:[%s17409_s2 + $0x108] sm:$0xff]  ;;  %v2249_v27 = vadd.f32 %v14437_v40, %v14075_v20  ;;  %v2254_v40 = vadd.f32 %v14450_v34, %v14092_v51 }
 0x37a   : > { %v14667_v1 = vpop.f32.mrf.mxu0 }
 0x37b   : > { %v2566_v16 = vpop.f32.mrf.mxu1  ;;  %11006 = vmatmul.mubr.msk.f32.gmra.mxu1 %vm1800_vm4, %v13068_v7 }
 0x37c   : > { %v14671_v6 = vadd.f32 %v2566_v16, %v2234_v17  ;;  %v11232_v53 = vpop.f32.mrf.mxu0  ;;  %11008 = vmatprep.mubr.msk.f32.mxu1 %vm12461_vm2, %v17547_v15  ;;  %v8969_v17 = vld [vmem:[%s17409_s2 + $0x118] sm:$0xff] }
 0x37d   : > { %v10760_v30 = vpop.f32.mrf.mxu1 }
 0x37e   : > { %v14677_v52 = vpop.f32.mrf.mxu0  ;;  %v17747_v30 = vld [vmem:[#allocation63_spill] sm:$0xff] }
 0x37f   : > { %v2571_v33 = vpop.f32.mrf.mxu1  ;;  %11009 = vmatmul.mubr.msk.f32.gmra.mxu1 %vm1800_vm4, %v17708_v18  ;;  %v8968_v18 = vld [vmem:[%s17409_s2 + $0x110] sm:$0xff] }
 0x380   : > { %v14681_v38 = vadd.f32 %v2571_v33, %v2239_v12  ;;  %v11235_v25 = vpop.f32.mrf.mxu0  ;;  %11114 = vmatprep.mubr.msk.f32.mxu1 %vm12461_vm2, %v17547_v15 }
 0x381   : > { %v10763_v7 = vpop.f32.mrf.mxu1 }
 0x382   : > { %v14690_v16 = vpop.f32.mrf.mxu0 }
 0x383   : > { %v2576_v53 = vpop.f32.mrf.mxu1  ;;  %11115 = vmatmul.mubr.msk.f32.vlgmr.msra.gmra.mxu1 %vm1800_vm4, %v17747_v30 }
 0x384   : > { %v14697_v29 = vadd.f32 %v2576_v53, %v2244_v50  ;;  %11297 = vmatpush3.msra.mxu1 %v8969_v17  ;;  %v11238_v12 = vpop.f32.mrf.mxu0  ;;  %11117 = vmatprep.mubr.msk.f32.mxu1 %vm12461_vm2, %v17547_v15  ;;  %v17748_v50 = vld [vmem:[#allocation64_spill] sm:$0xff] }
 0x385   : > { %v10766_v33 = vpop.f32.mrf.mxu1  ;;  %11298 = vmatprep.subr.mxu1 %v17547_v15  ;;  %v8966_v17 = vld [vmem:[%s17409_s2 + $0x100] sm:$0xff] }
 0x386   : > { %v14707_v25 = vpop.f32.mrf.mxu0  ;;  %11299 = vmatpush3.msra.mxu1 %v8968_v18  ;;  %v17749_v33 = vld [vmem:[#allocation65_spill] sm:$0xff] }
 0x387   : > { %v2581_v7 = vpop.f32.mrf.mxu1  ;;  %11118 = vmatmul.mubr.msk.f32.gmra.mxu1 %vm1800_vm4, %v17748_v50  ;;  %11300 = vmatprep.subr.mxu1 %v17547_v15  ;;  %v2259_v50 = vadd.f32 %v14459_v36, %v14105_v28  ;;  %v17751_v28 = vld [vmem:[#allocation67_spill] sm:$0xff] }
 0x388   : > { %v14715_v53 = vadd.f32 %v2581_v7, %v2249_v27  ;;  %v11241_v30 = vpop.f32.mrf.mxu0  ;;  %11120 = vmatprep.mubr.msk.f32.mxu1 %vm12461_vm2, %v17547_v15  ;;  %11301 = vmatpush3.msra.mxu1 %v8967_v2 }
 0x389   : > { %v10769_v20 = vpop.f32.mrf.mxu1  ;;  %11302 = vmatprep.subr.mxu1 %v17547_v15 }
 0x38a   : > { %v14722_v18 = vpop.f32.mrf.mxu0  ;;  %11303 = vmatpush3.msra.mxu1 %v8966_v17  ;;  %v17750_v17 = vld [vmem:[#allocation66_spill] sm:$0xff] }
 0x38b   : > { %v2586_v12 = vpop.f32.mrf.mxu1  ;;  %11121 = vmatmul.mubr.msk.f32.gmra.mxu1 %vm1800_vm4, %v17749_v33  ;;  %11505 = vmatprep.subr.mxu1 %v17547_v15 }
 0x38c   : > { %v14727_v27 = vadd.f32 %v2586_v12, %v2254_v40  ;;  %v11244_v7 = vpop.f32.mrf.mxu0  ;;  %11123 = vmatprep.mubr.msk.f32.mxu1 %vm12461_vm2, %v17547_v15  ;;  %v2264_v12 = vadd.f32 %v14467_v9, %v14117_v31  ;;  %v17752_v31 = vld [vmem:[#allocation68_spill] sm:$0xff] }
 0x38d   : > { %v10772_v2 = vpop.f32.mrf.mxu1 }
 0x38e   : > { %v14733_v51 = vpop.f32.mrf.mxu0 }
 0x38f   : > { %v2591_v34 = vpop.f32.mrf.mxu1  ;;  %11124 = vmatmul.mubr.msk.f32.gmra.mxu1 %vm1800_vm4, %v17750_v17 }
 0x390   : > { %v14737_v30 = vadd.f32 %v2591_v34, %v2259_v50  ;;  %v11247_v20 = vpop.f32.mrf.mxu0  ;;  %11126 = vmatprep.mubr.msk.f32.mxu1 %vm12461_vm2, %v17547_v15  ;;  %v2269_v34 = vadd.f32 %v14475_v41, %v14129_v47  ;;  %v17753_v47 = vld [vmem:[#allocation39_spill] sm:$0xff] }
 0x391   : > { %v10775_v40 = vpop.f32.mrf.mxu1 }
 0x392   : > { %v14743_v33 = vpop.f32.mrf.mxu0 }
 0x393   : > { %v2596_v7 = vpop.f32.mrf.mxu1  ;;  %11127 = vmatmul.mubr.msk.f32.gmra.mxu1 %vm1800_vm4, %v17751_v28 }
 0x394   : > { %v14747_v36 = vadd.f32 %v2596_v7, %v2264_v12  ;;  %v11250_v2 = vpop.f32.mrf.mxu0  ;;  %11129 = vmatprep.mubr.msk.f32.mxu1 %vm12461_vm2, %v17547_v15  ;;  %v2274_v7 = vadd.f32 %v14483_v46, %v14141_v35  ;;  %v17754_v35 = vld [vmem:[#allocation22_spill] sm:$0xff] }
 0x395   : > { %v10778_v50 = vpop.f32.mrf.mxu1 }
 0x396   : > { %v14753_v17 = vpop.f32.mrf.mxu0 }
 0x397   : > { %v2601_v20 = vpop.f32.mrf.mxu1  ;;  %11130 = vmatmul.mubr.msk.f32.gmra.mxu1 %vm1800_vm4, %v17752_v31 }
 0x398   : > { %v14757_v9 = vadd.f32 %v2601_v20, %v2269_v34  ;;  %v11253_v40 = vpop.f32.mrf.mxu0  ;;  %11132 = vmatprep.mubr.msk.f32.mxu1 %vm12461_vm2, %v17547_v15  ;;  %v2279_v20 = vadd.f32 %v14491_v37, %v14153_v55  ;;  %v17756_v55 = vld [vmem:[#allocation5_spill] sm:$0xff] }
 0x399   : > { %v10781_v12 = vpop.f32.mrf.mxu1 }
 0x39a   : > { %v14763_v28 = vpop.f32.mrf.mxu0 }
 0x39b   : > { %v2606_v2 = vpop.f32.mrf.mxu1  ;;  %11133 = vmatmul.mubr.msk.f32.gmra.mxu1 %vm1800_vm4, %v17753_v47 }
 0x39c   : > { %v14767_v41 = vadd.f32 %v2606_v2, %v2274_v7  ;;  %v11256_v50 = vpop.f32.mrf.mxu0  ;;  %11135 = vmatprep.mubr.msk.f32.mxu1 %vm12461_vm2, %v17547_v15  ;;  %v2284_v2 = vadd.f32 %v14499_v62, %v14165_v3  ;;  %v17758_v3 = vld [vmem:[#allocation41_spill] sm:$0xff] }
 0x39d   : > { %v10784_v34 = vpop.f32.mrf.mxu1 }
 0x39e   : > { %v14773_v31 = vpop.f32.mrf.mxu0 }
 0x39f   : > { %v2611_v40 = vpop.f32.mrf.mxu1  ;;  %11136 = vmatmul.mubr.msk.f32.gmra.mxu1 %vm1800_vm4, %v17754_v35 }
 0x3a0   : > { %v14777_v46 = vadd.f32 %v2611_v40, %v2279_v20  ;;  %v11259_v12 = vpop.f32.mrf.mxu0  ;;  %11138 = vmatprep.mubr.msk.f32.mxu1 %vm12461_vm2, %v17547_v15  ;;  %v2289_v40 = vadd.f32 %v14507_v8, %v14177_v60  ;;  %v17760_v60 = vld [vmem:[#allocation24_spill] sm:$0xff] }
 0x3a1   : > { %v10787_v7 = vpop.f32.mrf.mxu1 }
 0x3a2   : > { %v14783_v47 = vpop.f32.mrf.mxu0 }
 0x3a3   : > { %17755 = vst [vmem:[#allocation54_spill] sm:$0xff] %v14783_v47  ;;  %v2616_v50 = vpop.f32.mrf.mxu1  ;;  %11139 = vmatmul.mubr.msk.f32.gmra.mxu1 %vm1800_vm4, %v17756_v55 }
 0x3a4   : > { %v14787_v37 = vadd.f32 %v2616_v50, %v2284_v2  ;;  %v11262_v34 = vpop.f32.mrf.mxu0  ;;  %11141 = vmatprep.mubr.msk.f32.mxu1 %vm12461_vm2, %v17547_v15  ;;  %v2294_v50 = vadd.f32 %v14515_v4, %v14189_v42  ;;  %v17762_v42 = vld [vmem:[#allocation7_spill] sm:$0xff] }
 0x3a5   : > { %v10790_v20 = vpop.f32.mrf.mxu1 }
 0x3a6   : > { %v14793_v35 = vpop.f32.mrf.mxu0 }
 0x3a7   : > { %17757 = vst [vmem:[#allocation53_spill] sm:$0xff] %v14793_v35  ;;  %v2621_v12 = vpop.f32.mrf.mxu1  ;;  %11142 = vmatmul.mubr.msk.f32.gmra.mxu1 %vm1800_vm4, %v17758_v3  ;;  %v17806_v35 = vld [vmem:[#allocation47_spill] sm:$0xff] }
 0x3a8   : > { %v14797_v62 = vadd.f32 %v2621_v12, %v2289_v40  ;;  %v11265_v7 = vpop.f32.mrf.mxu0  ;;  %11144 = vmatprep.mubr.msk.f32.mxu1 %vm12461_vm2, %v17547_v15  ;;  %v2299_v12 = vadd.f32 %v14523_v57, %v14201_v19  ;;  %v17764_v19 = vld [vmem:[#allocation40_spill] sm:$0xff] }
 0x3a9   : > { %v10793_v2 = vpop.f32.mrf.mxu1 }
 0x3aa   : > { %v14803_v55 = vpop.f32.mrf.mxu0 }
 0x3ab   : > { %17759 = vst [vmem:[#allocation51_spill] sm:$0xff] %v14803_v55  ;;  %v2626_v34 = vpop.f32.mrf.mxu1  ;;  %11145 = vmatmul.mubr.msk.f32.gmra.mxu1 %vm1800_vm4, %v17760_v60  ;;  %v17790_v55 = vld [vmem:[#allocation45_spill] sm:$0xff] }
 0x3ac   : > { %v14807_v8 = vadd.f32 %v2626_v34, %v2294_v50  ;;  %v11268_v20 = vpop.f32.mrf.mxu0  ;;  %11147 = vmatprep.mubr.msk.f32.mxu1 %vm12461_vm2, %v17547_v15  ;;  %v2304_v34 = vadd.f32 %v14531_v63, %v14213_v45  ;;  %v17766_v45 = vld [vmem:[#allocation23_spill] sm:$0xff] }
 0x3ad   : > { %v10796_v40 = vpop.f32.mrf.mxu1 }
 0x3ae   : > { %v14813_v3 = vpop.f32.mrf.mxu0 }
 0x3af   : > { %17761 = vst [vmem:[#allocation55_spill] sm:$0xff] %v14813_v3  ;;  %v2631_v7 = vpop.f32.mrf.mxu1  ;;  %11148 = vmatmul.mubr.msk.f32.gmra.mxu1 %vm1800_vm4, %v17762_v42 }
 0x3b0   : > { %v14817_v4 = vadd.f32 %v2631_v7, %v2299_v12  ;;  %v11271_v2 = vpop.f32.mrf.mxu0  ;;  %11150 = vmatprep.mubr.msk.f32.mxu1 %vm12461_vm2, %v17547_v15  ;;  %v2309_v7 = vadd.f32 %v14539_v14, %v14225_v44  ;;  %v17768_v44 = vld [vmem:[#allocation6_spill] sm:$0xff] }
 0x3b1   : > { %v10799_v50 = vpop.f32.mrf.mxu1 }
 0x3b2   : > { %v14823_v60 = vpop.f32.mrf.mxu0 }
 0x3b3   : > { %17763 = vst [vmem:[#allocation69_spill] sm:$0xff] %v14823_v60  ;;  %v2636_v20 = vpop.f32.mrf.mxu1  ;;  %11151 = vmatmul.mubr.msk.f32.gmra.mxu1 %vm1800_vm4, %v17764_v19 }
 0x3b4   : > { %v14827_v57 = vadd.f32 %v2636_v20, %v2304_v34  ;;  %v11274_v40 = vpop.f32.mrf.mxu0  ;;  %11153 = vmatprep.mubr.msk.f32.mxu1 %vm12461_vm2, %v17547_v15  ;;  %v2314_v20 = vadd.f32 %v14547_v13, %v14237_v0  ;;  %v17770_v0 = vld [vmem:[#allocation43_spill] sm:$0xff] }
 0x3b5   : > { %v10802_v12 = vpop.f32.mrf.mxu1 }
 0x3b6   : > { %v14833_v42 = vpop.f32.mrf.mxu0 }
 0x3b7   : > { %17765 = vst [vmem:[#allocation72_spill] sm:$0xff] %v14833_v42  ;;  %v2641_v2 = vpop.f32.mrf.mxu1  ;;  %11154 = vmatmul.mubr.msk.f32.gmra.mxu1 %vm1800_vm4, %v17766_v45 }
 0x3b8   : > { %v14837_v63 = vadd.f32 %v2641_v2, %v2309_v7  ;;  %v11277_v50 = vpop.f32.mrf.mxu0  ;;  %11156 = vmatprep.mubr.msk.f32.mxu1 %vm12461_vm2, %v17547_v15  ;;  %v2319_v2 = vadd.f32 %v14555_v5, %v14249_v43  ;;  %v17774_v43 = vld [vmem:[#allocation26_spill] sm:$0xff] }
 0x3b9   : > { %v10805_v34 = vpop.f32.mrf.mxu1 }
 0x3ba   : > { %v14843_v19 = vpop.f32.mrf.mxu0 }
 0x3bb   : > { %17767 = vst [vmem:[#allocation75_spill] sm:$0xff] %v14843_v19  ;;  %v2646_v40 = vpop.f32.mrf.mxu1  ;;  %11157 = vmatmul.mubr.msk.f32.gmra.mxu1 %vm1800_vm4, %v17768_v44  ;;  %v17772_v44 = vld [vmem:[#allocation132_spill] sm:$0xff] }
 0x3bc   : > { %v14847_v14 = vadd.f32 %v2646_v40, %v2314_v20  ;;  %v11280_v12 = vpop.f32.mrf.mxu0  ;;  %11159 = vmatprep.mubr.msk.f32.mxu1 %vm12461_vm2, %v17547_v15  ;;  %v17771_v40 = vld [vmem:[#allocation103_spill] sm:$0xff] }
 0x3bd   : > { %v10808_v7 = vpop.f32.mrf.mxu1  ;;  %v2324_v12 = vadd.f32 %v17772_v44, %v17771_v40  ;;  %v17778_v40 = vld [vmem:[#allocation9_spill] sm:$0xff] }
 0x3be   : > { %v14853_v45 = vpop.f32.mrf.mxu0 }
 0x3bf   : > { %17769 = vst [vmem:[#allocation78_spill] sm:$0xff] %v14853_v45  ;;  %v2651_v50 = vpop.f32.mrf.mxu1  ;;  %11160 = vmatmul.mubr.msk.f32.gmra.mxu1 %vm1800_vm4, %v17770_v0  ;;  %v17776_v0 = vld [vmem:[#allocation134_spill] sm:$0xff] }
 0x3c0   : > { %v14857_v13 = vadd.f32 %v2651_v50, %v2319_v2  ;;  %v11283_v34 = vpop.f32.mrf.mxu0  ;;  %11162 = vmatprep.mubr.msk.f32.mxu1 %vm12461_vm2, %v17547_v15  ;;  %v17775_v50 = vld [vmem:[#allocation105_spill] sm:$0xff] }
 0x3c1   : > { %v10811_v20 = vpop.f32.mrf.mxu1  ;;  %v2329_v34 = vadd.f32 %v17776_v0, %v17775_v50  ;;  %v17782_v50 = vld [vmem:[#allocation42_spill] sm:$0xff] }
 0x3c2   : > { %v14863_v7 = vpop.f32.mrf.mxu0 }
 0x3c3   : > { %17773 = vst [vmem:[#allocation81_spill] sm:$0xff] %v14863_v7  ;;  %v2656_v19 = vpop.f32.mrf.mxu1  ;;  %11163 = vmatmul.mubr.msk.f32.gmra.mxu1 %vm1800_vm4, %v17774_v43 }
 0x3c4   : > { %v14867_v5 = vadd.f32 %v2656_v19, %v2324_v12  ;;  %v11286_v45 = vpop.f32.mrf.mxu0  ;;  %11165 = vmatprep.mubr.msk.f32.mxu1 %vm12461_vm2, %v17547_v15  ;;  %v17780_v12 = vld [vmem:[#allocation136_spill] sm:$0xff] }
 0x3c5   : > { %v10814_v2 = vpop.f32.mrf.mxu1  ;;  %v17779_v45 = vld [vmem:[#allocation107_spill] sm:$0xff] }
 0x3c6   : > { %v14873_v20 = vpop.f32.mrf.mxu0  ;;  %v2334_v43 = vadd.f32 %v17780_v12, %v17779_v45 }
 0x3c7   : > { %17777 = vst [vmem:[#allocation84_spill] sm:$0xff] %v14873_v20  ;;  %v2661_v42 = vpop.f32.mrf.mxu1  ;;  %11166 = vmatmul.mubr.msk.f32.gmra.mxu1 %vm1800_vm4, %v17778_v40  ;;  %v17784_v40 = vld [vmem:[#allocation25_spill] sm:$0xff] }
 0x3c8   : > { %v14877_v44 = vadd.f32 %v2661_v42, %v2329_v34  ;;  %v11289_v7 = vpop.f32.mrf.mxu0  ;;  %11168 = vmatprep.mubr.msk.f32.mxu1 %vm12461_vm2, %v17547_v15 }
 0x3c9   : > { %v10817_v19 = vpop.f32.mrf.mxu1 }
 0x3ca   : > { %v14883_v2 = vpop.f32.mrf.mxu0  ;;  %v17785_v19 = vld [vmem:[#allocation19_spill] sm:$0xff] }
 0x3cb   : > { %17781 = vst [vmem:[#allocation63_spill] sm:$0xff] %v14883_v2  ;;  %v2666_v60 = vpop.f32.mrf.mxu1  ;;  %11169 = vmatmul.mubr.msk.f32.gmra.mxu1 %vm1800_vm4, %v17782_v50  ;;  %v17787_v2 = vld [vmem:[#allocation8_spill] sm:$0xff] }
 0x3cc   : > { %v14887_v0 = vadd.f32 %v2666_v60, %v2334_v43  ;;  %v11292_v20 = vpop.f32.mrf.mxu0  ;;  %11171 = vmatprep.mubr.msk.f32.mxu1 %vm12461_vm2, %v17547_v15  ;;  %v17786_v60 = vld [vmem:[#allocation109_spill] sm:$0xff] }
 0x3cd   : > { %v10820_v42 = vpop.f32.mrf.mxu1 }
 0x3ce   : > { %v14891_v7 = vpop.f32.mrf.mxu0 }
 0x3cf   : > { %17783 = vst [vmem:[#allocation64_spill] sm:$0xff] %v14891_v7  ;;  %v2999_v34 = vpop.f32.mrf.mxu1  ;;  %11172 = vmatmul.mubr.msk.f32.gmra.mxu1 %vm1800_vm4, %v17784_v40  ;;  %v17788_v7 = vld [vmem:[#allocation18_spill] sm:$0xff] }
 0x3d0   : > { %v3000_v45 = vadd.f32 %v2999_v34, %v17785_v19  ;;  %v11295_v12 = vpop.f32.mrf.mxu0  ;;  %11174 = vmatprep.mubr.msk.f32.mxu1 %vm12461_vm2, %v17547_v15  ;;  %v17789_v40 = vld [vmem:[#allocation110_spill] sm:$0xff] }
 0x3d1   : > { %v10926_v50 = vpop.f32.mrf.mxu1 }
 0x3d2   : > { %v3366_v43 = vadd.f32 %v17786_v60, %v3000_v45  ;;  %v17791_v50 = vld [vmem:[#allocation20_spill] sm:$0xff] }
 0x3d3   : > { %v3004_v20 = vpop.f32.mrf.mxu1  ;;  %11175 = vmatmul.mubr.msk.f32.gmra.mxu1 %vm1800_vm4, %v17787_v2 }
 0x3d4   : > { %v14902_v42 = vadd.f32 %v3366_v43, %v14591_v49  ;;  %v3005_v3 = vadd.f32 %v3004_v20, %v17788_v7  ;;  %11177 = vmatprep.mubr.msk.f32.mxu1 %vm12461_vm2, %v17547_v15  ;;  %v17792_v7 = vld [vmem:[#allocation111_spill] sm:$0xff]  ;;  %v17793_v20 = vld [vmem:[#allocation28_spill] sm:$0xff] }
 0x3d5   : > { %v10929_v34 = vpop.f32.mrf.mxu1 }
 0x3d6   : > { %v3367_v19 = vadd.f32 %v17789_v40, %v3005_v3  ;;  %v17794_v34 = vld [vmem:[#allocation21_spill] sm:$0xff]  ;;  %v17795_v40 = vld [vmem:[#allocation112_spill] sm:$0xff] }
 0x3d7   : > { %v3009_v12 = vpop.f32.mrf.mxu1  ;;  %11178 = vmatmul.mubr.msk.f32.gmra.mxu1 %vm1800_vm4, %v17790_v55 }
 0x3d8   : > { %v14911_v45 = vadd.f32 %v3367_v19, %v14601_v48  ;;  %v3010_v2 = vadd.f32 %v3009_v12, %v17791_v50  ;;  %11180 = vmatprep.mubr.msk.f32.mxu1 %vm12461_vm2, %v17547_v15  ;;  %v17796_v50 = vld [vmem:[#allocation44_spill] sm:$0xff] }
 0x3d9   : > { %v10932_v49 = vpop.f32.mrf.mxu1 }
 0x3da   : > { %v3368_v60 = vadd.f32 %v17792_v7, %v3010_v2  ;;  %v17797_v49 = vld [vmem:[#allocation71_spill] sm:$0xff] }
 0x3db   : > { %v3014_v43 = vpop.f32.mrf.mxu1  ;;  %11181 = vmatmul.mubr.msk.f32.gmra.mxu1 %vm1800_vm4, %v17793_v20 }
 0x3dc   : > { %v14920_v3 = vadd.f32 %v3368_v60, %v14611_v10  ;;  %v3015_v55 = vadd.f32 %v3014_v43, %v17794_v34  ;;  %11183 = vmatprep.mubr.msk.f32.mxu1 %vm12461_vm2, %v17547_v15  ;;  %v9007_v10 = vld [vmem:[%s17411_s4 + $0x78] sm:$0xff]  ;;  %v17798_v43 = vld [vmem:[#allocation113_spill] sm:$0xff] }
 0x3dd   : > { %v10935_v48 = vpop.f32.mrf.mxu1  ;;  %11392 = vmatpush3.msra.mxu0 %v9007_v10  ;;  %v17802_v10 = vld [vmem:[#allocation10_spill] sm:$0xff] }
 0x3de   : > { %v3369_v19 = vadd.f32 %v17795_v40, %v3015_v55  ;;  %11393 = vmatprep.subr.mxu0 %v17547_v15  ;;  %v17799_v55 = vld [vmem:[#allocation27_spill] sm:$0xff]  ;;  %v17800_v48 = vld [vmem:[#allocation74_spill] sm:$0xff] }
 0x3df   : > { %v3019_v12 = vpop.f32.mrf.mxu1  ;;  %11184 = vmatmul.mubr.msk.f32.gmra.mxu1 %vm1800_vm4, %v17796_v50 }
 0x3e0   : > { %v14929_v2 = vadd.f32 %v3369_v19, %v14621_v24  ;;  %v3020_v7 = vadd.f32 %v3019_v12, %v17797_v49  ;;  %11186 = vmatprep.mubr.msk.f32.mxu1 %vm12461_vm2, %v17547_v15  ;;  %v17801_v12 = vld [vmem:[#allocation114_spill] sm:$0xff] }
 0x3e1   : > { %v10938_v60 = vpop.f32.mrf.mxu1 }
 0x3e2   : > { %v3370_v20 = vadd.f32 %v17798_v43, %v3020_v7  ;;  %v17803_v60 = vld [vmem:[#allocation77_spill] sm:$0xff] }
 0x3e3   : > { %v3024_v34 = vpop.f32.mrf.mxu1  ;;  %11187 = vmatmul.mubr.msk.f32.gmra.mxu1 %vm1800_vm4, %v17799_v55  ;;  %v17805_v55 = vld [vmem:[#allocation115_spill] sm:$0xff] }
 0x3e4   : > { %v14942_v24 = vadd.f32 %v3370_v20, %v14631_v22  ;;  %v3025_v40 = vadd.f32 %v3024_v34, %v17800_v48  ;;  %11189 = vmatprep.mubr.msk.f32.mxu1 %vm12461_vm2, %v17547_v15  ;;  %v17804_v20 = vld [vmem:[#allocation58_spill] sm:$0xff] }
 0x3e5   : > { %v10941_v19 = vpop.f32.mrf.mxu1  ;;  %v3407_v34 = vrot.slane %v17804_v20, 1 }
 0x3e6   : > { %v3371_v50 = vadd.f32 %v17801_v12, %v3025_v40  ;;  %v17807_v12 = vld [vmem:[#allocation80_spill] sm:$0xff] }
 0x3e7   : > { %v3029_v49 = vpop.f32.mrf.mxu1  ;;  %11190 = vmatmul.mubr.msk.f32.gmra.mxu1 %vm1800_vm4, %v17802_v10  ;;  %v17808_v10 = vld [vmem:[#allocation116_spill] sm:$0xff] }
 0x3e8   : > { %v14951_v7 = vadd.f32 %v3371_v50, %v14641_v39  ;;  %v3030_v43 = vadd.f32 %v3029_v49, %v17803_v60  ;;  %11192 = vmatprep.mubr.msk.f32.mxu1 %vm12461_vm2, %v17547_v15  ;;  %v9006_v49 = vld [vmem:[%s17411_s4 + $0x70] sm:$0xff] }
 0x3e9   : > { %v10944_v22 = vpop.f32.mrf.mxu1  ;;  %11394 = vmatpush3.msra.mxu0 %v9006_v49 }
 0x3ea   : > { %v3372_v48 = vadd.f32 %v17805_v55, %v3030_v43  ;;  %v17809_v43 = vld [vmem:[#allocation56_spill] sm:$0xff]  ;;  %11395 = vmatprep.subr.mxu0 %v17547_v15 }
 0x3eb   : > { %v3034_v19 = vpop.f32.mrf.mxu1  ;;  %11193 = vmatmul.mubr.msk.f32.gmra.mxu1 %vm1800_vm4, %v17806_v35  ;;  %v17810_v22 = vrot.slane %v17809_v43, 1 }
 0x3ec   : > { %v14961_v40 = vadd.f32 %v3372_v48, %v14651_v32  ;;  %v3035_v39 = vadd.f32 %v3034_v19, %v17807_v12  ;;  %11195 = vmatprep.mubr.msk.f32.mxu1 %vm12461_vm2, %v17547_v15  ;;  %v17811_v32 = vld [vmem:[#allocation57_spill] sm:$0xff]  ;;  %v17812_v19 = vld [vmem:[#allocation83_spill] sm:$0xff] }
 0x3ed   : > { %v10947_v50 = vpop.f32.mrf.mxu1  ;;  %v3408_v20 = vsel %vm1740_vm5, %v17810_v22, %v3407_v34  ;;  %v3409_v55 = vrot.slane %v17811_v32, 1 }
 0x3ee   : > { %v3373_v60 = vadd.f32 %v17808_v10, %v3035_v39  ;;  %v17813_v50 = vld [vmem:[#allocation11_spill] sm:$0xff] }
 0x3ef   : > { %v3039_v35 = vpop.f32.mrf.mxu1  ;;  %11196 = vmatmul.mubr.msk.f32.gmra.mxu1 %vm1800_vm4, %v3408_v20  ;;  %v3410_v49 = vsel %vm1740_vm5, %v3407_v34, %v3409_v55  ;;  %v17814_v20 = vld [vmem:[#allocation86_spill] sm:$0xff]  ;;  %v17817_v55 = vld [vmem:[#allocation87_spill] sm:$0xff] }
 0x3f0   : > { %v14977_v48 = vadd.f32 %v3373_v60, %v14661_v54  ;;  %v3040_v12 = vadd.f32 %v3039_v35, %v17812_v19  ;;  %11198 = vmatprep.mubr.msk.f32.mxu1 %vm12461_vm2, %v17547_v15  ;;  %v17815_v60 = vld [vmem:[#allocation117_spill] sm:$0xff] }
 0x3f1   : > { %v10950_v39 = vpop.f32.mrf.mxu1 }
 0x3f2   : > { %v3374_v10 = vadd.f32 %v17813_v50, %v3040_v12  ;;  %v17816_v39 = vld [vmem:[#allocation30_spill] sm:$0xff] }
 0x3f3   : > { %v3044_v43 = vpop.f32.mrf.mxu1  ;;  %11199 = vmatmul.mubr.msk.f32.gmra.mxu1 %vm1800_vm4, %v3410_v49  ;;  %v17818_v50 = vld [vmem:[#allocation62_spill] sm:$0xff] }
 0x3f4   : > { %v14986_v22 = vadd.f32 %v3374_v10, %v14671_v6  ;;  %v3045_v32 = vadd.f32 %v3044_v43, %v17814_v20  ;;  %11304 = vmatprep.mubr.msk.f32.mxu1 %vm12461_vm2, %v17547_v15  ;;  %v17819_v43 = vld [vmem:[#allocation13_spill] sm:$0xff] }
 0x3f5   : > { %v10953_v54 = vpop.f32.mrf.mxu1 }
 0x3f6   : > { %v3375_v35 = vadd.f32 %v17815_v60, %v3045_v32  ;;  %v17820_v32 = vld [vmem:[#allocation88_spill] sm:$0xff] }
 0x3f7   : > { %v3049_v19 = vpop.f32.mrf.mxu1  ;;  %11305 = vmatmul.mubr.msk.f32.vlgmr.msra.gmra.mxu1 %vm1800_vm4, %v17816_v39 }
 0x3f8   : > { %v14995_v34 = vadd.f32 %v3375_v35, %v14681_v38  ;;  %v3050_v12 = vadd.f32 %v3049_v19, %v17817_v55  ;;  %11307 = vmatprep.mubr.msk.f32.mxu1 %vm12461_vm2, %v17547_v15  ;;  %v9005_v38 = vld [vmem:[%s17411_s4 + $0x68] sm:$0xff] }
 0x3f9   : > { %v10956_v6 = vpop.f32.mrf.mxu1  ;;  %11396 = vmatpush3.msra.mxu0 %v9005_v38  ;;  %v17821_v35 = vld [vmem:[#allocation61_spill] sm:$0xff]  ;;  %v17822_v55 = vld [vmem:[#allocation46_spill] sm:$0xff] }
 0x3fa   : > { %v3376_v10 = vadd.f32 %v17818_v50, %v3050_v12  ;;  %11397 = vmatprep.subr.mxu0 %v17547_v15  ;;  %v17823_v12 = vld [vmem:[#allocation89_spill] sm:$0xff]  ;;  %v17826_v38 = vld [vmem:[#allocation90_spill] sm:$0xff] }
 0x3fb   : > { %v3054_v49 = vpop.f32.mrf.mxu1  ;;  %11308 = vmatmul.mubr.msk.f32.gmra.mxu1 %vm1800_vm4, %v17819_v43 }
 0x3fc   : > { %v15004_v20 = vadd.f32 %v3376_v10, %v14697_v29  ;;  %v3055_v54 = vadd.f32 %v3054_v49, %v17820_v32  ;;  %11310 = vmatprep.mubr.msk.f32.mxu1 %vm12461_vm2, %v17547_v15  ;;  %v17824_v10 = vld [vmem:[#allocation118_spill] sm:$0xff]  ;;  %v17825_v32 = vld [vmem:[#allocation29_spill] sm:$0xff] }
 0x3fd   : > { %v10959_v60 = vpop.f32.mrf.mxu1 }
 0x3fe   : > { %v3377_v19 = vadd.f32 %v17821_v35, %v3055_v54  ;;  %v17827_v35 = vld [vmem:[#allocation119_spill] sm:$0xff] }
 0x3ff   : > { %v3059_v39 = vpop.f32.mrf.mxu1  ;;  %11311 = vmatmul.mubr.msk.f32.gmra.mxu1 %vm1800_vm4, %v17822_v55  ;;  %v17828_v55 = vld [vmem:[#allocation12_spill] sm:$0xff] }
 0x400   : > { %v15017_v29 = vadd.f32 %v3377_v19, %v14715_v53  ;;  %v3060_v6 = vadd.f32 %v3059_v39, %v17823_v12  ;;  %11313 = vmatprep.mubr.msk.f32.mxu1 %vm12461_vm2, %v17547_v15 }
 0x401   : > { %v10962_v50 = vpop.f32.mrf.mxu1 }
 0x402   : > { %v3378_v49 = vadd.f32 %v17824_v10, %v3060_v6  ;;  %v17829_v6 = vld [vmem:[#allocation91_spill] sm:$0xff]  ;;  %v17830_v10 = vld [vmem:[#allocation120_spill] sm:$0xff] }
 0x403   : > { %v3064_v43 = vpop.f32.mrf.mxu1  ;;  %11314 = vmatmul.mubr.msk.f32.gmra.mxu1 %vm1800_vm4, %v17825_v32  ;;  %v17831_v32 = vld [vmem:[#allocation49_spill] sm:$0xff] }
 0x404   : > { %v15026_v54 = vadd.f32 %v3378_v49, %v14727_v27  ;;  %v3065_v60 = vadd.f32 %v3064_v43, %v17826_v38  ;;  %11316 = vmatprep.mubr.msk.f32.mxu1 %vm12461_vm2, %v17547_v15 }
 0x405   : > { %v10965_v53 = vpop.f32.mrf.mxu1 }
 0x406   : > { %v3379_v19 = vadd.f32 %v17827_v35, %v3065_v60  ;;  %v17832_v60 = vld [vmem:[#allocation92_spill] sm:$0xff] }
 0x407   : > { %v3069_v39 = vpop.f32.mrf.mxu1  ;;  %11317 = vmatmul.mubr.msk.f32.gmra.mxu1 %vm1800_vm4, %v17828_v55 }
 0x408   : > { %v15035_v12 = vadd.f32 %v3379_v19, %v14737_v30  ;;  %v3070_v50 = vadd.f32 %v3069_v39, %v17829_v6  ;;  %11319 = vmatprep.mubr.msk.f32.mxu1 %vm12461_vm2, %v17547_v15  ;;  %v9004_v30 = vld [vmem:[%s17411_s4 + $0x60] sm:$0xff] }
 0x409   : > { %v10968_v27 = vpop.f32.mrf.mxu1  ;;  %11398 = vmatpush3.msra.mxu0 %v9004_v30  ;;  %v17833_v19 = vld [vmem:[#allocation121_spill] sm:$0xff]  ;;  %v17834_v6 = vld [vmem:[#allocation32_spill] sm:$0xff]  ;;  %v17840_v30 = vld [vmem:[#allocation94_spill] sm:$0xff] }
 0x40a   : > { %v3380_v49 = vadd.f32 %v17830_v10, %v3070_v50  ;;  %11399 = vmatprep.subr.mxu0 %v17547_v15  ;;  %v17836_v50 = vld [vmem:[#allocation93_spill] sm:$0xff] }
 0x40b   : > { %v3074_v43 = vpop.f32.mrf.mxu1  ;;  %11320 = vmatmul.mubr.msk.f32.gmra.mxu1 %vm1800_vm4, %v17831_v32 }
 0x40c   : > { %v15044_v38 = vadd.f32 %v3380_v49, %v14747_v36  ;;  %v3075_v53 = vadd.f32 %v3074_v43, %v17832_v60  ;;  %11322 = vmatprep.mubr.msk.f32.mxu1 %vm12461_vm2, %v17547_v15  ;;  %v17837_v49 = vld [vmem:[#allocation122_spill] sm:$0xff]  ;;  %v17838_v60 = vld [vmem:[#allocation15_spill] sm:$0xff] }
 0x40d   : > { %v10971_v35 = vpop.f32.mrf.mxu1 }
 0x40e   : > { %v3381_v39 = vadd.f32 %v17833_v19, %v3075_v53  ;;  %v17841_v19 = vld [vmem:[#allocation123_spill] sm:$0xff] }
 0x40f   : > { %v3079_v55 = vpop.f32.mrf.mxu1  ;;  %11323 = vmatmul.mubr.msk.f32.gmra.mxu1 %vm1800_vm4, %v17834_v6  ;;  %v17842_v6 = vld [vmem:[#allocation48_spill] sm:$0xff] }
 0x410   : > { %v15057_v36 = vadd.f32 %v3381_v39, %v14757_v9  ;;  %v3080_v27 = vadd.f32 %v3079_v55, %v17836_v50  ;;  %11325 = vmatprep.mubr.msk.f32.mxu1 %vm12461_vm2, %v17547_v15 }
 0x411   : > { %v10974_v10 = vpop.f32.mrf.mxu1 }
 0x412   : > { %17835 = vst [vmem:[#allocation65_spill] sm:$0xff] %v15057_v36  ;;  %v3382_v43 = vadd.f32 %v17837_v49, %v3080_v27  ;;  %v17844_v27 = vld [vmem:[#allocation95_spill] sm:$0xff] }
 0x413   : > { %v3084_v32 = vpop.f32.mrf.mxu1  ;;  %11326 = vmatmul.mubr.msk.f32.gmra.mxu1 %vm1800_vm4, %v17838_v60  ;;  %v9003_v49 = vld [vmem:[%s17411_s4 + $0x58] sm:$0xff] }
 0x414   : > { %v15066_v53 = vadd.f32 %v3382_v43, %v14767_v41  ;;  %v3085_v35 = vadd.f32 %v3084_v32, %v17840_v30  ;;  %11328 = vmatprep.mubr.msk.f32.mxu1 %vm12461_vm2, %v17547_v15  ;;  %v17845_v43 = vld [vmem:[#allocation124_spill] sm:$0xff]  ;;  %11400 = vmatpush3.msra.mxu0 %v9003_v49  ;;  %v17846_v30 = vld [vmem:[#allocation31_spill] sm:$0xff] }
 0x415   : > { %v10977_v9 = vpop.f32.mrf.mxu1  ;;  %11401 = vmatprep.subr.mxu0 %v17547_v15 }
 0x416   : > { %17839 = vst [vmem:[#allocation66_spill] sm:$0xff] %v15066_v53  ;;  %v3383_v39 = vadd.f32 %v17841_v19, %v3085_v35  ;;  %v17848_v35 = vld [vmem:[#allocation96_spill] sm:$0xff] }
 0x417   : > { %v3089_v55 = vpop.f32.mrf.mxu1  ;;  %11329 = vmatmul.mubr.msk.f32.gmra.mxu1 %vm1800_vm4, %v17842_v6 }
 0x418   : > { %v15075_v50 = vadd.f32 %v3383_v39, %v14777_v46  ;;  %v3090_v10 = vadd.f32 %v3089_v55, %v17844_v27  ;;  %11331 = vmatprep.mubr.msk.f32.mxu1 %vm12461_vm2, %v17547_v15  ;;  %v17849_v39 = vld [vmem:[#allocation125_spill] sm:$0xff]  ;;  %v17850_v27 = vld [vmem:[#allocation14_spill] sm:$0xff] }
 0x419   : > { %v10980_v41 = vpop.f32.mrf.mxu1 }
 0x41a   : > { %17843 = vst [vmem:[#allocation67_spill] sm:$0xff] %v15075_v50  ;;  %v3384_v32 = vadd.f32 %v17845_v43, %v3090_v10  ;;  %v17852_v41 = vld [vmem:[#allocation97_spill] sm:$0xff]  ;;  %v17853_v43 = vld [vmem:[#allocation126_spill] sm:$0xff] }
 0x41b   : > { %v3094_v60 = vpop.f32.mrf.mxu1  ;;  %11332 = vmatmul.mubr.msk.f32.gmra.mxu1 %vm1800_vm4, %v17846_v30  ;;  %v17854_v30 = vld [vmem:[#allocation52_spill] sm:$0xff] }
 0x41c   : > { %v15088_v46 = vadd.f32 %v3384_v32, %v14787_v37  ;;  %v3095_v9 = vadd.f32 %v3094_v60, %v17848_v35  ;;  %11334 = vmatprep.mubr.msk.f32.mxu1 %vm12461_vm2, %v17547_v15 }
 0x41d   : > { %v10983_v19 = vpop.f32.mrf.mxu1 }
 0x41e   : > { %17847 = vst [vmem:[#allocation68_spill] sm:$0xff] %v15088_v46  ;;  %v3385_v55 = vadd.f32 %v17849_v39, %v3095_v9  ;;  %v17856_v9 = vld [vmem:[#allocation98_spill] sm:$0xff]  ;;  %v17857_v39 = vld [vmem:[#allocation127_spill] sm:$0xff] }
 0x41f   : > { %v3099_v6 = vpop.f32.mrf.mxu1  ;;  %11335 = vmatmul.mubr.msk.f32.gmra.mxu1 %vm1800_vm4, %v17850_v27  ;;  %v17858_v27 = vld [vmem:[#allocation34_spill] sm:$0xff] }
 0x420   : > { %v15097_v10 = vadd.f32 %v3385_v55, %v14797_v62  ;;  %v3100_v49 = vadd.f32 %v3099_v6, %v17852_v41  ;;  %11337 = vmatprep.mubr.msk.f32.mxu1 %vm12461_vm2, %v17547_v15 }
 0x421   : > { %v10986_v37 = vpop.f32.mrf.mxu1 }
 0x422   : > { %17851 = vst [vmem:[#allocation39_spill] sm:$0xff] %v15097_v10  ;;  %v3386_v32 = vadd.f32 %v17853_v43, %v3100_v49  ;;  %v17860_v49 = vld [vmem:[#allocation99_spill] sm:$0xff] }
 0x423   : > { %v3104_v60 = vpop.f32.mrf.mxu1  ;;  %11338 = vmatmul.mubr.msk.f32.gmra.mxu1 %vm1800_vm4, %v17854_v30 }
 0x424   : > { %v15106_v35 = vadd.f32 %v3386_v32, %v14807_v8  ;;  %v3105_v19 = vadd.f32 %v3104_v60, %v17856_v9  ;;  %11340 = vmatprep.mubr.msk.f32.mxu1 %vm12461_vm2, %v17547_v15  ;;  %v9002_v8 = vld [vmem:[%s17411_s4 + $0x50] sm:$0xff]  ;;  %v17861_v32 = vld [vmem:[#allocation128_spill] sm:$0xff]  ;;  %v17862_v9 = vld [vmem:[#allocation17_spill] sm:$0xff] }
 0x425   : > { %v10989_v62 = vpop.f32.mrf.mxu1  ;;  %11402 = vmatpush3.msra.mxu0 %v9002_v8  ;;  %v17868_v8 = vld [vmem:[#allocation101_spill] sm:$0xff] }
 0x426   : > { %17855 = vst [vmem:[#allocation22_spill] sm:$0xff] %v15106_v35  ;;  %v3387_v55 = vadd.f32 %v17857_v39, %v3105_v19  ;;  %11403 = vmatprep.subr.mxu0 %v17547_v15  ;;  %v17864_v19 = vld [vmem:[#allocation100_spill] sm:$0xff] }
 0x427   : > { %v3109_v6 = vpop.f32.mrf.mxu1  ;;  %11341 = vmatmul.mubr.msk.f32.gmra.mxu1 %vm1800_vm4, %v17858_v27 }
 0x428   : > { %v15115_v41 = vadd.f32 %v3387_v55, %v14817_v4  ;;  %v3110_v37 = vadd.f32 %v3109_v6, %v17860_v49  ;;  %11343 = vmatprep.mubr.msk.f32.mxu1 %vm12461_vm2, %v17547_v15  ;;  %v17865_v55 = vld [vmem:[#allocation129_spill] sm:$0xff]  ;;  %v17866_v49 = vld [vmem:[#allocation50_spill] sm:$0xff] }
 0x429   : > { %v10992_v43 = vpop.f32.mrf.mxu1 }
 0x42a   : > { %17859 = vst [vmem:[#allocation5_spill] sm:$0xff] %v15115_v41  ;;  %v3388_v60 = vadd.f32 %v17861_v32, %v3110_v37  ;;  %v9053_v32 = vld [vmem:[%s17411_s4 + $0x1b8] sm:$0xff] }
 0x42b   : > { %v3114_v30 = vpop.f32.mrf.mxu1  ;;  %11344 = vmatmul.mubr.msk.f32.gmra.mxu1 %vm1800_vm4, %v17862_v9 }
 0x42c   : > { %v15128_v4 = vadd.f32 %v3388_v60, %v14827_v57  ;;  %v3115_v62 = vadd.f32 %v3114_v30, %v17864_v19  ;;  %11346 = vmatprep.mubr.msk.f32.mxu1 %vm12461_vm2, %v17547_v15  ;;  %v17869_v60 = vld [vmem:[#allocation130_spill] sm:$0xff]  ;;  %11506 = vmatpush3.msra.mxu1 %v9053_v32  ;;  %v17870_v19 = vld [vmem:[#allocation33_spill] sm:$0xff] }
 0x42d   : > { %v10995_v39 = vpop.f32.mrf.mxu1  ;;  %11507 = vmatprep.subr.mxu1 %v17547_v15 }
 0x42e   : > { %17863 = vst [vmem:[#allocation41_spill] sm:$0xff] %v15128_v4  ;;  %v3389_v6 = vadd.f32 %v17865_v55, %v3115_v62  ;;  %v17872_v62 = vld [vmem:[#allocation102_spill] sm:$0xff] }
 0x42f   : > { %v3119_v27 = vpop.f32.mrf.mxu1  ;;  %11347 = vmatmul.mubr.msk.f32.gmra.mxu1 %vm1800_vm4, %v17866_v49 }
 0x430   : > { %v15137_v37 = vadd.f32 %v3389_v6, %v14837_v63  ;;  %v3120_v43 = vadd.f32 %v3119_v27, %v17868_v8  ;;  %11349 = vmatprep.mubr.msk.f32.mxu1 %vm12461_vm2, %v17547_v15  ;;  %v9001_v6 = vld [vmem:[%s17411_s4 + $0x48] sm:$0xff]  ;;  %v17873_v27 = vld [vmem:[#allocation131_spill] sm:$0xff] }
 0x431   : > { %v10998_v57 = vpop.f32.mrf.mxu1  ;;  %11404 = vmatpush3.msra.mxu0 %v9001_v6 }
 0x432   : > { %17867 = vst [vmem:[#allocation24_spill] sm:$0xff] %v15137_v37  ;;  %v3390_v30 = vadd.f32 %v17869_v60, %v3120_v43  ;;  %v17874_v43 = vld [vmem:[#allocation16_spill] sm:$0xff]  ;;  %11405 = vmatprep.subr.mxu0 %v17547_v15 }
 0x433   : > { %v3124_v9 = vpop.f32.mrf.mxu1  ;;  %11350 = vmatmul.mubr.msk.f32.gmra.mxu1 %vm1800_vm4, %v17870_v19  ;;  %v17876_v57 = vld [vmem:[#allocation104_spill] sm:$0xff] }
 0x434   : > { %v15150_v63 = vadd.f32 %v3390_v30, %v14847_v14  ;;  %v3125_v39 = vadd.f32 %v3124_v9, %v17872_v62  ;;  %11352 = vmatprep.mubr.msk.f32.mxu1 %vm12461_vm2, %v17547_v15  ;;  %v17877_v30 = vld [vmem:[#allocation133_spill] sm:$0xff]  ;;  %v17878_v62 = vld [vmem:[#allocation36_spill] sm:$0xff] }
 0x435   : > { %v11001_v55 = vpop.f32.mrf.mxu1 }
 0x436   : > { %17871 = vst [vmem:[#allocation7_spill] sm:$0xff] %v15150_v63  ;;  %v3391_v49 = vadd.f32 %v17873_v27, %v3125_v39  ;;  %v17880_v55 = vld [vmem:[#allocation106_spill] sm:$0xff]  ;;  %v17881_v27 = vld [vmem:[#allocation135_spill] sm:$0xff] }
 0x437   : > { %v3129_v8 = vpop.f32.mrf.mxu1  ;;  %11353 = vmatmul.mubr.msk.f32.gmra.mxu1 %vm1800_vm4, %v17874_v43  ;;  %v17882_v43 = vld [vmem:[#allocation35_spill] sm:$0xff] }
 0x438   : > { %v15163_v14 = vadd.f32 %v3391_v49, %v14857_v13  ;;  %v3130_v32 = vadd.f32 %v3129_v8, %v17876_v57  ;;  %11355 = vmatprep.mubr.msk.f32.mxu1 %vm12461_vm2, %v17547_v15 }
 0x439   : > { %v11004_v60 = vpop.f32.mrf.mxu1 }
 0x43a   : > { %17875 = vst [vmem:[#allocation40_spill] sm:$0xff] %v15163_v14  ;;  %v3392_v9 = vadd.f32 %v17877_v30, %v3130_v32  ;;  %v17884_v32 = vld [vmem:[#allocation108_spill] sm:$0xff] }
 0x43b   : > { %v3134_v19 = vpop.f32.mrf.mxu1  ;;  %11356 = vmatmul.mubr.msk.f32.gmra.mxu1 %vm1800_vm4, %v17878_v62 }
 0x43c   : > { %v15172_v39 = vadd.f32 %v3392_v9, %v14867_v5  ;;  %v3135_v6 = vadd.f32 %v3134_v19, %v17880_v55  ;;  %11358 = vmatprep.mubr.msk.f32.mxu1 %vm12461_vm2, %v17547_v15  ;;  %v17885_v19 = vld [vmem:[#allocation37_spill] sm:$0xff] }
 0x43d   : > { %v11007_v13 = vpop.f32.mrf.mxu1 }
 0x43e   : > { %17879 = vst [vmem:[#allocation23_spill] sm:$0xff] %v15172_v39  ;;  %v3393_v49 = vadd.f32 %v17881_v27, %v3135_v6  ;;  %v17887_v6 = vld [vmem:[#allocation38_spill] sm:$0xff] }
 0x43f   : > { %v3139_v8 = vpop.f32.mrf.mxu1  ;;  %11359 = vmatmul.mubr.msk.f32.gmra.mxu1 %vm1800_vm4, %v17882_v43 }
 0x440   : > { %v15181_v57 = vadd.f32 %v3393_v49, %v14877_v44  ;;  %v3140_v60 = vadd.f32 %v3139_v8, %v17884_v32  ;;  %11361 = vmatprep.mubr.msk.f32.mxu1 %vm12461_vm2, %v17547_v15  ;;  %v17888_v49 = vld [vmem:[#allocation70_spill] sm:$0xff]  ;;  %v9050_v8 = vld [vmem:[%s17411_s4 + $0x1a0] sm:$0xff]  ;;  %v9049_v32 = vld [vmem:[%s17411_s4 + $0x198] sm:$0xff] }
 0x441   : > { %v11010_v5 = vpop.f32.mrf.mxu1 }
 0x442   : > { %17883 = vst [vmem:[#allocation6_spill] sm:$0xff] %v15181_v57  ;;  %v3394_v30 = vadd.f32 %v14587_v11, %v3140_v60  ;;  %v9052_v11 = vld [vmem:[%s17411_s4 + $0x1b0] sm:$0xff]  ;;  %v17889_v5 = vld [vmem:[#allocation73_spill] sm:$0xff] }
 0x443   : > { %v15187_v9 = vpop.f32.mrf.mxu1  ;;  %11362 = vmatmul.mubr.msk.f32.gmra.mxu1 %vm1800_vm4, %v17885_v19  ;;  %v9048_v19 = vld [vmem:[%s17411_s4 + $0x190] sm:$0xff] }
 0x444   : > { %v15192_v62 = vadd.f32 %v3394_v30, %v14887_v0  ;;  %11364 = vmatprep.mubr.msk.f32.mxu1 %vm12461_vm2, %v17547_v15  ;;  %11508 = vmatpush3.msra.mxu1 %v9052_v11  ;;  %v9051_v0 = vld [vmem:[%s17411_s4 + $0x1a8] sm:$0xff]  ;;  %v9000_v30 = vld [vmem:[%s17411_s4 + $0x40] sm:$0xff] }
 0x445   : > { %v11116_v44 = vpop.f32.mrf.mxu1  ;;  %11509 = vmatprep.subr.mxu1 %v17547_v15  ;;  %11406 = vmatpush3.msra.mxu0 %v9000_v30  ;;  %v17890_v11 = vld [vmem:[#allocation76_spill] sm:$0xff]  ;;  %v17892_v30 = vld [vmem:[#allocation82_spill] sm:$0xff] }
 0x446   : > { %17886 = vst [vmem:[#allocation43_spill] sm:$0xff] %v15192_v62  ;;  %11510 = vmatpush3.msra.mxu1 %v9051_v0  ;;  %11410 = vmatprep.subr.mxu0 %v17547_v15 }
 0x447   : > { %v15196_v55 = vpop.f32.mrf.mxu1  ;;  %11365 = vmatmul.mubr.msk.f32.gmra.mxu1 %vm1800_vm4, %v17887_v6  ;;  %11511 = vmatprep.subr.mxu1 %v17547_v15 }
 0x448   : > { %11367 = vmatprep.mubr.msk.f32.mxu1 %vm12461_vm2, %v17547_v15  ;;  %11512 = vmatpush3.msra.mxu1 %v9050_v8 }
 0x449   : > { %v11119_v13 = vpop.f32.mrf.mxu1  ;;  %11513 = vmatprep.subr.mxu1 %v17547_v15 }
 0x44a   : > { %11514 = vmatpush3.msra.mxu1 %v9049_v32  ;;  %v9047_v13 = vld [vmem:[%s17411_s4 + $0x188] sm:$0xff] }
 0x44b   : > { %v15209_v27 = vpop.f32.mrf.mxu1  ;;  %11368 = vmatmul.mubr.msk.f32.gmra.mxu1 %vm1800_vm4, %v17888_v49  ;;  %11515 = vmatprep.subr.mxu1 %v17547_v15  ;;  %v9046_v49 = vld [vmem:[%s17411_s4 + $0x180] sm:$0xff] }
 0x44c   : > { %11370 = vmatprep.mubr.msk.f32.mxu1 %vm12461_vm2, %v17547_v15  ;;  %11516 = vmatpush3.msra.mxu1 %v9048_v19 }
 0x44d   : > { %v11122_v43 = vpop.f32.mrf.mxu1  ;;  %11517 = vmatprep.subr.mxu1 %v17547_v15 }
 0x44e   : > { %11518 = vmatpush3.msra.mxu1 %v9047_v13  ;;  %v17891_v43 = vld [vmem:[#allocation79_spill] sm:$0xff] }
 0x44f   : > { %v15222_v60 = vpop.f32.mrf.mxu1  ;;  %11371 = vmatmul.mubr.msk.f32.gmra.mxu1 %vm1800_vm4, %v17889_v5  ;;  %11519 = vmatprep.subr.mxu1 %v17547_v15 }
 0x450   : > { %11373 = vmatprep.mubr.msk.f32.mxu1 %vm12461_vm2, %v17547_v15  ;;  %11520 = vmatpush3.msra.mxu1 %v9046_v49  ;;  %v17894_v49 = vld [vmem:[#allocation59_spill] sm:$0xff] }
 0x451   : > { %v11125_v44 = vpop.f32.mrf.mxu1  ;;  %11543 = vmatprep.subr.mxu1 %v17547_v15 }
 0x453   : > { %v15237_v6 = vpop.f32.mrf.mxu1  ;;  %11374 = vmatmul.mubr.msk.f32.gmra.mxu1 %vm1800_vm4, %v17890_v11  ;;  %v17893_v11 = vld [vmem:[#allocation85_spill] sm:$0xff] }
 0x454   : > { %11376 = vmatprep.mubr.msk.f32.mxu1 %vm12461_vm2, %v17547_v15 }
 0x455   : > { %v11128_v0 = vpop.f32.mrf.mxu1 }
 0x457   : > { %v15251_v8 = vpop.f32.mrf.mxu1  ;;  %11377 = vmatmul.mubr.msk.f32.gmra.mxu1 %vm1800_vm4, %v17891_v43 }
 0x458   : > { %11379 = vmatprep.mubr.msk.f32.mxu1 %vm12461_vm2, %v17547_v15 }
 0x459   : > { %v11131_v32 = vpop.f32.mrf.mxu1 }
 0x45b   : > { %v15258_v5 = vpop.f32.mrf.mxu1  ;;  %11380 = vmatmul.mubr.msk.f32.gmra.mxu1 %vm1800_vm4, %v17892_v30  ;;  %v17895_v30 = vld [vmem:[#allocation60_spill] sm:$0xff] }
 0x45c   : > { %11382 = vmatprep.mubr.msk.f32.mxu1 %vm12461_vm2, %v17547_v15 }
 0x45d   : > { %v11134_v19 = vpop.f32.mrf.mxu1 }
 0x45f   : > { %v15264_v44 = vpop.f32.mrf.mxu1  ;;  %11383 = vmatmul.mubr.msk.f32.gmra.mxu1 %vm1800_vm4, %v17893_v11 }
 0x460   : > { %11385 = vmatprep.mubr.msk.f32.mxu1 %vm12461_vm2, %v17547_v15 }
 0x461   : > { %v11137_v13 = vpop.f32.mrf.mxu1 }
 0x463   : > { %v15270_v0 = vpop.f32.mrf.mxu1  ;;  %11386 = vmatmul.mubr.msk.f32.gmra.mxu1 %vm1800_vm4, %v17894_v49 }
 0x464   : > { %11388 = vmatprep.mubr.msk.f32.mxu1 %vm12461_vm2, %v17547_v15 }
 0x465   : > { %v11140_v43 = vpop.f32.mrf.mxu1 }
 0x467   : > { %v15276_v32 = vpop.f32.mrf.mxu1  ;;  %11389 = vmatmul.mubr.msk.f32.gmra.mxu1 %vm1800_vm4, %v17895_v30 }
 0x468   : > { %11521 = vmatprep.mubr.msk.f32.mxu1 %vm12461_vm2, %v17547_v15 }
 0x469   : > { %v11143_v19 = vpop.f32.mrf.mxu1 }
 0x46b   : > { %v15282_v11 = vpop.f32.mrf.mxu1 }
 0x46d   : > { %v11146_v13 = vpop.f32.mrf.mxu1 }
 0x46f   : > { %v15284_v62 = vpop.f32.mrf.mxu1 }
 0x471   : > { %v11149_v57 = vpop.f32.mrf.mxu1 }
 0x473   : > { %v15286_v49 = vpop.f32.mrf.mxu1 }
 0x475   : > { %v11152_v39 = vpop.f32.mrf.mxu1 }
 0x477   : > { %v15288_v14 = vpop.f32.mrf.mxu1 }
 0x479   : > { %v11155_v43 = vpop.f32.mrf.mxu1 }
 0x47b   : > { %v15290_v63 = vpop.f32.mrf.mxu1 }
 0x47d   : > { %v11158_v37 = vpop.f32.mrf.mxu1 }
 0x47f   : > { %v15292_v30 = vpop.f32.mrf.mxu1 }
 0x481   : > { %v11161_v4 = vpop.f32.mrf.mxu1 }
 0x483   : > { %v15294_v41 = vpop.f32.mrf.mxu1 }
 0x485   : > { %v11164_v19 = vpop.f32.mrf.mxu1 }
 0x487   : > { %v15296_v35 = vpop.f32.mrf.mxu1 }
 0x488   : > { %17896 = vst [vmem:[#allocation103_spill] sm:$0xff] %v15296_v35 }
 0x489   : > { %v11167_v13 = vpop.f32.mrf.mxu1 }
 0x48b   : > { %v15298_v10 = vpop.f32.mrf.mxu1 }
 0x48c   : > { %17897 = vst [vmem:[#allocation132_spill] sm:$0xff] %v15298_v10 }
 0x48d   : > { %v11170_v57 = vpop.f32.mrf.mxu1 }
 0x48f   : > { %v15300_v46 = vpop.f32.mrf.mxu1 }
 0x490   : > { %17898 = vst [vmem:[#allocation26_spill] sm:$0xff] %v15300_v46 }
 0x491   : > { %v11173_v39 = vpop.f32.mrf.mxu1 }
 0x493   : > { %v15302_v50 = vpop.f32.mrf.mxu1 }
 0x494   : > { %17899 = vst [vmem:[#allocation105_spill] sm:$0xff] %v15302_v50 }
 0x495   : > { %v11176_v43 = vpop.f32.mrf.mxu1 }
 0x497   : > { %v15304_v53 = vpop.f32.mrf.mxu1 }
 0x498   : > { %17900 = vst [vmem:[#allocation134_spill] sm:$0xff] %v15304_v53 }
 0x499   : > { %v11179_v37 = vpop.f32.mrf.mxu1 }
 0x49b   : > { %v15306_v47 = vpop.f32.mrf.mxu1 }
 0x49d   : > { %v11182_v4 = vpop.f32.mrf.mxu1 }
 0x49e   : > { %v3696_v4 = vadd.f32 %v14597_v56, %v15187_v9  ;;  %v3706_v56 = vadd.f32 %v14617_v23, %v15209_v27 }
 0x49f   : > { %v15308_v36 = vpop.f32.mrf.mxu1 }
 0x4a0   : > { %17901 = vst [vmem:[#allocation9_spill] sm:$0xff] %v15308_v36 }
 0x4a1   : > { %v11185_v19 = vpop.f32.mrf.mxu1 }
 0x4a2   : > { %v15325_v19 = vld [vmem:[%s17410_s3] ss:$0 sm:$0xff] }
 0x4a3   : > { %v15310_v35 = vpop.f32.mrf.mxu1 }
 0x4a4   : > { %17902 = vst [vmem:[#allocation107_spill] sm:$0xff] %v15310_v35 }
 0x4a5   : > { %v11188_v13 = vpop.f32.mrf.mxu1 }
 0x4a7   : > { %v15312_v10 = vpop.f32.mrf.mxu1 }
 0x4a8   : > { %17903 = vst [vmem:[#allocation136_spill] sm:$0xff] %v15312_v10 }
 0x4a9   : > { %v11191_v57 = vpop.f32.mrf.mxu1 }
 0x4ab   : > { %v15314_v46 = vpop.f32.mrf.mxu1 }
 0x4ac   : > { %17904 = vst [vmem:[#allocation42_spill] sm:$0xff] %v15314_v46 }
 0x4ad   : > { %v11194_v39 = vpop.f32.mrf.mxu1 }
 0x4ae   : > { %v3701_v39 = vadd.f32 %v14607_v58, %v15196_v55  ;;  %v3711_v58 = vadd.f32 %v14627_v61, %v15222_v60 }
 0x4af   : > { %v15316_v50 = vpop.f32.mrf.mxu1 }
 0x4b0   : > { %17905 = vst [vmem:[#allocation25_spill] sm:$0xff] %v15316_v50 }
 0x4b1   : > { %v11197_v43 = vpop.f32.mrf.mxu1 }
 0x4b3   : > { %v15318_v53 = vpop.f32.mrf.mxu1 }
 0x4b4   : > { %17906 = vst [vmem:[#allocation19_spill] sm:$0xff] %v15318_v53 }
 0x4b5   : > { %v11200_v37 = vpop.f32.mrf.mxu1 }
 0x4b7   : > { %v3918_v36 = vpop.f32.mrf.mxu1 }
 0x4b8   : > { %v4062_v13 = vadd.f32 %v3918_v36, %v3696_v4 }
 0x4b9   : > { %v11306_v57 = vpop.f32.mrf.mxu1 }
 0x4ba   : > { %v4127_v50 = vadd.f32 %v15325_v19, %v4062_v13 }
 0x4bb   : > { %v3923_v43 = vpop.f32.mrf.mxu1 }
 0x4bc   : > { %v4156_v53 = vadd.f32 %v4127_v50, %v14902_v42  ;;  %v4063_v37 = vadd.f32 %v3923_v43, %v3701_v39 }
 0x4bd   : > { %v11309_v46 = vpop.f32.mrf.mxu1 }
 0x4be   : > { %v4128_v9 = vadd.f32 %v15325_v19, %v4063_v37  ;;  %v4206_v55 = vrot.slane %v4156_v53, 1 }
 0x4bf   : > { %v3928_v10 = vpop.f32.mrf.mxu1 }
 0x4c0   : > { %v4157_v35 = vadd.f32 %v4128_v9, %v14911_v45  ;;  %v4064_v36 = vadd.f32 %v3928_v10, %v3706_v56  ;;  %v3716_v45 = vadd.f32 %v14637_v21, %v15237_v6 }
 0x4c1   : > { %v11312_v4 = vpop.f32.mrf.mxu1 }
 0x4c2   : > { %v4207_v13 = vrot.slane %v4157_v35, 1  ;;  %v4129_v57 = vadd.f32 %v15325_v19, %v4064_v36 }
 0x4c3   : > { %v3933_v42 = vpop.f32.mrf.mxu1 }
 0x4c4   : > { %v4208_v50 = vsel %vm1740_vm5, %v4206_v55, %v4207_v13  ;;  %v4158_v46 = vadd.f32 %v4129_v57, %v14920_v3  ;;  %v4065_v23 = vadd.f32 %v3933_v42, %v3711_v58  ;;  %v3721_v3 = vadd.f32 %v14647_v26, %v15251_v8 }
 0x4c5   : > { %v4255_v27 = vmax.f32 %v4156_v53, %v4208_v50  ;;  %v11315_v39 = vpop.f32.mrf.mxu1 }
 0x4c6   : > { %v4209_v10 = vrot.slane %v4158_v46, 1  ;;  %v4130_v43 = vadd.f32 %v15325_v19, %v4065_v23 }
 0x4c7   : > { %v3938_v37 = vpop.f32.mrf.mxu1 }
 0x4c8   : > { %v4210_v61 = vsel %vm1740_vm5, %v4207_v13, %v4209_v10  ;;  %v4159_v60 = vadd.f32 %v4130_v43, %v14929_v2  ;;  %v4066_v56 = vadd.f32 %v3938_v37, %v3716_v45  ;;  %v3726_v2 = vadd.f32 %v14657_v59, %v15258_v5  ;;  %v4348_v59 = vld [vmem:[%s17411_s4 + $0x38] sm:$0xff]  ;;  %v4347_v37 = vld [vmem:[%s17411_s4 + $0x30] sm:$0xff] }
 0x4c9   : > { %v4256_v9 = vmax.f32 %v4157_v35, %v4210_v61  ;;  %v11318_v36 = vpop.f32.mrf.mxu1  ;;  %v3731_v5 = vadd.f32 %v14667_v1, %v15264_v44 }
 0x4ca   : > { %v4277_v4 = vrot.slane %v4159_v60, 1  ;;  %v4131_v53 = vadd.f32 %v15325_v19, %v4066_v56  ;;  %v4346_v36 = vld [vmem:[%s17411_s4 + $0x28] sm:$0xff] }
 0x4cb   : > { %v3943_v58 = vpop.f32.mrf.mxu1 }
 0x4cc   : > { %v4278_v21 = vsel %vm1740_vm5, %v4209_v10, %v4277_v4  ;;  %v15350_v6 = vadd.f32 %v4131_v53, %v14942_v24  ;;  %v4067_v55 = vadd.f32 %v3943_v58, %v3721_v3  ;;  %v3736_v3 = vadd.f32 %v14677_v52, %v15270_v0 }
 0x4cd   : > { %v4313_v57 = vmax.f32 %v4158_v46, %v4278_v21  ;;  %v11321_v13 = vpop.f32.mrf.mxu1  ;;  %v4345_v21 = vld [vmem:[%s17411_s4 + $0x20] sm:$0xff] }
 0x4ce   : > { %v4211_v35 = vrot.slane %v15350_v6, 1  ;;  %v4132_v42 = vadd.f32 %v15325_v19, %v4067_v55 }
 0x4cf   : > { %v15356_v26 = vmax.f32 %v4255_v27, %v4313_v57  ;;  %v3948_v8 = vpop.f32.mrf.mxu1 }
 0x4d0   : > { %v4279_v50 = vsel %vm1740_vm5, %v4277_v4, %v4211_v35  ;;  %v15360_v23 = vadd.f32 %v4132_v42, %v14951_v7  ;;  %v4068_v24 = vadd.f32 %v3948_v8, %v3726_v2  ;;  %v4344_v2 = vld [vmem:[%s17411_s4 + $0x18] sm:$0xff] }
 0x4d1   : > { %v4359_v46 = vrot.slane %v15356_v26, 2  ;;  %v4314_v39 = vmax.f32 %v4159_v60, %v4279_v50  ;;  %v11324_v45 = vpop.f32.mrf.mxu1 }
 0x4d2   : > { %v4212_v27 = vrot.slane %v15360_v23, 1  ;;  %v4133_v10 = vadd.f32 %v15325_v19, %v4068_v24  ;;  %v9059_v24 = vld [vmem:[%s17411_s4 + $0x1e0] sm:$0xff] }
 0x4d3   : > { %v15370_v43 = vmax.f32 %v4256_v9, %v4314_v39  ;;  %v3953_v7 = vpop.f32.mrf.mxu1  ;;  %11408 = vmatmul.mubr.msk.f32.vlgmr.msra.gmra.mxu0 %vm4360_vm6, %v4359_v46 }
 0x4d4   : > { %v4213_v61 = vsel %vm1740_vm5, %v4211_v35, %v4212_v27  ;;  %v4162_v60 = vadd.f32 %v4133_v10, %v14961_v40  ;;  %v4069_v56 = vadd.f32 %v3953_v7, %v3731_v5  ;;  %11411 = vmatpush3.msra.mxu0 %v4348_v59  ;;  %11426 = vmatprep.mubr.msk.f32.mxu0 %vm12461_vm2, %v17547_v15  ;;  %v9062_v40 = vld [vmem:[%s17411_s4 + $0x1f8] sm:$0xff]  ;;  %v9060_v35 = vld [vmem:[%s17411_s4 + $0x1e8] sm:$0xff] }
 0x4d5   : > { %v4846_v1 = vrot.slane %v15370_v43, 4  ;;  %v4257_v44 = vmax.f32 %v15350_v6, %v4213_v61  ;;  %11412 = vmatprep.subr.mxu0 %v17547_v15  ;;  %v11327_v9 = vpop.f32.mrf.mxu1  ;;  %v9061_v6 = vld [vmem:[%s17411_s4 + $0x1f0] sm:$0xff]  ;;  %v4342_v59 = vld [vmem:[%s17411_s4 + $0x8] sm:$0xff]  ;;  %v9058_v5 = vld [vmem:[%s17411_s4 + $0x1d8] sm:$0xff] }
 0x4d6   : > { %v4214_v4 = vrot.slane %v4162_v60, 1  ;;  %v4134_v53 = vadd.f32 %v15325_v19, %v4069_v56  ;;  %11413 = vmatpush3.msra.mxu0 %v4347_v37  ;;  %v4341_v61 = vld [vmem:[%s17411_s4] sm:$0xff]  ;;  %v9017_v9 = vld [vmem:[%s17411_s4 + $0xb8] sm:$0xff] }
 0x4d7   : > { %11414 = vmatprep.subr.mxu0 %v17547_v15  ;;  %v3958_v58 = vpop.f32.mrf.mxu1  ;;  %11522 = vmatmul.mubr.msk.f32.vlgmr.msra.gmra.mxu1 %vm4360_vm6, %v4846_v1 }
 0x4d8   : > { %v4215_v55 = vsel %vm1740_vm5, %v4212_v27, %v4214_v4  ;;  %v4163_v52 = vadd.f32 %v4134_v53, %v14977_v48  ;;  %v4070_v0 = vadd.f32 %v3958_v58, %v3736_v3  ;;  %11415 = vmatpush3.msra.mxu0 %v4346_v36  ;;  %11544 = vmatpush3.msra.mxu1 %v9062_v40  ;;  %v9056_v3 = vld [vmem:[%s17411_s4 + $0x1c8] sm:$0xff] }
 0x4d9   : > { %v4258_v57 = vmax.f32 %v15360_v23, %v4215_v55  ;;  %11416 = vmatprep.subr.mxu0 %v17547_v15  ;;  %11545 = vmatprep.subr.mxu1 %v17547_v15  ;;  %v11330_v13 = vpop.f32.mrf.mxu1  ;;  %v3741_v48 = vadd.f32 %v14690_v16, %v15276_v32  ;;  %v4343_v23 = vld [vmem:[%s17411_s4 + $0x10] sm:$0xff]  ;;  %v3751_v36 = vadd.f32 %v14722_v18, %v15284_v62 }
 0x4da   : > { %v4280_v42 = vrot.slane %v4163_v52, 1  ;;  %v4135_v8 = vadd.f32 %v15325_v19, %v4070_v0  ;;  %11417 = vmatpush3.msra.mxu0 %v4345_v21  ;;  %11546 = vmatpush3.msra.mxu1 %v9061_v6  ;;  %v9016_v18 = vld [vmem:[%s17411_s4 + $0xb0] sm:$0xff]  ;;  %v9055_v6 = vld [vmem:[%s17411_s4 + $0x1c0] sm:$0xff]  ;;  %v3756_v0 = vadd.f32 %v14733_v51, %v15286_v49  ;;  %v9015_v13 = vld [vmem:[%s17411_s4 + $0xa8] sm:$0xff] }
 0x4db   : > { %11418 = vmatprep.subr.mxu0 %v17547_v15  ;;  %11547 = vmatprep.subr.mxu1 %v17547_v15  ;;  %v3963_v50 = vpop.f32.mrf.mxu1 }
 0x4dc   : > { %v4281_v16 = vsel %vm1740_vm5, %v4214_v4, %v4280_v42  ;;  %v15424_v32 = vadd.f32 %v4135_v8, %v14986_v22  ;;  %v4071_v46 = vadd.f32 %v3963_v50, %v3741_v48  ;;  %11419 = vmatpush3.msra.mxu0 %v4344_v2  ;;  %11548 = vmatpush3.msra.mxu1 %v9060_v35  ;;  %v9089_v35 = vld [vmem:[%s17411_s4 + $0x2b8] sm:$0xff] }
 0x4dd   : > { %v4315_v39 = vmax.f32 %v4162_v60, %v4281_v16  ;;  %11420 = vmatprep.subr.mxu0 %v17547_v15  ;;  %11549 = vmatprep.subr.mxu1 %v17547_v15  ;;  %v11333_v45 = vpop.f32.mrf.mxu1  ;;  %v3746_v22 = vadd.f32 %v14707_v25, %v15282_v11  ;;  %v9057_v25 = vld [vmem:[%s17411_s4 + $0x1d0] sm:$0xff] }
 0x4de   : > { %v4216_v27 = vrot.slane %v15424_v32, 1  ;;  %v4136_v10 = vadd.f32 %v15325_v19, %v4071_v46  ;;  %11421 = vmatpush3.msra.mxu0 %v4343_v23  ;;  %11550 = vmatpush3.msra.mxu1 %v9059_v24  ;;  %v3761_v23 = vadd.f32 %v14743_v33, %v15288_v14 }
 0x4df   : > { %v15438_v7 = vmax.f32 %v4257_v44, %v4315_v39  ;;  %11422 = vmatprep.subr.mxu0 %v17547_v15  ;;  %11551 = vmatprep.subr.mxu1 %v17547_v15  ;;  %v3968_v37 = vpop.f32.mrf.mxu1  ;;  %v9087_v39 = vld [vmem:[%s17411_s4 + $0x2a8] sm:$0xff] }
 0x4e0   : > { %v4282_v11 = vsel %vm1740_vm5, %v4280_v42, %v4216_v27  ;;  %v15450_v60 = vadd.f32 %v4136_v10, %v14995_v34  ;;  %v4072_v56 = vadd.f32 %v3968_v37, %v3746_v22  ;;  %11423 = vmatpush3.msra.mxu0 %v4342_v59  ;;  %11552 = vmatpush3.msra.mxu1 %v9058_v5  ;;  %v9014_v42 = vld [vmem:[%s17411_s4 + $0xa0] sm:$0xff]  ;;  %v9012_v59 = vld [vmem:[%s17411_s4 + $0x90] sm:$0xff] }
 0x4e1   : > { %v4316_v1 = vmax.f32 %v4163_v52, %v4282_v11  ;;  %11424 = vmatprep.subr.mxu0 %v17547_v15  ;;  %11553 = vmatprep.subr.mxu1 %v17547_v15  ;;  %v11336_v44 = vpop.f32.mrf.mxu1 }
 0x4e2   : > { %v4217_v40 = vrot.slane %v15450_v60, 1  ;;  %v4137_v34 = vadd.f32 %v15325_v19, %v4072_v56  ;;  %11425 = vmatpush3.msra.mxu0 %v4341_v61  ;;  %11554 = vmatpush3.msra.mxu1 %v9057_v25  ;;  %v9011_v61 = vld [vmem:[%s17411_s4 + $0x88] sm:$0xff] }
 0x4e3   : > { %v15464_v4 = vmax.f32 %v4258_v57, %v4316_v1  ;;  %11427 = vmatmul.mubr.msk.f32.vlgmr.msra.gmra.mxu0 %vm4360_vm6, %v15356_v26  ;;  %11429 = vmatprep.subr.mxu0 %v17547_v15  ;;  %v3973_v53 = vpop.f32.mrf.mxu1  ;;  %v9010_v1 = vld [vmem:[%s17411_s4 + $0x80] sm:$0xff] }
 0x4e4   : > { %v4218_v62 = vsel %vm1740_vm5, %v4216_v27, %v4217_v40  ;;  %v4166_v58 = vadd.f32 %v4137_v34, %v15004_v20  ;;  %11555 = vmatprep.subr.mxu1 %v17547_v15  ;;  %v4073_v21 = vadd.f32 %v3973_v53, %v3751_v36  ;;  %11430 = vmatpush3.msra.mxu0 %v9017_v9  ;;  %v9086_v27 = vld [vmem:[%s17411_s4 + $0x2a0] sm:$0xff]  ;;  %v9084_v36 = vld [vmem:[%s17411_s4 + $0x290] sm:$0xff]  ;;  %v4514_v53 = vrot.slane %v15356_v26, 4 }
 0x4e5   : > { %v4259_v55 = vmax.f32 %v15424_v32, %v4218_v62  ;;  %11556 = vmatpush3.msra.mxu1 %v9056_v3  ;;  %11431 = vmatprep.subr.mxu0 %v17547_v15  ;;  %v11339_v52 = vpop.f32.mrf.mxu1  ;;  %v9013_v32 = vld [vmem:[%s17411_s4 + $0x98] sm:$0xff] }
 0x4e6   : > { %v4219_v57 = vrot.slane %v4166_v58, 1  ;;  %v4138_v20 = vadd.f32 %v15325_v19, %v4073_v21  ;;  %11557 = vmatprep.subr.mxu1 %v17547_v15  ;;  %11432 = vmatpush3.msra.mxu0 %v9016_v18  ;;  %v9026_v62 = vld [vmem:[%s17411_s4 + $0xf8] sm:$0xff]  ;;  %v9083_v21 = vld [vmem:[%s17411_s4 + $0x288] sm:$0xff]  ;;  %v3776_v52 = vadd.f32 %v14773_v31, %v15294_v41  ;;  %v5176_v31 = vrot.slane %v15438_v7, 6 }
 0x4e7   : > { %11558 = vmatpush3.msra.mxu1 %v9055_v6  ;;  %11559 = vmatprep.mubr.msk.f32.mxu1 %vm12461_vm2, %v17547_v15  ;;  %v3978_v2 = vpop.f32.mrf.mxu1 }
 0x4e8   : > { %v4220_v51 = vsel %vm1740_vm5, %v4217_v40, %v4219_v57  ;;  %v4167_v49 = vadd.f32 %v4138_v20, %v15017_v29  ;;  %11433 = vmatprep.subr.mxu0 %v17547_v15  ;;  %11560 = vmatmul.mubr.msk.f32.vlgmr.msra.gmra.mxu1 %vm4360_vm6, %v15438_v7  ;;  %v4074_v48 = vadd.f32 %v3978_v2, %v3756_v0  ;;  %v9088_v29 = vld [vmem:[%s17411_s4 + $0x2b0] sm:$0xff]  ;;  %v9082_v20 = vld [vmem:[%s17411_s4 + $0x280] sm:$0xff] }
 0x4e9   : > { %v4260_v8 = vmax.f32 %v15450_v60, %v4220_v51  ;;  %11581 = vmatprep.subr.mxu1 %v17547_v15  ;;  %11434 = vmatpush3.msra.mxu0 %v9015_v13  ;;  %v11342_v50 = vpop.f32.mrf.mxu1 }
 0x4ea   : > { %v4283_v24 = vrot.slane %v4167_v49, 1  ;;  %v4139_v16 = vadd.f32 %v15325_v19, %v4074_v48  ;;  %11582 = vmatpush3.msra.mxu1 %v9089_v35  ;;  %11435 = vmatprep.subr.mxu0 %v17547_v15  ;;  %v17907_v35 = vld [vmem:[#allocation65_spill] sm:$0xff]  ;;  %v17908_v50 = vld [vmem:[#allocation103_spill] sm:$0xff] }
 0x4eb   : > { %11583 = vmatprep.subr.mxu1 %v17547_v15  ;;  %11436 = vmatpush3.msra.mxu0 %v9014_v42  ;;  %v3983_v46 = vpop.f32.mrf.mxu1  ;;  %v9107_v42 = vld [vmem:[%s17411_s4 + $0x338] sm:$0xff] }
 0x4ec   : > { %v4284_v33 = vsel %vm1740_vm5, %v4219_v57, %v4283_v24  ;;  %v15518_v14 = vadd.f32 %v4139_v16, %v15026_v54  ;;  %11584 = vmatpush3.msra.mxu1 %v9088_v29  ;;  %11437 = vmatprep.subr.mxu0 %v17547_v15  ;;  %v4075_v45 = vadd.f32 %v3983_v46, %v3761_v23  ;;  %v17909_v29 = vld [vmem:[#allocation54_spill] sm:$0xff] }
 0x4ed   : > { %v4317_v5 = vmax.f32 %v4166_v58, %v4284_v33  ;;  %11585 = vmatprep.subr.mxu1 %v17547_v15  ;;  %11438 = vmatpush3.msra.mxu0 %v9013_v32  ;;  %v11345_v22 = vpop.f32.mrf.mxu1  ;;  %v3766_v54 = vadd.f32 %v14753_v17, %v15290_v63  ;;  %v9085_v17 = vld [vmem:[%s17411_s4 + $0x298] sm:$0xff]  ;;  %v3781_v23 = vadd.f32 %v17909_v29, %v17908_v50  ;;  %v9023_v32 = vld [vmem:[%s17411_s4 + $0xe0] sm:$0xff]  ;;  %v9106_v46 = vld [vmem:[%s17411_s4 + $0x330] sm:$0xff] }
 0x4ee   : > { %v4221_v10 = vrot.slane %v15518_v14, 1  ;;  %v4140_v37 = vadd.f32 %v15325_v19, %v4075_v45  ;;  %11586 = vmatpush3.msra.mxu1 %v9087_v39  ;;  %11439 = vmatprep.subr.mxu0 %v17547_v15  ;;  %v9101_v50 = vld [vmem:[%s17411_s4 + $0x308] sm:$0xff] }
 0x4ef   : > { %v15536_v25 = vmax.f32 %v4259_v55, %v4317_v5  ;;  %11587 = vmatprep.subr.mxu1 %v17547_v15  ;;  %11440 = vmatpush3.msra.mxu0 %v9012_v59  ;;  %v3988_v11 = vpop.f32.mrf.mxu1  ;;  %v9022_v5 = vld [vmem:[%s17411_s4 + $0xd8] sm:$0xff] }
 0x4f0   : > { %v4285_v63 = vsel %vm1740_vm5, %v4283_v24, %v4221_v10  ;;  %v15544_v60 = vadd.f32 %v4140_v37, %v15035_v12  ;;  %11588 = vmatpush3.msra.mxu1 %v9086_v27  ;;  %11441 = vmatprep.subr.mxu0 %v17547_v15  ;;  %v4076_v56 = vadd.f32 %v3988_v11, %v3766_v54  ;;  %v9105_v27 = vld [vmem:[%s17411_s4 + $0x328] sm:$0xff] }
 0x4f1   : > { %v4318_v44 = vmax.f32 %v4167_v49, %v4285_v63  ;;  %11589 = vmatprep.subr.mxu1 %v17547_v15  ;;  %11442 = vmatpush3.msra.mxu0 %v9011_v61  ;;  %v11348_v9 = vpop.f32.mrf.mxu1  ;;  %v3771_v12 = vadd.f32 %v14763_v28, %v15292_v30  ;;  %v9024_v49 = vld [vmem:[%s17411_s4 + $0xe8] sm:$0xff]  ;;  %v9021_v63 = vld [vmem:[%s17411_s4 + $0xd0] sm:$0xff] }
 0x4f2   : > { %v4222_v40 = vrot.slane %v15544_v60, 1  ;;  %v4141_v34 = vadd.f32 %v15325_v19, %v4076_v56  ;;  %11590 = vmatpush3.msra.mxu1 %v9085_v17  ;;  %11443 = vmatprep.subr.mxu0 %v17547_v15  ;;  %v17912_v37 = vld [vmem:[#allocation53_spill] sm:$0xff]  ;;  %v17913_v9 = vld [vmem:[#allocation67_spill] sm:$0xff] }
 0x4f3   : > { %v15559_v3 = vmax.f32 %v4260_v8, %v4318_v44  ;;  %11591 = vmatprep.subr.mxu1 %v17547_v15  ;;  %11444 = vmatpush3.msra.mxu0 %v9010_v1  ;;  %v3993_v18 = vpop.f32.mrf.mxu1  ;;  %v9104_v56 = vld [vmem:[%s17411_s4 + $0x320] sm:$0xff] }
 0x4f4   : > { %v4223_v28 = vsel %vm1740_vm5, %v4221_v10, %v4222_v40  ;;  %v4170_v30 = vadd.f32 %v4141_v34, %v15044_v38  ;;  %11445 = vmatprep.mubr.msk.f32.mxu0 %vm12461_vm2, %v17547_v15  ;;  %11592 = vmatpush3.msra.mxu1 %v9084_v36  ;;  %v4077_v58 = vadd.f32 %v3993_v18, %v3771_v12  ;;  %v9025_v38 = vld [vmem:[%s17411_s4 + $0xf0] sm:$0xff]  ;;  %v17911_v10 = vld [vmem:[#allocation132_spill] sm:$0xff] }
 0x4f5   : > { %v4261_v6 = vmax.f32 %v15518_v14, %v4223_v28  ;;  %11446 = vmatmul.mubr.msk.f32.vlgmr.msra.gmra.mxu0 %vm4360_vm6, %v4514_v53  ;;  %11448 = vmatprep.subr.mxu0 %v17547_v15  ;;  %v11351_v55 = vpop.f32.mrf.mxu1  ;;  %v17910_v14 = vld [vmem:[#allocation66_spill] sm:$0xff]  ;;  %v3786_v61 = vadd.f32 %v17912_v37, %v17911_v10  ;;  %v9103_v53 = vld [vmem:[%s17411_s4 + $0x318] sm:$0xff] }
 0x4f6   : > { %v4224_v0 = vrot.slane %v4170_v30, 1  ;;  %11593 = vmatprep.subr.mxu1 %v17547_v15  ;;  %v4142_v57 = vadd.f32 %v15325_v19, %v4077_v58  ;;  %11449 = vmatpush3.msra.mxu0 %v9026_v62  ;;  %v17914_v62 = vld [vmem:[#allocation26_spill] sm:$0xff]  ;;  %v17915_v28 = vld [vmem:[#allocation51_spill] sm:$0xff] }
 0x4f7   : > { %11594 = vmatpush3.msra.mxu1 %v9083_v21  ;;  %11450 = vmatprep.subr.mxu0 %v17547_v15  ;;  %v3998_v13 = vpop.f32.mrf.mxu1  ;;  %v9133_v10 = vld [vmem:[%s17411_s4 + $0x3f8] sm:$0xff] }
 0x4f8   : > { %v4225_v2 = vsel %vm1740_vm5, %v4222_v40, %v4224_v0  ;;  %v4171_v51 = vadd.f32 %v4142_v57, %v17907_v35  ;;  %11595 = vmatprep.subr.mxu1 %v17547_v15  ;;  %11451 = vmatpush3.msra.mxu0 %v9025_v38  ;;  %v4078_v41 = vadd.f32 %v3998_v13, %v3776_v52  ;;  %v9020_v40 = vld [vmem:[%s17411_s4 + $0xc8] sm:$0xff]  ;;  %v9102_v38 = vld [vmem:[%s17411_s4 + $0x310] sm:$0xff]  ;;  %v17916_v57 = vld [vmem:[#allocation68_spill] sm:$0xff]  ;;  %v4597_v35 = vrot.slane %v15356_v26, 6 }
 0x4f9   : > { %v4262_v48 = vmax.f32 %v15544_v60, %v4225_v2  ;;  %11596 = vmatpush3.msra.mxu1 %v9082_v20  ;;  %11597 = vmatprep.mubr.msk.f32.mxu1 %vm12461_vm2, %v17547_v15  ;;  %v11354_v8 = vpop.f32.mrf.mxu1  ;;  %v9034_v26 = vld [vmem:[%s17411_s4 + $0x130] sm:$0xff] }
 0x4fa   : > { %v4286_v24 = vrot.slane %v4171_v51, 1  ;;  %11452 = vmatprep.subr.mxu0 %v17547_v15  ;;  %11598 = vmatmul.mubr.msk.f32.vlgmr.msra.gmra.mxu1 %vm4360_vm6, %v5176_v31  ;;  %v4143_v16 = vadd.f32 %v15325_v19, %v4078_v41  ;;  %v17917_v41 = vld [vmem:[#allocation105_spill] sm:$0xff] }
 0x4fb   : > { %11619 = vmatprep.subr.mxu1 %v17547_v15  ;;  %11453 = vmatpush3.msra.mxu0 %v9024_v49  ;;  %v4003_v39 = vpop.f32.mrf.mxu1  ;;  %v17918_v49 = vld [vmem:[#allocation55_spill] sm:$0xff] }
 0x4fc   : > { %v4287_v33 = vsel %vm1740_vm5, %v4224_v0, %v4286_v24  ;;  %v15614_v45 = vadd.f32 %v4143_v16, %v17910_v14  ;;  %11620 = vmatpush3.msra.mxu1 %v9107_v42  ;;  %11454 = vmatprep.subr.mxu0 %v17547_v15  ;;  %v4079_v59 = vadd.f32 %v4003_v39, %v3781_v23  ;;  %v17920_v14 = vld [vmem:[#allocation134_spill] sm:$0xff] }
 0x4fd   : > { %v4319_v22 = vmax.f32 %v4170_v30, %v4287_v33  ;;  %11621 = vmatprep.subr.mxu1 %v17547_v15  ;;  %11455 = vmatpush3.msra.mxu0 %v9023_v32  ;;  %v11357_v54 = vpop.f32.mrf.mxu1  ;;  %v3791_v30 = vadd.f32 %v17915_v28, %v17914_v62  ;;  %v9100_v32 = vld [vmem:[%s17411_s4 + $0x300] sm:$0xff] }
 0x4fe   : > { %v4226_v11 = vrot.slane %v15614_v45, 1  ;;  %11622 = vmatpush3.msra.mxu1 %v9106_v46  ;;  %11456 = vmatprep.subr.mxu0 %v17547_v15  ;;  %v4144_v17 = vadd.f32 %v15325_v19, %v4079_v59  ;;  %v9033_v54 = vld [vmem:[%s17411_s4 + $0x128] sm:$0xff] }
 0x4ff   : > { %v15632_v60 = vmax.f32 %v4261_v6, %v4319_v22  ;;  %11623 = vmatprep.subr.mxu1 %v17547_v15  ;;  %11457 = vmatpush3.msra.mxu0 %v9022_v5  ;;  %v4008_v1 = vpop.f32.mrf.mxu1  ;;  %v9019_v6 = vld [vmem:[%s17411_s4 + $0xc0] sm:$0xff]  ;;  %v5342_v22 = vrot.slane %v15464_v4, 2 }
 0x500   : > { %v4288_v44 = vsel %vm1740_vm5, %v4286_v24, %v4226_v11  ;;  %v15640_v36 = vadd.f32 %v4144_v17, %v17913_v9  ;;  %11624 = vmatpush3.msra.mxu1 %v9105_v27  ;;  %11458 = vmatprep.subr.mxu0 %v17547_v15  ;;  %v4080_v12 = vadd.f32 %v4008_v1, %v3786_v61  ;;  %v17919_v24 = vld [vmem:[#allocation39_spill] sm:$0xff] }
 0x501   : > { %v4320_v34 = vmax.f32 %v4171_v51, %v4288_v44  ;;  %11625 = vmatprep.subr.mxu1 %v17547_v15  ;;  %11459 = vmatpush3.msra.mxu0 %v9021_v63  ;;  %v11360_v18 = vpop.f32.mrf.mxu1  ;;  %v9035_v51 = vld [vmem:[%s17411_s4 + $0x138] sm:$0xff]  ;;  %v9032_v63 = vld [vmem:[%s17411_s4 + $0x120] sm:$0xff]  ;;  %v9132_v44 = vld [vmem:[%s17411_s4 + $0x3f0] sm:$0xff] }
 0x502   : > { %v4227_v58 = vrot.slane %v15640_v36, 1  ;;  %11626 = vmatpush3.msra.mxu1 %v9104_v56  ;;  %11460 = vmatprep.subr.mxu0 %v17547_v15  ;;  %v4145_v21 = vadd.f32 %v15325_v19, %v4080_v12 }
 0x503   : > { %v15658_v55 = vmax.f32 %v4262_v48, %v4320_v34  ;;  %11627 = vmatprep.subr.mxu1 %v17547_v15  ;;  %11461 = vmatpush3.msra.mxu0 %v9020_v40  ;;  %v4013_v52 = vpop.f32.mrf.mxu1  ;;  %v3796_v48 = vadd.f32 %v17918_v49, %v17917_v41  ;;  %v9129_v41 = vld [vmem:[%s17411_s4 + $0x3d8] sm:$0xff] }
 0x504   : > { %v4228_v0 = vsel %vm1740_vm5, %v4226_v11, %v4227_v58  ;;  %v4174_v20 = vadd.f32 %v4145_v21, %v17916_v57  ;;  %11628 = vmatpush3.msra.mxu1 %v9103_v53  ;;  %11462 = vmatprep.subr.mxu0 %v17547_v15  ;;  %v4081_v13 = vadd.f32 %v4013_v52, %v3791_v30  ;;  %v17922_v11 = vld [vmem:[#allocation22_spill] sm:$0xff]  ;;  %v9031_v53 = vld [vmem:[%s17411_s4 + $0x118] sm:$0xff]  ;;  %v17924_v30 = vld [vmem:[#allocation5_spill] sm:$0xff] }
 0x505   : > { %v4263_v2 = vmax.f32 %v15614_v45, %v4228_v0  ;;  %11629 = vmatprep.subr.mxu1 %v17547_v15  ;;  %11463 = vmatpush3.msra.mxu0 %v9019_v6  ;;  %v11363_v31 = vpop.f32.mrf.mxu1  ;;  %v17921_v45 = vld [vmem:[#allocation69_spill] sm:$0xff]  ;;  %v9030_v21 = vld [vmem:[%s17411_s4 + $0x110] sm:$0xff] }
 0x506   : > { %v4229_v42 = vrot.slane %v4174_v20, 1  ;;  %11464 = vmatprep.mubr.msk.f32.mxu0 %vm12461_vm2, %v17547_v15  ;;  %11630 = vmatpush3.msra.mxu1 %v9102_v38  ;;  %v4146_v8 = vadd.f32 %v15325_v19, %v4081_v13  ;;  %v3801_v59 = vadd.f32 %v17921_v45, %v17920_v14  ;;  %v9130_v52 = vld [vmem:[%s17411_s4 + $0x3e0] sm:$0xff]  ;;  %v9044_v14 = vld [vmem:[%s17411_s4 + $0x178] sm:$0xff] }
 0x507   : > { %11465 = vmatmul.mubr.msk.f32.vlgmr.msra.gmra.mxu0 %vm4360_vm6, %v4597_v35  ;;  %11467 = vmatprep.subr.mxu0 %v17547_v15  ;;  %v4018_v29 = vpop.f32.mrf.mxu1  ;;  %v17925_v57 = vld [vmem:[#allocation9_spill] sm:$0xff] }
 0x508   : > { %v4230_v23 = vsel %vm1740_vm5, %v4227_v58, %v4229_v42  ;;  %11631 = vmatprep.subr.mxu1 %v17547_v15  ;;  %v4175_v16 = vadd.f32 %v4146_v8, %v17919_v24  ;;  %11468 = vmatpush3.msra.mxu0 %v9035_v51  ;;  %v4082_v46 = vadd.f32 %v4018_v29, %v3796_v48  ;;  %v9029_v51 = vld [vmem:[%s17411_s4 + $0x108] sm:$0xff] }
 0x509   : > { %v4264_v39 = vmax.f32 %v15640_v36, %v4230_v23  ;;  %11632 = vmatpush3.msra.mxu1 %v9101_v50  ;;  %11469 = vmatprep.subr.mxu0 %v17547_v15  ;;  %v11366_v33 = vpop.f32.mrf.mxu1  ;;  %v17923_v36 = vld [vmem:[#allocation72_spill] sm:$0xff]  ;;  %v9128_v23 = vld [vmem:[%s17411_s4 + $0x3d0] sm:$0xff] }
 0x50a   : > { %v4289_v5 = vrot.slane %v4175_v16, 1  ;;  %11633 = vmatprep.subr.mxu1 %v17547_v15  ;;  %11470 = vmatpush3.msra.mxu0 %v9034_v26  ;;  %v4147_v27 = vadd.f32 %v15325_v19, %v4082_v46  ;;  %v3806_v12 = vadd.f32 %v17923_v36, %v15306_v47  ;;  %v9131_v47 = vld [vmem:[%s17411_s4 + $0x3e8] sm:$0xff]  ;;  %v9028_v50 = vld [vmem:[%s17411_s4 + $0x100] sm:$0xff] }
 0x50b   : > { %11634 = vmatpush3.msra.mxu1 %v9100_v32  ;;  %11635 = vmatprep.mubr.msk.f32.mxu1 %vm12461_vm2, %v17547_v15  ;;  %v4023_v37 = vpop.f32.mrf.mxu1  ;;  %v17929_v32 = vld [vmem:[#allocation78_spill] sm:$0xff] }
 0x50c   : > { %v4290_v61 = vsel %vm1740_vm5, %v4229_v42, %v4289_v5  ;;  %11471 = vmatprep.subr.mxu0 %v17547_v15  ;;  %11636 = vmatmul.mubr.msk.f32.vlgmr.msra.gmra.mxu1 %vm4360_vm6, %v5342_v22  ;;  %v15711_v17 = vadd.f32 %v4147_v27, %v17922_v11  ;;  %v4083_v56 = vadd.f32 %v4023_v37, %v3801_v59  ;;  %v17927_v42 = vld [vmem:[#allocation41_spill] sm:$0xff]  ;;  %v9043_v37 = vld [vmem:[%s17411_s4 + $0x170] sm:$0xff]  ;;  %v17931_v11 = vld [vmem:[#allocation136_spill] sm:$0xff] }
 0x50d   : > { %v4321_v1 = vmax.f32 %v4174_v20, %v4290_v61  ;;  %11657 = vmatprep.subr.mxu1 %v17547_v15  ;;  %11472 = vmatpush3.msra.mxu0 %v9033_v54  ;;  %v11369_v9 = vpop.f32.mrf.mxu1  ;;  %v17926_v20 = vld [vmem:[#allocation75_spill] sm:$0xff]  ;;  %v9127_v27 = vld [vmem:[%s17411_s4 + $0x3c8] sm:$0xff] }
 0x50e   : > { %v4231_v40 = vrot.slane %v15711_v17, 1  ;;  %11658 = vmatpush3.msra.mxu1 %v9133_v10  ;;  %11473 = vmatprep.subr.mxu0 %v17547_v15  ;;  %v4148_v34 = vadd.f32 %v15325_v19, %v4083_v56  ;;  %v3811_v13 = vadd.f32 %v17926_v20, %v17925_v57  ;;  %v9142_v20 = vld [vmem:[%s17411_s4 + $0x430] sm:$0xff] }
 0x50f   : > { %v15728_v18 = vmax.f32 %v4263_v2, %v4321_v1  ;;  %11659 = vmatprep.subr.mxu1 %v17547_v15  ;;  %11474 = vmatpush3.msra.mxu0 %v9032_v63  ;;  %v4028_v62 = vpop.f32.mrf.mxu1  ;;  %v9126_v1 = vld [vmem:[%s17411_s4 + $0x3c0] sm:$0xff] }
 0x510   : > { %v4291_v28 = vsel %vm1740_vm5, %v4289_v5, %v4231_v40  ;;  %11660 = vmatpush3.msra.mxu1 %v9132_v44  ;;  %11475 = vmatprep.subr.mxu0 %v17547_v15  ;;  %v15737_v58 = vadd.f32 %v4148_v34, %v17924_v30  ;;  %v4084_v6 = vadd.f32 %v4028_v62, %v3806_v12  ;;  %v17930_v5 = vld [vmem:[#allocation24_spill] sm:$0xff]  ;;  %v5518_v12 = vrot.slane %v15536_v25, 2 }
 0x511   : > { %v4322_v38 = vmax.f32 %v4175_v16, %v4291_v28  ;;  %11661 = vmatprep.subr.mxu1 %v17547_v15  ;;  %11476 = vmatpush3.msra.mxu0 %v9031_v53  ;;  %v11372_v0 = vpop.f32.mrf.mxu1  ;;  %v17928_v16 = vld [vmem:[#allocation107_spill] sm:$0xff]  ;;  %v9042_v53 = vld [vmem:[%s17411_s4 + $0x168] sm:$0xff] }
 0x512   : > { %v4232_v2 = vrot.slane %v15737_v58, 1  ;;  %11662 = vmatpush3.msra.mxu1 %v9131_v47  ;;  %11477 = vmatprep.subr.mxu0 %v17547_v15  ;;  %v4149_v35 = vadd.f32 %v15325_v19, %v4084_v6  ;;  %v3816_v46 = vadd.f32 %v17929_v32, %v17928_v16  ;;  %v9143_v28 = vld [vmem:[%s17411_s4 + $0x438] sm:$0xff] }
 0x513   : > { %v15754_v31 = vmax.f32 %v4264_v39, %v4322_v38  ;;  %11663 = vmatprep.subr.mxu1 %v17547_v15  ;;  %11478 = vmatpush3.msra.mxu0 %v9030_v21  ;;  %v4033_v49 = vpop.f32.mrf.mxu1  ;;  %v17935_v21 = vld [vmem:[#allocation84_spill] sm:$0xff] }
 0x514   : > { %v4233_v48 = vsel %vm1740_vm5, %v4231_v40, %v4232_v2  ;;  %11664 = vmatpush3.msra.mxu1 %v9130_v52  ;;  %11479 = vmatprep.subr.mxu0 %v17547_v15  ;;  %v4178_v8 = vadd.f32 %v4149_v35, %v17927_v42  ;;  %v4085_v26 = vadd.f32 %v4033_v49, %v3811_v13  ;;  %v17933_v40 = vld [vmem:[#allocation7_spill] sm:$0xff]  ;;  %v9041_v52 = vld [vmem:[%s17411_s4 + $0x160] sm:$0xff]  ;;  %v9141_v42 = vld [vmem:[%s17411_s4 + $0x428] sm:$0xff] }
 0x515   : > { %v4265_v29 = vmax.f32 %v15711_v17, %v4233_v48  ;;  %11665 = vmatprep.subr.mxu1 %v17547_v15  ;;  %11480 = vmatpush3.msra.mxu0 %v9029_v51  ;;  %v11375_v24 = vpop.f32.mrf.mxu1  ;;  %v17932_v17 = vld [vmem:[#allocation81_spill] sm:$0xff]  ;;  %v17936_v35 = vld [vmem:[#allocation40_spill] sm:$0xff] }
 0x516   : > { %v4234_v39 = vrot.slane %v4178_v8, 1  ;;  %11666 = vmatpush3.msra.mxu1 %v9129_v41  ;;  %11481 = vmatprep.subr.mxu0 %v17547_v15  ;;  %v4150_v33 = vadd.f32 %v15325_v19, %v4085_v26  ;;  %v3821_v63 = vadd.f32 %v17932_v17, %v17931_v11  ;;  %v9040_v41 = vld [vmem:[%s17411_s4 + $0x158] sm:$0xff]  ;;  %v9039_v24 = vld [vmem:[%s17411_s4 + $0x150] sm:$0xff]  ;;  %v9037_v17 = vld [vmem:[%s17411_s4 + $0x140] sm:$0xff] }
 0x517   : > { %11667 = vmatprep.subr.mxu1 %v17547_v15  ;;  %11482 = vmatpush3.msra.mxu0 %v9028_v50  ;;  %v4038_v45 = vpop.f32.mrf.mxu1  ;;  %v17937_v50 = vld [vmem:[#allocation25_spill] sm:$0xff]  ;;  %v17938_v26 = vld [vmem:[#allocation63_spill] sm:$0xff] }
 0x518   : > { %v4235_v59 = vsel %vm1740_vm5, %v4232_v2, %v4234_v39  ;;  %11483 = vmatprep.mubr.msk.f32.mxu0 %vm12461_vm2, %v17547_v15  ;;  %11668 = vmatpush3.msra.mxu1 %v9128_v23  ;;  %v4179_v22 = vadd.f32 %v4150_v33, %v17930_v5  ;;  %v4086_v54 = vadd.f32 %v4038_v45, %v3816_v46  ;;  %v9140_v46 = vld [vmem:[%s17411_s4 + $0x420] sm:$0xff] }
 0x519   : > { %v4266_v10 = vmax.f32 %v15737_v58, %v4235_v59  ;;  %11484 = vmatmul.mubr.msk.f32.vlgmr.msra.gmra.mxu0 %vm4360_vm6, %v15370_v43  ;;  %11486 = vmatprep.subr.mxu0 %v17547_v15  ;;  %v11378_v61 = vpop.f32.mrf.mxu1  ;;  %v17934_v58 = vld [vmem:[#allocation42_spill] sm:$0xff] }
 0x51a   : > { %11669 = vmatprep.subr.mxu1 %v17547_v15  ;;  %v4292_v56 = vrot.slane %v4179_v22, 1  ;;  %11487 = vmatpush3.msra.mxu0 %v9044_v14  ;;  %v4151_v44 = vadd.f32 %v15325_v19, %v4086_v54  ;;  %v3826_v6 = vadd.f32 %v17935_v21, %v17934_v58  ;;  %v17939_v14 = vld [vmem:[#allocation23_spill] sm:$0xff]  ;;  %v9038_v59 = vld [vmem:[%s17411_s4 + $0x148] sm:$0xff]  ;;  %v9136_v21 = vld [vmem:[%s17411_s4 + $0x400] sm:$0xff] }
 0x51b   : > { %11670 = vmatpush3.msra.mxu1 %v9127_v27  ;;  %11488 = vmatprep.subr.mxu0 %v17547_v15  ;;  %v4043_v9 = vpop.f32.mrf.mxu1  ;;  %v9139_v27 = vld [vmem:[%s17411_s4 + $0x418] sm:$0xff] }
 0x51c   : > { %v4293_v36 = vsel %vm1740_vm5, %v4234_v39, %v4292_v56  ;;  %11671 = vmatprep.subr.mxu1 %v17547_v15  ;;  %11489 = vmatpush3.msra.mxu0 %v9043_v37  ;;  %v15805_v34 = vadd.f32 %v4151_v44, %v17933_v40  ;;  %v4087_v47 = vadd.f32 %v4043_v9, %v3821_v63  ;;  %v17941_v37 = vld [vmem:[#allocation64_spill] sm:$0xff]  ;;  %v17942_v9 = vld [vmem:[#allocation6_spill] sm:$0xff] }
 0x51d   : > { %v4323_v62 = vmax.f32 %v4178_v8, %v4293_v36  ;;  %11672 = vmatpush3.msra.mxu1 %v9126_v1  ;;  %11673 = vmatprep.mubr.msk.f32.mxu1 %vm12461_vm2, %v17547_v15  ;;  %v11381_v30 = vpop.f32.mrf.mxu1 }
 0x51e   : > { %11490 = vmatprep.subr.mxu0 %v17547_v15  ;;  %11674 = vmatmul.mubr.msk.f32.vlgmr.msra.gmra.mxu1 %vm4360_vm6, %v5518_v12  ;;  %v4236_v38 = vrot.slane %v15805_v34, 1  ;;  %v4152_v0 = vadd.f32 %v15325_v19, %v4087_v47 }
 0x51f   : > { %v15824_v57 = vmax.f32 %v4265_v29, %v4323_v62  ;;  %11695 = vmatprep.subr.mxu1 %v17547_v15  ;;  %11491 = vmatpush3.msra.mxu0 %v9042_v53  ;;  %v4048_v13 = vpop.f32.mrf.mxu1  ;;  %v3831_v29 = vadd.f32 %v17938_v26, %v17937_v50  ;;  %v9137_v62 = vld [vmem:[%s17411_s4 + $0x408] sm:$0xff]  ;;  %v9065_v26 = vld [vmem:[%s17411_s4 + $0x210] sm:$0xff] }
 0x520   : > { %v4294_v2 = vsel %vm1740_vm5, %v4292_v56, %v4236_v38  ;;  %11696 = vmatpush3.msra.mxu1 %v9143_v28  ;;  %11492 = vmatprep.subr.mxu0 %v17547_v15  ;;  %v15833_v51 = vadd.f32 %v4152_v0, %v17936_v35  ;;  %v4088_v49 = vadd.f32 %v4048_v13, %v3826_v6  ;;  %v9138_v56 = vld [vmem:[%s17411_s4 + $0x410] sm:$0xff]  ;;  %v12397_v28 = vld [vmem:[%s17410_s3] ss:$0 sm:$0xff]  ;;  %v5672_v0 = vrot.slane %v15536_v25, 4  ;;  %v9068_v13 = vld [vmem:[%s17411_s4 + $0x228] sm:$0xff] }
 0x521   : > { %v4324_v48 = vmax.f32 %v4179_v22, %v4294_v2  ;;  %11697 = vmatprep.subr.mxu1 %v17547_v15  ;;  %11493 = vmatpush3.msra.mxu0 %v9041_v52  ;;  %v11384_v8 = vpop.f32.mrf.mxu1  ;;  %v17943_v6 = vld [vmem:[#allocation43_spill] sm:$0xff]  ;;  %v9159_v50 = vld [vmem:[%s17411_s4 + $0x4a8] sm:$0xff] }
 0x522   : > { %11698 = vmatpush3.msra.mxu1 %v9142_v20  ;;  %11494 = vmatprep.subr.mxu0 %v17547_v15  ;;  %v4237_v23 = vrot.slane %v15833_v51, 1  ;;  %v4153_v16 = vadd.f32 %v15325_v19, %v4088_v49  ;;  %v9161_v35 = vld [vmem:[%s17411_s4 + $0x4b8] sm:$0xff] }
 0x523   : > { %v15850_v32 = vmax.f32 %v4266_v10, %v4324_v48  ;;  %11699 = vmatprep.subr.mxu1 %v17547_v15  ;;  %11495 = vmatpush3.msra.mxu0 %v9040_v41  ;;  %v4053_v39 = vpop.f32.mrf.mxu1  ;;  %v17940_v10 = vld [vmem:[#allocation19_spill] sm:$0xff]  ;;  %v9067_v41 = vld [vmem:[%s17411_s4 + $0x220] sm:$0xff] }
 0x524   : > { %v4238_v33 = vsel %vm1740_vm5, %v4236_v38, %v4237_v23  ;;  %11700 = vmatpush3.msra.mxu1 %v9141_v42  ;;  %11496 = vmatprep.subr.mxu0 %v17547_v15  ;;  %v4182_v45 = vadd.f32 %v4153_v16, %v17939_v14  ;;  %v4089_v5 = vadd.f32 %v4053_v39, %v3831_v29  ;;  %v9160_v48 = vld [vmem:[%s17411_s4 + $0x4b0] sm:$0xff]  ;;  %v9066_v42 = vld [vmem:[%s17411_s4 + $0x218] sm:$0xff]  ;;  %v9158_v29 = vld [vmem:[%s17411_s4 + $0x4a0] sm:$0xff]  ;;  %v4939_v39 = vrot.slane %v15438_v7, 2 }
 0x525   : > { %v4267_v22 = vmax.f32 %v15805_v34, %v4238_v33  ;;  %11701 = vmatprep.subr.mxu1 %v17547_v15  ;;  %11497 = vmatpush3.msra.mxu0 %v9039_v24  ;;  %v11387_v54 = vpop.f32.mrf.mxu1  ;;  %v3836_v61 = vadd.f32 %v17941_v37, %v17940_v10  ;;  %v9070_v34 = vld [vmem:[%s17411_s4 + $0x238] sm:$0xff]  ;;  %v9063_v16 = vld [vmem:[%s17411_s4 + $0x200] sm:$0xff]  ;;  %v9155_v14 = vld [vmem:[%s17411_s4 + $0x488] sm:$0xff] }
 0x526   : > { %11702 = vmatpush3.msra.mxu1 %v9140_v46  ;;  %11498 = vmatprep.subr.mxu0 %v17547_v15  ;;  %v4239_v11 = vrot.slane %v4182_v45, 1  ;;  %v4154_v63 = vadd.f32 %v15325_v19, %v4089_v5  ;;  %v4763_v19 = vrot.slane %v15370_v43, 2  ;;  %v9069_v43 = vld [vmem:[%s17411_s4 + $0x230] sm:$0xff]  ;;  %v9157_v24 = vld [vmem:[%s17411_s4 + $0x498] sm:$0xff]  ;;  %v9078_v5 = vld [vmem:[%s17411_s4 + $0x268] sm:$0xff] }
 0x527   : > { %11703 = vmatprep.subr.mxu1 %v17547_v15  ;;  %11499 = vmatpush3.msra.mxu0 %v9038_v59  ;;  %v4058_v1 = vpop.f32.mrf.mxu1  ;;  %v9156_v46 = vld [vmem:[%s17411_s4 + $0x490] sm:$0xff]  ;;  %v9080_v33 = vld [vmem:[%s17411_s4 + $0x278] sm:$0xff]  ;;  %v9154_v59 = vld [vmem:[%s17411_s4 + $0x480] sm:$0xff] }
 0x528   : > { %v4240_v44 = vsel %vm1740_vm5, %v4237_v23, %v4239_v11  ;;  %11704 = vmatpush3.msra.mxu1 %v9139_v27  ;;  %11500 = vmatprep.subr.mxu0 %v17547_v15  ;;  %v4183_v36 = vadd.f32 %v4154_v63, %v17942_v9  ;;  %v4090_v12 = vadd.f32 %v4058_v1, %v3836_v61  ;;  %v9064_v23 = vld [vmem:[%s17411_s4 + $0x208] sm:$0xff]  ;;  %v9077_v27 = vld [vmem:[%s17411_s4 + $0x260] sm:$0xff]  ;;  %v9178_v54 = vld [vmem:[%s17411_s4 + $0x530] sm:$0xff] }
 0x529   : > { %v4268_v40 = vmax.f32 %v15833_v51, %v4240_v44  ;;  %11705 = vmatprep.subr.mxu1 %v17547_v15  ;;  %11501 = vmatpush3.msra.mxu0 %v9037_v17  ;;  %v11390_v53 = vpop.f32.mrf.mxu1  ;;  %v9076_v10 = vld [vmem:[%s17411_s4 + $0x258] sm:$0xff]  ;;  %v9177_v37 = vld [vmem:[%s17411_s4 + $0x528] sm:$0xff]  ;;  %v9075_v61 = vld [vmem:[%s17411_s4 + $0x250] sm:$0xff]  ;;  %v5093_v44 = vrot.slane %v15438_v7, 4 }
 0x52a   : > { %11502 = vmatprep.mubr.msk.f32.mxu0 %vm12461_vm2, %v17547_v15  ;;  %11706 = vmatpush3.msra.mxu1 %v9138_v56  ;;  %v4295_v47 = vrot.slane %v4183_v36, 1  ;;  %v4155_v30 = vadd.f32 %v12397_v28, %v4090_v12  ;;  %v9074_v17 = vld [vmem:[%s17411_s4 + $0x248] sm:$0xff]  ;;  %v9175_v63 = vld [vmem:[%s17411_s4 + $0x518] sm:$0xff]  ;;  %v9073_v56 = vld [vmem:[%s17411_s4 + $0x240] sm:$0xff] }
 0x52b   : > { %11503 = vmatmul.mubr.msk.f32.vlgmr.msra.gmra.mxu0 %vm4360_vm6, %v4763_v19  ;;  %11524 = vmatprep.subr.mxu0 %v17547_v15  ;;  %v9174_v1 = vld [vmem:[%s17411_s4 + $0x510] sm:$0xff]  ;;  %v9098_v9 = vld [vmem:[%s17411_s4 + $0x2f8] sm:$0xff]  ;;  %v9172_v12 = vld [vmem:[%s17411_s4 + $0x500] sm:$0xff] }
 0x52c   : > { %11707 = vmatprep.subr.mxu1 %v17547_v15  ;;  %v4296_v58 = vsel %vm1740_vm5, %v4239_v11, %v4295_v47  ;;  %11525 = vmatpush3.msra.mxu0 %v9070_v34  ;;  %v4184_v38 = vadd.f32 %v4155_v30, %v17943_v6  ;;  %v9176_v11 = vld [vmem:[%s17411_s4 + $0x520] sm:$0xff]  ;;  %v9097_v7 = vld [vmem:[%s17411_s4 + $0x2f0] sm:$0xff]  ;;  %v9096_v19 = vld [vmem:[%s17411_s4 + $0x2e8] sm:$0xff] }
 0x52d   : > { %v4325_v52 = vmax.f32 %v4182_v45, %v4296_v58  ;;  %11708 = vmatpush3.msra.mxu1 %v9137_v62  ;;  %11526 = vmatprep.subr.mxu0 %v17547_v15  ;;  %v9079_v45 = vld [vmem:[%s17411_s4 + $0x270] sm:$0xff]  ;;  %v9188_v34 = vld [vmem:[%s17411_s4 + $0x578] sm:$0xff]  ;;  %v9095_v53 = vld [vmem:[%s17411_s4 + $0x2e0] sm:$0xff] }
 0x52e   : > { %11709 = vmatprep.subr.mxu1 %v17547_v15  ;;  %11527 = vmatpush3.msra.mxu0 %v9069_v43  ;;  %v4297_v20 = vrot.slane %v4184_v38, 1  ;;  %v9094_v62 = vld [vmem:[%s17411_s4 + $0x2d8] sm:$0xff]  ;;  %v9186_v28 = vld [vmem:[%s17411_s4 + $0x568] sm:$0xff]  ;;  %v9093_v30 = vld [vmem:[%s17411_s4 + $0x2d0] sm:$0xff] }
 0x52f   : > { %v15912_v2 = vmax.f32 %v4267_v22, %v4325_v52  ;;  %11710 = vmatpush3.msra.mxu1 %v9136_v21  ;;  %11711 = vmatprep.mubr.msk.f32.mxu1 %vm12461_vm2, %v17547_v15  ;;  %v9179_v22 = vld [vmem:[%s17411_s4 + $0x538] sm:$0xff]  ;;  %v9185_v43 = vld [vmem:[%s17411_s4 + $0x560] sm:$0xff]  ;;  %v9092_v58 = vld [vmem:[%s17411_s4 + $0x2c8] sm:$0xff] }
 0x530   : > { %11528 = vmatprep.subr.mxu0 %v17547_v15  ;;  %11712 = vmatmul.mubr.msk.f32.vlgmr.msra.gmra.mxu1 %vm4360_vm6, %v5672_v0  ;;  %v4298_v51 = vsel %vm1740_vm5, %v4295_v47, %v4297_v20  ;;  %v9187_v47 = vld [vmem:[%s17411_s4 + $0x570] sm:$0xff]  ;;  %v9184_v21 = vld [vmem:[%s17411_s4 + $0x558] sm:$0xff]  ;;  %v9091_v6 = vld [vmem:[%s17411_s4 + $0x2c0] sm:$0xff] }
 0x531   : > { %11733 = vmatprep.subr.mxu1 %v17547_v15  ;;  %v4326_v49 = vmax.f32 %v4183_v36, %v4298_v51  ;;  %11529 = vmatpush3.msra.mxu0 %v9068_v13  ;;  %v9173_v36 = vld [vmem:[%s17411_s4 + $0x508] sm:$0xff]  ;;  %v9183_v38 = vld [vmem:[%s17411_s4 + $0x550] sm:$0xff]  ;;  %v9116_v52 = vld [vmem:[%s17411_s4 + $0x378] sm:$0xff] }
 0x532   : > { %11734 = vmatpush3.msra.mxu1 %v9161_v35  ;;  %11530 = vmatprep.subr.mxu0 %v17547_v15  ;;  %v9182_v0 = vld [vmem:[%s17411_s4 + $0x548] sm:$0xff]  ;;  %v9115_v20 = vld [vmem:[%s17411_s4 + $0x370] sm:$0xff]  ;;  %v9181_v13 = vld [vmem:[%s17411_s4 + $0x540] sm:$0xff] }
 0x533   : > { %v15933_v8 = vmax.f32 %v4268_v40, %v4326_v49  ;;  %11735 = vmatprep.subr.mxu1 %v17547_v15  ;;  %11531 = vmatpush3.msra.mxu0 %v9067_v41  ;;  %v6004_v40 = vrot.slane %v15559_v3, 4  ;;  %v9114_v35 = vld [vmem:[%s17411_s4 + $0x368] sm:$0xff]  ;;  %v9215_v51 = vld [vmem:[%s17411_s4 + $0x638] sm:$0xff]  ;;  %v9113_v41 = vld [vmem:[%s17411_s4 + $0x360] sm:$0xff] }
 0x534   : > { %11736 = vmatpush3.msra.mxu1 %v9160_v48  ;;  %11532 = vmatprep.subr.mxu0 %v17547_v15  ;;  %v9214_v49 = vld [vmem:[%s17411_s4 + $0x630] sm:$0xff]  ;;  %v9112_v48 = vld [vmem:[%s17411_s4 + $0x358] sm:$0xff] }
 0x535   : > { %11737 = vmatprep.subr.mxu1 %v17547_v15  ;;  %11533 = vmatpush3.msra.mxu0 %v9066_v42  ;;  %v9213_v42 = vld [vmem:[%s17411_s4 + $0x628] sm:$0xff] }
 0x536   : > { %11738 = vmatpush3.msra.mxu1 %v9159_v50  ;;  %11534 = vmatprep.subr.mxu0 %v17547_v15  ;;  %v9111_v50 = vld [vmem:[%s17411_s4 + $0x350] sm:$0xff] }
 0x537   : > { %11739 = vmatprep.subr.mxu1 %v17547_v15  ;;  %11535 = vmatpush3.msra.mxu0 %v9065_v26  ;;  %v9212_v26 = vld [vmem:[%s17411_s4 + $0x620] sm:$0xff] }
 0x538   : > { %11740 = vmatpush3.msra.mxu1 %v9158_v29  ;;  %11536 = vmatprep.subr.mxu0 %v17547_v15  ;;  %v9110_v29 = vld [vmem:[%s17411_s4 + $0x348] sm:$0xff] }
 0x539   : > { %11741 = vmatprep.subr.mxu1 %v17547_v15  ;;  %11537 = vmatpush3.msra.mxu0 %v9064_v23  ;;  %v9211_v23 = vld [vmem:[%s17411_s4 + $0x618] sm:$0xff] }
 0x53a   : > { %11742 = vmatpush3.msra.mxu1 %v9157_v24  ;;  %11538 = vmatprep.subr.mxu0 %v17547_v15  ;;  %v9109_v24 = vld [vmem:[%s17411_s4 + $0x340] sm:$0xff] }
 0x53b   : > { %11743 = vmatprep.subr.mxu1 %v17547_v15  ;;  %11539 = vmatpush3.msra.mxu0 %v9063_v16  ;;  %v9210_v16 = vld [vmem:[%s17411_s4 + $0x610] sm:$0xff] }
 0x53c   : > { %11540 = vmatprep.mubr.msk.f32.mxu0 %vm12461_vm2, %v17547_v15  ;;  %11744 = vmatpush3.msra.mxu1 %v9156_v46  ;;  %v5425_v46 = vrot.slane %v15464_v4, 4 }
 0x53d   : > { %11541 = vmatmul.mubr.msk.f32.vlgmr.msra.gmra.mxu0 %vm4360_vm6, %v4939_v39  ;;  %11562 = vmatprep.subr.mxu0 %v17547_v15  ;;  %v9125_v39 = vld [vmem:[%s17411_s4 + $0x3b8] sm:$0xff] }
 0x53e   : > { %11745 = vmatprep.subr.mxu1 %v17547_v15  ;;  %11563 = vmatpush3.msra.mxu0 %v9080_v33  ;;  %v9209_v33 = vld [vmem:[%s17411_s4 + $0x608] sm:$0xff] }
 0x53f   : > { %11746 = vmatpush3.msra.mxu1 %v9155_v14  ;;  %11564 = vmatprep.subr.mxu0 %v17547_v15  ;;  %v9208_v14 = vld [vmem:[%s17411_s4 + $0x600] sm:$0xff] }
 0x540   : > { %11747 = vmatprep.subr.mxu1 %v17547_v15  ;;  %11565 = vmatpush3.msra.mxu0 %v9079_v45  ;;  %v6334_v45 = vrot.slane %v15632_v60, 6 }
 0x541   : > { %11748 = vmatpush3.msra.mxu1 %v9154_v59  ;;  %11749 = vmatprep.mubr.msk.f32.mxu1 %vm12461_vm2, %v17547_v15  ;;  %v9123_v59 = vld [vmem:[%s17411_s4 + $0x3a8] sm:$0xff] }
 0x542   : > { %11566 = vmatprep.subr.mxu0 %v17547_v15  ;;  %11750 = vmatmul.mubr.msk.f32.vlgmr.msra.gmra.mxu1 %vm4360_vm6, %v15559_v3 }
 0x543   : > { %11771 = vmatprep.subr.mxu1 %v17547_v15  ;;  %11567 = vmatpush3.msra.mxu0 %v9078_v5  ;;  %v9233_v5 = vld [vmem:[%s17411_s4 + $0x6b8] sm:$0xff] }
 0x544   : > { %11772 = vmatpush3.msra.mxu1 %v9179_v22  ;;  %11568 = vmatprep.subr.mxu0 %v17547_v15  ;;  %v9122_v22 = vld [vmem:[%s17411_s4 + $0x3a0] sm:$0xff] }
 0x545   : > { %11773 = vmatprep.subr.mxu1 %v17547_v15  ;;  %11569 = vmatpush3.msra.mxu0 %v9077_v27  ;;  %v9232_v27 = vld [vmem:[%s17411_s4 + $0x6b0] sm:$0xff] }
 0x546   : > { %11774 = vmatpush3.msra.mxu1 %v9178_v54  ;;  %11570 = vmatprep.subr.mxu0 %v17547_v15  ;;  %v9121_v54 = vld [vmem:[%s17411_s4 + $0x398] sm:$0xff] }
 0x547   : > { %11775 = vmatprep.subr.mxu1 %v17547_v15  ;;  %11571 = vmatpush3.msra.mxu0 %v9076_v10  ;;  %v9231_v10 = vld [vmem:[%s17411_s4 + $0x6a8] sm:$0xff] }
 0x548   : > { %11776 = vmatpush3.msra.mxu1 %v9177_v37  ;;  %11572 = vmatprep.subr.mxu0 %v17547_v15  ;;  %v9120_v37 = vld [vmem:[%s17411_s4 + $0x390] sm:$0xff] }
 0x549   : > { %11777 = vmatprep.subr.mxu1 %v17547_v15  ;;  %11573 = vmatpush3.msra.mxu0 %v9075_v61  ;;  %v9230_v61 = vld [vmem:[%s17411_s4 + $0x6a0] sm:$0xff] }
 0x54a   : > { %11778 = vmatpush3.msra.mxu1 %v9176_v11  ;;  %11574 = vmatprep.subr.mxu0 %v17547_v15  ;;  %v9119_v11 = vld [vmem:[%s17411_s4 + $0x388] sm:$0xff] }
 0x54b   : > { %11779 = vmatprep.subr.mxu1 %v17547_v15  ;;  %11575 = vmatpush3.msra.mxu0 %v9074_v17  ;;  %v9229_v17 = vld [vmem:[%s17411_s4 + $0x698] sm:$0xff] }
 0x54c   : > { %11780 = vmatpush3.msra.mxu1 %v9175_v63  ;;  %11576 = vmatprep.subr.mxu0 %v17547_v15  ;;  %v9118_v63 = vld [vmem:[%s17411_s4 + $0x380] sm:$0xff] }
 0x54d   : > { %11781 = vmatprep.subr.mxu1 %v17547_v15  ;;  %11577 = vmatpush3.msra.mxu0 %v9073_v56  ;;  %v9228_v56 = vld [vmem:[%s17411_s4 + $0x690] sm:$0xff] }
 0x54e   : > { %11578 = vmatprep.mubr.msk.f32.mxu0 %vm12461_vm2, %v17547_v15  ;;  %11782 = vmatpush3.msra.mxu1 %v9174_v1  ;;  %v9152_v1 = vld [vmem:[%s17411_s4 + $0x478] sm:$0xff] }
 0x54f   : > { %11579 = vmatmul.mubr.msk.f32.vlgmr.msra.gmra.mxu0 %vm4360_vm6, %v5093_v44  ;;  %11600 = vmatprep.subr.mxu0 %v17547_v15  ;;  %v9227_v44 = vld [vmem:[%s17411_s4 + $0x688] sm:$0xff] }
 0x550   : > { %11783 = vmatprep.subr.mxu1 %v17547_v15  ;;  %11601 = vmatpush3.msra.mxu0 %v9098_v9  ;;  %v9151_v9 = vld [vmem:[%s17411_s4 + $0x470] sm:$0xff] }
 0x551   : > { %11784 = vmatpush3.msra.mxu1 %v9173_v36  ;;  %11602 = vmatprep.subr.mxu0 %v17547_v15  ;;  %v9226_v36 = vld [vmem:[%s17411_s4 + $0x680] sm:$0xff] }
 0x552   : > { %11785 = vmatprep.subr.mxu1 %v17547_v15  ;;  %11603 = vmatpush3.msra.mxu0 %v9097_v7  ;;  %v6500_v7 = vrot.slane %v15658_v55, 2 }
 0x553   : > { %11786 = vmatpush3.msra.mxu1 %v9172_v12  ;;  %11787 = vmatprep.mubr.msk.f32.mxu1 %vm12461_vm2, %v17547_v15  ;;  %v9150_v12 = vld [vmem:[%s17411_s4 + $0x468] sm:$0xff] }
 0x554   : > { %11604 = vmatprep.subr.mxu0 %v17547_v15  ;;  %11788 = vmatmul.mubr.msk.f32.vlgmr.msra.gmra.mxu1 %vm4360_vm6, %v6004_v40  ;;  %v9259_v40 = vld [vmem:[%s17411_s4 + $0x778] sm:$0xff] }
 0x555   : > { %11809 = vmatprep.subr.mxu1 %v17547_v15  ;;  %11605 = vmatpush3.msra.mxu0 %v9096_v19  ;;  %v9149_v19 = vld [vmem:[%s17411_s4 + $0x460] sm:$0xff] }
 0x556   : > { %11810 = vmatpush3.msra.mxu1 %v9188_v34  ;;  %11606 = vmatprep.subr.mxu0 %v17547_v15  ;;  %v9258_v34 = vld [vmem:[%s17411_s4 + $0x770] sm:$0xff] }
 0x557   : > { %11811 = vmatprep.subr.mxu1 %v17547_v15  ;;  %11607 = vmatpush3.msra.mxu0 %v9095_v53  ;;  %v9148_v53 = vld [vmem:[%s17411_s4 + $0x458] sm:$0xff] }
 0x558   : > { %11812 = vmatpush3.msra.mxu1 %v9187_v47  ;;  %11608 = vmatprep.subr.mxu0 %v17547_v15  ;;  %v9257_v47 = vld [vmem:[%s17411_s4 + $0x768] sm:$0xff] }
 0x559   : > { %11813 = vmatprep.subr.mxu1 %v17547_v15  ;;  %11609 = vmatpush3.msra.mxu0 %v9094_v62  ;;  %v9147_v62 = vld [vmem:[%s17411_s4 + $0x450] sm:$0xff] }
 0x55a   : > { %11814 = vmatpush3.msra.mxu1 %v9186_v28  ;;  %11610 = vmatprep.subr.mxu0 %v17547_v15  ;;  %v9256_v28 = vld [vmem:[%s17411_s4 + $0x760] sm:$0xff] }
 0x55b   : > { %11815 = vmatprep.subr.mxu1 %v17547_v15  ;;  %11611 = vmatpush3.msra.mxu0 %v9093_v30  ;;  %v9146_v30 = vld [vmem:[%s17411_s4 + $0x448] sm:$0xff] }
 0x55c   : > { %11816 = vmatpush3.msra.mxu1 %v9185_v43  ;;  %11612 = vmatprep.subr.mxu0 %v17547_v15  ;;  %v9255_v43 = vld [vmem:[%s17411_s4 + $0x758] sm:$0xff] }
 0x55d   : > { %11817 = vmatprep.subr.mxu1 %v17547_v15  ;;  %11613 = vmatpush3.msra.mxu0 %v9092_v58  ;;  %v9145_v58 = vld [vmem:[%s17411_s4 + $0x440] sm:$0xff] }
 0x55e   : > { %11818 = vmatpush3.msra.mxu1 %v9184_v21  ;;  %11614 = vmatprep.subr.mxu0 %v17547_v15  ;;  %v9254_v21 = vld [vmem:[%s17411_s4 + $0x750] sm:$0xff] }
 0x55f   : > { %11819 = vmatprep.subr.mxu1 %v17547_v15  ;;  %11615 = vmatpush3.msra.mxu0 %v9091_v6 }
 0x560   : > { %11616 = vmatprep.mubr.msk.f32.mxu0 %vm12461_vm2, %v17547_v15  ;;  %11820 = vmatpush3.msra.mxu1 %v9183_v38  ;;  %v5755_v38 = vrot.slane %v15536_v25, 6 }
 0x561   : > { %11617 = vmatmul.mubr.msk.f32.vlgmr.msra.gmra.mxu0 %vm4360_vm6, %v15464_v4  ;;  %11638 = vmatprep.subr.mxu0 %v17547_v15  ;;  %v9124_v4 = vld [vmem:[%s17411_s4 + $0x3b0] sm:$0xff] }
 0x562   : > { %11821 = vmatprep.subr.mxu1 %v17547_v15  ;;  %11639 = vmatpush3.msra.mxu0 %v9116_v52  ;;  %v9170_v52 = vld [vmem:[%s17411_s4 + $0x4f8] sm:$0xff] }
 0x563   : > { %11822 = vmatpush3.msra.mxu1 %v9182_v0  ;;  %11640 = vmatprep.subr.mxu0 %v17547_v15 }
 0x564   : > { %11823 = vmatprep.subr.mxu1 %v17547_v15  ;;  %11641 = vmatpush3.msra.mxu0 %v9115_v20  ;;  %v9253_v20 = vld [vmem:[%s17411_s4 + $0x748] sm:$0xff] }
 0x565   : > { %11824 = vmatpush3.msra.mxu1 %v9181_v13  ;;  %11825 = vmatprep.mubr.msk.f32.mxu1 %vm12461_vm2, %v17547_v15 }
 0x566   : > { %11642 = vmatprep.subr.mxu0 %v17547_v15  ;;  %11826 = vmatmul.mubr.msk.f32.vlgmr.msra.gmra.mxu1 %vm4360_vm6, %v15632_v60 }
 0x567   : > { %11847 = vmatprep.subr.mxu1 %v17547_v15  ;;  %11643 = vmatpush3.msra.mxu0 %v9114_v35  ;;  %v9252_v35 = vld [vmem:[%s17411_s4 + $0x740] sm:$0xff] }
 0x568   : > { %11848 = vmatpush3.msra.mxu1 %v9215_v51  ;;  %11644 = vmatprep.subr.mxu0 %v17547_v15 }
 0x569   : > { %11849 = vmatprep.subr.mxu1 %v17547_v15  ;;  %11645 = vmatpush3.msra.mxu0 %v9113_v41  ;;  %v6676_v41 = vrot.slane %v15728_v18, 2 }
 0x56a   : > { %11850 = vmatpush3.msra.mxu1 %v9214_v49  ;;  %11646 = vmatprep.subr.mxu0 %v17547_v15  ;;  %v9168_v49 = vld [vmem:[%s17411_s4 + $0x4e8] sm:$0xff] }
 0x56b   : > { %11851 = vmatprep.subr.mxu1 %v17547_v15  ;;  %11647 = vmatpush3.msra.mxu0 %v9112_v48  ;;  %v9269_v48 = vld [vmem:[%s17411_s4 + $0x7b8] sm:$0xff] }
 0x56c   : > { %11852 = vmatpush3.msra.mxu1 %v9213_v42  ;;  %11648 = vmatprep.subr.mxu0 %v17547_v15  ;;  %v9167_v42 = vld [vmem:[%s17411_s4 + $0x4e0] sm:$0xff] }
 0x56d   : > { %11853 = vmatprep.subr.mxu1 %v17547_v15  ;;  %11649 = vmatpush3.msra.mxu0 %v9111_v50  ;;  %v9268_v50 = vld [vmem:[%s17411_s4 + $0x7b0] sm:$0xff] }
 0x56e   : > { %11854 = vmatpush3.msra.mxu1 %v9212_v26  ;;  %11650 = vmatprep.subr.mxu0 %v17547_v15  ;;  %v9166_v26 = vld [vmem:[%s17411_s4 + $0x4d8] sm:$0xff] }
 0x56f   : > { %11855 = vmatprep.subr.mxu1 %v17547_v15  ;;  %11651 = vmatpush3.msra.mxu0 %v9110_v29  ;;  %v9267_v29 = vld [vmem:[%s17411_s4 + $0x7a8] sm:$0xff] }
 0x570   : > { %11856 = vmatpush3.msra.mxu1 %v9211_v23  ;;  %11652 = vmatprep.subr.mxu0 %v17547_v15  ;;  %v9165_v23 = vld [vmem:[%s17411_s4 + $0x4d0] sm:$0xff] }
 0x571   : > { %11857 = vmatprep.subr.mxu1 %v17547_v15  ;;  %11653 = vmatpush3.msra.mxu0 %v9109_v24  ;;  %v9266_v24 = vld [vmem:[%s17411_s4 + $0x7a0] sm:$0xff] }
 0x572   : > { %11654 = vmatprep.mubr.msk.f32.mxu0 %vm12461_vm2, %v17547_v15  ;;  %11858 = vmatpush3.msra.mxu1 %v9210_v16  ;;  %v9164_v16 = vld [vmem:[%s17411_s4 + $0x4c8] sm:$0xff] }
 0x573   : > { %11655 = vmatmul.mubr.msk.f32.vlgmr.msra.gmra.mxu0 %vm4360_vm6, %v5425_v46  ;;  %11676 = vmatprep.subr.mxu0 %v17547_v15  ;;  %v9265_v46 = vld [vmem:[%s17411_s4 + $0x798] sm:$0xff] }
 0x574   : > { %11859 = vmatprep.subr.mxu1 %v17547_v15  ;;  %11677 = vmatpush3.msra.mxu0 %v9125_v39 }
 0x575   : > { %11860 = vmatpush3.msra.mxu1 %v9209_v33  ;;  %11678 = vmatprep.subr.mxu0 %v17547_v15  ;;  %v9163_v33 = vld [vmem:[%s17411_s4 + $0x4c0] sm:$0xff] }
 0x576   : > { %11861 = vmatprep.subr.mxu1 %v17547_v15  ;;  %11679 = vmatpush3.msra.mxu0 %v9124_v4 }
 0x577   : > { %11862 = vmatpush3.msra.mxu1 %v9208_v14  ;;  %11863 = vmatprep.mubr.msk.f32.mxu1 %vm12461_vm2, %v17547_v15  ;;  %v9264_v14 = vld [vmem:[%s17411_s4 + $0x790] sm:$0xff] }
 0x578   : > { %11680 = vmatprep.subr.mxu0 %v17547_v15  ;;  %11864 = vmatmul.mubr.msk.f32.vlgmr.msra.gmra.mxu1 %vm4360_vm6, %v6334_v45 }
 0x579   : > { %11885 = vmatprep.subr.mxu1 %v17547_v15  ;;  %11681 = vmatpush3.msra.mxu0 %v9123_v59  ;;  %v5921_v59 = vrot.slane %v15559_v3, 2  ;;  %v9195_v3 = vld [vmem:[%s17411_s4 + $0x5b0] sm:$0xff] }
 0x57a   : > { %11886 = vmatpush3.msra.mxu1 %v9233_v5  ;;  %11682 = vmatprep.subr.mxu0 %v17547_v15  ;;  %v9196_v5 = vld [vmem:[%s17411_s4 + $0x5b8] sm:$0xff] }
 0x57b   : > { %11887 = vmatprep.subr.mxu1 %v17547_v15  ;;  %11683 = vmatpush3.msra.mxu0 %v9122_v22  ;;  %v9263_v22 = vld [vmem:[%s17411_s4 + $0x788] sm:$0xff] }
 0x57c   : > { %11888 = vmatpush3.msra.mxu1 %v9232_v27  ;;  %11684 = vmatprep.subr.mxu0 %v17547_v15 }
 0x57d   : > { %11889 = vmatprep.subr.mxu1 %v17547_v15  ;;  %11685 = vmatpush3.msra.mxu0 %v9121_v54  ;;  %v9262_v54 = vld [vmem:[%s17411_s4 + $0x780] sm:$0xff] }
 0x57e   : > { %11890 = vmatpush3.msra.mxu1 %v9231_v10  ;;  %11686 = vmatprep.subr.mxu0 %v17547_v15 }
 0x57f   : > { %11891 = vmatprep.subr.mxu1 %v17547_v15  ;;  %11687 = vmatpush3.msra.mxu0 %v9120_v37  ;;  %v6830_v37 = vrot.slane %v15728_v18, 4 }
 0x580   : > { %11892 = vmatpush3.msra.mxu1 %v9230_v61  ;;  %11688 = vmatprep.subr.mxu0 %v17547_v15  ;;  %v9194_v61 = vld [vmem:[%s17411_s4 + $0x5a8] sm:$0xff] }
 0x581   : > { %11893 = vmatprep.subr.mxu1 %v17547_v15  ;;  %11689 = vmatpush3.msra.mxu0 %v9119_v11  ;;  %v9287_v11 = vld [vmem:[%s17411_s4 + $0x838] sm:$0xff] }
 0x582   : > { %11894 = vmatpush3.msra.mxu1 %v9229_v17  ;;  %11690 = vmatprep.subr.mxu0 %v17547_v15  ;;  %v9193_v17 = vld [vmem:[%s17411_s4 + $0x5a0] sm:$0xff] }
 0x583   : > { %11895 = vmatprep.subr.mxu1 %v17547_v15  ;;  %11691 = vmatpush3.msra.mxu0 %v9118_v63  ;;  %v9286_v63 = vld [vmem:[%s17411_s4 + $0x830] sm:$0xff] }
 0x584   : > { %11692 = vmatprep.mubr.msk.f32.mxu0 %vm12461_vm2, %v17547_v15  ;;  %11896 = vmatpush3.msra.mxu1 %v9228_v56  ;;  %v9192_v56 = vld [vmem:[%s17411_s4 + $0x598] sm:$0xff] }
 0x585   : > { %11693 = vmatmul.mubr.msk.f32.vlgmr.msra.gmra.mxu0 %vm4360_vm6, %v15536_v25  ;;  %11714 = vmatprep.subr.mxu0 %v17547_v15  ;;  %v9169_v25 = vld [vmem:[%s17411_s4 + $0x4f0] sm:$0xff] }
 0x586   : > { %11897 = vmatprep.subr.mxu1 %v17547_v15  ;;  %11715 = vmatpush3.msra.mxu0 %v9152_v1  ;;  %v9285_v1 = vld [vmem:[%s17411_s4 + $0x828] sm:$0xff] }
 0x587   : > { %11898 = vmatpush3.msra.mxu1 %v9227_v44  ;;  %11716 = vmatprep.subr.mxu0 %v17547_v15  ;;  %v9191_v44 = vld [vmem:[%s17411_s4 + $0x590] sm:$0xff] }
 0x588   : > { %11899 = vmatprep.subr.mxu1 %v17547_v15  ;;  %11717 = vmatpush3.msra.mxu0 %v9151_v9  ;;  %v9284_v9 = vld [vmem:[%s17411_s4 + $0x820] sm:$0xff] }
 0x589   : > { %11900 = vmatpush3.msra.mxu1 %v9226_v36  ;;  %11901 = vmatprep.mubr.msk.f32.mxu1 %vm12461_vm2, %v17547_v15  ;;  %v9190_v36 = vld [vmem:[%s17411_s4 + $0x588] sm:$0xff] }
 0x58a   : > { %11718 = vmatprep.subr.mxu0 %v17547_v15  ;;  %11902 = vmatmul.mubr.msk.f32.vlgmr.msra.gmra.mxu1 %vm4360_vm6, %v6500_v7  ;;  %v9283_v7 = vld [vmem:[%s17411_s4 + $0x818] sm:$0xff] }
 0x58b   : > { %11923 = vmatprep.subr.mxu1 %v17547_v15  ;;  %11719 = vmatpush3.msra.mxu0 %v9150_v12 }
 0x58c   : > { %11924 = vmatpush3.msra.mxu1 %v9259_v40  ;;  %11720 = vmatprep.subr.mxu0 %v17547_v15  ;;  %v9189_v40 = vld [vmem:[%s17411_s4 + $0x580] sm:$0xff] }
 0x58d   : > { %11925 = vmatprep.subr.mxu1 %v17547_v15  ;;  %11721 = vmatpush3.msra.mxu0 %v9149_v19 }
 0x58e   : > { %11926 = vmatpush3.msra.mxu1 %v9258_v34  ;;  %11722 = vmatprep.subr.mxu0 %v17547_v15  ;;  %v9282_v34 = vld [vmem:[%s17411_s4 + $0x810] sm:$0xff] }
 0x58f   : > { %11927 = vmatprep.subr.mxu1 %v17547_v15  ;;  %11723 = vmatpush3.msra.mxu0 %v9148_v53 }
 0x590   : > { %11928 = vmatpush3.msra.mxu1 %v9257_v47  ;;  %11724 = vmatprep.subr.mxu0 %v17547_v15  ;;  %v6097_v47 = vrot.slane %v15632_v60, 2 }
 0x591   : > { %11929 = vmatprep.subr.mxu1 %v17547_v15  ;;  %11725 = vmatpush3.msra.mxu0 %v9147_v62  ;;  %v9206_v62 = vld [vmem:[%s17411_s4 + $0x5f8] sm:$0xff] }
 0x592   : > { %11930 = vmatpush3.msra.mxu1 %v9256_v28  ;;  %11726 = vmatprep.subr.mxu0 %v17547_v15  ;;  %v9281_v28 = vld [vmem:[%s17411_s4 + $0x808] sm:$0xff] }
 0x593   : > { %11931 = vmatprep.subr.mxu1 %v17547_v15  ;;  %11727 = vmatpush3.msra.mxu0 %v9146_v30  ;;  %v4429_v6 = vpop.f32.mrf.mxu0 }
 0x594   : > { %11932 = vmatpush3.msra.mxu1 %v9255_v43  ;;  %11728 = vmatprep.subr.mxu0 %v17547_v15  ;;  %v9205_v43 = vld [vmem:[%s17411_s4 + $0x5f0] sm:$0xff] }
 0x595   : > { %11933 = vmatprep.subr.mxu1 %v17547_v15  ;;  %11729 = vmatpush3.msra.mxu0 %v9145_v58  ;;  %v11409_v0 = vpop.f32.mrf.mxu0  ;;  %v9280_v58 = vld [vmem:[%s17411_s4 + $0x800] sm:$0xff] }
 0x596   : > { %11730 = vmatprep.mubr.msk.f32.mxu0 %vm12461_vm2, %v17547_v15  ;;  %11934 = vmatpush3.msra.mxu1 %v9254_v21  ;;  %v9304_v0 = vld [vmem:[%s17411_s4 + $0x8b0] sm:$0xff] }
 0x597   : > { %11731 = vmatmul.mubr.msk.f32.vlgmr.msra.gmra.mxu0 %vm4360_vm6, %v5755_v38  ;;  %11752 = vmatprep.subr.mxu0 %v17547_v15  ;;  %v16339_v13 = vpop.f32.mrf.mxu1  ;;  %v9305_v38 = vld [vmem:[%s17411_s4 + $0x8b8] sm:$0xff] }
 0x598   : > { %11935 = vmatprep.subr.mxu1 %v17547_v15  ;;  %11753 = vmatpush3.msra.mxu0 %v9170_v52  ;;  %v9203_v52 = vld [vmem:[%s17411_s4 + $0x5e0] sm:$0xff] }
 0x599   : > { %11936 = vmatpush3.msra.mxu1 %v9253_v20  ;;  %11754 = vmatprep.subr.mxu0 %v17547_v15  ;;  %v11523_v51 = vpop.f32.mrf.mxu1  ;;  %v9202_v20 = vld [vmem:[%s17411_s4 + $0x5d8] sm:$0xff] }
 0x59a   : > { %11937 = vmatprep.subr.mxu1 %v17547_v15  ;;  %11755 = vmatpush3.msra.mxu0 %v9169_v25  ;;  %v9303_v25 = vld [vmem:[%s17411_s4 + $0x8a8] sm:$0xff]  ;;  %v9302_v51 = vld [vmem:[%s17411_s4 + $0x8a0] sm:$0xff] }
 0x59b   : > { %11938 = vmatpush3.msra.mxu1 %v9252_v35  ;;  %11939 = vmatprep.mubr.msk.f32.mxu1 %vm12461_vm2, %v17547_v15  ;;  %v9201_v35 = vld [vmem:[%s17411_s4 + $0x5d0] sm:$0xff] }
 0x59c   : > { %11756 = vmatprep.subr.mxu0 %v17547_v15  ;;  %11940 = vmatmul.mubr.msk.f32.vlgmr.msra.gmra.mxu1 %vm4360_vm6, %v6676_v41  ;;  %v9200_v41 = vld [vmem:[%s17411_s4 + $0x5c8] sm:$0xff] }
 0x59d   : > { %11961 = vmatprep.subr.mxu1 %v17547_v15  ;;  %11757 = vmatpush3.msra.mxu0 %v9168_v49  ;;  %v9301_v49 = vld [vmem:[%s17411_s4 + $0x898] sm:$0xff] }
 0x59e   : > { %11962 = vmatpush3.msra.mxu1 %v9269_v48  ;;  %11758 = vmatprep.subr.mxu0 %v17547_v15 }
 0x59f   : > { %11963 = vmatprep.subr.mxu1 %v17547_v15  ;;  %11759 = vmatpush3.msra.mxu0 %v9167_v42  ;;  %v9199_v42 = vld [vmem:[%s17411_s4 + $0x5c0] sm:$0xff] }
 0x5a0   : > { %11964 = vmatpush3.msra.mxu1 %v9268_v50  ;;  %11760 = vmatprep.subr.mxu0 %v17547_v15 }
 0x5a1   : > { %11965 = vmatprep.subr.mxu1 %v17547_v15  ;;  %11761 = vmatpush3.msra.mxu0 %v9166_v26  ;;  %v9300_v26 = vld [vmem:[%s17411_s4 + $0x890] sm:$0xff] }
 0x5a2   : > { %11966 = vmatpush3.msra.mxu1 %v9267_v29  ;;  %11762 = vmatprep.subr.mxu0 %v17547_v15 }
 0x5a3   : > { %11967 = vmatprep.subr.mxu1 %v17547_v15  ;;  %11763 = vmatpush3.msra.mxu0 %v9165_v23  ;;  %v4501_v39 = vpop.f32.mrf.mxu0  ;;  %v6251_v23 = vrot.slane %v15632_v60, 4  ;;  %v9223_v60 = vld [vmem:[%s17411_s4 + $0x670] sm:$0xff] }
 0x5a4   : > { %11968 = vmatpush3.msra.mxu1 %v9266_v24  ;;  %11764 = vmatprep.subr.mxu0 %v17547_v15  ;;  %v4502_v4 = vadd.f32 %v4501_v39, %v4429_v6  ;;  %v9204_v6 = vld [vmem:[%s17411_s4 + $0x5e8] sm:$0xff]  ;;  %v9224_v24 = vld [vmem:[%s17411_s4 + $0x678] sm:$0xff]  ;;  %v9298_v39 = vld [vmem:[%s17411_s4 + $0x880] sm:$0xff] }
 0x5a5   : > { %11969 = vmatprep.subr.mxu1 %v17547_v15  ;;  %11765 = vmatpush3.msra.mxu0 %v9164_v16  ;;  %v11428_v45 = vpop.f32.mrf.mxu0  ;;  %v9299_v16 = vld [vmem:[%s17411_s4 + $0x888] sm:$0xff] }
 0x5a6   : > { %11970 = vmatpush3.msra.mxu1 %v9265_v46  ;;  %11766 = vmatprep.subr.mxu0 %v17547_v15  ;;  %v9314_v45 = vld [vmem:[%s17411_s4 + $0x8f8] sm:$0xff] }
 0x5a7   : > { %11971 = vmatprep.subr.mxu1 %v17547_v15  ;;  %11767 = vmatpush3.msra.mxu0 %v9163_v33 }
 0x5a8   : > { %11768 = vmatprep.mubr.msk.f32.mxu0 %vm12461_vm2, %v17547_v15  ;;  %11972 = vmatpush3.msra.mxu1 %v9264_v14  ;;  %v16408_v27 = vpop.f32.mrf.mxu1  ;;  %v9222_v14 = vld [vmem:[%s17411_s4 + $0x668] sm:$0xff] }
 0x5a9   : > { %11769 = vmatmul.mubr.msk.f32.vlgmr.msra.gmra.mxu0 %vm4360_vm6, %v5921_v59  ;;  %11790 = vmatprep.subr.mxu0 %v17547_v15  ;;  %v9221_v59 = vld [vmem:[%s17411_s4 + $0x660] sm:$0xff] }
 0x5aa   : > { %11973 = vmatprep.subr.mxu1 %v17547_v15  ;;  %11791 = vmatpush3.msra.mxu0 %v9196_v5  ;;  %v11561_v10 = vpop.f32.mrf.mxu1  ;;  %v9313_v5 = vld [vmem:[%s17411_s4 + $0x8f0] sm:$0xff] }
 0x5ab   : > { %11974 = vmatpush3.msra.mxu1 %v9263_v22  ;;  %11792 = vmatprep.subr.mxu0 %v17547_v15  ;;  %v9220_v22 = vld [vmem:[%s17411_s4 + $0x658] sm:$0xff]  ;;  %v9311_v10 = vld [vmem:[%s17411_s4 + $0x8e0] sm:$0xff] }
 0x5ac   : > { %11975 = vmatprep.subr.mxu1 %v17547_v15  ;;  %11793 = vmatpush3.msra.mxu0 %v9195_v3  ;;  %v9312_v3 = vld [vmem:[%s17411_s4 + $0x8e8] sm:$0xff] }
 0x5ad   : > { %11976 = vmatpush3.msra.mxu1 %v9262_v54  ;;  %11977 = vmatprep.mubr.msk.f32.mxu1 %vm12461_vm2, %v17547_v15  ;;  %v9219_v54 = vld [vmem:[%s17411_s4 + $0x650] sm:$0xff] }
 0x5ae   : > { %11794 = vmatprep.subr.mxu0 %v17547_v15  ;;  %11978 = vmatmul.mubr.msk.f32.vlgmr.msra.gmra.mxu1 %vm4360_vm6, %v6830_v37  ;;  %v9218_v37 = vld [vmem:[%s17411_s4 + $0x648] sm:$0xff] }
 0x5af   : > { %11999 = vmatprep.subr.mxu1 %v17547_v15  ;;  %11795 = vmatpush3.msra.mxu0 %v9194_v61  ;;  %v9310_v61 = vld [vmem:[%s17411_s4 + $0x8d8] sm:$0xff] }
 0x5b0   : > { %12000 = vmatpush3.msra.mxu1 %v9287_v11  ;;  %11796 = vmatprep.subr.mxu0 %v17547_v15 }
 0x5b1   : > { %12001 = vmatprep.subr.mxu1 %v17547_v15  ;;  %11797 = vmatpush3.msra.mxu0 %v9193_v17  ;;  %v9217_v17 = vld [vmem:[%s17411_s4 + $0x640] sm:$0xff] }
 0x5b2   : > { %12002 = vmatpush3.msra.mxu1 %v9286_v63  ;;  %11798 = vmatprep.subr.mxu0 %v17547_v15 }
 0x5b3   : > { %12003 = vmatprep.subr.mxu1 %v17547_v15  ;;  %11799 = vmatpush3.msra.mxu0 %v9192_v56  ;;  %v9309_v56 = vld [vmem:[%s17411_s4 + $0x8d0] sm:$0xff] }
 0x5b4   : > { %12004 = vmatpush3.msra.mxu1 %v9285_v1  ;;  %11800 = vmatprep.subr.mxu0 %v17547_v15 }
 0x5b5   : > { %12005 = vmatprep.subr.mxu1 %v17547_v15  ;;  %11801 = vmatpush3.msra.mxu0 %v9191_v44  ;;  %v4583_v12 = vpop.f32.mrf.mxu0  ;;  %v9242_v44 = vld [vmem:[%s17411_s4 + $0x6f8] sm:$0xff] }
 0x5b6   : > { %12006 = vmatpush3.msra.mxu1 %v9284_v9  ;;  %11802 = vmatprep.subr.mxu0 %v17547_v15  ;;  %v4587_v19 = vadd.f32 %v4583_v12, %v4502_v4  ;;  %v7162_v4 = vrot.slane %v15754_v31, 4  ;;  %v9308_v9 = vld [vmem:[%s17411_s4 + $0x8c8] sm:$0xff]  ;;  %v9307_v12 = vld [vmem:[%s17411_s4 + $0x8c0] sm:$0xff] }
 0x5b7   : > { %12007 = vmatprep.subr.mxu1 %v17547_v15  ;;  %11803 = vmatpush3.msra.mxu0 %v9190_v36  ;;  %v11447_v53 = vpop.f32.mrf.mxu0 }
 0x5b8   : > { %12008 = vmatpush3.msra.mxu1 %v9283_v7  ;;  %11804 = vmatprep.subr.mxu0 %v17547_v15  ;;  %v9241_v7 = vld [vmem:[%s17411_s4 + $0x6f0] sm:$0xff]  ;;  %v9239_v53 = vld [vmem:[%s17411_s4 + $0x6e0] sm:$0xff] }
 0x5b9   : > { %12009 = vmatprep.subr.mxu1 %v17547_v15  ;;  %11805 = vmatpush3.msra.mxu0 %v9189_v40 }
 0x5ba   : > { %11806 = vmatprep.mubr.msk.f32.mxu0 %vm12461_vm2, %v17547_v15  ;;  %12010 = vmatpush3.msra.mxu1 %v9282_v34  ;;  %v16482_v30 = vpop.f32.mrf.mxu1  ;;  %v9341_v34 = vld [vmem:[%s17411_s4 + $0x9b8] sm:$0xff] }
 0x5bb   : > { %11807 = vmatmul.mubr.msk.f32.vlgmr.msra.gmra.mxu0 %vm4360_vm6, %v6097_v47  ;;  %11828 = vmatprep.subr.mxu0 %v17547_v15  ;;  %v9340_v47 = vld [vmem:[%s17411_s4 + $0x9b0] sm:$0xff] }
 0x5bc   : > { %12011 = vmatprep.subr.mxu1 %v17547_v15  ;;  %11829 = vmatpush3.msra.mxu0 %v9206_v62  ;;  %v11599_v21 = vpop.f32.mrf.mxu1  ;;  %v9238_v62 = vld [vmem:[%s17411_s4 + $0x6d8] sm:$0xff] }
 0x5bd   : > { %12012 = vmatpush3.msra.mxu1 %v9281_v28  ;;  %11830 = vmatprep.subr.mxu0 %v17547_v15  ;;  %v9339_v28 = vld [vmem:[%s17411_s4 + $0x9a8] sm:$0xff] }
 0x5be   : > { %12013 = vmatprep.subr.mxu1 %v17547_v15  ;;  %11831 = vmatpush3.msra.mxu0 %v9205_v43  ;;  %v9237_v43 = vld [vmem:[%s17411_s4 + $0x6d0] sm:$0xff]  ;;  %v9236_v21 = vld [vmem:[%s17411_s4 + $0x6c8] sm:$0xff] }
 0x5bf   : > { %12014 = vmatpush3.msra.mxu1 %v9280_v58  ;;  %12015 = vmatprep.mubr.msk.f32.mxu1 %vm12461_vm2, %v17547_v15  ;;  %v9338_v58 = vld [vmem:[%s17411_s4 + $0x9a0] sm:$0xff] }
 0x5c0   : > { %11832 = vmatprep.subr.mxu0 %v17547_v15  ;;  %12016 = vmatmul.mubr.msk.f32.vlgmr.msra.gmra.mxu1 %vm4360_vm6, %v15754_v31 }
 0x5c1   : > { %12037 = vmatprep.subr.mxu1 %v17547_v15  ;;  %11833 = vmatpush3.msra.mxu0 %v9204_v6  ;;  %v9337_v6 = vld [vmem:[%s17411_s4 + $0x998] sm:$0xff] }
 0x5c2   : > { %12038 = vmatpush3.msra.mxu1 %v9305_v38  ;;  %11834 = vmatprep.subr.mxu0 %v17547_v15 }
 0x5c3   : > { %12039 = vmatprep.subr.mxu1 %v17547_v15  ;;  %11835 = vmatpush3.msra.mxu0 %v9203_v52  ;;  %v9235_v52 = vld [vmem:[%s17411_s4 + $0x6c0] sm:$0xff] }
 0x5c4   : > { %12040 = vmatpush3.msra.mxu1 %v9304_v0  ;;  %11836 = vmatprep.subr.mxu0 %v17547_v15 }
 0x5c5   : > { %12041 = vmatprep.subr.mxu1 %v17547_v15  ;;  %11837 = vmatpush3.msra.mxu0 %v9202_v20  ;;  %v9336_v20 = vld [vmem:[%s17411_s4 + $0x990] sm:$0xff] }
 0x5c6   : > { %12042 = vmatpush3.msra.mxu1 %v9303_v25  ;;  %11838 = vmatprep.subr.mxu0 %v17547_v15 }
 0x5c7   : > { %12043 = vmatprep.subr.mxu1 %v17547_v15  ;;  %11839 = vmatpush3.msra.mxu0 %v9201_v35  ;;  %v4666_v48 = vpop.f32.mrf.mxu0  ;;  %v6583_v35 = vrot.slane %v15658_v55, 4 }
 0x5c8   : > { %12044 = vmatpush3.msra.mxu1 %v9302_v51  ;;  %11840 = vmatprep.subr.mxu0 %v17547_v15  ;;  %v4670_v50 = vadd.f32 %v4666_v48, %v4587_v19  ;;  %v9240_v19 = vld [vmem:[%s17411_s4 + $0x6e8] sm:$0xff]  ;;  %v9251_v51 = vld [vmem:[%s17411_s4 + $0x738] sm:$0xff]  ;;  %v9334_v48 = vld [vmem:[%s17411_s4 + $0x980] sm:$0xff] }
 0x5c9   : > { %12045 = vmatprep.subr.mxu1 %v17547_v15  ;;  %11841 = vmatpush3.msra.mxu0 %v9200_v41  ;;  %v11466_v29 = vpop.f32.mrf.mxu0  ;;  %v9335_v41 = vld [vmem:[%s17411_s4 + $0x988] sm:$0xff] }
 0x5ca   : > { %12046 = vmatpush3.msra.mxu1 %v9301_v49  ;;  %11842 = vmatprep.subr.mxu0 %v17547_v15  ;;  %v9359_v29 = vld [vmem:[%s17411_s4 + $0xa38] sm:$0xff] }
 0x5cb   : > { %12047 = vmatprep.subr.mxu1 %v17547_v15  ;;  %11843 = vmatpush3.msra.mxu0 %v9199_v42 }
 0x5cc   : > { %11844 = vmatprep.mubr.msk.f32.mxu0 %vm12461_vm2, %v17547_v15  ;;  %12048 = vmatpush3.msra.mxu1 %v9300_v26  ;;  %v16556_v46 = vpop.f32.mrf.mxu1  ;;  %v9249_v26 = vld [vmem:[%s17411_s4 + $0x728] sm:$0xff] }
 0x5cd   : > { %11845 = vmatmul.mubr.msk.f32.vlgmr.msra.gmra.mxu0 %vm4360_vm6, %v6251_v23  ;;  %11866 = vmatprep.subr.mxu0 %v17547_v15  ;;  %v9248_v23 = vld [vmem:[%s17411_s4 + $0x720] sm:$0xff] }
 0x5ce   : > { %12049 = vmatprep.subr.mxu1 %v17547_v15  ;;  %11867 = vmatpush3.msra.mxu0 %v9224_v24  ;;  %v11637_v33 = vpop.f32.mrf.mxu1  ;;  %v9358_v24 = vld [vmem:[%s17411_s4 + $0xa30] sm:$0xff] }
 0x5cf   : > { %12050 = vmatpush3.msra.mxu1 %v9299_v16  ;;  %11868 = vmatprep.subr.mxu0 %v17547_v15  ;;  %v9247_v16 = vld [vmem:[%s17411_s4 + $0x718] sm:$0xff]  ;;  %v9356_v33 = vld [vmem:[%s17411_s4 + $0xa20] sm:$0xff] }
 0x5d0   : > { %12051 = vmatprep.subr.mxu1 %v17547_v15  ;;  %11869 = vmatpush3.msra.mxu0 %v9223_v60  ;;  %v9357_v60 = vld [vmem:[%s17411_s4 + $0xa28] sm:$0xff] }
 0x5d1   : > { %12052 = vmatpush3.msra.mxu1 %v9298_v39  ;;  %12053 = vmatprep.mubr.msk.f32.mxu1 %vm12461_vm2, %v17547_v15  ;;  %v9246_v39 = vld [vmem:[%s17411_s4 + $0x710] sm:$0xff] }
 0x5d2   : > { %11870 = vmatprep.subr.mxu0 %v17547_v15  ;;  %12054 = vmatmul.mubr.msk.f32.vlgmr.msra.gmra.mxu1 %vm4360_vm6, %v7162_v4  ;;  %v9245_v4 = vld [vmem:[%s17411_s4 + $0x708] sm:$0xff] }
 0x5d3   : > { %12075 = vmatprep.subr.mxu1 %v17547_v15  ;;  %11871 = vmatpush3.msra.mxu0 %v9222_v14  ;;  %v9355_v14 = vld [vmem:[%s17411_s4 + $0xa18] sm:$0xff] }
 0x5d4   : > { %12076 = vmatpush3.msra.mxu1 %v9314_v45  ;;  %11872 = vmatprep.subr.mxu0 %v17547_v15 }
 0x5d5   : > { %12077 = vmatprep.subr.mxu1 %v17547_v15  ;;  %11873 = vmatpush3.msra.mxu0 %v9221_v59  ;;  %v9244_v59 = vld [vmem:[%s17411_s4 + $0x700] sm:$0xff] }
 0x5d6   : > { %12078 = vmatpush3.msra.mxu1 %v9313_v5  ;;  %11874 = vmatprep.subr.mxu0 %v17547_v15  ;;  %v9354_v5 = vld [vmem:[%s17411_s4 + $0xa10] sm:$0xff] }
 0x5d7   : > { %12079 = vmatprep.subr.mxu1 %v17547_v15  ;;  %11875 = vmatpush3.msra.mxu0 %v9220_v22 }
 0x5d8   : > { %12080 = vmatpush3.msra.mxu1 %v9312_v3  ;;  %11876 = vmatprep.subr.mxu0 %v17547_v15  ;;  %v9278_v3 = vld [vmem:[%s17411_s4 + $0x7f8] sm:$0xff] }
 0x5d9   : > { %12081 = vmatprep.subr.mxu1 %v17547_v15  ;;  %11877 = vmatpush3.msra.mxu0 %v9219_v54  ;;  %v4749_v11 = vpop.f32.mrf.mxu0  ;;  %v9353_v54 = vld [vmem:[%s17411_s4 + $0xa08] sm:$0xff] }
 0x5da   : > { %12082 = vmatpush3.msra.mxu1 %v9311_v10  ;;  %11878 = vmatprep.subr.mxu0 %v17547_v15  ;;  %v4753_v63 = vadd.f32 %v4749_v11, %v4670_v50  ;;  %v7492_v50 = vrot.slane %v15824_v57, 6 }
 0x5db   : > { %12083 = vmatprep.subr.mxu1 %v17547_v15  ;;  %11879 = vmatpush3.msra.mxu0 %v9218_v37  ;;  %v11485_v1 = vpop.f32.mrf.mxu0  ;;  %v9277_v37 = vld [vmem:[%s17411_s4 + $0x7f0] sm:$0xff] }
 0x5dc   : > { %12084 = vmatpush3.msra.mxu1 %v9310_v61  ;;  %11880 = vmatprep.subr.mxu0 %v17547_v15  ;;  %v9352_v61 = vld [vmem:[%s17411_s4 + $0xa00] sm:$0xff] }
 0x5dd   : > { %12085 = vmatprep.subr.mxu1 %v17547_v15  ;;  %11881 = vmatpush3.msra.mxu0 %v9217_v17  ;;  %v7658_v17 = vrot.slane %v15850_v32, 2  ;;  %v9275_v1 = vld [vmem:[%s17411_s4 + $0x7e0] sm:$0xff] }
 0x5de   : > { %11882 = vmatprep.mubr.msk.f32.mxu0 %vm12461_vm2, %v17547_v15  ;;  %12086 = vmatpush3.msra.mxu1 %v9309_v56  ;;  %v16629_v36 = vpop.f32.mrf.mxu1  ;;  %v9385_v56 = vld [vmem:[%s17411_s4 + $0xaf8] sm:$0xff] }
 0x5df   : > { %11883 = vmatmul.mubr.msk.f32.vlgmr.msra.gmra.mxu0 %vm4360_vm6, %v15658_v55  ;;  %11904 = vmatprep.subr.mxu0 %v17547_v15  ;;  %v9250_v55 = vld [vmem:[%s17411_s4 + $0x730] sm:$0xff] }
 0x5e0   : > { %12087 = vmatprep.subr.mxu1 %v17547_v15  ;;  %11905 = vmatpush3.msra.mxu0 %v9242_v44  ;;  %v11675_v40 = vpop.f32.mrf.mxu1  ;;  %v9384_v44 = vld [vmem:[%s17411_s4 + $0xaf0] sm:$0xff] }
 0x5e1   : > { %12088 = vmatpush3.msra.mxu1 %v9308_v9  ;;  %11906 = vmatprep.subr.mxu0 %v17547_v15  ;;  %v9274_v9 = vld [vmem:[%s17411_s4 + $0x7d8] sm:$0xff]  ;;  %v9382_v40 = vld [vmem:[%s17411_s4 + $0xae0] sm:$0xff] }
 0x5e2   : > { %12089 = vmatprep.subr.mxu1 %v17547_v15  ;;  %11907 = vmatpush3.msra.mxu0 %v9241_v7  ;;  %v9383_v7 = vld [vmem:[%s17411_s4 + $0xae8] sm:$0xff] }
 0x5e3   : > { %12090 = vmatpush3.msra.mxu1 %v9307_v12  ;;  %12091 = vmatprep.mubr.msk.f32.mxu1 %vm12461_vm2, %v17547_v15  ;;  %v9273_v12 = vld [vmem:[%s17411_s4 + $0x7d0] sm:$0xff] }
 0x5e4   : > { %11908 = vmatprep.subr.mxu0 %v17547_v15  ;;  %12092 = vmatmul.mubr.msk.f32.vlgmr.msra.gmra.mxu1 %vm4360_vm6, %v15824_v57 }
 0x5e5   : > { %12113 = vmatprep.subr.mxu1 %v17547_v15  ;;  %11909 = vmatpush3.msra.mxu0 %v9240_v19  ;;  %v9272_v19 = vld [vmem:[%s17411_s4 + $0x7c8] sm:$0xff] }
 0x5e6   : > { %12114 = vmatpush3.msra.mxu1 %v9341_v34  ;;  %11910 = vmatprep.subr.mxu0 %v17547_v15 }
 0x5e7   : > { %12115 = vmatprep.subr.mxu1 %v17547_v15  ;;  %11911 = vmatpush3.msra.mxu0 %v9239_v53  ;;  %v9381_v53 = vld [vmem:[%s17411_s4 + $0xad8] sm:$0xff] }
 0x5e8   : > { %12116 = vmatpush3.msra.mxu1 %v9340_v47  ;;  %11912 = vmatprep.subr.mxu0 %v17547_v15 }
 0x5e9   : > { %12117 = vmatprep.subr.mxu1 %v17547_v15  ;;  %11913 = vmatpush3.msra.mxu0 %v9238_v62  ;;  %v9271_v62 = vld [vmem:[%s17411_s4 + $0x7c0] sm:$0xff] }
 0x5ea   : > { %12118 = vmatpush3.msra.mxu1 %v9339_v28  ;;  %11914 = vmatprep.subr.mxu0 %v17547_v15 }
 0x5eb   : > { %12119 = vmatprep.subr.mxu1 %v17547_v15  ;;  %11915 = vmatpush3.msra.mxu0 %v9237_v43  ;;  %v4832_v38 = vpop.f32.mrf.mxu0 }
 0x5ec   : > { %12120 = vmatpush3.msra.mxu1 %v9338_v58  ;;  %11916 = vmatprep.subr.mxu0 %v17547_v15  ;;  %v16689_v0 = vadd.f32 %v4832_v38, %v4753_v63  ;;  %v9276_v63 = vld [vmem:[%s17411_s4 + $0x7e8] sm:$0xff]  ;;  %v6913_v58 = vrot.slane %v15728_v18, 6 }
 0x5ed   : > { %12121 = vmatprep.subr.mxu1 %v17547_v15  ;;  %11917 = vmatpush3.msra.mxu0 %v9236_v21  ;;  %v11504_v25 = vpop.f32.mrf.mxu0  ;;  %v9296_v21 = vld [vmem:[%s17411_s4 + $0x878] sm:$0xff] }
 0x5ee   : > { %12122 = vmatpush3.msra.mxu1 %v9337_v6  ;;  %11918 = vmatprep.subr.mxu0 %v17547_v15  ;;  %v9379_v6 = vld [vmem:[%s17411_s4 + $0xac8] sm:$0xff]  ;;  %v7834_v25 = vrot.slane %v15912_v2, 2 }
 0x5ef   : > { %12123 = vmatprep.subr.mxu1 %v17547_v15  ;;  %11919 = vmatpush3.msra.mxu0 %v9235_v52  ;;  %v9378_v52 = vld [vmem:[%s17411_s4 + $0xac0] sm:$0xff] }
 0x5f0   : > { %11920 = vmatprep.mubr.msk.f32.mxu0 %vm12461_vm2, %v17547_v15  ;;  %12124 = vmatpush3.msra.mxu1 %v9336_v20  ;;  %v16706_v49 = vpop.f32.mrf.mxu1 }
 0x5f1   : > { %11921 = vmatmul.mubr.msk.f32.vlgmr.msra.gmra.mxu0 %vm4360_vm6, %v6583_v35  ;;  %11942 = vmatprep.subr.mxu0 %v17547_v15  ;;  %v9294_v35 = vld [vmem:[%s17411_s4 + $0x868] sm:$0xff] }
 0x5f2   : > { %12125 = vmatprep.subr.mxu1 %v17547_v15  ;;  %11943 = vmatpush3.msra.mxu0 %v9251_v51  ;;  %v11713_v42 = vpop.f32.mrf.mxu1  ;;  %v9395_v51 = vld [vmem:[%s17411_s4 + $0xb38] sm:$0xff] }
 0x5f3   : > { %12126 = vmatpush3.msra.mxu1 %v9335_v41  ;;  %11944 = vmatprep.subr.mxu0 %v17547_v15  ;;  %v9293_v41 = vld [vmem:[%s17411_s4 + $0x860] sm:$0xff]  ;;  %v9393_v42 = vld [vmem:[%s17411_s4 + $0xb28] sm:$0xff] }
 0x5f4   : > { %12127 = vmatprep.subr.mxu1 %v17547_v15  ;;  %11945 = vmatpush3.msra.mxu0 %v9250_v55  ;;  %v9394_v55 = vld [vmem:[%s17411_s4 + $0xb30] sm:$0xff] }
 0x5f5   : > { %12128 = vmatpush3.msra.mxu1 %v9334_v48  ;;  %12129 = vmatprep.mubr.msk.f32.mxu1 %vm12461_vm2, %v17547_v15  ;;  %v9292_v48 = vld [vmem:[%s17411_s4 + $0x858] sm:$0xff] }
 0x5f6   : > { %11946 = vmatprep.subr.mxu0 %v17547_v15  ;;  %12130 = vmatmul.mubr.msk.f32.vlgmr.msra.gmra.mxu1 %vm4360_vm6, %v7492_v50  ;;  %v9291_v50 = vld [vmem:[%s17411_s4 + $0x850] sm:$0xff] }
 0x5f7   : > { %12151 = vmatprep.subr.mxu1 %v17547_v15  ;;  %11947 = vmatpush3.msra.mxu0 %v9249_v26  ;;  %v9392_v26 = vld [vmem:[%s17411_s4 + $0xb20] sm:$0xff] }
 0x5f8   : > { %12152 = vmatpush3.msra.mxu1 %v9359_v29  ;;  %11948 = vmatprep.subr.mxu0 %v17547_v15  ;;  %v9290_v29 = vld [vmem:[%s17411_s4 + $0x848] sm:$0xff] }
 0x5f9   : > { %12153 = vmatprep.subr.mxu1 %v17547_v15  ;;  %11949 = vmatpush3.msra.mxu0 %v9248_v23 }
 0x5fa   : > { %12154 = vmatpush3.msra.mxu1 %v9358_v24  ;;  %11950 = vmatprep.subr.mxu0 %v17547_v15  ;;  %v9391_v24 = vld [vmem:[%s17411_s4 + $0xb18] sm:$0xff] }
 0x5fb   : > { %12155 = vmatprep.subr.mxu1 %v17547_v15  ;;  %11951 = vmatpush3.msra.mxu0 %v9247_v16 }
 0x5fc   : > { %12156 = vmatpush3.msra.mxu1 %v9357_v60  ;;  %11952 = vmatprep.subr.mxu0 %v17547_v15  ;;  %v9289_v60 = vld [vmem:[%s17411_s4 + $0x840] sm:$0xff] }
 0x5fd   : > { %12157 = vmatprep.subr.mxu1 %v17547_v15  ;;  %11953 = vmatpush3.msra.mxu0 %v9246_v39  ;;  %v5008_v45 = vpop.f32.mrf.mxu0 }
 0x5fe   : > { %12158 = vmatpush3.msra.mxu1 %v9356_v33  ;;  %11954 = vmatprep.subr.mxu0 %v17547_v15  ;;  %v5081_v34 = vadd.f32 %v16408_v27, %v5008_v45  ;;  %v9380_v27 = vld [vmem:[%s17411_s4 + $0xad0] sm:$0xff]  ;;  %v9389_v45 = vld [vmem:[%s17411_s4 + $0xb08] sm:$0xff] }
 0x5ff   : > { %12159 = vmatprep.subr.mxu1 %v17547_v15  ;;  %11955 = vmatpush3.msra.mxu0 %v9245_v4  ;;  %v11542_v22 = vpop.f32.mrf.mxu0  ;;  %v7079_v4 = vrot.slane %v15754_v31, 2  ;;  %v9321_v31 = vld [vmem:[%s17411_s4 + $0x930] sm:$0xff] }
 0x600   : > { %12160 = vmatpush3.msra.mxu1 %v9355_v14  ;;  %11956 = vmatprep.subr.mxu0 %v17547_v15  ;;  %v9322_v14 = vld [vmem:[%s17411_s4 + $0x938] sm:$0xff] }
 0x601   : > { %12161 = vmatprep.subr.mxu1 %v17547_v15  ;;  %11957 = vmatpush3.msra.mxu0 %v9244_v59 }
 0x602   : > { %11958 = vmatprep.mubr.msk.f32.mxu0 %vm12461_vm2, %v17547_v15  ;;  %12162 = vmatpush3.msra.mxu1 %v9354_v5  ;;  %v16779_v10 = vpop.f32.mrf.mxu1  ;;  %v9388_v5 = vld [vmem:[%s17411_s4 + $0xb00] sm:$0xff] }
 0x603   : > { %11959 = vmatmul.mubr.msk.f32.vlgmr.msra.gmra.mxu0 %vm4360_vm6, %v15728_v18  ;;  %11980 = vmatprep.subr.mxu0 %v17547_v15  ;;  %v9295_v18 = vld [vmem:[%s17411_s4 + $0x870] sm:$0xff] }
 0x604   : > { %12163 = vmatprep.subr.mxu1 %v17547_v15  ;;  %11981 = vmatpush3.msra.mxu0 %v9278_v3  ;;  %v11751_v11 = vpop.f32.mrf.mxu1  ;;  %v7988_v3 = vrot.slane %v15912_v2, 4 }
 0x605   : > { %12164 = vmatpush3.msra.mxu1 %v9353_v54  ;;  %11982 = vmatprep.subr.mxu0 %v17547_v15  ;;  %v9320_v54 = vld [vmem:[%s17411_s4 + $0x928] sm:$0xff]  ;;  %v9412_v11 = vld [vmem:[%s17411_s4 + $0xbb0] sm:$0xff] }
 0x606   : > { %12165 = vmatprep.subr.mxu1 %v17547_v15  ;;  %11983 = vmatpush3.msra.mxu0 %v9277_v37  ;;  %v9413_v37 = vld [vmem:[%s17411_s4 + $0xbb8] sm:$0xff] }
 0x607   : > { %12166 = vmatpush3.msra.mxu1 %v9352_v61  ;;  %12167 = vmatprep.mubr.msk.f32.mxu1 %vm12461_vm2, %v17547_v15  ;;  %v9319_v61 = vld [vmem:[%s17411_s4 + $0x920] sm:$0xff] }
 0x608   : > { %11984 = vmatprep.subr.mxu0 %v17547_v15  ;;  %12168 = vmatmul.mubr.msk.f32.vlgmr.msra.gmra.mxu1 %vm4360_vm6, %v7658_v17  ;;  %v9318_v17 = vld [vmem:[%s17411_s4 + $0x918] sm:$0xff] }
 0x609   : > { %12189 = vmatprep.subr.mxu1 %v17547_v15  ;;  %11985 = vmatpush3.msra.mxu0 %v9276_v63  ;;  %v9411_v63 = vld [vmem:[%s17411_s4 + $0xba8] sm:$0xff] }
 0x60a   : > { %12190 = vmatpush3.msra.mxu1 %v9385_v56  ;;  %11986 = vmatprep.subr.mxu0 %v17547_v15  ;;  %v9317_v56 = vld [vmem:[%s17411_s4 + $0x910] sm:$0xff] }
 0x60b   : > { %12191 = vmatprep.subr.mxu1 %v17547_v15  ;;  %11987 = vmatpush3.msra.mxu0 %v9275_v1  ;;  %v9410_v1 = vld [vmem:[%s17411_s4 + $0xba0] sm:$0xff] }
 0x60c   : > { %12192 = vmatpush3.msra.mxu1 %v9384_v44  ;;  %11988 = vmatprep.subr.mxu0 %v17547_v15  ;;  %v9316_v44 = vld [vmem:[%s17411_s4 + $0x908] sm:$0xff] }
 0x60d   : > { %12193 = vmatprep.subr.mxu1 %v17547_v15  ;;  %11989 = vmatpush3.msra.mxu0 %v9274_v9 }
 0x60e   : > { %12194 = vmatpush3.msra.mxu1 %v9383_v7  ;;  %11990 = vmatprep.subr.mxu0 %v17547_v15  ;;  %v9409_v7 = vld [vmem:[%s17411_s4 + $0xb98] sm:$0xff] }
 0x60f   : > { %12195 = vmatprep.subr.mxu1 %v17547_v15  ;;  %11991 = vmatpush3.msra.mxu0 %v9273_v12  ;;  %v5162_v47 = vpop.f32.mrf.mxu0 }
 0x610   : > { %12196 = vmatpush3.msra.mxu1 %v9382_v40  ;;  %11992 = vmatprep.subr.mxu0 %v17547_v15  ;;  %v5166_v28 = vadd.f32 %v5162_v47, %v5081_v34  ;;  %v4919_v40 = vadd.f32 %v16339_v13, %v16689_v0  ;;  %v7255_v0 = vrot.slane %v15824_v57, 2  ;;  %v9332_v47 = vld [vmem:[%s17411_s4 + $0x978] sm:$0xff] }
 0x611   : > { %12197 = vmatprep.subr.mxu1 %v17547_v15  ;;  %11993 = vmatpush3.msra.mxu0 %v9272_v19  ;;  %v11580_v43 = vpop.f32.mrf.mxu0  ;;  %v9315_v19 = vld [vmem:[%s17411_s4 + $0x900] sm:$0xff] }
 0x612   : > { %12198 = vmatpush3.msra.mxu1 %v9381_v53  ;;  %11994 = vmatprep.subr.mxu0 %v17547_v15  ;;  %v5249_v23 = vadd.f32 %v16482_v30, %v5166_v28  ;;  %v9390_v30 = vld [vmem:[%s17411_s4 + $0xb10] sm:$0xff]  ;;  %v9406_v43 = vld [vmem:[%s17411_s4 + $0xb80] sm:$0xff] }
 0x613   : > { %12199 = vmatprep.subr.mxu1 %v17547_v15  ;;  %11995 = vmatpush3.msra.mxu0 %v9271_v62  ;;  %v9407_v62 = vld [vmem:[%s17411_s4 + $0xb88] sm:$0xff] }
 0x614   : > { %11996 = vmatprep.mubr.msk.f32.mxu0 %vm12461_vm2, %v17547_v15  ;;  %12200 = vmatpush3.msra.mxu1 %v9380_v27  ;;  %v16855_v38 = vpop.f32.mrf.mxu1  ;;  %v9331_v27 = vld [vmem:[%s17411_s4 + $0x970] sm:$0xff] }
 0x615   : > { %11997 = vmatmul.mubr.msk.f32.vlgmr.msra.gmra.mxu0 %vm4360_vm6, %v6913_v58  ;;  %12018 = vmatprep.subr.mxu0 %v17547_v15 }
 0x616   : > { %12201 = vmatprep.subr.mxu1 %v17547_v15  ;;  %12019 = vmatpush3.msra.mxu0 %v9296_v21  ;;  %v11789_v20 = vpop.f32.mrf.mxu1  ;;  %v9330_v21 = vld [vmem:[%s17411_s4 + $0x968] sm:$0xff] }
 0x617   : > { %12202 = vmatpush3.msra.mxu1 %v9379_v6  ;;  %12020 = vmatprep.subr.mxu0 %v17547_v15  ;;  %v9431_v6 = vld [vmem:[%s17411_s4 + $0xc38] sm:$0xff] }
 0x618   : > { %12203 = vmatprep.subr.mxu1 %v17547_v15  ;;  %12021 = vmatpush3.msra.mxu0 %v9295_v18  ;;  %v9329_v18 = vld [vmem:[%s17411_s4 + $0x960] sm:$0xff]  ;;  %v9328_v20 = vld [vmem:[%s17411_s4 + $0x958] sm:$0xff] }
 0x619   : > { %12204 = vmatpush3.msra.mxu1 %v9378_v52  ;;  %12205 = vmatprep.mubr.msk.f32.mxu1 %vm12461_vm2, %v17547_v15  ;;  %v9430_v52 = vld [vmem:[%s17411_s4 + $0xc30] sm:$0xff] }
 0x61a   : > { %12022 = vmatprep.subr.mxu0 %v17547_v15  ;;  %12206 = vmatmul.mubr.msk.f32.vlgmr.msra.gmra.mxu1 %vm4360_vm6, %v7834_v25  ;;  %v9429_v25 = vld [vmem:[%s17411_s4 + $0xc28] sm:$0xff] }
 0x61b   : > { %12227 = vmatprep.subr.mxu1 %v17547_v15  ;;  %12023 = vmatpush3.msra.mxu0 %v9294_v35  ;;  %v9327_v35 = vld [vmem:[%s17411_s4 + $0x950] sm:$0xff] }
 0x61c   : > { %12228 = vmatpush3.msra.mxu1 %v9395_v51  ;;  %12024 = vmatprep.subr.mxu0 %v17547_v15  ;;  %v9428_v51 = vld [vmem:[%s17411_s4 + $0xc20] sm:$0xff] }
 0x61d   : > { %12229 = vmatprep.subr.mxu1 %v17547_v15  ;;  %12025 = vmatpush3.msra.mxu0 %v9293_v41  ;;  %v9326_v41 = vld [vmem:[%s17411_s4 + $0x948] sm:$0xff] }
 0x61e   : > { %12230 = vmatpush3.msra.mxu1 %v9394_v55  ;;  %12026 = vmatprep.subr.mxu0 %v17547_v15  ;;  %v9427_v55 = vld [vmem:[%s17411_s4 + $0xc18] sm:$0xff] }
 0x61f   : > { %12231 = vmatprep.subr.mxu1 %v17547_v15  ;;  %12027 = vmatpush3.msra.mxu0 %v9292_v48 }
 0x620   : > { %12232 = vmatpush3.msra.mxu1 %v9393_v42  ;;  %12028 = vmatprep.subr.mxu0 %v17547_v15  ;;  %v9325_v42 = vld [vmem:[%s17411_s4 + $0x940] sm:$0xff] }
 0x621   : > { %12233 = vmatprep.subr.mxu1 %v17547_v15  ;;  %12029 = vmatpush3.msra.mxu0 %v9291_v50  ;;  %v5328_v16 = vpop.f32.mrf.mxu0  ;;  %v9426_v50 = vld [vmem:[%s17411_s4 + $0xc10] sm:$0xff] }
 0x622   : > { %12234 = vmatpush3.msra.mxu1 %v9392_v26  ;;  %12030 = vmatprep.subr.mxu0 %v17547_v15  ;;  %v5332_v39 = vadd.f32 %v5328_v16, %v5249_v23  ;;  %v9350_v23 = vld [vmem:[%s17411_s4 + $0x9f8] sm:$0xff] }
 0x623   : > { %12235 = vmatprep.subr.mxu1 %v17547_v15  ;;  %12031 = vmatpush3.msra.mxu0 %v9290_v29  ;;  %v11618_v33 = vpop.f32.mrf.mxu0  ;;  %v7409_v29 = vrot.slane %v15824_v57, 4  ;;  %v9349_v57 = vld [vmem:[%s17411_s4 + $0x9f0] sm:$0xff] }
 0x624   : > { %12236 = vmatpush3.msra.mxu1 %v9391_v24  ;;  %12032 = vmatprep.subr.mxu0 %v17547_v15  ;;  %v5415_v9 = vadd.f32 %v16556_v46, %v5332_v39  ;;  %v9408_v46 = vld [vmem:[%s17411_s4 + $0xb90] sm:$0xff]  ;;  %v9425_v24 = vld [vmem:[%s17411_s4 + $0xc08] sm:$0xff] }
 0x625   : > { %12237 = vmatprep.subr.mxu1 %v17547_v15  ;;  %12033 = vmatpush3.msra.mxu0 %v9289_v60  ;;  %v9424_v60 = vld [vmem:[%s17411_s4 + $0xc00] sm:$0xff]  ;;  %v9348_v33 = vld [vmem:[%s17411_s4 + $0x9e8] sm:$0xff] }
 0x626   : > { %12034 = vmatprep.mubr.msk.f32.mxu0 %vm12461_vm2, %v17547_v15  ;;  %12238 = vmatpush3.msra.mxu1 %v9390_v30  ;;  %v16930_v59 = vpop.f32.mrf.mxu1  ;;  %v8320_v30 = vrot.slane %v15933_v8, 4 }
 0x627   : > { %12035 = vmatmul.mubr.msk.f32.vlgmr.msra.gmra.mxu0 %vm4360_vm6, %v7079_v4  ;;  %12056 = vmatprep.subr.mxu0 %v17547_v15  ;;  %v9347_v4 = vld [vmem:[%s17411_s4 + $0x9e0] sm:$0xff] }
 0x628   : > { %12239 = vmatprep.subr.mxu1 %v17547_v15  ;;  %12057 = vmatpush3.msra.mxu0 %v9322_v14  ;;  %v11827_v22 = vpop.f32.mrf.mxu1  ;;  %v9346_v14 = vld [vmem:[%s17411_s4 + $0x9d8] sm:$0xff] }
 0x629   : > { %12240 = vmatpush3.msra.mxu1 %v9389_v45  ;;  %12058 = vmatprep.subr.mxu0 %v17547_v15 }
 0x62a   : > { %12241 = vmatprep.subr.mxu1 %v17547_v15  ;;  %12059 = vmatpush3.msra.mxu0 %v9321_v31  ;;  %v9345_v31 = vld [vmem:[%s17411_s4 + $0x9d0] sm:$0xff] }
 0x62b   : > { %12242 = vmatpush3.msra.mxu1 %v9388_v5  ;;  %12243 = vmatprep.mubr.msk.f32.mxu1 %vm12461_vm2, %v17547_v15  ;;  %v9344_v5 = vld [vmem:[%s17411_s4 + $0x9c8] sm:$0xff] }
 0x62c   : > { %12060 = vmatprep.subr.mxu0 %v17547_v15  ;;  %12244 = vmatmul.mubr.msk.f32.vlgmr.msra.gmra.mxu1 %vm4360_vm6, %v7988_v3 }
 0x62d   : > { %12265 = vmatprep.subr.mxu1 %v17547_v15  ;;  %12061 = vmatpush3.msra.mxu0 %v9320_v54 }
 0x62e   : > { %12266 = vmatpush3.msra.mxu1 %v9413_v37  ;;  %12062 = vmatprep.subr.mxu0 %v17547_v15 }
 0x62f   : > { %12267 = vmatprep.subr.mxu1 %v17547_v15  ;;  %12063 = vmatpush3.msra.mxu0 %v9319_v61  ;;  %v9368_v61 = vld [vmem:[%s17411_s4 + $0xa78] sm:$0xff] }
 0x630   : > { %12268 = vmatpush3.msra.mxu1 %v9412_v11  ;;  %12064 = vmatprep.subr.mxu0 %v17547_v15 }
 0x631   : > { %12269 = vmatprep.subr.mxu1 %v17547_v15  ;;  %12065 = vmatpush3.msra.mxu0 %v9318_v17  ;;  %v9366_v17 = vld [vmem:[%s17411_s4 + $0xa68] sm:$0xff] }
 0x632   : > { %12270 = vmatpush3.msra.mxu1 %v9411_v63  ;;  %12066 = vmatprep.subr.mxu0 %v17547_v15 }
 0x633   : > { %12271 = vmatprep.subr.mxu1 %v17547_v15  ;;  %12067 = vmatpush3.msra.mxu0 %v9317_v56  ;;  %v5494_v12 = vpop.f32.mrf.mxu0  ;;  %v9365_v56 = vld [vmem:[%s17411_s4 + $0xa60] sm:$0xff] }
 0x634   : > { %12272 = vmatpush3.msra.mxu1 %v9410_v1  ;;  %12068 = vmatprep.subr.mxu0 %v17547_v15  ;;  %v5498_v34 = vadd.f32 %v5494_v12, %v5415_v9  ;;  %v9364_v1 = vld [vmem:[%s17411_s4 + $0xa58] sm:$0xff]  ;;  %v9362_v9 = vld [vmem:[%s17411_s4 + $0xa48] sm:$0xff] }
 0x635   : > { %12273 = vmatprep.subr.mxu1 %v17547_v15  ;;  %12069 = vmatpush3.msra.mxu0 %v9316_v44  ;;  %v11656_v53 = vpop.f32.mrf.mxu0  ;;  %v9363_v44 = vld [vmem:[%s17411_s4 + $0xa50] sm:$0xff] }
 0x636   : > { %12274 = vmatpush3.msra.mxu1 %v9409_v7  ;;  %12070 = vmatprep.subr.mxu0 %v17547_v15  ;;  %v16997_v13 = vadd.f32 %v5498_v34, %v4919_v40  ;;  %v9361_v7 = vld [vmem:[%s17411_s4 + $0xa40] sm:$0xff]  ;;  %v9377_v34 = vld [vmem:[%s17411_s4 + $0xab8] sm:$0xff] }
 0x637   : > { %12275 = vmatprep.subr.mxu1 %v17547_v15  ;;  %12071 = vmatpush3.msra.mxu0 %v9315_v19  ;;  %v7741_v19 = vrot.slane %v15850_v32, 4 }
 0x638   : > { %12072 = vmatprep.mubr.msk.f32.mxu0 %vm12461_vm2, %v17547_v15  ;;  %12276 = vmatpush3.msra.mxu1 %v9408_v46  ;;  %v17009_v28 = vpop.f32.mrf.mxu1 }
 0x639   : > { %12073 = vmatmul.mubr.msk.f32.vlgmr.msra.gmra.mxu0 %vm4360_vm6, %v7255_v0  ;;  %12094 = vmatprep.subr.mxu0 %v17547_v15 }
 0x63a   : > { %12277 = vmatprep.subr.mxu1 %v17547_v15  ;;  %12095 = vmatpush3.msra.mxu0 %v9332_v47  ;;  %v11865_v58 = vpop.f32.mrf.mxu1  ;;  %v9374_v47 = vld [vmem:[%s17411_s4 + $0xaa0] sm:$0xff] }
 0x63b   : > { %12278 = vmatpush3.msra.mxu1 %v9407_v62  ;;  %12096 = vmatprep.subr.mxu0 %v17547_v15  ;;  %v9371_v58 = vld [vmem:[%s17411_s4 + $0xa88] sm:$0xff] }
 0x63c   : > { %12279 = vmatprep.subr.mxu1 %v17547_v15  ;;  %12097 = vmatpush3.msra.mxu0 %v9331_v27  ;;  %v9373_v27 = vld [vmem:[%s17411_s4 + $0xa98] sm:$0xff] }
 0x63d   : > { %12280 = vmatpush3.msra.mxu1 %v9406_v43  ;;  %12281 = vmatprep.mubr.msk.f32.mxu1 %vm12461_vm2, %v17547_v15  ;;  %v9372_v43 = vld [vmem:[%s17411_s4 + $0xa90] sm:$0xff] }
 0x63e   : > { %12098 = vmatprep.subr.mxu0 %v17547_v15  ;;  %12282 = vmatmul.mubr.msk.f32.vlgmr.msra.gmra.mxu1 %vm4360_vm6, %v15933_v8 }
 0x63f   : > { %12303 = vmatprep.subr.mxu1 %v17547_v15  ;;  %12099 = vmatpush3.msra.mxu0 %v9330_v21  ;;  %v9370_v21 = vld [vmem:[%s17411_s4 + $0xa80] sm:$0xff] }
 0x640   : > { %12304 = vmatpush3.msra.mxu1 %v9431_v6  ;;  %12100 = vmatprep.subr.mxu0 %v17547_v15  ;;  %v9404_v6 = vld [vmem:[%s17411_s4 + $0xb78] sm:$0xff] }
 0x641   : > { %12305 = vmatprep.subr.mxu1 %v17547_v15  ;;  %12101 = vmatpush3.msra.mxu0 %v9329_v18 }
 0x642   : > { %12306 = vmatpush3.msra.mxu1 %v9430_v52  ;;  %12102 = vmatprep.subr.mxu0 %v17547_v15  ;;  %v9403_v52 = vld [vmem:[%s17411_s4 + $0xb70] sm:$0xff] }
 0x643   : > { %12307 = vmatprep.subr.mxu1 %v17547_v15  ;;  %12103 = vmatpush3.msra.mxu0 %v9328_v20 }
 0x644   : > { %12308 = vmatpush3.msra.mxu1 %v9429_v25  ;;  %12104 = vmatprep.subr.mxu0 %v17547_v15  ;;  %v9402_v25 = vld [vmem:[%s17411_s4 + $0xb68] sm:$0xff] }
 0x645   : > { %12309 = vmatprep.subr.mxu1 %v17547_v15  ;;  %12105 = vmatpush3.msra.mxu0 %v9327_v35  ;;  %v5659_v48 = vpop.f32.mrf.mxu0  ;;  %v9401_v35 = vld [vmem:[%s17411_s4 + $0xb60] sm:$0xff] }
 0x646   : > { %12310 = vmatpush3.msra.mxu1 %v9428_v51  ;;  %12106 = vmatprep.subr.mxu0 %v17547_v15  ;;  %v5660_v45 = vadd.f32 %v5659_v48, %v16629_v36  ;;  %v9343_v36 = vld [vmem:[%s17411_s4 + $0x9c0] sm:$0xff]  ;;  %v9399_v48 = vld [vmem:[%s17411_s4 + $0xb50] sm:$0xff] }
 0x647   : > { %12311 = vmatprep.subr.mxu1 %v17547_v15  ;;  %12107 = vmatpush3.msra.mxu0 %v9326_v41  ;;  %v11694_v26 = vpop.f32.mrf.mxu0  ;;  %v9400_v41 = vld [vmem:[%s17411_s4 + $0xb58] sm:$0xff] }
 0x648   : > { %12312 = vmatpush3.msra.mxu1 %v9427_v55  ;;  %12108 = vmatprep.subr.mxu0 %v17547_v15  ;;  %v5745_v22 = vadd.f32 %v16706_v49, %v5660_v45  ;;  %v9367_v49 = vld [vmem:[%s17411_s4 + $0xa70] sm:$0xff]  ;;  %v8071_v26 = vrot.slane %v15912_v2, 6  ;;  %v9416_v45 = vld [vmem:[%s17411_s4 + $0xbc8] sm:$0xff] }
 0x649   : > { %12313 = vmatprep.subr.mxu1 %v17547_v15  ;;  %12109 = vmatpush3.msra.mxu0 %v9325_v42  ;;  %v9398_v42 = vld [vmem:[%s17411_s4 + $0xb48] sm:$0xff] }
 0x64a   : > { %12110 = vmatprep.mubr.msk.f32.mxu0 %vm12461_vm2, %v17547_v15  ;;  %12314 = vmatpush3.msra.mxu1 %v9426_v50  ;;  %v17083_v16 = vpop.f32.mrf.mxu1  ;;  %v9397_v50 = vld [vmem:[%s17411_s4 + $0xb40] sm:$0xff] }
 0x64b   : > { %12111 = vmatmul.mubr.msk.f32.vlgmr.msra.gmra.mxu0 %vm4360_vm6, %v7409_v29  ;;  %12132 = vmatprep.subr.mxu0 %v17547_v15  ;;  %v9422_v29 = vld [vmem:[%s17411_s4 + $0xbf8] sm:$0xff] }
 0x64c   : > { %12315 = vmatprep.subr.mxu1 %v17547_v15  ;;  %12133 = vmatpush3.msra.mxu0 %v9350_v23  ;;  %v11903_v39 = vpop.f32.mrf.mxu1 }
 0x64d   : > { %12316 = vmatpush3.msra.mxu1 %v9425_v24  ;;  %12134 = vmatprep.subr.mxu0 %v17547_v15  ;;  %v9421_v24 = vld [vmem:[%s17411_s4 + $0xbf0] sm:$0xff]  ;;  %v9419_v39 = vld [vmem:[%s17411_s4 + $0xbe0] sm:$0xff] }
 0x64e   : > { %12317 = vmatprep.subr.mxu1 %v17547_v15  ;;  %12135 = vmatpush3.msra.mxu0 %v9349_v57  ;;  %v9420_v57 = vld [vmem:[%s17411_s4 + $0xbe8] sm:$0xff] }
 0x64f   : > { %12318 = vmatpush3.msra.mxu1 %v9424_v60  ;;  %12319 = vmatprep.mubr.msk.f32.mxu1 %vm12461_vm2, %v17547_v15 }
 0x650   : > { %12136 = vmatprep.subr.mxu0 %v17547_v15  ;;  %12320 = vmatmul.mubr.msk.f32.vlgmr.msra.gmra.mxu1 %vm4360_vm6, %v8320_v30  ;;  %v9418_v30 = vld [vmem:[%s17411_s4 + $0xbd8] sm:$0xff] }
 0x651   : > { %12137 = vmatpush3.msra.mxu0 %v9348_v33  ;;  %12148 = vmatprep.mubr.msk.f32.mxu0 %vm12461_vm2, %v17547_v15 }
 0x652   : > { %12138 = vmatprep.subr.mxu0 %v17547_v15 }
 0x653   : > { %12139 = vmatpush3.msra.mxu0 %v9347_v4  ;;  %v9417_v4 = vld [vmem:[%s17411_s4 + $0xbd0] sm:$0xff] }
 0x654   : > { %12140 = vmatprep.subr.mxu0 %v17547_v15 }
 0x655   : > { %12141 = vmatpush3.msra.mxu0 %v9346_v14 }
 0x656   : > { %12142 = vmatprep.subr.mxu0 %v17547_v15 }
 0x657   : > { %12143 = vmatpush3.msra.mxu0 %v9345_v31  ;;  %v5824_v3 = vpop.f32.mrf.mxu0  ;;  %v9415_v31 = vld [vmem:[%s17411_s4 + $0xbc0] sm:$0xff] }
 0x658   : > { %12144 = vmatprep.subr.mxu0 %v17547_v15  ;;  %v5828_v54 = vadd.f32 %v5824_v3, %v5745_v22 }
 0x659   : > { %12145 = vmatpush3.msra.mxu0 %v9344_v5  ;;  %v11732_v37 = vpop.f32.mrf.mxu0  ;;  %v8237_v5 = vrot.slane %v15933_v8, 2 }
 0x65a   : > { %12146 = vmatprep.subr.mxu0 %v17547_v15  ;;  %v5911_v12 = vadd.f32 %v16779_v10, %v5828_v54  ;;  %v9376_v10 = vld [vmem:[%s17411_s4 + $0xab0] sm:$0xff] }
 0x65b   : > { %12147 = vmatpush3.msra.mxu0 %v9343_v36 }
 0x65c   : > { %12149 = vmatmul.mubr.msk.f32.vlgmr.msra.gmra.mxu0 %vm4360_vm6, %v15850_v32  ;;  %12170 = vmatprep.subr.mxu0 %v17547_v15  ;;  %v17137_v11 = vpop.f32.mrf.mxu1  ;;  %v9375_v32 = vld [vmem:[%s17411_s4 + $0xaa8] sm:$0xff] }
 0x65d   : > { %12171 = vmatpush3.msra.mxu0 %v9368_v61  ;;  %12186 = vmatprep.mubr.msk.f32.mxu0 %vm12461_vm2, %v17547_v15 }
 0x65e   : > { %12172 = vmatprep.subr.mxu0 %v17547_v15  ;;  %v11941_v63 = vpop.f32.mrf.mxu1 }
 0x65f   : > { %12173 = vmatpush3.msra.mxu0 %v9367_v49 }
 0x660   : > { %12174 = vmatprep.subr.mxu0 %v17547_v15 }
 0x661   : > { %12175 = vmatpush3.msra.mxu0 %v9366_v17 }
 0x662   : > { %12176 = vmatprep.subr.mxu0 %v17547_v15 }
 0x663   : > { %12177 = vmatpush3.msra.mxu0 %v9365_v56 }
 0x664   : > { %12178 = vmatprep.subr.mxu0 %v17547_v15 }
 0x665   : > { %12179 = vmatpush3.msra.mxu0 %v9364_v1 }
 0x666   : > { %12180 = vmatprep.subr.mxu0 %v17547_v15 }
 0x667   : > { %12181 = vmatpush3.msra.mxu0 %v9363_v44 }
 0x668   : > { %12182 = vmatprep.subr.mxu0 %v17547_v15 }
 0x669   : > { %12183 = vmatpush3.msra.mxu0 %v9362_v9  ;;  %v5990_v40 = vpop.f32.mrf.mxu0 }
 0x66a   : > { %12184 = vmatprep.subr.mxu0 %v17547_v15  ;;  %v17171_v46 = vadd.f32 %v5990_v40, %v5911_v12 }
 0x66b   : > { %12185 = vmatpush3.msra.mxu0 %v9361_v7  ;;  %v11770_v53 = vpop.f32.mrf.mxu0 }
 0x66c   : > { %12187 = vmatmul.mubr.msk.f32.vlgmr.msra.gmra.mxu0 %vm4360_vm6, %v7741_v19  ;;  %12208 = vmatprep.subr.mxu0 %v17547_v15  ;;  %v6077_v17 = vadd.f32 %v16855_v38, %v17171_v46  ;;  %v8413_v38 = vld [vmem:[%s17413_s6 + $0x58] sm:$0xff]  ;;  %v8411_v46 = vld [vmem:[%s17413_s6 + $0x48] sm:$0xff]  ;;  %v8410_v53 = vld [vmem:[%s17413_s6 + $0x40] sm:$0xff] }
 0x66d   : > { %12209 = vmatpush3.msra.mxu0 %v9377_v34  ;;  %12224 = vmatprep.mubr.msk.f32.mxu0 %vm12461_vm2, %v17547_v15 }
 0x66e   : > { %12210 = vmatprep.subr.mxu0 %v17547_v15  ;;  %v17184_v0 = vpop.f32.mrf.mxu1 }
 0x66f   : > { %12211 = vmatpush3.msra.mxu0 %v9376_v10 }
 0x670   : > { %12212 = vmatprep.subr.mxu0 %v17547_v15  ;;  %v11979_v62 = vpop.f32.mrf.mxu1 }
 0x671   : > { %12213 = vmatpush3.msra.mxu0 %v9375_v32 }
 0x672   : > { %12214 = vmatprep.subr.mxu0 %v17547_v15 }
 0x673   : > { %12215 = vmatpush3.msra.mxu0 %v9374_v47 }
 0x674   : > { %12216 = vmatprep.subr.mxu0 %v17547_v15 }
 0x675   : > { %12217 = vmatpush3.msra.mxu0 %v9373_v27  ;;  %v8408_v27 = vld [vmem:[%s17413_s6 + $0x30] sm:$0xff] }
 0x676   : > { %12218 = vmatprep.subr.mxu0 %v17547_v15 }
 0x677   : > { %12219 = vmatpush3.msra.mxu0 %v9372_v43  ;;  %v8407_v43 = vld [vmem:[%s17413_s6 + $0x28] sm:$0xff] }
 0x678   : > { %12220 = vmatprep.subr.mxu0 %v17547_v15 }
 0x679   : > { %12221 = vmatpush3.msra.mxu0 %v9371_v58 }
 0x67a   : > { %12222 = vmatprep.subr.mxu0 %v17547_v15 }
 0x67b   : > { %12223 = vmatpush3.msra.mxu0 %v9370_v21  ;;  %v6166_v18 = vpop.f32.mrf.mxu0  ;;  %v8406_v21 = vld [vmem:[%s17413_s6 + $0x20] sm:$0xff] }
 0x67c   : > { %12225 = vmatmul.mubr.msk.f32.vlgmr.msra.gmra.mxu0 %vm4360_vm6, %v15912_v2  ;;  %12246 = vmatprep.subr.mxu0 %v17547_v15  ;;  %v6239_v23 = vadd.f32 %v16930_v59, %v6166_v18  ;;  %v8404_v18 = vld [vmem:[%s17413_s6 + $0x10] sm:$0xff] }
 0x67d   : > { %12247 = vmatpush3.msra.mxu0 %v9404_v6  ;;  %12262 = vmatprep.mubr.msk.f32.mxu0 %vm12461_vm2, %v17547_v15  ;;  %v11808_v20 = vpop.f32.mrf.mxu0  ;;  %v8405_v6 = vld [vmem:[%s17413_s6 + $0x18] sm:$0xff] }
 0x67e   : > { %12248 = vmatprep.subr.mxu0 %v17547_v15  ;;  %v8402_v20 = vld [vmem:[%s17413_s6] sm:$0xff] }
 0x67f   : > { %12249 = vmatpush3.msra.mxu0 %v9403_v52  ;;  %v8403_v52 = vld [vmem:[%s17413_s6 + $0x8] sm:$0xff] }
 0x680   : > { %12250 = vmatprep.subr.mxu0 %v17547_v15  ;;  %v17226_v51 = vpop.f32.mrf.mxu1 }
 0x681   : > { %12251 = vmatpush3.msra.mxu0 %v9402_v25 }
 0x682   : > { %12252 = vmatprep.subr.mxu0 %v17547_v15  ;;  %v12017_v55 = vpop.f32.mrf.mxu1 }
 0x683   : > { %12253 = vmatpush3.msra.mxu0 %v9401_v35 }
 0x684   : > { %12254 = vmatprep.subr.mxu0 %v17547_v15 }
 0x685   : > { %12255 = vmatpush3.msra.mxu0 %v9400_v41 }
 0x686   : > { %12256 = vmatprep.subr.mxu0 %v17547_v15 }
 0x687   : > { %12257 = vmatpush3.msra.mxu0 %v9399_v48 }
 0x688   : > { %12258 = vmatprep.subr.mxu0 %v17547_v15 }
 0x689   : > { %12259 = vmatpush3.msra.mxu0 %v9398_v42 }
 0x68a   : > { %12260 = vmatprep.subr.mxu0 %v17547_v15 }
 0x68b   : > { %12261 = vmatpush3.msra.mxu0 %v9397_v50 }
 0x68c   : > { %12263 = vmatmul.mubr.msk.f32.vlgmr.msra.gmra.mxu0 %vm4360_vm6, %v8071_v26  ;;  %12284 = vmatprep.subr.mxu0 %v17547_v15 }
 0x68d   : > { %12285 = vmatpush3.msra.mxu0 %v9422_v29  ;;  %12300 = vmatprep.mubr.msk.f32.mxu0 %vm12461_vm2, %v17547_v15  ;;  %v6320_v2 = vpop.f32.mrf.mxu0 }
 0x68e   : > { %12286 = vmatprep.subr.mxu0 %v17547_v15  ;;  %v6324_v59 = vadd.f32 %v6320_v2, %v6239_v23 }
 0x68f   : > { %12287 = vmatpush3.msra.mxu0 %v9421_v24  ;;  %v11846_v60 = vpop.f32.mrf.mxu0 }
 0x690   : > { %12288 = vmatprep.subr.mxu0 %v17547_v15  ;;  %v6407_v22 = vadd.f32 %v17009_v28, %v6324_v59 }
 0x691   : > { %12289 = vmatpush3.msra.mxu0 %v9420_v57 }
 0x692   : > { %12290 = vmatprep.subr.mxu0 %v17547_v15  ;;  %v17269_v33 = vpop.f32.mrf.mxu1 }
 0x693   : > { %12291 = vmatpush3.msra.mxu0 %v9419_v39 }
 0x694   : > { %12292 = vmatprep.subr.mxu0 %v17547_v15  ;;  %v12055_v14 = vpop.f32.mrf.mxu1 }
 0x695   : > { %12293 = vmatpush3.msra.mxu0 %v9418_v30 }
 0x696   : > { %12294 = vmatprep.subr.mxu0 %v17547_v15 }
 0x697   : > { %12295 = vmatpush3.msra.mxu0 %v9417_v4 }
 0x698   : > { %12296 = vmatprep.subr.mxu0 %v17547_v15 }
 0x699   : > { %12297 = vmatpush3.msra.mxu0 %v9416_v45 }
 0x69a   : > { %12298 = vmatprep.subr.mxu0 %v17547_v15 }
 0x69b   : > { %12299 = vmatpush3.msra.mxu0 %v9415_v31 }
 0x69c   : > { %12301 = vmatmul.mubr.msk.f32.vlgmr.msra.gmra.mxu0 %vm4360_vm6, %v8237_v5  ;;  %12322 = vmatprep.subr.mxu0 %v17547_v15 }
 0x69d   : > { %12348 = vmatprep.mubr.msk.f32.mxu0 %vm12461_vm2, %v17547_v15 }
 0x69f   : > { %v6486_v3 = vpop.f32.mrf.mxu0 }
 0x6a0   : > { %v6490_v36 = vadd.f32 %v6486_v3, %v6407_v22 }
 0x6a1   : > { %v11884_v54 = vpop.f32.mrf.mxu0 }
 0x6a2   : > { %v6573_v8 = vadd.f32 %v17083_v16, %v6490_v36  ;;  %v8414_v16 = vld [vmem:[%s17413_s6 + $0x60] sm:$0xf] }
 0x6a3   : > { %12323 = vmatpush3.msk.msra.mxu0 %vm8420_vm7, %v8414_v16 }
 0x6a4   : > { %v17290_v37 = vpop.f32.mrf.mxu1  ;;  %12324 = vmatprep.subr.mxu0 %v17547_v15 }
 0x6a5   : > { %12325 = vmatpush3.msra.mxu0 %v8413_v38 }
 0x6a6   : > { %v12093_v61 = vpop.f32.mrf.mxu1  ;;  %12326 = vmatprep.subr.mxu0 %v17547_v15 }
 0x6b1   : > { %v6652_v49 = vpop.f32.mrf.mxu0 }
 0x6b2   : > { %v6656_v63 = vadd.f32 %v6652_v49, %v6573_v8 }
 0x6b3   : > { %v11922_v56 = vpop.f32.mrf.mxu0 }
 0x6b4   : > { %v8396_v1 = vadd.f32 %v6656_v63, %v6077_v17 }
 0x6b6   : > { %v17296_v44 = vadd.f32 %v8396_v1, %v16997_v13  ;;  %v17298_v9 = vpop.f32.mrf.mxu1  ;;  %v8412_v13 = vld [vmem:[%s17413_s6 + $0x50] sm:$0xff] }
 0x6b7   : > { %12327 = vmatpush3.msra.mxu0 %v8412_v13 }
 0x6b8   : > { %v12131_v28 = vpop.f32.mrf.mxu1  ;;  %12328 = vmatprep.subr.mxu0 %v17547_v15 }
 0x6b9   : > { %12329 = vmatpush3.msra.mxu0 %v8411_v46 }
 0x6ba   : > { %12330 = vmatprep.subr.mxu0 %v17547_v15 }
 0x6bb   : > { %12331 = vmatpush3.msra.mxu0 %v8410_v53 }
 0x6bc   : > { %12332 = vmatprep.subr.mxu0 %v17547_v15 }
 0x6c3   : > { %v6817_v7 = vpop.f32.mrf.mxu0 }
 0x6c4   : > { %v6818_v34 = vadd.f32 %v6817_v7, %v17137_v11  ;;  %v8409_v11 = vld [vmem:[%s17413_s6 + $0x38] sm:$0xff] }
 0x6c5   : > { %v11960_v12 = vpop.f32.mrf.mxu0  ;;  %12333 = vmatpush3.msra.mxu0 %v8409_v11 }
 0x6c6   : > { %v6903_v10 = vadd.f32 %v17184_v0, %v6818_v34  ;;  %12334 = vmatprep.subr.mxu0 %v17547_v15 }
 0x6c7   : > { %12335 = vmatpush3.msra.mxu0 %v8408_v27 }
 0x6c8   : > { %v17300_v40 = vpop.f32.mrf.mxu1  ;;  %12336 = vmatprep.subr.mxu0 %v17547_v15 }
 0x6c9   : > { %12337 = vmatpush3.msra.mxu0 %v8407_v43 }
 0x6ca   : > { %v12169_v19 = vpop.f32.mrf.mxu1  ;;  %12338 = vmatprep.subr.mxu0 %v17547_v15 }
 0x6cb   : > { %12339 = vmatpush3.msra.mxu0 %v8406_v21  ;;  %v8415_v19 = vld [vmem:[%s17414_s7] sm:$0x1] }
 0x6cc   : > { %12340 = vmatprep.subr.mxu0 %v17547_v15 }
 0x6cd   : > { %12341 = vmatpush3.msra.mxu0 %v8405_v6 }
 0x6ce   : > { %12342 = vmatprep.subr.mxu0 %v17547_v15 }
 0x6cf   : > { %12343 = vmatpush3.msra.mxu0 %v8404_v18 }
 0x6d0   : > { %12344 = vmatprep.subr.mxu0 %v17547_v15 }
 0x6d1   : > { %12345 = vmatpush3.msra.mxu0 %v8403_v52 }
 0x6d2   : > { %12346 = vmatprep.subr.mxu0 %v17547_v15 }
 0x6d3   : > { %12347 = vmatpush3.msra.mxu0 %v8402_v20 }
 0x6d5   : > { %v6982_v32 = vpop.f32.mrf.mxu0 }
 0x6d6   : > { %v6986_v47 = vadd.f32 %v6982_v32, %v6903_v10 }
 0x6d7   : > { %v11998_v62 = vpop.f32.mrf.mxu0 }
 0x6d8   : > { %v7069_v25 = vadd.f32 %v17226_v51, %v6986_v47 }
 0x6da   : > { %v7903_v0 = vpop.f32.mrf.mxu1 }
 0x6dc   : > { %v12207_v58 = vpop.f32.mrf.mxu1 }
 0x6e7   : > { %v7148_v35 = vpop.f32.mrf.mxu0 }
 0x6e8   : > { %v7152_v41 = vadd.f32 %v7148_v35, %v7069_v25 }
 0x6e9   : > { %v12036_v55 = vpop.f32.mrf.mxu0 }
 0x6ea   : > { %v7235_v31 = vadd.f32 %v17269_v33, %v7152_v41  ;;  %v8394_v33 = vld [vmem:[%s17412_s5] sm:$0x1] }
 0x6ec   : > { %v8057_v48 = vpop.f32.mrf.mxu1 }
 0x6ee   : > { %v12245_v42 = vpop.f32.mrf.mxu1 }
 0x6f9   : > { %v7324_v50 = vpop.f32.mrf.mxu0 }
 0x6fa   : > { %v7397_v24 = vadd.f32 %v17290_v37, %v7324_v50 }
 0x6fb   : > { %v12074_v26 = vpop.f32.mrf.mxu0 }
 0x6fe   : > { %v8223_v29 = vpop.f32.mrf.mxu1 }
 0x700   : > { %v12283_v23 = vpop.f32.mrf.mxu1 }
 0x70b   : > { %v7478_v2 = vpop.f32.mrf.mxu0 }
 0x70c   : > { %v7482_v15 = vadd.f32 %v7478_v2, %v7397_v24 }
 0x70d   : > { %v12112_v57 = vpop.f32.mrf.mxu0 }
 0x70e   : > { %v7565_v51 = vadd.f32 %v17298_v9, %v7482_v15 }
 0x710   : > { %v8389_v59 = vpop.f32.mrf.mxu1 }
 0x712   : > { %v12321_v60 = vpop.f32.mrf.mxu1 }
 0x71c   : > { %v7644_v39 = vpop.f32.mrf.mxu0 }
 0x71d   : > { %v7648_v4 = vadd.f32 %v7644_v39, %v7565_v51 }
 0x71e   : > { %v12150_v30 = vpop.f32.mrf.mxu0 }
 0x71f   : > { %v7731_v14 = vadd.f32 %v17300_v40, %v7648_v4 }
 0x72c   : > { %v7810_v45 = vpop.f32.mrf.mxu0 }
 0x72d   : > { %v7814_v5 = vadd.f32 %v7810_v45, %v7731_v14 }
 0x72e   : > { %v12188_v22 = vpop.f32.mrf.mxu0 }
 0x72f   : > { %v8398_v3 = vadd.f32 %v7814_v5, %v7235_v31 }
 0x73c   : > { %v7975_v36 = vpop.f32.mrf.mxu0 }
 0x73d   : > { %v7976_v8 = vadd.f32 %v7975_v36, %v7903_v0 }
 0x73e   : > { %v12226_v54 = vpop.f32.mrf.mxu0 }
 0x73f   : > { %v8061_v49 = vadd.f32 %v8057_v48, %v7976_v8 }
 0x74c   : > { %v8140_v37 = vpop.f32.mrf.mxu0 }
 0x74d   : > { %v8144_v17 = vadd.f32 %v8140_v37, %v8061_v49 }
 0x74e   : > { %v12264_v61 = vpop.f32.mrf.mxu0 }
 0x74f   : > { %v8227_v63 = vadd.f32 %v8223_v29, %v8144_v17 }
 0x75c   : > { %v8306_v56 = vpop.f32.mrf.mxu0 }
 0x75d   : > { %v8310_v1 = vadd.f32 %v8306_v56, %v8227_v63 }
 0x75e   : > { %v12302_v9 = vpop.f32.mrf.mxu0 }
 0x75f   : > { %v8393_v28 = vadd.f32 %v8389_v59, %v8310_v1 }
 0x761   : > { %v8399_v7 = vadd.f32 %v8398_v3, %v8393_v28 }
 0x763   : > { %v8400_v12 = vadd.f32 %v8399_v7, %v17296_v44 }
 0x765   : > { %v8401_v40 = vadd.f32 %v8400_v12, %v8394_v33 }
 0x767   : > { %12349 = vmatmul.mubr.msk.f32.vlgmr.msra.gmra.mxu0 %vm8416_vm8, %v8401_v40 }
 0x827   : > { %v8490_v16 = vpop.f32.mrf.mxu0 }
 0x828   : > { %v8491_v38 = vadd.f32 %v8490_v16, %v8415_v19 }
 0x829   : > { %v12350_v44 = vpop.f32.mrf.mxu0 }
 0x82a   : > { %8495 = vst.msk [vmem:[%s297_s21] sm:$0x1] %vm8494_vm9, %v8491_v38 }
 0x82b   : > { %12411 = shalt.err (!%p12408_p3)
}
 0x82c   : > { %s12412_s18 = scalar_lea.hbm %s17372_s25, 16  ;;  %s12416_s20 = scalar_lea.hbm %s17415_s8, 32 }
 0x82d   : > { %p12413_p4 = scmp.ne.s32.totalorder %s17372_s25, %s12412_s18  ;;  %p12417_p9 = scmp.lt.s32.totalorder %s17372_s25, %s17415_s8 }
 0x82e   : > { %p12418_p10 = scmp.lt.s32.totalorder %s12416_s20, %s12412_s18 }
 0x82f   : > { %p12414_p7 = pnand %p12413_p4, %p12546_p5 }
 0x830   : > { %p12419_p11 = por %p12418_p10, %p12417_p9 }
 0x831   : > { %p12415_p8 = pneg %p12414_p7 }
 0x833   : > { %p12420_p12 = pnand %p12419_p11, %p12415_p8 }
 0x835   : > { %12423 = shalt.err (!%p12420_p12)
}
 0x836   : > { %12356 = dma.vmem_to_hbm [thread:$0]  (%p12546_p5), %s8510_s22, 16, %s17372_s25, %s8497_s26  }
 0x837 PF: > { %p12362_p13 = scmp.ge.s32.totalorder %s12458_s30, 2  ;;  %s8521_s24 = sand.u32 1, %s12446_s27  }
 0x838   : > { %s8522_s10 = scalar_lea.sflag [#allocation3], %s8521_s24 }
 0x839   : > { %p12359_p0 = pnand %p12362_p13, %p12550_p6 }
 0x83b   : > { %p12360_p1 = pneg %p12359_p0 }
 0x83d   : > { %12441 = dma.done.wait (%p12360_p1), %s8522_s10, 16  }
 0x83e   : > { %12443 = vsyncadd (%p12360_p1), %s8522_s10, 4294967280  ;;  %p18_p2 = scmp.ge.s32.totalorder %s12533_s11, 4   ;;  %s17944_s27 = smov %s12450_s28 }
 0x83f   : > { %s17945_s28 = smov %s12454_s29  ;;  %s17946_s29 = smov %s12544_s14 }
 0x840   : > { %s17947_s30 = smov %s12533_s11  ;;  %20 = sbr.rel (!%p18_p2) target bundleno = 3 (0x3), region = 143 }
 0x845   :  { %8526 = vsyncpa [#allocation3], 1 }
 0x846   :  { %8528 = vsyncpa [#allocation3 + $0x1], 1 }

</bundles_post_ra>
